<compile_context>
chip_gen: v5e
topology: v5e:2x2
jax: 0.10.0
libtpu: 0.0.40
codegen_flags: <defaults>
</compile_context>

<pallas_src>
import jax
import jax.numpy as jnp
from jax.experimental import pallas as pl
from jax.experimental.pallas import tpu as pltpu

HIDDEN = 256          # GRU hidden size (fixed by the module)
NUM_DIRS = 2          # bidirectional
H1 = 32               # fc1 output features
OUT = 7               # fc2 output features
MAX_TK = 20480        # largest fc1 reduction tile (perf review: few big grid steps)


def _sigmoid(x):
    return 1.0 / (1.0 + jnp.exp(-x))


# -----------------------------------------------------------------------------
# Bidirectional GRU layer: one pallas_call, grid = (direction, time).
# -----------------------------------------------------------------------------
def _gru_bidir_kernel(x_ref, wih_ref, whh_ref, bih_ref, bhh_ref, out_ref, h_ref):
    d = pl.program_id(0)            # 0 = forward, 1 = reverse
    t = pl.program_id(1)            # recurrence step (sequential)
    hidden = h_ref.shape[-1]

    @pl.when(t == 0)
    def _():                        # h_0 = 0 (PyTorch default)
        h_ref[d] = jnp.zeros(h_ref.shape[1:], h_ref.dtype)

    x_t = x_ref[...]                # (N, F_in)
    h_prev = h_ref[d]               # (N, H)
    # Gates in PyTorch order [r | z | n]; weights stored transposed (F_in, 3H).
    gx = jnp.dot(x_t, wih_ref[...], preferred_element_type=jnp.float32) + bih_ref[...]
    gh = jnp.dot(h_prev, whh_ref[...], preferred_element_type=jnp.float32) + bhh_ref[...]
    r = _sigmoid(gx[:, :hidden] + gh[:, :hidden])
    z = _sigmoid(gx[:, hidden:2 * hidden] + gh[:, hidden:2 * hidden])
    n = jnp.tanh(gx[:, 2 * hidden:] + r * gh[:, 2 * hidden:])
    h_new = (1.0 - z) * n + z * h_prev
    h_ref[d] = h_new
    out_ref[...] = h_new.astype(out_ref.dtype)


def gru_bidir_layer(x_tnf, wih, whh, bih, bhh):
    """One bidirectional GRU layer.

    x_tnf: (T, N, F_in) f32. Weights stacked over direction:
      wih (2, F_in, 3H), whh (2, H, 3H), bih/bhh (2, 1, 3H).
    Returns (2, T, N, H) f32; [0] = forward outputs, [1] = reverse outputs
    (already in original time order).
    """
    T, N, f_in = x_tnf.shape
    hidden = whh.shape[1]
    g = 3 * hidden

    def tidx(d, t):
        # forward reads/writes time t; reverse reads/writes time T-1-t.
        return t + d * (T - 1 - 2 * t)

    return pl.pallas_call(
        _gru_bidir_kernel,
        out_shape=jax.ShapeDtypeStruct((NUM_DIRS, T, N, hidden), jnp.float32),
        grid_spec=pltpu.PrefetchScalarGridSpec(
            num_scalar_prefetch=0,
            grid=(NUM_DIRS, T),
            in_specs=[
                pl.BlockSpec((None, N, f_in), lambda d, t: (tidx(d, t), 0, 0)),
                pl.BlockSpec((None, f_in, g), lambda d, t: (d, 0, 0)),
                pl.BlockSpec((None, hidden, g), lambda d, t: (d, 0, 0)),
                pl.BlockSpec((None, 1, g), lambda d, t: (d, 0, 0)),
                pl.BlockSpec((None, 1, g), lambda d, t: (d, 0, 0)),
            ],
            out_specs=pl.BlockSpec((None, None, N, hidden),
                                   lambda d, t: (d, tidx(d, t), 0, 0)),
            scratch_shapes=[pltpu.VMEM((NUM_DIRS, N, hidden), jnp.float32)],
        ),
        # Direction axis is independent -> "parallel" lets v7x use both
        # TensorCores; the time axis is the carried recurrence -> "arbitrary".
        compiler_params=pltpu.CompilerParams(
            dimension_semantics=("parallel", "arbitrary")),
    )(x_tnf, wih, whh, bih, bhh)


# -----------------------------------------------------------------------------
# Fused head: fc1 (BN folded) + ReLU + fc2, tiled over the long reduction axis.
# -----------------------------------------------------------------------------
def _head_kernel(x_ref, w1_ref, b1_ref, w2_ref, b2_ref, o_ref, acc_ref):
    k = pl.program_id(0)

    @pl.when(k == 0)
    def _():
        acc_ref[...] = jnp.zeros_like(acc_ref)

    # Hot loop: bf16 x bf16 -> f32 accumulation on the MXU.
    acc_ref[...] += jnp.dot(x_ref[...], w1_ref[...],
                            preferred_element_type=jnp.float32)

    @pl.when(k == pl.num_programs(0) - 1)
    def _():
        h = jnp.maximum(acc_ref[...] + b1_ref[...], 0.0)   # fc1 bias (BN folded) + ReLU
        out = jnp.dot(h, w2_ref[...],
                      preferred_element_type=jnp.float32) + b2_ref[...]
        o_ref[...] = out.astype(o_ref.dtype)


def _pick_tk(k_in, max_tk=MAX_TK):
    """Largest reduction tile (multiple of 512) dividing k_in, capped at max_tk."""
    if k_in <= max_tk:
        return k_in
    for cand in range(max_tk, 511, -512):
        if k_in % cand == 0:
            return cand
    return 512


def head_forward(x_bf16, w1f_bf16, b1f, w2, b2):
    """Fused fc1(+folded BN) + ReLU + fc2 over a (N, K) bf16 input."""
    n, k_in = x_bf16.shape
    tk = _pick_tk(k_in)
    cost = pl.CostEstimate(
        flops=2 * n * k_in * H1 + 2 * n * H1 * OUT,
        transcendentals=0,
        bytes_accessed=(x_bf16.size + w1f_bf16.size) * 2
        + (b1f.size + w2.size + b2.size + n * OUT) * 4,
    )
    # NOTE(v7x): the head itself is not split across the two TensorCores —
    # halving H1=32 would break the 128-lane block rule and a K-split needs a
    # cross-core combine; after the bf16 cast the head HBM traffic is small and
    # the GRU kernels (which do use both cores via their parallel direction
    # axis) dominate. If batch N grows (>=128), add N as a "parallel" grid axis.
    return pl.pallas_call(
        _head_kernel,
        out_shape=jax.ShapeDtypeStruct((n, OUT), jnp.float32),
        grid_spec=pltpu.PrefetchScalarGridSpec(
            num_scalar_prefetch=0,
            grid=(k_in // tk,),
            in_specs=[
                pl.BlockSpec((n, tk), lambda i: (0, i)),      # activation tile (bf16)
                pl.BlockSpec((tk, H1), lambda i: (i, 0)),     # folded fc1 weight (bf16)
                pl.BlockSpec((1, H1), lambda i: (0, 0)),      # folded fc1 bias (f32)
                pl.BlockSpec((H1, OUT), lambda i: (0, 0)),    # fc2 weight
                pl.BlockSpec((1, OUT), lambda i: (0, 0)),     # fc2 bias
            ],
            out_specs=pl.BlockSpec((n, OUT), lambda i: (0, 0)),
            scratch_shapes=[pltpu.VMEM((n, H1), jnp.float32)],
        ),
        compiler_params=pltpu.CompilerParams(
            dimension_semantics=("arbitrary",)),
        cost_estimate=cost,
    )(x_bf16, w1f_bf16, b1f, w2, b2)


# -----------------------------------------------------------------------------
# Full model forward.
# -----------------------------------------------------------------------------
def gru_model_forward(input_seqs, params):
    """Pallas forward of the Gru module. input_seqs: (N, T, F)."""
    n, t, _ = input_seqs.shape
    x0 = jnp.transpose(input_seqs, (1, 0, 2)).astype(jnp.float32)      # (T, N, F)
    h0 = gru_bidir_layer(x0, params["wih0"], params["whh0"],
                         params["bih0"], params["bhh0"])               # (2, T, N, H)
    # Layer-1 input: per-time concat [fwd H | bwd H], time-major.
    x1 = jnp.transpose(h0, (1, 2, 0, 3)).reshape(t, n, NUM_DIRS * HIDDEN)
    h1 = gru_bidir_layer(x1, params["wih1"], params["whh1"],
                         params["bih1"], params["bhh1"])               # (2, T, N, H)
    # PyTorch Flatten order: (N, T, [fwd H | bwd H]) -> (N, T*512).
    # The bf16 cast for the memory-bound fc1 matmul is fused into this
    # (unavoidable) transpose; no extra f32 activation copy is materialized.
    head_x = jnp.transpose(h1, (2, 1, 0, 3)).reshape(n, t * NUM_DIRS * HIDDEN)
    head_x = head_x.astype(jnp.bfloat16)
    return head_forward(head_x, params["w1f_bf16"], params["b1f"],
                        params["w2"], params["b2"])


# -----------------------------------------------------------------------------
# Parameters (PyTorch-default-style init) and pure-JAX reference.
# -----------------------------------------------------------------------------
def init_params(key, seq_len, feat_in):
    k_in = seq_len * NUM_DIRS * HIDDEN
    keys = jax.random.split(key, 16)
    it = iter(keys)

    def u(shape, bound):
        return jax.random.uniform(next(it), shape, jnp.float32, -bound, bound)

    p = {}
    gru_bound = 1.0 / float(HIDDEN) ** 0.5
    for layer, f_in in ((0, feat_in), (1, NUM_DIRS * HIDDEN)):
        p[f"wih{layer}"] = u((NUM_DIRS, f_in, 3 * HIDDEN), gru_bound)   # transposed
        p[f"whh{layer}"] = u((NUM_DIRS, HIDDEN, 3 * HIDDEN), gru_bound)
        p[f"bih{layer}"] = u((NUM_DIRS, 1, 3 * HIDDEN), gru_bound)
        p[f"bhh{layer}"] = u((NUM_DIRS, 1, 3 * HIDDEN), gru_bound)

    bound1 = 1.0 / float(k_in) ** 0.5
    w1 = u((k_in, H1), bound1)
    fc1_b = u((1, H1), bound1)
    bound2 = 1.0 / float(H1) ** 0.5
    p["w2"] = u((H1, OUT), bound2)
    p["b2"] = u((1, OUT), bound2)

    # TODO(synk): training-mode BatchNorm (batch statistics) is not implemented;
    # eval-mode running stats (fresh: mean=0, var=1, gamma=1, beta=0) are folded
    # exactly into the fc1 weight/bias.
    eps = 1e-5
    gamma = jnp.ones((1, H1), jnp.float32)
    beta = jnp.zeros((1, H1), jnp.float32)
    r_mean = jnp.zeros((1, H1), jnp.float32)
    r_var = jnp.ones((1, H1), jnp.float32)
    scale = gamma / jnp.sqrt(r_var + eps)
    shift = beta - r_mean * scale
    p["w1f_bf16"] = (w1 * scale).astype(jnp.bfloat16)   # bf16 halves head HBM traffic
    p["b1f"] = fc1_b * scale + shift
    return p


def _gru_layer_ref(x_tnf, wih, whh, bih, bhh):
    hidden = whh.shape[1]
    n = x_tnf.shape[1]

    def cell(h, x_t, d):
        gx = x_t @ wih[d] + bih[d]
        gh = h @ whh[d] + bhh[d]
        r = _sigmoid(gx[:, :hidden] + gh[:, :hidden])
        z = _sigmoid(gx[:, hidden:2 * hidden] + gh[:, hidden:2 * hidden])
        nn_ = jnp.tanh(gx[:, 2 * hidden:] + r * gh[:, 2 * hidden:])
        return (1.0 - z) * nn_ + z * h

    h0 = jnp.zeros((n, hidden), jnp.float32)

    def scan_dir(xs, d):
        def step(h, x_t):
            hn = cell(h, x_t, d)
            return hn, hn
        _, ys = jax.lax.scan(step, h0, xs)
        return ys

    out_f = scan_dir(x_tnf, 0)
    out_b = scan_dir(x_tnf[::-1], 1)[::-1]
    return out_f, out_b          # each (T, N, H)


def reference_forward(input_seqs, params):
    """Pure-JAX reference mirroring the kernel's dtype choices (f32 GRU, bf16 fc1 operands)."""
    n, t, _ = input_seqs.shape
    x0 = jnp.transpose(input_seqs, (1, 0, 2)).astype(jnp.float32)
    f0, b0 = _gru_layer_ref(x0, params["wih0"], params["whh0"],
                            params["bih0"], params["bhh0"])
    x1 = jnp.concatenate([f0, b0], axis=-1)
    f1, b1 = _gru_layer_ref(x1, params["wih1"], params["whh1"],
                            params["bih1"], params["bhh1"])
    h = jnp.stack([f1, b1], axis=2)                       # (T, N, 2, H)
    head_x = jnp.transpose(h, (1, 0, 2, 3)).reshape(n, t * NUM_DIRS * HIDDEN)
    head_x = head_x.astype(jnp.bfloat16).astype(jnp.float32)
    w1 = params["w1f_bf16"].astype(jnp.float32)
    hid = jnp.maximum(head_x @ w1 + params["b1f"], 0.0)
    return hid @ params["w2"] + params["b2"]


if __name__ == "__main__":
    key = jax.random.PRNGKey(0)
    k_params, k_x = jax.random.split(key)

    # Small shapes consistent with the module: cfg['input_shape'] = (T, F) = (48, 64),
    # batch N = 2. Hidden=256, bidirectional, 2 layers are fixed by Gru().
    # Head reduction K = T*512 = 24576 -> tile 12288 -> 2 grid steps.
    N, T, F = 2, 48, 64
    params = init_params(k_params, T, F)
    input_seqs = jax.random.normal(k_x, (N, T, F), jnp.float32)

    out = jax.block_until_ready(jax.jit(gru_model_forward)(input_seqs, params))
    ref = jax.block_until_ready(jax.jit(reference_forward)(input_seqs, params))

    assert out.shape == (N, OUT)
    # Tolerance covers MXU-vs-XLA f32 matmul precision differences inside the
    # recurrent GRU plus the intentional bf16 rounding of the fc1 operands;
    # real bugs (wrong gate/flatten order) produce O(0.1) errors.
    assert jnp.allclose(out, ref, atol=2e-2, rtol=2e-2), (
        f"mismatch vs reference: max |diff| = {jnp.max(jnp.abs(out - ref)):.3e}")
    print("KERNEL_OK")
</pallas_src>

<mosaic_0001>
module attributes {stable_mosaic.version = 11 : i64} {
  func.func @_gru_bidir_kernel(%arg0: i32, %arg1: i32, %arg2: memref<1x2x512xf32, #tpu.memory_space<vmem>>, %arg3: memref<1x512x768xf32, #tpu.memory_space<vmem>>, %arg4: memref<1x256x768xf32, #tpu.memory_space<vmem>>, %arg5: memref<1x1x768xf32, #tpu.memory_space<vmem>>, %arg6: memref<1x1x768xf32, #tpu.memory_space<vmem>>, %arg7: memref<1x1x2x256xf32, #tpu.memory_space<vmem>>, %arg8: memref<2x2x256xf32, #tpu.memory_space<vmem>>) attributes {dimension_semantics = [#tpu.dimension_semantics<parallel>, #tpu.dimension_semantics<arbitrary>], iteration_bounds = array<i64: 2, 48>, scalar_prefetch = 0 : i64, scratch_operands = 1 : i64, tpu.core_type = #tpu.core_type<tc>, window_params = [{transform_indices = @transform_0, window_bounds = array<i64: 1, 2, 512>}, {transform_indices = @transform_1, window_bounds = array<i64: 1, 512, 768>}, {transform_indices = @transform_2, window_bounds = array<i64: 1, 256, 768>}, {transform_indices = @transform_3, window_bounds = array<i64: 1, 1, 768>}, {transform_indices = @transform_4, window_bounds = array<i64: 1, 1, 768>}, {transform_indices = @transform_5, window_bounds = array<i64: 1, 1, 2, 256>}]} {
    %c0_i32 = arith.constant 0 : i32
    %0 = arith.cmpi eq, %arg1, %c0_i32 : i32
    %1 = arith.extui %0 : i1 to i32
    %c0_i32_0 = arith.constant 0 : i32
    %2 = arith.cmpi ne, %1, %c0_i32_0 : i32
    scf.if %2 {
      %cst_31 = arith.constant 0.000000e+00 : f32
      %59 = vector.broadcast %cst_31 : f32 to vector<2x256xf32>
      %60 = arith.index_cast %arg0 : i32 to index
      %c0_32 = arith.constant 0 : index
      %c0_33 = arith.constant 0 : index
      %61 = vector.load %arg8[%60, %c0_32, %c0_33] : memref<2x2x256xf32, #tpu.memory_space<vmem>>, vector<1x2x256xf32>
      %62 = vector.shape_cast %61 : vector<1x2x256xf32> to vector<2x256xf32>
      %63 = vector.shape_cast %59 : vector<2x256xf32> to vector<1x2x256xf32>
      tpu.vector_store %arg8[%60, %c0_32, %c0_33], %63 {strides = array<i32>} : memref<2x2x256xf32, #tpu.memory_space<vmem>>, vector<1x2x256xf32>,
    } else {
    }
    %c0 = arith.constant 0 : index
    %c0_1 = arith.constant 0 : index
    %c0_2 = arith.constant 0 : index
    %3 = vector.load %arg2[%c0, %c0_1, %c0_2] : memref<1x2x512xf32, #tpu.memory_space<vmem>>, vector<1x2x512xf32>
    %4 = vector.shape_cast %3 : vector<1x2x512xf32> to vector<2x512xf32>
    %5 = arith.index_cast %arg0 : i32 to index
    %c0_3 = arith.constant 0 : index
    %c0_4 = arith.constant 0 : index
    %6 = vector.load %arg8[%5, %c0_3, %c0_4] : memref<2x2x256xf32, #tpu.memory_space<vmem>>, vector<1x2x256xf32>
    %7 = vector.shape_cast %6 : vector<1x2x256xf32> to vector<2x256xf32>
    %c0_5 = arith.constant 0 : index
    %c0_6 = arith.constant 0 : index
    %c0_7 = arith.constant 0 : index
    %8 = vector.load %arg3[%c0_5, %c0_6, %c0_7] : memref<1x512x768xf32, #tpu.memory_space<vmem>>, vector<1x512x768xf32>
    %9 = vector.shape_cast %8 : vector<1x512x768xf32> to vector<512x768xf32>
    %cst = arith.constant dense<0.000000e+00> : vector<2x768xf32>
    %10 = tpu.matmul %4, %9, %cst {dimension_numbers = #tpu.dot_dimension_numbers<[1], [0], [0], [1], [0, 0, 1, 1], [], []>} : vector<2x512xf32>, vector<512x768xf32>, vector<2x768xf32> -> vector<2x768xf32>
    %c0_8 = arith.constant 0 : index
    %c0_9 = arith.constant 0 : index
    %c0_10 = arith.constant 0 : index
    %11 = vector.load %arg5[%c0_8, %c0_9, %c0_10] : memref<1x1x768xf32, #tpu.memory_space<vmem>>, vector<1x1x768xf32>
    %12 = vector.shape_cast %11 : vector<1x1x768xf32> to vector<1x768xf32>
    %13 = vector.broadcast %12 : vector<1x768xf32> to vector<2x768xf32>
    %14 = arith.addf %10, %13 : vector<2x768xf32>
    %c0_11 = arith.constant 0 : index
    %c0_12 = arith.constant 0 : index
    %c0_13 = arith.constant 0 : index
    %15 = vector.load %arg4[%c0_11, %c0_12, %c0_13] : memref<1x256x768xf32, #tpu.memory_space<vmem>>, vector<1x256x768xf32>
    %16 = vector.shape_cast %15 : vector<1x256x768xf32> to vector<256x768xf32>
    %cst_14 = arith.constant dense<0.000000e+00> : vector<2x768xf32>
    %17 = tpu.matmul %7, %16, %cst_14 {dimension_numbers = #tpu.dot_dimension_numbers<[1], [0], [0], [1], [0, 0, 1, 1], [], []>} : vector<2x256xf32>, vector<256x768xf32>, vector<2x768xf32> -> vector<2x768xf32>
    %c0_15 = arith.constant 0 : index
    %c0_16 = arith.constant 0 : index
    %c0_17 = arith.constant 0 : index
    %18 = vector.load %arg6[%c0_15, %c0_16, %c0_17] : memref<1x1x768xf32, #tpu.memory_space<vmem>>, vector<1x1x768xf32>
    %19 = vector.shape_cast %18 : vector<1x1x768xf32> to vector<1x768xf32>
    %20 = vector.broadcast %19 : vector<1x768xf32> to vector<2x768xf32>
    %21 = arith.addf %17, %20 : vector<2x768xf32>
    %22 = vector.extract_strided_slice %14 {offsets = [0, 0], sizes = [2, 256], strides = [1, 1]} : vector<2x768xf32> to vector<2x256xf32>
    %23 = vector.extract_strided_slice %21 {offsets = [0, 0], sizes = [2, 256], strides = [1, 1]} : vector<2x768xf32> to vector<2x256xf32>
    %24 = arith.addf %22, %23 : vector<2x256xf32>
    %cst_18 = arith.constant 0.000000e+00 : f32
    %25 = vector.broadcast %cst_18 : f32 to vector<2x256xf32>
    %26 = arith.subf %25, %24 : vector<2x256xf32>
    %27 = math.exp %26 : vector<2x256xf32>
    %cst_19 = arith.constant 1.000000e+00 : f32
    %28 = vector.broadcast %cst_19 : f32 to vector<2x256xf32>
    %29 = arith.addf %28, %27 : vector<2x256xf32>
    %cst_20 = arith.constant 1.000000e+00 : f32
    %30 = vector.broadcast %cst_20 : f32 to vector<2x256xf32>
    %31 = arith.divf %30, %29 : vector<2x256xf32>
    %32 = vector.extract_strided_slice %14 {offsets = [0, 256], sizes = [2, 256], strides = [1, 1]} : vector<2x768xf32> to vector<2x256xf32>
    %33 = vector.extract_strided_slice %21 {offsets = [0, 256], sizes = [2, 256], strides = [1, 1]} : vector<2x768xf32> to vector<2x256xf32>
    %34 = arith.addf %32, %33 : vector<2x256xf32>
    %cst_21 = arith.constant 0.000000e+00 : f32
    %35 = vector.broadcast %cst_21 : f32 to vector<2x256xf32>
    %36 = arith.subf %35, %34 : vector<2x256xf32>
    %37 = math.exp %36 : vector<2x256xf32>
    %cst_22 = arith.constant 1.000000e+00 : f32
    %38 = vector.broadcast %cst_22 : f32 to vector<2x256xf32>
    %39 = arith.addf %38, %37 : vector<2x256xf32>
    %cst_23 = arith.constant 1.000000e+00 : f32
    %40 = vector.broadcast %cst_23 : f32 to vector<2x256xf32>
    %41 = arith.divf %40, %39 : vector<2x256xf32>
    %42 = vector.extract_strided_slice %14 {offsets = [0, 512], sizes = [2, 256], strides = [1, 1]} : vector<2x768xf32> to vector<2x256xf32>
    %43 = vector.extract_strided_slice %21 {offsets = [0, 512], sizes = [2, 256], strides = [1, 1]} : vector<2x768xf32> to vector<2x256xf32>
    %44 = arith.mulf %31, %43 : vector<2x256xf32>
    %45 = arith.addf %42, %44 : vector<2x256xf32>
    %46 = math.tanh %45 : vector<2x256xf32>
    %cst_24 = arith.constant 1.000000e+00 : f32
    %47 = vector.broadcast %cst_24 : f32 to vector<2x256xf32>
    %48 = arith.subf %47, %41 : vector<2x256xf32>
    %49 = arith.mulf %48, %46 : vector<2x256xf32>
    %50 = arith.mulf %41, %7 : vector<2x256xf32>
    %51 = arith.addf %49, %50 : vector<2x256xf32>
    %52 = arith.index_cast %arg0 : i32 to index
    %c0_25 = arith.constant 0 : index
    %c0_26 = arith.constant 0 : index
    %53 = vector.load %arg8[%52, %c0_25, %c0_26] : memref<2x2x256xf32, #tpu.memory_space<vmem>>, vector<1x2x256xf32>
    %54 = vector.shape_cast %53 : vector<1x2x256xf32> to vector<2x256xf32>
    %55 = vector.shape_cast %51 : vector<2x256xf32> to vector<1x2x256xf32>
    tpu.vector_store %arg8[%52, %c0_25, %c0_26], %55 {strides = array<i32>} : memref<2x2x256xf32, #tpu.memory_space<vmem>>, vector<1x2x256xf32>,
    %c0_27 = arith.constant 0 : index
    %c0_28 = arith.constant 0 : index
    %c0_29 = arith.constant 0 : index
    %c0_30 = arith.constant 0 : index
    %56 = vector.load %arg7[%c0_27, %c0_28, %c0_29, %c0_30] : memref<1x1x2x256xf32, #tpu.memory_space<vmem>>, vector<1x1x2x256xf32>
    %57 = vector.shape_cast %56 : vector<1x1x2x256xf32> to vector<2x256xf32>
    %58 = vector.shape_cast %51 : vector<2x256xf32> to vector<1x1x2x256xf32>
    tpu.vector_store %arg7[%c0_27, %c0_28, %c0_29, %c0_30], %58 {strides = array<i32>} : memref<1x1x2x256xf32, #tpu.memory_space<vmem>>, vector<1x1x2x256xf32>,
    return
  }
  func.func @transform_0(%arg0: i32, %arg1: i32) -> (i32, i32, i32) {
    %c2_i32 = arith.constant 2 : i32
    %0 = arith.muli %c2_i32, %arg1 : i32
    %c47_i32 = arith.constant 47 : i32
    %1 = arith.subi %c47_i32, %0 : i32
    %2 = arith.muli %arg0, %1 : i32
    %3 = arith.addi %arg1, %2 : i32
    %c0_i32 = arith.constant 0 : i32
    %c0_i32_0 = arith.constant 0 : i32
    %c0_i32_1 = arith.constant 0 : i32
    return %3, %c0_i32, %c0_i32_0 : i32, i32, i32
  }
  func.func @transform_1(%arg0: i32, %arg1: i32) -> (i32, i32, i32) {
    %c0_i32 = arith.constant 0 : i32
    %c0_i32_0 = arith.constant 0 : i32
    %c0_i32_1 = arith.constant 0 : i32
    return %arg0, %c0_i32, %c0_i32_0 : i32, i32, i32
  }
  func.func @transform_2(%arg0: i32, %arg1: i32) -> (i32, i32, i32) {
    %c0_i32 = arith.constant 0 : i32
    %c0_i32_0 = arith.constant 0 : i32
    %c0_i32_1 = arith.constant 0 : i32
    return %arg0, %c0_i32, %c0_i32_0 : i32, i32, i32
  }
  func.func @transform_3(%arg0: i32, %arg1: i32) -> (i32, i32, i32) {
    %c0_i32 = arith.constant 0 : i32
    %c0_i32_0 = arith.constant 0 : i32
    %c0_i32_1 = arith.constant 0 : i32
    return %arg0, %c0_i32, %c0_i32_0 : i32, i32, i32
  }
  func.func @transform_4(%arg0: i32, %arg1: i32) -> (i32, i32, i32) {
    %c0_i32 = arith.constant 0 : i32
    %c0_i32_0 = arith.constant 0 : i32
    %c0_i32_1 = arith.constant 0 : i32
    return %arg0, %c0_i32, %c0_i32_0 : i32, i32, i32
  }
  func.func @transform_5(%arg0: i32, %arg1: i32) -> (i32, i32, i32, i32) {
    %c2_i32 = arith.constant 2 : i32
    %0 = arith.muli %c2_i32, %arg1 : i32
    %c47_i32 = arith.constant 47 : i32
    %1 = arith.subi %c47_i32, %0 : i32
    %2 = arith.muli %arg0, %1 : i32
    %3 = arith.addi %arg1, %2 : i32
    %c0_i32 = arith.constant 0 : i32
    %c0_i32_0 = arith.constant 0 : i32
    %c0_i32_1 = arith.constant 0 : i32
    return %arg0, %3, %c0_i32, %c0_i32_0 : i32, i32, i32, i32
  }
}

module attributes {stable_mosaic.version = 11 : i64} {
  func.func @_gru_bidir_kernel(%arg0: i32, %arg1: i32, %arg2: memref<1x2x64xf32, #tpu.memory_space<vmem>>, %arg3: memref<1x64x768xf32, #tpu.memory_space<vmem>>, %arg4: memref<1x256x768xf32, #tpu.memory_space<vmem>>, %arg5: memref<1x1x768xf32, #tpu.memory_space<vmem>>, %arg6: memref<1x1x768xf32, #tpu.memory_space<vmem>>, %arg7: memref<1x1x2x256xf32, #tpu.memory_space<vmem>>, %arg8: memref<2x2x256xf32, #tpu.memory_space<vmem>>) attributes {dimension_semantics = [#tpu.dimension_semantics<parallel>, #tpu.dimension_semantics<arbitrary>], iteration_bounds = array<i64: 2, 48>, scalar_prefetch = 0 : i64, scratch_operands = 1 : i64, tpu.core_type = #tpu.core_type<tc>, window_params = [{transform_indices = @transform_0, window_bounds = array<i64: 1, 2, 64>}, {transform_indices = @transform_1, window_bounds = array<i64: 1, 64, 768>}, {transform_indices = @transform_2, window_bounds = array<i64: 1, 256, 768>}, {transform_indices = @transform_3, window_bounds = array<i64: 1, 1, 768>}, {transform_indices = @transform_4, window_bounds = array<i64: 1, 1, 768>}, {transform_indices = @transform_5, window_bounds = array<i64: 1, 1, 2, 256>}]} {
    %c0_i32 = arith.constant 0 : i32
    %0 = arith.cmpi eq, %arg1, %c0_i32 : i32
    %1 = arith.extui %0 : i1 to i32
    %c0_i32_0 = arith.constant 0 : i32
    %2 = arith.cmpi ne, %1, %c0_i32_0 : i32
    scf.if %2 {
      %cst_31 = arith.constant 0.000000e+00 : f32
      %59 = vector.broadcast %cst_31 : f32 to vector<2x256xf32>
      %60 = arith.index_cast %arg0 : i32 to index
      %c0_32 = arith.constant 0 : index
      %c0_33 = arith.constant 0 : index
      %61 = vector.load %arg8[%60, %c0_32, %c0_33] : memref<2x2x256xf32, #tpu.memory_space<vmem>>, vector<1x2x256xf32>
      %62 = vector.shape_cast %61 : vector<1x2x256xf32> to vector<2x256xf32>
      %63 = vector.shape_cast %59 : vector<2x256xf32> to vector<1x2x256xf32>
      tpu.vector_store %arg8[%60, %c0_32, %c0_33], %63 {strides = array<i32>} : memref<2x2x256xf32, #tpu.memory_space<vmem>>, vector<1x2x256xf32>,
    } else {
    }
    %c0 = arith.constant 0 : index
    %c0_1 = arith.constant 0 : index
    %c0_2 = arith.constant 0 : index
    %3 = vector.load %arg2[%c0, %c0_1, %c0_2] : memref<1x2x64xf32, #tpu.memory_space<vmem>>, vector<1x2x64xf32>
    %4 = vector.shape_cast %3 : vector<1x2x64xf32> to vector<2x64xf32>
    %5 = arith.index_cast %arg0 : i32 to index
    %c0_3 = arith.constant 0 : index
    %c0_4 = arith.constant 0 : index
    %6 = vector.load %arg8[%5, %c0_3, %c0_4] : memref<2x2x256xf32, #tpu.memory_space<vmem>>, vector<1x2x256xf32>
    %7 = vector.shape_cast %6 : vector<1x2x256xf32> to vector<2x256xf32>
    %c0_5 = arith.constant 0 : index
    %c0_6 = arith.constant 0 : index
    %c0_7 = arith.constant 0 : index
    %8 = vector.load %arg3[%c0_5, %c0_6, %c0_7] : memref<1x64x768xf32, #tpu.memory_space<vmem>>, vector<1x64x768xf32>
    %9 = vector.shape_cast %8 : vector<1x64x768xf32> to vector<64x768xf32>
    %cst = arith.constant dense<0.000000e+00> : vector<2x768xf32>
    %10 = tpu.matmul %4, %9, %cst {dimension_numbers = #tpu.dot_dimension_numbers<[1], [0], [0], [1], [0, 0, 1, 1], [], []>} : vector<2x64xf32>, vector<64x768xf32>, vector<2x768xf32> -> vector<2x768xf32>
    %c0_8 = arith.constant 0 : index
    %c0_9 = arith.constant 0 : index
    %c0_10 = arith.constant 0 : index
    %11 = vector.load %arg5[%c0_8, %c0_9, %c0_10] : memref<1x1x768xf32, #tpu.memory_space<vmem>>, vector<1x1x768xf32>
    %12 = vector.shape_cast %11 : vector<1x1x768xf32> to vector<1x768xf32>
    %13 = vector.broadcast %12 : vector<1x768xf32> to vector<2x768xf32>
    %14 = arith.addf %10, %13 : vector<2x768xf32>
    %c0_11 = arith.constant 0 : index
    %c0_12 = arith.constant 0 : index
    %c0_13 = arith.constant 0 : index
    %15 = vector.load %arg4[%c0_11, %c0_12, %c0_13] : memref<1x256x768xf32, #tpu.memory_space<vmem>>, vector<1x256x768xf32>
    %16 = vector.shape_cast %15 : vector<1x256x768xf32> to vector<256x768xf32>
    %cst_14 = arith.constant dense<0.000000e+00> : vector<2x768xf32>
    %17 = tpu.matmul %7, %16, %cst_14 {dimension_numbers = #tpu.dot_dimension_numbers<[1], [0], [0], [1], [0, 0, 1, 1], [], []>} : vector<2x256xf32>, vector<256x768xf32>, vector<2x768xf32> -> vector<2x768xf32>
    %c0_15 = arith.constant 0 : index
    %c0_16 = arith.constant 0 : index
    %c0_17 = arith.constant 0 : index
    %18 = vector.load %arg6[%c0_15, %c0_16, %c0_17] : memref<1x1x768xf32, #tpu.memory_space<vmem>>, vector<1x1x768xf32>
    %19 = vector.shape_cast %18 : vector<1x1x768xf32> to vector<1x768xf32>
    %20 = vector.broadcast %19 : vector<1x768xf32> to vector<2x768xf32>
    %21 = arith.addf %17, %20 : vector<2x768xf32>
    %22 = vector.extract_strided_slice %14 {offsets = [0, 0], sizes = [2, 256], strides = [1, 1]} : vector<2x768xf32> to vector<2x256xf32>
    %23 = vector.extract_strided_slice %21 {offsets = [0, 0], sizes = [2, 256], strides = [1, 1]} : vector<2x768xf32> to vector<2x256xf32>
    %24 = arith.addf %22, %23 : vector<2x256xf32>
    %cst_18 = arith.constant 0.000000e+00 : f32
    %25 = vector.broadcast %cst_18 : f32 to vector<2x256xf32>
    %26 = arith.subf %25, %24 : vector<2x256xf32>
    %27 = math.exp %26 : vector<2x256xf32>
    %cst_19 = arith.constant 1.000000e+00 : f32
    %28 = vector.broadcast %cst_19 : f32 to vector<2x256xf32>
    %29 = arith.addf %28, %27 : vector<2x256xf32>
    %cst_20 = arith.constant 1.000000e+00 : f32
    %30 = vector.broadcast %cst_20 : f32 to vector<2x256xf32>
    %31 = arith.divf %30, %29 : vector<2x256xf32>
    %32 = vector.extract_strided_slice %14 {offsets = [0, 256], sizes = [2, 256], strides = [1, 1]} : vector<2x768xf32> to vector<2x256xf32>
    %33 = vector.extract_strided_slice %21 {offsets = [0, 256], sizes = [2, 256], strides = [1, 1]} : vector<2x768xf32> to vector<2x256xf32>
    %34 = arith.addf %32, %33 : vector<2x256xf32>
    %cst_21 = arith.constant 0.000000e+00 : f32
    %35 = vector.broadcast %cst_21 : f32 to vector<2x256xf32>
    %36 = arith.subf %35, %34 : vector<2x256xf32>
    %37 = math.exp %36 : vector<2x256xf32>
    %cst_22 = arith.constant 1.000000e+00 : f32
    %38 = vector.broadcast %cst_22 : f32 to vector<2x256xf32>
    %39 = arith.addf %38, %37 : vector<2x256xf32>
    %cst_23 = arith.constant 1.000000e+00 : f32
    %40 = vector.broadcast %cst_23 : f32 to vector<2x256xf32>
    %41 = arith.divf %40, %39 : vector<2x256xf32>
    %42 = vector.extract_strided_slice %14 {offsets = [0, 512], sizes = [2, 256], strides = [1, 1]} : vector<2x768xf32> to vector<2x256xf32>
    %43 = vector.extract_strided_slice %21 {offsets = [0, 512], sizes = [2, 256], strides = [1, 1]} : vector<2x768xf32> to vector<2x256xf32>
    %44 = arith.mulf %31, %43 : vector<2x256xf32>
    %45 = arith.addf %42, %44 : vector<2x256xf32>
    %46 = math.tanh %45 : vector<2x256xf32>
    %cst_24 = arith.constant 1.000000e+00 : f32
    %47 = vector.broadcast %cst_24 : f32 to vector<2x256xf32>
    %48 = arith.subf %47, %41 : vector<2x256xf32>
    %49 = arith.mulf %48, %46 : vector<2x256xf32>
    %50 = arith.mulf %41, %7 : vector<2x256xf32>
    %51 = arith.addf %49, %50 : vector<2x256xf32>
    %52 = arith.index_cast %arg0 : i32 to index
    %c0_25 = arith.constant 0 : index
    %c0_26 = arith.constant 0 : index
    %53 = vector.load %arg8[%52, %c0_25, %c0_26] : memref<2x2x256xf32, #tpu.memory_space<vmem>>, vector<1x2x256xf32>
    %54 = vector.shape_cast %53 : vector<1x2x256xf32> to vector<2x256xf32>
    %55 = vector.shape_cast %51 : vector<2x256xf32> to vector<1x2x256xf32>
    tpu.vector_store %arg8[%52, %c0_25, %c0_26], %55 {strides = array<i32>} : memref<2x2x256xf32, #tpu.memory_space<vmem>>, vector<1x2x256xf32>,
    %c0_27 = arith.constant 0 : index
    %c0_28 = arith.constant 0 : index
    %c0_29 = arith.constant 0 : index
    %c0_30 = arith.constant 0 : index
    %56 = vector.load %arg7[%c0_27, %c0_28, %c0_29, %c0_30] : memref<1x1x2x256xf32, #tpu.memory_space<vmem>>, vector<1x1x2x256xf32>
    %57 = vector.shape_cast %56 : vector<1x1x2x256xf32> to vector<2x256xf32>
    %58 = vector.shape_cast %51 : vector<2x256xf32> to vector<1x1x2x256xf32>
    tpu.vector_store %arg7[%c0_27, %c0_28, %c0_29, %c0_30], %58 {strides = array<i32>} : memref<1x1x2x256xf32, #tpu.memory_space<vmem>>, vector<1x1x2x256xf32>,
    return
  }
  func.func @transform_0(%arg0: i32, %arg1: i32) -> (i32, i32, i32) {
    %c2_i32 = arith.constant 2 : i32
    %0 = arith.muli %c2_i32, %arg1 : i32
    %c47_i32 = arith.constant 47 : i32
    %1 = arith.subi %c47_i32, %0 : i32
    %2 = arith.muli %arg0, %1 : i32
    %3 = arith.addi %arg1, %2 : i32
    %c0_i32 = arith.constant 0 : i32
    %c0_i32_0 = arith.constant 0 : i32
    %c0_i32_1 = arith.constant 0 : i32
    return %3, %c0_i32, %c0_i32_0 : i32, i32, i32
  }
  func.func @transform_1(%arg0: i32, %arg1: i32) -> (i32, i32, i32) {
    %c0_i32 = arith.constant 0 : i32
    %c0_i32_0 = arith.constant 0 : i32
    %c0_i32_1 = arith.constant 0 : i32
    return %arg0, %c0_i32, %c0_i32_0 : i32, i32, i32
  }
  func.func @transform_2(%arg0: i32, %arg1: i32) -> (i32, i32, i32) {
    %c0_i32 = arith.constant 0 : i32
    %c0_i32_0 = arith.constant 0 : i32
    %c0_i32_1 = arith.constant 0 : i32
    return %arg0, %c0_i32, %c0_i32_0 : i32, i32, i32
  }
  func.func @transform_3(%arg0: i32, %arg1: i32) -> (i32, i32, i32) {
    %c0_i32 = arith.constant 0 : i32
    %c0_i32_0 = arith.constant 0 : i32
    %c0_i32_1 = arith.constant 0 : i32
    return %arg0, %c0_i32, %c0_i32_0 : i32, i32, i32
  }
  func.func @transform_4(%arg0: i32, %arg1: i32) -> (i32, i32, i32) {
    %c0_i32 = arith.constant 0 : i32
    %c0_i32_0 = arith.constant 0 : i32
    %c0_i32_1 = arith.constant 0 : i32
    return %arg0, %c0_i32, %c0_i32_0 : i32, i32, i32
  }
  func.func @transform_5(%arg0: i32, %arg1: i32) -> (i32, i32, i32, i32) {
    %c2_i32 = arith.constant 2 : i32
    %0 = arith.muli %c2_i32, %arg1 : i32
    %c47_i32 = arith.constant 47 : i32
    %1 = arith.subi %c47_i32, %0 : i32
    %2 = arith.muli %arg0, %1 : i32
    %3 = arith.addi %arg1, %2 : i32
    %c0_i32 = arith.constant 0 : i32
    %c0_i32_0 = arith.constant 0 : i32
    %c0_i32_1 = arith.constant 0 : i32
    return %arg0, %3, %c0_i32, %c0_i32_0 : i32, i32, i32, i32
  }
}

module attributes {stable_mosaic.version = 11 : i64} {
  func.func @_head_kernel(%arg0: i32, %arg1: memref<2x12288xbf16, #tpu.memory_space<vmem>>, %arg2: memref<12288x32xbf16, #tpu.memory_space<vmem>>, %arg3: memref<1x32xf32, #tpu.memory_space<vmem>>, %arg4: memref<32x7xf32, #tpu.memory_space<vmem>>, %arg5: memref<1x7xf32, #tpu.memory_space<vmem>>, %arg6: memref<2x7xf32, #tpu.memory_space<vmem>>, %arg7: memref<2x32xf32, #tpu.memory_space<vmem>>) attributes {dimension_semantics = [#tpu.dimension_semantics<arbitrary>], iteration_bounds = array<i64: 2>, scalar_prefetch = 0 : i64, scratch_operands = 1 : i64, tpu.core_type = #tpu.core_type<tc>, window_params = [{transform_indices = @transform_0, window_bounds = array<i64: 2, 12288>}, {transform_indices = @transform_1, window_bounds = array<i64: 12288, 32>}, {pipeline_mode = #tpu.pipeline_mode<synchronous>, transform_indices = @transform_2, window_bounds = array<i64: 1, 32>}, {pipeline_mode = #tpu.pipeline_mode<synchronous>, transform_indices = @transform_3, window_bounds = array<i64: 32, 7>}, {pipeline_mode = #tpu.pipeline_mode<synchronous>, transform_indices = @transform_4, window_bounds = array<i64: 1, 7>}, {pipeline_mode = #tpu.pipeline_mode<synchronous>, transform_indices = @transform_5, window_bounds = array<i64: 2, 7>}]} {
    %c0_i32 = arith.constant 0 : i32
    %0 = arith.cmpi eq, %arg0, %c0_i32 : i32
    %1 = arith.extui %0 : i1 to i32
    %c0_i32_0 = arith.constant 0 : i32
    %2 = arith.cmpi ne, %1, %c0_i32_0 : i32
    scf.if %2 {
      %cst_9 = arith.constant 0.000000e+00 : f32
      %12 = vector.broadcast %cst_9 : f32 to vector<2x32xf32>
      %c0_10 = arith.constant 0 : index
      %c0_11 = arith.constant 0 : index
      %13 = vector.load %arg7[%c0_10, %c0_11] : memref<2x32xf32, #tpu.memory_space<vmem>>, vector<2x32xf32>
      tpu.vector_store %arg7[%c0_10, %c0_11], %12 {strides = array<i32>} : memref<2x32xf32, #tpu.memory_space<vmem>>, vector<2x32xf32>,
    } else {
    }
    %c0 = arith.constant 0 : index
    %c0_1 = arith.constant 0 : index
    %3 = vector.load %arg7[%c0, %c0_1] : memref<2x32xf32, #tpu.memory_space<vmem>>, vector<2x32xf32>
    %c0_2 = arith.constant 0 : index
    %c0_3 = arith.constant 0 : index
    %4 = vector.load %arg1[%c0_2, %c0_3] : memref<2x12288xbf16, #tpu.memory_space<vmem>>, vector<2x12288xbf16>
    %c0_4 = arith.constant 0 : index
    %c0_5 = arith.constant 0 : index
    %5 = vector.load %arg2[%c0_4, %c0_5] : memref<12288x32xbf16, #tpu.memory_space<vmem>>, vector<12288x32xbf16>
    %cst = arith.constant dense<0.000000e+00> : vector<2x32xf32>
    %6 = tpu.matmul %4, %5, %cst {dimension_numbers = #tpu.dot_dimension_numbers<[1], [0], [0], [1], [0, 0, 1, 1], [], []>} : vector<2x12288xbf16>, vector<12288x32xbf16>, vector<2x32xf32> -> vector<2x32xf32>
    %7 = arith.addf %3, %6 : vector<2x32xf32>
    %c0_6 = arith.constant 0 : index
    %c0_7 = arith.constant 0 : index
    %8 = vector.load %arg7[%c0_6, %c0_7] : memref<2x32xf32, #tpu.memory_space<vmem>>, vector<2x32xf32>
    tpu.vector_store %arg7[%c0_6, %c0_7], %7 {strides = array<i32>} : memref<2x32xf32, #tpu.memory_space<vmem>>, vector<2x32xf32>,
    %c1_i32 = arith.constant 1 : i32
    %9 = arith.cmpi eq, %arg0, %c1_i32 : i32
    %10 = arith.extui %9 : i1 to i32
    %c0_i32_8 = arith.constant 0 : i32
    %11 = arith.cmpi ne, %10, %c0_i32_8 : i32
    scf.if %11 {
      %c0_9 = arith.constant 0 : index
      %c0_10 = arith.constant 0 : index
      %12 = vector.load %arg7[%c0_9, %c0_10] : memref<2x32xf32, #tpu.memory_space<vmem>>, vector<2x32xf32>
      %c0_11 = arith.constant 0 : index
      %c0_12 = arith.constant 0 : index
      %13 = vector.load %arg3[%c0_11, %c0_12] : memref<1x32xf32, #tpu.memory_space<vmem>>, vector<1x32xf32>
      %14 = vector.broadcast %13 : vector<1x32xf32> to vector<2x32xf32>
      %15 = arith.addf %12, %14 : vector<2x32xf32>
      %cst_13 = arith.constant 0.000000e+00 : f32
      %16 = vector.broadcast %cst_13 : f32 to vector<2x32xf32>
      %17 = arith.maximumf %15, %16 : vector<2x32xf32>
      %c0_14 = arith.constant 0 : index
      %c0_15 = arith.constant 0 : index
      %18 = vector.load %arg4[%c0_14, %c0_15] : memref<32x7xf32, #tpu.memory_space<vmem>>, vector<32x7xf32>
      %cst_16 = arith.constant dense<0.000000e+00> : vector<2x7xf32>
      %19 = tpu.matmul %17, %18, %cst_16 {dimension_numbers = #tpu.dot_dimension_numbers<[1], [0], [0], [1], [0, 0, 1, 1], [], []>} : vector<2x32xf32>, vector<32x7xf32>, vector<2x7xf32> -> vector<2x7xf32>
      %c0_17 = arith.constant 0 : index
      %c0_18 = arith.constant 0 : index
      %20 = vector.load %arg5[%c0_17, %c0_18] : memref<1x7xf32, #tpu.memory_space<vmem>>, vector<1x7xf32>
      %21 = vector.broadcast %20 : vector<1x7xf32> to vector<2x7xf32>
      %22 = arith.addf %19, %21 : vector<2x7xf32>
      %c0_19 = arith.constant 0 : index
      %c0_20 = arith.constant 0 : index
      %23 = vector.load %arg6[%c0_19, %c0_20] : memref<2x7xf32, #tpu.memory_space<vmem>>, vector<2x7xf32>
      tpu.vector_store %arg6[%c0_19, %c0_20], %22 {strides = array<i32>} : memref<2x7xf32, #tpu.memory_space<vmem>>, vector<2x7xf32>,
    } else {
    }
    return
  }
  func.func @transform_0(%arg0: i32) -> (i32, i32) {
    %c0_i32 = arith.constant 0 : i32
    %c0_i32_0 = arith.constant 0 : i32
    return %c0_i32, %arg0 : i32, i32
  }
  func.func @transform_1(%arg0: i32) -> (i32, i32) {
    %c0_i32 = arith.constant 0 : i32
    %c0_i32_0 = arith.constant 0 : i32
    return %arg0, %c0_i32 : i32, i32
  }
  func.func @transform_2(%arg0: i32) -> (i32, i32) {
    %c0_i32 = arith.constant 0 : i32
    %c0_i32_0 = arith.constant 0 : i32
    %c0_i32_1 = arith.constant 0 : i32
    return %c0_i32, %c0_i32_0 : i32, i32
  }
  func.func @transform_3(%arg0: i32) -> (i32, i32) {
    %c0_i32 = arith.constant 0 : i32
    %c0_i32_0 = arith.constant 0 : i32
    %c0_i32_1 = arith.constant 0 : i32
    return %c0_i32, %c0_i32_0 : i32, i32
  }
  func.func @transform_4(%arg0: i32) -> (i32, i32) {
    %c0_i32 = arith.constant 0 : i32
    %c0_i32_0 = arith.constant 0 : i32
    %c0_i32_1 = arith.constant 0 : i32
    return %c0_i32, %c0_i32_0 : i32, i32
  }
  func.func @transform_5(%arg0: i32) -> (i32, i32) {
    %c0_i32 = arith.constant 0 : i32
    %c0_i32_0 = arith.constant 0 : i32
    %c0_i32_1 = arith.constant 0 : i32
    return %c0_i32, %c0_i32_0 : i32, i32
  }
}

</mosaic_0001>

<bundles_post_ra>
// kernel: gru_model_forward.3
= control target key start
LH: loop header
LB: loop body
LE: loop exit
PB: predicated region body
PF: predicated region fallthrough
CT: control target
= control target key end

     0   :  { %s2282_s0 = inlined_call_operand.vmem [shape: f32[48,2,64], index: 0, kind: input, shape index: {}]   ;;  %s2283_s1 = inlined_call_operand.hbm [shape: f32[2,64,768], index: 1, kind: input, shape index: {}]   ;;  %s2284_s2 = inlined_call_operand.hbm [shape: f32[2,256,768], index: 2, kind: input, shape index: {}]   ;;  %s2285_s3 = inlined_call_operand.hbm [shape: f32[2,1,768], index: 3, kind: input, shape index: {}]   ;;  %s2286_s4 = inlined_call_operand.hbm [shape: f32[2,1,768], index: 4, kind: input, shape index: {}]   ;;  %s2287_s5 = inlined_call_operand.vmem [shape: f32[2,48,2,256], index: 5, kind: output, shape index: {}]  }
   0x1   :  { %2292 = sst [smem:[#allocation18_spill]] %s2284_s2 }
   0x2   :  { %2293 = sst [smem:[#allocation19_spill]] %s2287_s5 }
   0x3   :  { %10 = vsyncpa [#allocation4], 0 }
   0x4   :  { %12 = vsyncpa [#allocation4 + $0x1], 0 }
   0x5   :  { %13 = vsyncpa [#allocation6], 0 }
   0x6   :  { %15 = vsyncpa [#allocation6 + $0x1], 0 }
   0x7   :  { %16 = vsyncpa [#allocation9], 0 }
   0x8   :  { %18 = vsyncpa [#allocation9 + $0x1], 0  ;;  %s1782_s18 = smov 0   ;;  %s1784_s19 = smov 0  }
   0x9   :  { %s1786_s20 = smov 0   ;;  %s1788_s21 = smov 0  }
   0xa   :  { %s1790_s22 = smov 0   ;;  %s1792_s23 = smov 0  }
   0xb   :  { %s1794_s24 = smov 0   ;;  %s1796_s25 = smov 0  }
   0xc LB: > { %2294 = sst [smem:[#allocation13_spill]] %s1727_s20  ;;  %s2288_s26 = sadd.s32 4294967295, %s1747_s25   ;;  %s1747_s25 = sphi %s1796_s25, %s24_s25   ;;  %s1743_s24 = sphi %s1794_s24, %s2313_s24   ;;  %s1739_s23 = sphi %s1792_s23, %s2308_s23   ;;  %s1735_s22 = sphi %s1790_s22, %s2312_s22   ;;  %s1731_s21 = sphi %s1788_s21, %s2307_s21   ;;  %s1727_s20 = sphi %s1786_s20, %s2306_s20   ;;  %s1723_s19 = sphi %s1784_s19, %s2311_s19   ;;  %s1719_s18 = sphi %s1782_s18, %s2310_s18  }
   0xd   : > { %2295 = sst [smem:[#allocation14_spill]] %s1739_s23  ;;  %s33_s27 = sadd.s32 1, %s1739_s23 }
   0xe   : > { %p34_p0 = scmp.ge.s32.totalorder %s33_s27, 48  ;;  %s36_s28 = sadd.s32 1, %s1743_s24 }
   0xf   : > { %s77_s29 = sadd.s32 1, %s1727_s20  ;;  %p84_p1 = scmp.ne.s32.totalorder %s1727_s20, %s1723_s19 }
  0x10   : > { %s2315_s27 = smov (%p34_p0, %s33_s27), 0  ;;  %s2317_s28 = smov (!%p34_p0, %s36_s28), %s1743_s24 }
  0x11   : > { %2296 = sst [smem:[#allocation15_spill]] %s2315_s27  ;;  %p85_p2 = scmp.eq.s32.totalorder %s1747_s25, 0 }
  0x12   : > { %p90_p3 = scmp.ne.s32.totalorder %s1723_s19, %s1719_s18  ;;  %p38_p4 = scmp.ge.s32.totalorder %s2317_s28, 2 }
  0x13   : > { %p91_p5 = scmp.eq.s32.totalorder %s2288_s26, 0  ;;  %p86_p6 = por %p85_p2, %p84_p1 }
  0x14   : > { %s2319_s28 = smov (%p38_p4, %s2317_s28), 0  ;;  %p1465_p8 = scmp.lt.s32.totalorder %s1747_s25, 96 }
  0x15   : > { %2297 = sst [smem:[#allocation16_spill]] %s2319_s28  ;;  %p1835_p7 = por %p91_p5, %p90_p3 }
  0x16   : > { %s74_s6 = ssub.s32 %s1743_s24, %s2319_s28  ;;  %s1843_s7 = sand.u32 1, %s1727_s20  }
  0x17   : > { %p75_p9 = scmp.eq.s32.totalorder %s74_s6, 0  ;;  %p1845_p10 = pnand %p1465_p8, %p86_p6 }
  0x18   : > { %s265_s10 = sand.u32 1, %s1747_s25   ;;  %s1434_s11 = smul.u32 1536, %s1843_s7 }
  0x19   : > { %s1850_s9 = scalar_select %p75_p9, %s1727_s20, %s77_s29  }
  0x1a   : > { %s1435_s12 = smul.u32 1536, %s1743_s24  ;;  %p1411_p11 = scmp.ge.s32.totalorder %s1747_s25, 1 }
  0x1b   : > { %2300 = sst [smem:[#allocation17_spill]] %s1850_s9  ;;  %p323_p12 = scmp.lt.s32.totalorder %s1747_s25, 97 }
  0x1c   : > { %s2301_s2 = sld [smem:[#allocation18_spill]]  ;;  %s269_s16 = scalar_lea.vmem [#allocation5], %s1434_s11 }
  0x1d   : > { %s277_s17 = sshll.u32 %s269_s16, 4  ;;  %p1860_p13 = pnand %p1411_p11, %p323_p12  ;;  %s278_s17 = int_to_ptr.vmem [resolvable:$true] %s277_s17 }
  0x1e   : > { %s266_s6 = scalar_lea.sflag [#allocation6], %s265_s10  ;;  %s1749_s26 = smov 768  }
  0x1f   : > { %s1750_s28 = smov 48   ;;  %s1432_s27 = smul.u32 384, %s1843_s7 }
  0x20   : > { %s1433_s13 = smul.u32 384, %s1743_s24  ;;  %s244_s9 = scalar_lea.sflag [#allocation4], %s1843_s7 }
  0x21   : > { %s247_s16 = scalar_lea.vmem [#allocation3], %s1432_s27  ;;  %s1437_s10 = smul.u32 6, %s1743_s24 }
  0x22   : > { %s274_s15 = scalar_lea.hbm %s2301_s2, %s1435_s12  ;;  %s1436_s12 = smul.u32 6, %s1843_s7 }
  0x23   : > { %s275_s18 = sshll.u32 %s274_s15, 4  ;;  %s252_s15 = scalar_lea.hbm %s2283_s1, %s1433_s13  ;;  %s276_s18 = int_to_ptr.hbm [resolvable:$true] %s275_s18 }
  0x24   : > { %1458 = dma.hbm_to_vmem [thread:$0]  (!%p1845_p10), %s276_s18, 24576, %s278_s17, %s266_s6, %s1749_s26, %s1749_s26, %s1750_s28  }
  0x25   : > { %s255_s2 = sshll.u32 %s247_s16, 4  ;;  %s253_s23 = sshll.u32 %s252_s15, 4  ;;  %s256_s2 = int_to_ptr.vmem [resolvable:$true] %s255_s2  ;;  %s254_s23 = int_to_ptr.hbm [resolvable:$true] %s253_s23 }
  0x26   : > { %1455 = dma.hbm_to_vmem [thread:$0]  (!%p1845_p10), %s254_s23, 6144, %s256_s2, %s244_s9, %s1749_s26, %s1749_s26, %s1750_s28  }
  0x27   : > { %s291_s17 = scalar_lea.vmem [#allocation7], %s1436_s12  ;;  %s295_s11 = scalar_lea.hbm %s2285_s3, %s1437_s10 }
  0x28   : > { %s299_s18 = sshll.u32 %s291_s17, 4  ;;  %s314_s14 = scalar_lea.hbm %s2286_s4, %s1437_s10  ;;  %s300_s18 = int_to_ptr.vmem [resolvable:$true] %s299_s18 }
  0x29   : > { %s297_s15 = sshll.u32 %s295_s11, 4  ;;  %s316_s16 = sshll.u32 %s314_s14, 4  ;;  %s298_s15 = int_to_ptr.hbm [resolvable:$true] %s297_s15  ;;  %s317_s16 = int_to_ptr.hbm [resolvable:$true] %s316_s16 }
  0x2a   : > { %1461 = dma.hbm_to_vmem [thread:$0]  (!%p1845_p10), %s298_s15, 96, %s300_s18, %s266_s6  }
  0x2b   : > { %s310_s2 = scalar_lea.vmem [#allocation8], %s1436_s12  ;;  %s307_s26 = scalar_lea.sflag [#allocation9], %s1843_s7 }
  0x2c   : > { %s318_s23 = sshll.u32 %s310_s2, 4  ;;  %327 = sbr.rel (%p1860_p13) target bundleno = 358 (0x166), region = 40  ;;  %s319_s23 = int_to_ptr.vmem [resolvable:$true] %s318_s23 }
  0x2d   : > { %1464 = dma.hbm_to_vmem [thread:$0]  (!%p1845_p10), %s317_s16, 96, %s319_s23, %s307_s26  }
  0x2e   : > { %s329_s5 = sand.u32 (!%p1860_p13), 1, %s1723_s19  }
  0x2f   : > { %s1440_s20 = smul.u32 (!%p1860_p13), 384, %s329_s5  ;;  %s330_s28 = scalar_lea.sflag (!%p1860_p13), [#allocation4], %s329_s5 }
  0x31   : > { %s1890_s9 = scalar_lea.vmem [#allocation3], %s1440_s20 }
  0x32   : > { %1706 = dma.done.wait (%p1835_p7), %s330_s28, 6144  }
  0x33   : > { %1708 = vsyncadd (%p1835_p7), %s330_s28, 4294961152  ;;  %s2303_s6 = sadd.s32 4294967295, %s1747_s25   ;;  %s1441_s8 = smul.u32 1536, %s329_s5 }
  0x34   : > { %s339_s7 = sand.u32 1, %s2303_s6  }
  0x35   : > { %s340_s12 = scalar_lea.sflag [#allocation6], %s339_s7  ;;  %s1898_s29 = scalar_lea.vmem [#allocation5], %s1441_s8 }
  0x36   : > { %1710 = dma.done.wait (%p1835_p7), %s340_s12, 24672  }
  0x37   : > { %1712 = vsyncadd (%p1835_p7), %s340_s12, 4294942624  ;;  %s1442_s10 = smul.u32 6, %s329_s5  ;;  %s360_s18 = scalar_lea.sflag [#allocation9], %s329_s5 }
  0x39   : > { %s1904_s17 = scalar_lea.vmem [#allocation7], %s1442_s10  ;;  %s1906_s11 = scalar_lea.vmem [#allocation8], %s1442_s10 }
  0x3a   : > { %1714 = dma.done.wait (%p1835_p7), %s360_s18, 96  }
  0x3b   : > { %1716 = vsyncadd (%p1835_p7), %s360_s18, 4294967200  ;;  %s1412_s13 = sshll.u32 %s1731_s21, 1  ;;  %p438_p0 = scmp.lt.s32.totalorder %s1735_s22, 1 }
  0x3c   : > { %s423_s27 = ssub.s32 47, %s1412_s13  ;;  %s2304_s8 = sld [smem:[#allocation19_spill]] }
  0x3d   : > { %s424_s14 = smul.u32 %s1735_s22, %s423_s27  ;;  %p1417_p2 = scmp.ne.s32.totalorder %s1731_s21, 0 }
  0x3e   : > { %s439_s15 = scalar_select %p438_p0, %s1735_s22, 1 }
  0x3f   : > { %s425_s16 = sadd.s32 %s1731_s21, %s424_s14  ;;  %s1430_s10 = sshll.u32 (!%p1417_p2), %s1735_s22, 2 }
  0x40   : > { %p426_p1 = scmp.lt.s32.totalorder %s425_s16, 47  ;;  %s1443_s2 = smul.u32 96, %s439_s15 }
  0x41   : > { %s457_s18 = scalar_lea.vmem (!%p1417_p2), [#allocation2], %s1430_s10 }
  0x42   : > { %s2321_s16 = smov (!%p426_p1, %s425_s16), 47  ;;  %454 = sbr.rel (%p1417_p2) target bundleno = 73 (0x49), region = 60 }
  0x43   : > { %s1413_s23 = sshll.u32 %s2321_s16, 1 }
  0x44   : > { %s1920_s30 = scalar_lea.vmem %s2282_s0, %s1413_s23  ;;  %s444_s20 = sadd.s32 %s1443_s2, %s1413_s23 }
  0x45   : > { %s1416_s28 = sshll.u32 %s444_s20, 1 }
  0x46   : > { %s1925_s12 = scalar_lea.vmem %s2304_s8, %s1416_s28 }
  0x47   : > { %v1751_v0 = vmov 0.0  }
  0x48   : > { %458 = vst [vmem:[%s457_s18] sm:$0xf] %v1751_v0 }
  0x49 PF: > { %v506_v1 = vld [vmem:[%s1890_s9 + $0x150] sm:$0xff]  ;;  %v508_v2 = vld [vmem:[%s1890_s9 + $0x160] sm:$0xff]  ;;  %v507_v4 = vld [vmem:[%s1890_s9 + $0x158] sm:$0xff]  ;;  %s1431_s21 = sshll.u32 %s1735_s22, 2  ;;  %vm526_vm0 = vcmask 523264  }
  0x4a   : > { %v500_v3 = vld [vmem:[%s1890_s9 + $0x120] sm:$0xff]  ;;  %538 = vmatpush.msra.mxu0 %v506_v1  ;;  %578 = vmatpush.msra.mxu2 %v508_v2  ;;  %v502_v5 = vld [vmem:[%s1890_s9 + $0x130] sm:$0xff]  ;;  %v509_v6 = vld [vmem:[%s1890_s9 + $0x168] sm:$0xff]  ;;  %s1999_s22 = scalar_lea.vmem [#allocation2], %s1431_s21 }
  0x4b   : > { %558 = vmatpush.msra.mxu1 %v507_v4  ;;  %598 = vmatpush.msra.mxu3 %v509_v6  ;;  %v494_v7 = vld [vmem:[%s1890_s9 + $0xf0] sm:$0xff]  ;;  %v501_v8 = vld [vmem:[%s1890_s9 + $0x128] sm:$0xff]  ;;  %v496_v9 = vld [vmem:[%s1890_s9 + $0x100] sm:$0xff] }
  0x4c   : > { %539 = vmatpush.msra.mxu0 %v500_v3  ;;  %579 = vmatpush.msra.mxu2 %v502_v5  ;;  %v503_v10 = vld [vmem:[%s1890_s9 + $0x138] sm:$0xff]  ;;  %v488_v12 = vld [vmem:[%s1890_s9 + $0xc0] sm:$0xff]  ;;  %v490_v13 = vld [vmem:[%s1890_s9 + $0xd0] sm:$0xff] }
  0x4d   : > { %v495_v11 = vld [vmem:[%s1890_s9 + $0xf8] sm:$0xff]  ;;  %559 = vmatpush.msra.mxu1 %v501_v8  ;;  %599 = vmatpush.msra.mxu3 %v503_v10  ;;  %v497_v14 = vld [vmem:[%s1890_s9 + $0x108] sm:$0xff]  ;;  %v482_v17 = vld [vmem:[%s1890_s9 + $0x90] sm:$0xff] }
  0x4e   : > { %540 = vmatpush.msra.mxu0 %v494_v7  ;;  %580 = vmatpush.msra.mxu2 %v496_v9  ;;  %v489_v15 = vld [vmem:[%s1890_s9 + $0xc8] sm:$0xff]  ;;  %v491_v16 = vld [vmem:[%s1890_s9 + $0xd8] sm:$0xff]  ;;  %v484_v18 = vld [vmem:[%s1890_s9 + $0xa0] sm:$0xff] }
  0x4f   : > { %560 = vmatpush.msra.mxu1 %v495_v11  ;;  %600 = vmatpush.msra.mxu3 %v497_v14  ;;  %v483_v19 = vld [vmem:[%s1890_s9 + $0x98] sm:$0xff]  ;;  %v485_v20 = vld [vmem:[%s1890_s9 + $0xa8] sm:$0xff]  ;;  %v476_v21 = vld [vmem:[%s1890_s9 + $0x60] sm:$0xff] }
  0x50   : > { %541 = vmatpush.msra.mxu0 %v488_v12  ;;  %581 = vmatpush.msra.mxu2 %v490_v13  ;;  %v478_v22 = vld [vmem:[%s1890_s9 + $0x70] sm:$0xff]  ;;  %v477_v23 = vld [vmem:[%s1890_s9 + $0x68] sm:$0xff]  ;;  %v479_v24 = vld [vmem:[%s1890_s9 + $0x78] sm:$0xff] }
  0x51   : > { %561 = vmatpush.msra.mxu1 %v489_v15  ;;  %601 = vmatpush.msra.mxu3 %v491_v16  ;;  %v470_v25 = vld [vmem:[%s1890_s9 + $0x30] sm:$0xff]  ;;  %v472_v26 = vld [vmem:[%s1890_s9 + $0x40] sm:$0xff]  ;;  %v471_v27 = vld [vmem:[%s1890_s9 + $0x38] sm:$0xff] }
  0x52   : > { %542 = vmatpush.msra.mxu0 %v482_v17  ;;  %582 = vmatpush.msra.mxu2 %v484_v18  ;;  %v473_v28 = vld [vmem:[%s1890_s9 + $0x48] sm:$0xff]  ;;  %v464_v29 = vld [vmem:[%s1890_s9] sm:$0xff]  ;;  %v466_v30 = vld [vmem:[%s1890_s9 + $0x10] sm:$0xff] }
  0x53   : > { %562 = vmatpush.msra.mxu1 %v483_v19  ;;  %602 = vmatpush.msra.mxu3 %v485_v20  ;;  %v510_v31 = vld [vmem:[%s1890_s9 + $0x170] sm:$0xff]  ;;  %v465_v33 = vld [vmem:[%s1890_s9 + $0x8] sm:$0xff]  ;;  %v467_v34 = vld [vmem:[%s1890_s9 + $0x18] sm:$0xff] }
  0x54   : > { %543 = vmatpush.msra.mxu0 %v476_v21  ;;  %583 = vmatpush.msra.mxu2 %v478_v22  ;;  %v740_v32 = vld [vmem:[%s1898_s29 + $0x2d0] sm:$0xff]  ;;  %v504_v35 = vld [vmem:[%s1890_s9 + $0x140] sm:$0xff]  ;;  %v511_v36 = vld [vmem:[%s1890_s9 + $0x178] sm:$0xff] }
  0x55   : > { %563 = vmatpush.msra.mxu1 %v477_v23  ;;  %603 = vmatpush.msra.mxu3 %v479_v24  ;;  %v734_v37 = vld [vmem:[%s1898_s29 + $0x2a0] sm:$0xff]  ;;  %v836_v38 = vld [vmem:[%s1898_s29 + $0x5d0] sm:$0xff]  ;;  %v505_v40 = vld [vmem:[%s1890_s9 + $0x148] sm:$0xff] }
  0x56   : > { %544 = vmatpush.msra.mxu0 %v470_v25  ;;  %584 = vmatpush.msra.mxu2 %v472_v26  ;;  %v498_v39 = vld [vmem:[%s1890_s9 + $0x110] sm:$0xff]  ;;  %v830_v42 = vld [vmem:[%s1898_s29 + $0x5a0] sm:$0xff]  ;;  %v499_v44 = vld [vmem:[%s1890_s9 + $0x118] sm:$0xff] }
  0x57   : > { %564 = vmatpush.msra.mxu1 %v471_v27  ;;  %604 = vmatpush.msra.mxu3 %v473_v28  ;;  %v728_v41 = vld [vmem:[%s1898_s29 + $0x270] sm:$0xff]  ;;  %v492_v43 = vld [vmem:[%s1890_s9 + $0xe0] sm:$0xff]  ;;  %v493_v48 = vld [vmem:[%s1890_s9 + $0xe8] sm:$0xff] }
  0x58   : > { %545 = vmatpush.msra.mxu0 %v464_v29  ;;  %585 = vmatpush.msra.mxu2 %v466_v30  ;;  %v722_v45 = vld [vmem:[%s1898_s29 + $0x240] sm:$0xff]  ;;  %v824_v46 = vld [vmem:[%s1898_s29 + $0x570] sm:$0xff]  ;;  %v487_v52 = vld [vmem:[%s1890_s9 + $0xb8] sm:$0xff] }
  0x59   : > { %565 = vmatpush.msra.mxu1 %v465_v33  ;;  %605 = vmatpush.msra.mxu3 %v467_v34  ;;  %v486_v47 = vld [vmem:[%s1890_s9 + $0xb0] sm:$0xff]  ;;  %v818_v50 = vld [vmem:[%s1898_s29 + $0x540] sm:$0xff]  ;;  %v481_v56 = vld [vmem:[%s1890_s9 + $0x88] sm:$0xff] }
  0x5a   : > { %618 = vmatpush.msrb.mxu0 %v510_v31  ;;  %862 = vmatpush.msrb.mxu2 %v740_v32  ;;  %v716_v49 = vld [vmem:[%s1898_s29 + $0x210] sm:$0xff]  ;;  %v480_v51 = vld [vmem:[%s1890_s9 + $0x80] sm:$0xff]  ;;  %v475_v60 = vld [vmem:[%s1890_s9 + $0x58] sm:$0xff] }
  0x5b   : > { %638 = vmatpush.msrb.mxu1 %v511_v36  ;;  %882 = vmatpush.msrb.mxu3 %v836_v38  ;;  %v710_v53 = vld [vmem:[%s1898_s29 + $0x1e0] sm:$0xff]  ;;  %v812_v54 = vld [vmem:[%s1898_s29 + $0x510] sm:$0xff]  ;;  %v469_v0 = vld [vmem:[%s1890_s9 + $0x28] sm:$0xff] }
  0x5c   : > { %619 = vmatpush.msrb.mxu0 %v504_v35  ;;  %863 = vmatpush.msrb.mxu2 %v734_v37  ;;  %v474_v55 = vld [vmem:[%s1890_s9 + $0x50] sm:$0xff]  ;;  %v806_v58 = vld [vmem:[%s1898_s29 + $0x4e0] sm:$0xff]  ;;  %v741_v1 = vld [vmem:[%s1898_s29 + $0x2d8] sm:$0xff] }
  0x5d   : > { %639 = vmatpush.msrb.mxu1 %v505_v40  ;;  %883 = vmatpush.msrb.mxu3 %v830_v42  ;;  %v704_v57 = vld [vmem:[%s1898_s29 + $0x1b0] sm:$0xff]  ;;  %v468_v59 = vld [vmem:[%s1890_s9 + $0x20] sm:$0xff]  ;;  %v735_v5 = vld [vmem:[%s1898_s29 + $0x2a8] sm:$0xff] }
  0x5e   : > { %620 = vmatpush.msrb.mxu0 %v498_v39  ;;  %864 = vmatpush.msrb.mxu2 %v728_v41  ;;  %v698_v61 = vld [vmem:[%s1898_s29 + $0x180] sm:$0xff]  ;;  %v800_v62 = vld [vmem:[%s1898_s29 + $0x4b0] sm:$0xff]  ;;  %v837_v6 = vld [vmem:[%s1898_s29 + $0x5d8] sm:$0xff] }
  0x5f   : > { %640 = vmatpush.msrb.mxu1 %v499_v44  ;;  %884 = vmatpush.msrb.mxu3 %v824_v46  ;;  %v1993_v63 = vld [vmem:[%s1920_s30] sm:$0x3]  ;;  %v794_v3 = vld [vmem:[%s1898_s29 + $0x480] sm:$0xff]  ;;  %v729_v9 = vld [vmem:[%s1898_s29 + $0x278] sm:$0xff] }
  0x60   : > { %621 = vmatpush.msrb.mxu0 %v492_v43  ;;  %865 = vmatpush.msrb.mxu2 %v722_v45  ;;  %v692_v2 = vld [vmem:[%s1898_s29 + $0x150] sm:$0xff]  ;;  %v686_v7 = vld [vmem:[%s1898_s29 + $0x120] sm:$0xff]  ;;  %v831_v10 = vld [vmem:[%s1898_s29 + $0x5a8] sm:$0xff] }
  0x61   : > { %641 = vmatpush.msrb.mxu1 %v493_v48  ;;  %885 = vmatpush.msrb.mxu3 %v818_v50  ;;  %v463_v4 = vld [vmem:[%s1999_s22] sm:$0xf]  ;;  %v782_v12 = vld [vmem:[%s1898_s29 + $0x420] sm:$0xff]  ;;  %v723_v13 = vld [vmem:[%s1898_s29 + $0x248] sm:$0xff] }
  0x62   : > { %622 = vmatpush.msrb.mxu0 %v486_v47  ;;  %866 = vmatpush.msrb.mxu2 %v716_v49  ;;  %857 = vst [vmem:[#allocation1] ss:$4 sm:$0xff] %v463_v4  ;;  %v788_v8 = vld [vmem:[%s1898_s29 + $0x450] sm:$0xff]  ;;  %v825_v14 = vld [vmem:[%s1898_s29 + $0x578] sm:$0xff]  ;;  %v674_v15 = vld [vmem:[%s1898_s29 + $0xc0] sm:$0xff] }
  0x63   : > { %642 = vmatpush.msrb.mxu1 %v487_v52  ;;  %886 = vmatpush.msrb.mxu3 %v812_v54  ;;  %v680_v11 = vld [vmem:[%s1898_s29 + $0xf0] sm:$0xff]  ;;  %v717_v17 = vld [vmem:[%s1898_s29 + $0x218] sm:$0xff]  ;;  %v819_v18 = vld [vmem:[%s1898_s29 + $0x548] sm:$0xff] }
  0x64   : > { %623 = vmatpush.msrb.mxu0 %v480_v51  ;;  %867 = vmatpush.msrb.mxu2 %v710_v53  ;;  %v776_v16 = vld [vmem:[%s1898_s29 + $0x3f0] sm:$0xff]  ;;  %v770_v22 = vld [vmem:[%s1898_s29 + $0x3c0] sm:$0xff]  ;;  %v711_v23 = vld [vmem:[%s1898_s29 + $0x1e8] sm:$0xff] }
  0x65   : > { %643 = vmatpush.msrb.mxu1 %v481_v56  ;;  %887 = vmatpush.msrb.mxu3 %v806_v58  ;;  %v668_v19 = vld [vmem:[%s1898_s29 + $0x90] sm:$0xff]  ;;  %v813_v24 = vld [vmem:[%s1898_s29 + $0x518] sm:$0xff]  ;;  %v662_v25 = vld [vmem:[%s1898_s29 + $0x60] sm:$0xff] }
  0x66   : > { %624 = vmatpush.msrb.mxu0 %v474_v55  ;;  %868 = vmatpush.msrb.mxu2 %v704_v57  ;;  %v764_v26 = vld [vmem:[%s1898_s29 + $0x390] sm:$0xff]  ;;  %v705_v27 = vld [vmem:[%s1898_s29 + $0x1b8] sm:$0xff]  ;;  %v807_v28 = vld [vmem:[%s1898_s29 + $0x4e8] sm:$0xff] }
  0x67   : > { %644 = vmatpush.msrb.mxu1 %v475_v60  ;;  %888 = vmatpush.msrb.mxu3 %v800_v62  ;;  %v656_v29 = vld [vmem:[%s1898_s29 + $0x30] sm:$0xff]  ;;  %v758_v30 = vld [vmem:[%s1898_s29 + $0x360] sm:$0xff]  ;;  %v699_v31 = vld [vmem:[%s1898_s29 + $0x188] sm:$0xff] }
  0x68   : > { %625 = vmatpush.msrb.mxu0 %v468_v59  ;;  %869 = vmatpush.msrb.mxu2 %v698_v61  ;;  %v801_v32 = vld [vmem:[%s1898_s29 + $0x4b8] sm:$0xff]  ;;  %v650_v33 = vld [vmem:[%s1898_s29] sm:$0xff]  ;;  %v752_v34 = vld [vmem:[%s1898_s29 + $0x330] sm:$0xff] }
  0x69   : > { %1422 = vmatmul.msk.f32.vlgmr.msra.gmra.mxu0 %vm526_vm0, %v1993_v63  ;;  %645 = vmatpush.msrb.mxu1 %v469_v0  ;;  %v2021_v20 = vld.sshfl [vmem:[#allocation1] sm:$0xff pattern:$0x73625140]  ;;  %v2023_v21 = vld.sshfl [vmem:[#allocation1 + $0x8] sm:$0xff pattern:$0x73625140] }
  0x6a   : > { %902 = vmatpush.msra.mxu0 %v741_v1  ;;  %870 = vmatpush.msrb.mxu2 %v692_v2  ;;  %1192 = vst [vmem:[#allocation1] ss:$4 sm:$0xff] %v463_v4  ;;  %v693_v35 = vld [vmem:[%s1898_s29 + $0x158] sm:$0xff]  ;;  %v795_v36 = vld [vmem:[%s1898_s29 + $0x488] sm:$0xff]  ;;  %v742_v37 = vld [vmem:[%s1898_s29 + $0x2e0] sm:$0xff] }
  0x6b   : > { %889 = vmatpush.msrb.mxu3 %v794_v3  ;;  %1423 = vmatmul.msk.f32.vlgmr.msra.gmra.mxu1 %vm526_vm0, %v1993_v63  ;;  %v746_v38 = vld [vmem:[%s1898_s29 + $0x300] sm:$0xff]  ;;  %v687_v39 = vld [vmem:[%s1898_s29 + $0x128] sm:$0xff]  ;;  %v789_v40 = vld [vmem:[%s1898_s29 + $0x458] sm:$0xff] }
  0x6c   : > { %903 = vmatpush.msra.mxu0 %v735_v5  ;;  %922 = vmatpush.msra.mxu1 %v837_v6  ;;  %v736_v41 = vld [vmem:[%s1898_s29 + $0x2b0] sm:$0xff]  ;;  %v838_v42 = vld [vmem:[%s1898_s29 + $0x5e0] sm:$0xff]  ;;  %v681_v43 = vld [vmem:[%s1898_s29 + $0xf8] sm:$0xff] }
  0x6d   : > { %871 = vmatpush.msrb.mxu2 %v686_v7  ;;  %890 = vmatpush.msrb.mxu3 %v788_v8  ;;  %v783_v44 = vld [vmem:[%s1898_s29 + $0x428] sm:$0xff]  ;;  %v730_v45 = vld [vmem:[%s1898_s29 + $0x280] sm:$0xff]  ;;  %v832_v46 = vld [vmem:[%s1898_s29 + $0x5b0] sm:$0xff] }
  0x6e   : > { %904 = vmatpush.msra.mxu0 %v729_v9  ;;  %923 = vmatpush.msra.mxu1 %v831_v10  ;;  %v675_v47 = vld [vmem:[%s1898_s29 + $0xc8] sm:$0xff]  ;;  %v777_v48 = vld [vmem:[%s1898_s29 + $0x3f8] sm:$0xff]  ;;  %v724_v49 = vld [vmem:[%s1898_s29 + $0x250] sm:$0xff] }
  0x6f   : > { %872 = vmatpush.msrb.mxu2 %v680_v11  ;;  %891 = vmatpush.msrb.mxu3 %v782_v12  ;;  %v826_v50 = vld [vmem:[%s1898_s29 + $0x580] sm:$0xff]  ;;  %v771_v51 = vld [vmem:[%s1898_s29 + $0x3c8] sm:$0xff]  ;;  %v669_v52 = vld [vmem:[%s1898_s29 + $0x98] sm:$0xff] }
  0x70   : > { %905 = vmatpush.msra.mxu0 %v723_v13  ;;  %924 = vmatpush.msra.mxu1 %v825_v14  ;;  %v718_v53 = vld [vmem:[%s1898_s29 + $0x220] sm:$0xff]  ;;  %v820_v54 = vld [vmem:[%s1898_s29 + $0x550] sm:$0xff]  ;;  %v663_v55 = vld [vmem:[%s1898_s29 + $0x68] sm:$0xff] }
  0x71   : > { %873 = vmatpush.msrb.mxu2 %v674_v15  ;;  %892 = vmatpush.msrb.mxu3 %v776_v16  ;;  %v765_v56 = vld [vmem:[%s1898_s29 + $0x398] sm:$0xff]  ;;  %v712_v57 = vld [vmem:[%s1898_s29 + $0x1f0] sm:$0xff]  ;;  %v814_v58 = vld [vmem:[%s1898_s29 + $0x520] sm:$0xff] }
  0x72   : > { %1424 = vmatmul.msk.f32.vlgmr.msra.gmra.mxu2 %vm526_vm0, %v1993_v63  ;;  %906 = vmatpush.msra.mxu0 %v717_v17  ;;  %v657_v59 = vld [vmem:[%s1898_s29 + $0x38] sm:$0xff]  ;;  %v759_v60 = vld [vmem:[%s1898_s29 + $0x368] sm:$0xff]  ;;  %v706_v61 = vld [vmem:[%s1898_s29 + $0x1c0] sm:$0xff] }
  0x73   : > { %925 = vmatpush.msra.mxu1 %v819_v18  ;;  %874 = vmatpush.msrb.mxu2 %v668_v19  ;;  %v808_v62 = vld [vmem:[%s1898_s29 + $0x4f0] sm:$0xff]  ;;  %v651_v0 = vld [vmem:[%s1898_s29 + $0x8] sm:$0xff]  ;;  %v753_v1 = vld [vmem:[%s1898_s29 + $0x338] sm:$0xff] }
  0x74   : > { %893 = vmatpush.msrb.mxu3 %v770_v22  ;;  %907 = vmatpush.msra.mxu0 %v711_v23  ;;  %v700_v2 = vld [vmem:[%s1898_s29 + $0x190] sm:$0xff]  ;;  %v747_v3 = vld [vmem:[%s1898_s29 + $0x308] sm:$0xff]  ;;  %v694_v5 = vld [vmem:[%s1898_s29 + $0x160] sm:$0xff] }
  0x75   : > { %1425 = vmatmul.msk.f32.vlgmr.msra.gmra.mxu3 %vm526_vm0, %v1993_v63  ;;  %926 = vmatpush.msra.mxu1 %v813_v24  ;;  %v743_v4 = vld [vmem:[%s1898_s29 + $0x2e8] sm:$0xff]  ;;  %v796_v6 = vld [vmem:[%s1898_s29 + $0x490] sm:$0xff]  ;;  %v737_v7 = vld [vmem:[%s1898_s29 + $0x2b8] sm:$0xff] }
  0x76   : > { %875 = vmatpush.msrb.mxu2 %v662_v25  ;;  %894 = vmatpush.msrb.mxu3 %v764_v26  ;;  %v839_v8 = vld [vmem:[%s1898_s29 + $0x5e8] sm:$0xff]  ;;  %v688_v9 = vld [vmem:[%s1898_s29 + $0x130] sm:$0xff]  ;;  %v790_v10 = vld [vmem:[%s1898_s29 + $0x460] sm:$0xff] }
  0x77   : > { %908 = vmatpush.msra.mxu0 %v705_v27  ;;  %927 = vmatpush.msra.mxu1 %v807_v28  ;;  %v731_v11 = vld [vmem:[%s1898_s29 + $0x288] sm:$0xff]  ;;  %v833_v12 = vld [vmem:[%s1898_s29 + $0x5b8] sm:$0xff]  ;;  %v682_v13 = vld [vmem:[%s1898_s29 + $0x100] sm:$0xff] }
  0x78   : > { %876 = vmatpush.msrb.mxu2 %v656_v29  ;;  %895 = vmatpush.msrb.mxu3 %v758_v30  ;;  %v784_v14 = vld [vmem:[%s1898_s29 + $0x430] sm:$0xff]  ;;  %v725_v15 = vld [vmem:[%s1898_s29 + $0x258] sm:$0xff]  ;;  %v827_v16 = vld [vmem:[%s1898_s29 + $0x588] sm:$0xff] }
  0x79   : > { %909 = vmatpush.msra.mxu0 %v699_v31  ;;  %928 = vmatpush.msra.mxu1 %v801_v32  ;;  %v676_v17 = vld [vmem:[%s1898_s29 + $0xd0] sm:$0xff]  ;;  %v778_v18 = vld [vmem:[%s1898_s29 + $0x400] sm:$0xff]  ;;  %v719_v19 = vld [vmem:[%s1898_s29 + $0x228] sm:$0xff] }
  0x7a   : > { %877 = vmatpush.msrb.mxu2 %v650_v33  ;;  %896 = vmatpush.msrb.mxu3 %v752_v34  ;;  %v821_v22 = vld [vmem:[%s1898_s29 + $0x558] sm:$0xff]  ;;  %v670_v23 = vld [vmem:[%s1898_s29 + $0xa0] sm:$0xff]  ;;  %v772_v24 = vld [vmem:[%s1898_s29 + $0x3d0] sm:$0xff] }
  0x7b   : > { %878 = vmatmul.f32.vlgmr.msrb.gmra.mxu2 %v2021_v20  ;;  %910 = vmatpush.msra.mxu0 %v693_v35  ;;  %v713_v25 = vld [vmem:[%s1898_s29 + $0x1f8] sm:$0xff]  ;;  %v815_v26 = vld [vmem:[%s1898_s29 + $0x528] sm:$0xff]  ;;  %v664_v27 = vld [vmem:[%s1898_s29 + $0x70] sm:$0xff] }
  0x7c   : > { %929 = vmatpush.msra.mxu1 %v795_v36  ;;  %942 = vmatpush.msra.mxu2 %v742_v37  ;;  %v766_v28 = vld [vmem:[%s1898_s29 + $0x3a0] sm:$0xff]  ;;  %v707_v29 = vld [vmem:[%s1898_s29 + $0x1c8] sm:$0xff]  ;;  %v809_v30 = vld [vmem:[%s1898_s29 + $0x4f8] sm:$0xff] }
  0x7d   : > { %897 = vmatpush.msrb.mxu3 %v746_v38  ;;  %911 = vmatpush.msra.mxu0 %v687_v39  ;;  %v658_v31 = vld [vmem:[%s1898_s29 + $0x40] sm:$0xff]  ;;  %v760_v32 = vld [vmem:[%s1898_s29 + $0x370] sm:$0xff]  ;;  %v701_v33 = vld [vmem:[%s1898_s29 + $0x198] sm:$0xff] }
  0x7e   : > { %898 = vmatmul.f32.vlgmr.msrb.gmra.mxu3 %v2023_v21  ;;  %930 = vmatpush.msra.mxu1 %v789_v40  ;;  %v803_v34 = vld [vmem:[%s1898_s29 + $0x4c8] sm:$0xff]  ;;  %v652_v35 = vld [vmem:[%s1898_s29 + $0x10] sm:$0xff]  ;;  %v754_v36 = vld [vmem:[%s1898_s29 + $0x340] sm:$0xff] }
  0x7f   : > { %943 = vmatpush.msra.mxu2 %v736_v41  ;;  %962 = vmatpush.msra.mxu3 %v838_v42  ;;  %v695_v37 = vld [vmem:[%s1898_s29 + $0x168] sm:$0xff]  ;;  %v797_v38 = vld [vmem:[%s1898_s29 + $0x498] sm:$0xff]  ;;  %v744_v39 = vld [vmem:[%s1898_s29 + $0x2f0] sm:$0xff] }
  0x80   : > { %912 = vmatpush.msra.mxu0 %v681_v43  ;;  %931 = vmatpush.msra.mxu1 %v783_v44  ;;  %v748_v40 = vld [vmem:[%s1898_s29 + $0x310] sm:$0xff]  ;;  %v689_v41 = vld [vmem:[%s1898_s29 + $0x138] sm:$0xff]  ;;  %v791_v42 = vld [vmem:[%s1898_s29 + $0x468] sm:$0xff] }
  0x81   : > { %944 = vmatpush.msra.mxu2 %v730_v45  ;;  %963 = vmatpush.msra.mxu3 %v832_v46  ;;  %v738_v43 = vld [vmem:[%s1898_s29 + $0x2c0] sm:$0xff]  ;;  %v840_v44 = vld [vmem:[%s1898_s29 + $0x5f0] sm:$0xff]  ;;  %v683_v45 = vld [vmem:[%s1898_s29 + $0x108] sm:$0xff] }
  0x82   : > { %913 = vmatpush.msra.mxu0 %v675_v47  ;;  %932 = vmatpush.msra.mxu1 %v777_v48  ;;  %v785_v46 = vld [vmem:[%s1898_s29 + $0x438] sm:$0xff]  ;;  %v732_v47 = vld [vmem:[%s1898_s29 + $0x290] sm:$0xff]  ;;  %v834_v48 = vld [vmem:[%s1898_s29 + $0x5c0] sm:$0xff] }
  0x83   : > { %945 = vmatpush.msra.mxu2 %v724_v49  ;;  %964 = vmatpush.msra.mxu3 %v826_v50  ;;  %v677_v49 = vld [vmem:[%s1898_s29 + $0xd8] sm:$0xff]  ;;  %v779_v50 = vld [vmem:[%s1898_s29 + $0x408] sm:$0xff] }
  0x84   : > { %1426 = vmatmul.msk.f32.vlgmr.msrb.gmra.mxu0 %vm526_vm0, %v1993_v63  ;;  %933 = vmatpush.msra.mxu1 %v771_v51  ;;  %v726_v51 = vld [vmem:[%s1898_s29 + $0x260] sm:$0xff] }
  0x85   : > { %914 = vmatpush.msra.mxu0 %v669_v52  ;;  %946 = vmatpush.msra.mxu2 %v718_v53  ;;  %v828_v52 = vld [vmem:[%s1898_s29 + $0x590] sm:$0xff]  ;;  %v671_v53 = vld [vmem:[%s1898_s29 + $0xa8] sm:$0xff] }
  0x86   : > { %965 = vmatpush.msra.mxu3 %v820_v54  ;;  %1427 = vmatmul.msk.f32.vlgmr.msrb.gmra.mxu1 %vm526_vm0, %v1993_v63  ;;  %v802_v63 = vld [vmem:[%s1898_s29 + $0x4c0] sm:$0xff]  ;;  %v773_v54 = vld [vmem:[%s1898_s29 + $0x3d8] sm:$0xff] }
  0x87   : > { %915 = vmatpush.msra.mxu0 %v663_v55  ;;  %934 = vmatpush.msra.mxu1 %v765_v56  ;;  %v720_v55 = vld [vmem:[%s1898_s29 + $0x230] sm:$0xff]  ;;  %v822_v56 = vld [vmem:[%s1898_s29 + $0x560] sm:$0xff] }
  0x88   : > { %947 = vmatpush.msra.mxu2 %v712_v57  ;;  %966 = vmatpush.msra.mxu3 %v814_v58  ;;  %v665_v57 = vld [vmem:[%s1898_s29 + $0x78] sm:$0xff]  ;;  %v767_v58 = vld [vmem:[%s1898_s29 + $0x3a8] sm:$0xff] }
  0x89   : > { %916 = vmatpush.msra.mxu0 %v657_v59  ;;  %935 = vmatpush.msra.mxu1 %v759_v60  ;;  %v714_v59 = vld [vmem:[%s1898_s29 + $0x200] sm:$0xff]  ;;  %v816_v60 = vld [vmem:[%s1898_s29 + $0x530] sm:$0xff] }
  0x8a   : > { %948 = vmatpush.msra.mxu2 %v706_v61  ;;  %967 = vmatpush.msra.mxu3 %v808_v62  ;;  %v659_v61 = vld [vmem:[%s1898_s29 + $0x48] sm:$0xff]  ;;  %v761_v62 = vld [vmem:[%s1898_s29 + $0x378] sm:$0xff] }
  0x8b   : > { %917 = vmatpush.msra.mxu0 %v651_v0  ;;  %936 = vmatpush.msra.mxu1 %v753_v1  ;;  %v708_v0 = vld [vmem:[%s1898_s29 + $0x1d0] sm:$0xff]  ;;  %v810_v1 = vld [vmem:[%s1898_s29 + $0x500] sm:$0xff] }
  0x8c   : > { %949 = vmatpush.msra.mxu2 %v700_v2  ;;  %968 = vmatpush.msra.mxu3 %v802_v63  ;;  %v653_v2 = vld [vmem:[%s1898_s29 + $0x18] sm:$0xff]  ;;  %v755_v63 = vld [vmem:[%s1898_s29 + $0x348] sm:$0xff] }
  0x8d   : > { %918 = vmatmul.f32.vlgmr.msra.gmra.mxu0 %v2021_v20  ;;  %937 = vmatpush.msra.mxu1 %v747_v3  ;;  %v702_v3 = vld [vmem:[%s1898_s29 + $0x1a0] sm:$0xff] }
  0x8e   : > { %982 = vmatpush.msrb.mxu0 %v743_v4  ;;  %950 = vmatpush.msra.mxu2 %v694_v5  ;;  %v804_v4 = vld [vmem:[%s1898_s29 + $0x4d0] sm:$0xff]  ;;  %v749_v5 = vld [vmem:[%s1898_s29 + $0x318] sm:$0xff] }
  0x8f   : > { %969 = vmatpush.msra.mxu3 %v796_v6  ;;  %938 = vmatmul.f32.vlgmr.msra.gmra.mxu1 %v2023_v21  ;;  %v745_v6 = vld [vmem:[%s1898_s29 + $0x2f8] sm:$0xff] }
  0x90   : > { %983 = vmatpush.msrb.mxu0 %v737_v7  ;;  %1002 = vmatpush.msrb.mxu1 %v839_v8  ;;  %v696_v7 = vld [vmem:[%s1898_s29 + $0x170] sm:$0xff]  ;;  %v798_v8 = vld [vmem:[%s1898_s29 + $0x4a0] sm:$0xff] }
  0x91   : > { %951 = vmatpush.msra.mxu2 %v688_v9  ;;  %970 = vmatpush.msra.mxu3 %v790_v10  ;;  %v739_v9 = vld [vmem:[%s1898_s29 + $0x2c8] sm:$0xff]  ;;  %v841_v10 = vld [vmem:[%s1898_s29 + $0x5f8] sm:$0xff] }
  0x92   : > { %984 = vmatpush.msrb.mxu0 %v731_v11  ;;  %1003 = vmatpush.msrb.mxu1 %v833_v12  ;;  %v690_v11 = vld [vmem:[%s1898_s29 + $0x140] sm:$0xff]  ;;  %v792_v12 = vld [vmem:[%s1898_s29 + $0x470] sm:$0xff] }
  0x93   : > { %952 = vmatpush.msra.mxu2 %v682_v13  ;;  %971 = vmatpush.msra.mxu3 %v784_v14  ;;  %v733_v13 = vld [vmem:[%s1898_s29 + $0x298] sm:$0xff]  ;;  %v835_v14 = vld [vmem:[%s1898_s29 + $0x5c8] sm:$0xff] }
  0x94   : > { %985 = vmatpush.msrb.mxu0 %v725_v15  ;;  %1004 = vmatpush.msrb.mxu1 %v827_v16  ;;  %v684_v15 = vld [vmem:[%s1898_s29 + $0x110] sm:$0xff]  ;;  %v786_v16 = vld [vmem:[%s1898_s29 + $0x440] sm:$0xff] }
  0x95   : > { %953 = vmatpush.msra.mxu2 %v676_v17  ;;  %972 = vmatpush.msra.mxu3 %v778_v18  ;;  %v727_v17 = vld [vmem:[%s1898_s29 + $0x268] sm:$0xff]  ;;  %v829_v18 = vld [vmem:[%s1898_s29 + $0x598] sm:$0xff] }
  0x96   : > { %986 = vmatpush.msrb.mxu0 %v719_v19  ;;  %1005 = vmatpush.msrb.mxu1 %v821_v22  ;;  %v678_v19 = vld [vmem:[%s1898_s29 + $0xe0] sm:$0xff]  ;;  %v780_v22 = vld [vmem:[%s1898_s29 + $0x410] sm:$0xff] }
  0x97   : > { %954 = vmatpush.msra.mxu2 %v670_v23  ;;  %973 = vmatpush.msra.mxu3 %v772_v24  ;;  %v721_v23 = vld [vmem:[%s1898_s29 + $0x238] sm:$0xff]  ;;  %v823_v24 = vld [vmem:[%s1898_s29 + $0x568] sm:$0xff] }
  0x98   : > { %987 = vmatpush.msrb.mxu0 %v713_v25  ;;  %1006 = vmatpush.msrb.mxu1 %v815_v26  ;;  %v672_v25 = vld [vmem:[%s1898_s29 + $0xb0] sm:$0xff]  ;;  %v774_v26 = vld [vmem:[%s1898_s29 + $0x3e0] sm:$0xff] }
  0x99   : > { %955 = vmatpush.msra.mxu2 %v664_v27  ;;  %974 = vmatpush.msra.mxu3 %v766_v28  ;;  %v715_v27 = vld [vmem:[%s1898_s29 + $0x208] sm:$0xff]  ;;  %v817_v28 = vld [vmem:[%s1898_s29 + $0x538] sm:$0xff] }
  0x9a   : > { %988 = vmatpush.msrb.mxu0 %v707_v29  ;;  %1007 = vmatpush.msrb.mxu1 %v809_v30  ;;  %v666_v29 = vld [vmem:[%s1898_s29 + $0x80] sm:$0xff]  ;;  %v768_v30 = vld [vmem:[%s1898_s29 + $0x3b0] sm:$0xff] }
  0x9b   : > { %956 = vmatpush.msra.mxu2 %v658_v31  ;;  %975 = vmatpush.msra.mxu3 %v760_v32  ;;  %v709_v31 = vld [vmem:[%s1898_s29 + $0x1d8] sm:$0xff]  ;;  %v811_v32 = vld [vmem:[%s1898_s29 + $0x508] sm:$0xff] }
  0x9c   : > { %989 = vmatpush.msrb.mxu0 %v701_v33  ;;  %1008 = vmatpush.msrb.mxu1 %v803_v34  ;;  %v660_v33 = vld [vmem:[%s1898_s29 + $0x50] sm:$0xff]  ;;  %v762_v34 = vld [vmem:[%s1898_s29 + $0x380] sm:$0xff] }
  0x9d   : > { %957 = vmatpush.msra.mxu2 %v652_v35  ;;  %976 = vmatpush.msra.mxu3 %v754_v36  ;;  %v703_v35 = vld [vmem:[%s1898_s29 + $0x1a8] sm:$0xff]  ;;  %v805_v36 = vld [vmem:[%s1898_s29 + $0x4d8] sm:$0xff] }
  0x9e   : > { %958 = vmatmul.f32.vlgmr.msra.gmra.mxu2 %v2021_v20  ;;  %990 = vmatpush.msrb.mxu0 %v695_v37  ;;  %v654_v37 = vld [vmem:[%s1898_s29 + $0x20] sm:$0xff] }
  0x9f   : > { %1009 = vmatpush.msrb.mxu1 %v797_v38  ;;  %1022 = vmatpush.msrb.mxu2 %v744_v39  ;;  %v756_v38 = vld [vmem:[%s1898_s29 + $0x350] sm:$0xff]  ;;  %v697_v39 = vld [vmem:[%s1898_s29 + $0x178] sm:$0xff] }
  0xa0   : > { %977 = vmatpush.msra.mxu3 %v748_v40  ;;  %991 = vmatpush.msrb.mxu0 %v689_v41  ;;  %v799_v40 = vld [vmem:[%s1898_s29 + $0x4a8] sm:$0xff]  ;;  %v750_v41 = vld [vmem:[%s1898_s29 + $0x320] sm:$0xff] }
  0xa1   : > { %978 = vmatmul.f32.vlgmr.msra.gmra.mxu3 %v2023_v21  ;;  %1010 = vmatpush.msrb.mxu1 %v791_v42  ;;  %v691_v42 = vld [vmem:[%s1898_s29 + $0x148] sm:$0xff] }
  0xa2   : > { %1023 = vmatpush.msrb.mxu2 %v738_v43  ;;  %1042 = vmatpush.msrb.mxu3 %v840_v44  ;;  %v793_v43 = vld [vmem:[%s1898_s29 + $0x478] sm:$0xff] }
  0xa3   : > { %992 = vmatpush.msrb.mxu0 %v683_v45  ;;  %1011 = vmatpush.msrb.mxu1 %v785_v46  ;;  %v685_v44 = vld [vmem:[%s1898_s29 + $0x118] sm:$0xff]  ;;  %v787_v45 = vld [vmem:[%s1898_s29 + $0x448] sm:$0xff] }
  0xa4   : > { %1024 = vmatpush.msrb.mxu2 %v732_v47  ;;  %1043 = vmatpush.msrb.mxu3 %v834_v48  ;;  %v679_v46 = vld [vmem:[%s1898_s29 + $0xe8] sm:$0xff]  ;;  %v781_v47 = vld [vmem:[%s1898_s29 + $0x418] sm:$0xff] }
  0xa5   : > { %993 = vmatpush.msrb.mxu0 %v677_v49  ;;  %1012 = vmatpush.msrb.mxu1 %v779_v50  ;;  %v673_v48 = vld [vmem:[%s1898_s29 + $0xb8] sm:$0xff]  ;;  %v775_v49 = vld [vmem:[%s1898_s29 + $0x3e8] sm:$0xff] }
  0xa6   : > { %1025 = vmatpush.msrb.mxu2 %v726_v51  ;;  %1044 = vmatpush.msrb.mxu3 %v828_v52  ;;  %v667_v50 = vld [vmem:[%s1898_s29 + $0x88] sm:$0xff]  ;;  %v769_v51 = vld [vmem:[%s1898_s29 + $0x3b8] sm:$0xff] }
  0xa7   : > { %994 = vmatpush.msrb.mxu0 %v671_v53  ;;  %1013 = vmatpush.msrb.mxu1 %v773_v54  ;;  %v661_v52 = vld [vmem:[%s1898_s29 + $0x58] sm:$0xff]  ;;  %v763_v53 = vld [vmem:[%s1898_s29 + $0x388] sm:$0xff] }
  0xa8   : > { %1026 = vmatpush.msrb.mxu2 %v720_v55  ;;  %1045 = vmatpush.msrb.mxu3 %v822_v56  ;;  %v655_v54 = vld [vmem:[%s1898_s29 + $0x28] sm:$0xff]  ;;  %v757_v55 = vld [vmem:[%s1898_s29 + $0x358] sm:$0xff] }
  0xa9   : > { %995 = vmatpush.msrb.mxu0 %v665_v57  ;;  %1014 = vmatpush.msrb.mxu1 %v767_v58  ;;  %v751_v56 = vld [vmem:[%s1898_s29 + $0x328] sm:$0xff] }
  0xaa   : > { %1027 = vmatpush.msrb.mxu2 %v714_v59  ;;  %1046 = vmatpush.msrb.mxu3 %v816_v60 }
  0xab   : > { %996 = vmatpush.msrb.mxu0 %v659_v61  ;;  %1015 = vmatpush.msrb.mxu1 %v761_v62  ;;  %v2205_v61 = vld [vmem:[%s1906_s11] sm:$0x3f] }
  0xac   : > { %1028 = vmatpush.msrb.mxu2 %v708_v0  ;;  %1047 = vmatpush.msrb.mxu3 %v810_v1  ;;  %v844_v0 = vperm.slane %v2205_v61, 0 }
  0xad   : > { %997 = vmatpush.msrb.mxu0 %v653_v2  ;;  %1016 = vmatpush.msrb.mxu1 %v755_v63  ;;  %v2213_v63 = vld [vmem:[%s1904_s17] sm:$0x3f] }
  0xae   : > { %1029 = vmatpush.msrb.mxu2 %v702_v3  ;;  %1048 = vmatpush.msrb.mxu3 %v804_v4  ;;  %v514_v4 = vperm.slane %v2213_v63, 0 }
  0xaf   : > { %998 = vmatmul.f32.vlgmr.msrb.gmra.mxu0 %v2021_v20  ;;  %1017 = vmatpush.msrb.mxu1 %v749_v5 }
  0xb0   : > { %1062 = vmatpush.msra.mxu0 %v745_v6  ;;  %1030 = vmatpush.msrb.mxu2 %v696_v7 }
  0xb1   : > { %1049 = vmatpush.msrb.mxu3 %v798_v8  ;;  %1018 = vmatmul.f32.vlgmr.msrb.gmra.mxu1 %v2023_v21 }
  0xb2   : > { %1063 = vmatpush.msra.mxu0 %v739_v9  ;;  %1082 = vmatpush.msra.mxu1 %v841_v10 }
  0xb3   : > { %1031 = vmatpush.msrb.mxu2 %v690_v11  ;;  %1050 = vmatpush.msrb.mxu3 %v792_v12  ;;  %v515_v11 = vperm.slane %v2213_v63, 1 }
  0xb4   : > { %1064 = vmatpush.msra.mxu0 %v733_v13  ;;  %1083 = vmatpush.msra.mxu1 %v835_v14 }
  0xb5   : > { %1032 = vmatpush.msrb.mxu2 %v684_v15  ;;  %1051 = vmatpush.msrb.mxu3 %v786_v16 }
  0xb6   : > { %1065 = vmatpush.msra.mxu0 %v727_v17  ;;  %1084 = vmatpush.msra.mxu1 %v829_v18  ;;  %v846_v17 = vperm.slane %v2205_v61, 2 }
  0xb7   : > { %1033 = vmatpush.msrb.mxu2 %v678_v19  ;;  %1052 = vmatpush.msrb.mxu3 %v780_v22  ;;  %v516_v19 = vperm.slane %v2213_v63, 2 }
  0xb8   : > { %1066 = vmatpush.msra.mxu0 %v721_v23  ;;  %1085 = vmatpush.msra.mxu1 %v823_v24 }
  0xb9   : > { %1034 = vmatpush.msrb.mxu2 %v672_v25  ;;  %1053 = vmatpush.msrb.mxu3 %v774_v26 }
  0xba   : > { %1067 = vmatpush.msra.mxu0 %v715_v27  ;;  %1086 = vmatpush.msra.mxu1 %v817_v28 }
  0xbb   : > { %1035 = vmatpush.msrb.mxu2 %v666_v29  ;;  %1054 = vmatpush.msrb.mxu3 %v768_v30 }
  0xbc   : > { %1068 = vmatpush.msra.mxu0 %v709_v31  ;;  %1087 = vmatpush.msra.mxu1 %v811_v32  ;;  %v847_v31 = vperm.slane %v2205_v61, 3 }
  0xbd   : > { %1036 = vmatpush.msrb.mxu2 %v660_v33  ;;  %1055 = vmatpush.msrb.mxu3 %v762_v34  ;;  %v517_v33 = vperm.slane %v2213_v63, 3 }
  0xbe   : > { %1069 = vmatpush.msra.mxu0 %v703_v35  ;;  %1088 = vmatpush.msra.mxu1 %v805_v36 }
  0xbf   : > { %1037 = vmatpush.msrb.mxu2 %v654_v37  ;;  %1056 = vmatpush.msrb.mxu3 %v756_v38 }
  0xc0   : > { %1038 = vmatmul.f32.vlgmr.msrb.gmra.mxu2 %v2021_v20  ;;  %1070 = vmatpush.msra.mxu0 %v697_v39 }
  0xc1   : > { %1089 = vmatpush.msra.mxu1 %v799_v40  ;;  %1057 = vmatpush.msrb.mxu3 %v750_v41 }
  0xc2   : > { %1058 = vmatmul.f32.vlgmr.msrb.gmra.mxu3 %v2023_v21  ;;  %1071 = vmatpush.msra.mxu0 %v691_v42 }
  0xc3   : > { %1090 = vmatpush.msra.mxu1 %v793_v43 }
  0xc4   : > { %1072 = vmatpush.msra.mxu0 %v685_v44 }
  0xc5   : > { %1091 = vmatpush.msra.mxu1 %v787_v45 }
  0xc6   : > { %1073 = vmatpush.msra.mxu0 %v679_v46 }
  0xc7   : > { %1092 = vmatpush.msra.mxu1 %v781_v47 }
  0xc8   : > { %1074 = vmatpush.msra.mxu0 %v673_v48 }
  0xc9   : > { %1093 = vmatpush.msra.mxu1 %v775_v49 }
  0xca   : > { %1075 = vmatpush.msra.mxu0 %v667_v50 }
  0xcb   : > { %1094 = vmatpush.msra.mxu1 %v769_v51 }
  0xcc   : > { %1076 = vmatpush.msra.mxu0 %v661_v52 }
  0xcd   : > { %1095 = vmatpush.msra.mxu1 %v763_v53 }
  0xce   : > { %1077 = vmatpush.msra.mxu0 %v655_v54  ;;  %v848_v54 = vperm.slane %v2205_v61, 4 }
  0xcf   : > { %1096 = vmatpush.msra.mxu1 %v757_v55  ;;  %1078 = vmatmul.f32.vlgmr.msra.gmra.mxu0 %v2021_v20 }
  0xd1   : > { %1097 = vmatpush.msra.mxu1 %v751_v56 }
  0xd2   : > { %1098 = vmatmul.f32.vlgmr.msra.gmra.mxu1 %v2023_v21  ;;  %v845_v21 = vperm.slane %v2205_v61, 1 }
  0xe6   : > { %v547_v57 = vpop.f32.mrf.mxu0 }
  0xe7   : > { %v548_v7 = vadd.f32 %v547_v57, %v514_v4 }
  0xe8   : > { %v567_v59 = vpop.f32.mrf.mxu1 }
  0xe9   : > { %v568_v14 = vadd.f32 %v567_v59, %v515_v11  ;;  %v849_v11 = vperm.slane %v2205_v61, 5 }
  0xf5   : > { %v587_v58 = vpop.f32.mrf.mxu2 }
  0xf6   : > { %v588_v26 = vadd.f32 %v587_v58, %v516_v19 }
  0xf8   : > { %v607_v60 = vpop.f32.mrf.mxu3 }
  0xf9   : > { %v608_v39 = vadd.f32 %v607_v60, %v517_v33 }
  0xfe   : > { %v879_v1 = vpop.f32.mrf.mxu2 }
  0xff   : > { %v880_v3 = vadd.f32 %v879_v1, %v844_v0 }
 0x101   : > { %v2207_v62 = vpop.f32.mrf.mxu0  ;;  %v899_v20 = vpop.f32.mrf.mxu3 }
 0x102   : > { %v900_v5 = vadd.f32 %v899_v20, %v880_v3 }
 0x103   : > { %v2210_v2 = vpop.f32.mrf.mxu1 }
 0x104   : > { %v1102_v9 = vadd.f32 %v900_v5, %v548_v7 }
 0x106   : > { %v1104_v13 = vsub.f32 0.0, %v1102_v9 }
 0x108   : > { %v1106_v16 = vmul.f32 1.442695, %v1104_v13 }
 0x10a   : > { %v919_v6 = vpop.f32.mrf.mxu0  ;;  %1533 = vpow2.f32 %v1106_v16 }
 0x10b   : > { %v920_v8 = vadd.f32 %v919_v6, %v845_v21 }
 0x10c   : > { %v939_v10 = vpop.f32.mrf.mxu1 }
 0x10d   : > { %v940_v12 = vadd.f32 %v939_v10, %v920_v8 }
 0x10f   : > { %v1103_v15 = vadd.f32 %v940_v12, %v568_v14  ;;  %v518_v12 = vperm.slane %v2213_v63, 4  ;;  %v519_v14 = vperm.slane %v2213_v63, 5 }
 0x110   : > { %v1534_v28 = vpop.eup %1533 }
 0x111   : > { %v1105_v18 = vsub.f32 0.0, %v1103_v15  ;;  %v1110_v32 = vadd.f32 1.0, %v1534_v28 }
 0x113   : > { %v1108_v24 = vmul.f32 1.442695, %v1105_v18  ;;  %v1123_v3 = vand.u32 2147483648, %v1110_v32  ;;  %vm1117_vm2 = vweird.f32 %v1110_v32  ;;  %v1121_v4 = vand.u32 2147483647, %v1110_v32 }
 0x115   : > { %1535 = vpow2.f32 %v1108_v24  ;;  %v1124_v10 = vor.u32 1.1754944e-38, %v1123_v3  ;;  %vm1122_vm4 = vcmp.eq.f32.partialorder %v1121_v4, 8.507059e+37  ;;  %v628_v24 = vadd.f32 %v2207_v62, %v518_v12 }
 0x116   : > { %1537 = vrcp.f32 %v1110_v32 }
 0x11b   : > { %v1536_v37 = vpop.eup %1535 }
 0x11c   : > { %v2222_v41 = vadd.f32 1.0, %v1536_v37  ;;  %v1538_v44 = vpop.eup %1537 }
 0x11d   : > { %v1113_v48 = vmul.f32 %v1538_v44, %v1110_v32  ;;  %vm1118_vm1 = vweird.f32 %v1538_v44 }
 0x11e   : > { %vm1119_vm3 = vmor %vm1117_vm2, %vm1118_vm1  ;;  %v1138_v16 = vand.u32 2147483648, %v2222_v41  ;;  %vm1132_vm6 = vweird.f32 %v2222_v41  ;;  %v1136_v19 = vand.u32 2147483647, %v2222_v41  ;;  %vm1204_vm1 = vcmask 1041408  }
 0x11f   : > { %v1114_v50 = vsub.f32 1.0, %v1113_v48  ;;  %v1193_v48 = vld.sshfl [vmem:[#allocation1] sm:$0xff pattern:$0x73625140] }
 0x120   : > { %vm1137_vm9 = vcmp.eq.f32.partialorder %v1136_v19, 8.507059e+37 }
 0x121   : > { %v959_v22 = vpop.f32.mrf.mxu2  ;;  %v1115_v55 = vmul.f32 %v1538_v44, %v1114_v50 }
 0x122   : > { %v960_v23 = vadd.f32 %v959_v22, %v846_v17 }
 0x123   : > { %v1116_v60 = vadd.f32 %v1538_v44, %v1115_v55 }
 0x124   : > { %v979_v25 = vpop.f32.mrf.mxu3 }
 0x125   : > { %v980_v27 = vadd.f32 %v979_v25, %v960_v23  ;;  %v1120_v7 = vsel %vm1119_vm3, %v1538_v44, %v1116_v60  ;;  %v1194_v44 = vld.sshfl [vmem:[#allocation1 + $0x8] sm:$0xff pattern:$0x73625140] }
 0x126   : > { %v1125_v15 = vsel %vm1122_vm4, %v1124_v10, %v1120_v7 }
 0x127   : > { %v1142_v29 = vadd.f32 %v980_v27, %v588_v26  ;;  %v648_v26 = vadd.f32 %v2210_v2, %v519_v14  ;;  %v1139_v27 = vor.u32 1.1754944e-38, %v1138_v16 }
 0x129   : > { %v1144_v30 = vsub.f32 0.0, %v1142_v29 }
 0x12b   : > { %v1146_v34 = vmul.f32 1.442695, %v1144_v30 }
 0x12c   : > { %v999_v35 = vpop.f32.mrf.mxu0 }
 0x12d   : > { %v1000_v36 = vadd.f32 %v999_v35, %v847_v31  ;;  %1539 = vpow2.f32 %v1146_v34 }
 0x12e   : > { %v1019_v38 = vpop.f32.mrf.mxu1  ;;  %1541 = vrcp.f32 %v2222_v41 }
 0x12f   : > { %v1020_v40 = vadd.f32 %v1019_v38, %v1000_v36 }
 0x131   : > { %v1143_v42 = vadd.f32 %v1020_v40, %v608_v39 }
 0x133   : > { %v1145_v43 = vsub.f32 0.0, %v1143_v42  ;;  %v1540_v45 = vpop.eup %1539 }
 0x134   : > { %v2225_v47 = vadd.f32 1.0, %v1540_v45  ;;  %v1542_v49 = vpop.eup %1541 }
 0x135   : > { %v1148_v46 = vmul.f32 1.442695, %v1145_v43  ;;  %v1128_v53 = vmul.f32 %v1542_v49, %v2222_v41  ;;  %vm1133_vm5 = vweird.f32 %v1542_v49 }
 0x136   : > { %vm1134_vm7 = vmor %vm1132_vm6, %vm1133_vm5  ;;  %vm1157_vm11 = vweird.f32 %v2225_v47  ;;  %v1163_v33 = vand.u32 2147483648, %v2225_v47  ;;  %v1161_v2 = vand.u32 2147483647, %v2225_v47 }
 0x137   : > { %1543 = vpow2.f32 %v1148_v46  ;;  %v1129_v57 = vsub.f32 1.0, %v1128_v53 }
 0x138   : > { %1545 = vrcp.f32 %v2225_v47  ;;  %v1164_v39 = vor.u32 1.1754944e-38, %v1163_v33  ;;  %vm1162_vm15 = vcmp.eq.f32.partialorder %v1161_v2, 8.507059e+37 }
 0x139   : > { %v1130_v21 = vmul.f32 %v1542_v49, %v1129_v57 }
 0x13b   : > { %v1131_v13 = vadd.f32 %v1542_v49, %v1130_v21 }
 0x13d   : > { %v1544_v51 = vpop.eup %1543  ;;  %v1135_v25 = vsel %vm1134_vm7, %v1542_v49, %v1131_v13 }
 0x13e   : > { %v2228_v52 = vadd.f32 1.0, %v1544_v51  ;;  %v2233_v56 = vpop.eup %1545  ;;  %v1140_v31 = vsel %vm1137_vm9, %v1139_v27, %v1135_v25 }
 0x13f   : > { %v1153_v0 = vmul.f32 %v2233_v56, %v2225_v47  ;;  %vm1158_vm8 = vweird.f32 %v2233_v56 }
 0x140   : > { %1547 = vrcp.f32 %v2228_v52  ;;  %v1178_v62 = vand.u32 2147483648, %v2228_v52  ;;  %vm1159_vm12 = vmor %vm1157_vm11, %vm1158_vm8  ;;  %vm1172_vm13 = vweird.f32 %v2228_v52  ;;  %v1176_v35 = vand.u32 2147483647, %v2228_v52 }
 0x141   : > { %v1154_v8 = vsub.f32 1.0, %v1153_v0 }
 0x142   : > { %v1179_v40 = vor.u32 1.1754944e-38, %v1178_v62  ;;  %vm1177_vm0 = vcmp.eq.f32.partialorder %v1176_v35, 8.507059e+37 }
 0x143   : > { %v1039_v58 = vpop.f32.mrf.mxu2  ;;  %v1155_v22 = vmul.f32 %v2233_v56, %v1154_v8 }
 0x144   : > { %v1040_v59 = vadd.f32 %v1039_v58, %v848_v54 }
 0x145   : > { %v1059_v1 = vpop.f32.mrf.mxu3  ;;  %v1156_v30 = vadd.f32 %v2233_v56, %v1155_v22 }
 0x146   : > { %v1548_v20 = vpop.eup %1547  ;;  %v1060_v6 = vadd.f32 %v1059_v1, %v1040_v59 }
 0x147   : > { %v1168_v5 = vmul.f32 %v1548_v20, %v2228_v52  ;;  %vm1173_vm10 = vweird.f32 %v1548_v20  ;;  %v1160_v37 = vsel %vm1159_vm12, %v2233_v56, %v1156_v30 }
 0x148   : > { %v1182_v17 = vmul.f32 %v1125_v15, %v1060_v6  ;;  %vm1174_vm14 = vmor %vm1172_vm13, %vm1173_vm10  ;;  %v1165_v41 = vsel %vm1162_vm15, %v1164_v39, %v1160_v37 }
 0x149   : > { %v1169_v9 = vsub.f32 1.0, %v1168_v5  ;;  %v1188_v45 = vsub.f32 1.0, %v1165_v41  ;;  %v1197_v52 = vmul.f32 %v1193_v48, %v1165_v41 }
 0x14a   : > { %v1184_v28 = vadd.f32 %v1182_v17, %v628_v24 }
 0x14b   : > { %v1170_v23 = vmul.f32 %v1548_v20, %v1169_v9 }
 0x14c   : > { %v1079_v18 = vpop.f32.mrf.mxu0  ;;  %1549 = vtanh.f32 %v1184_v28 }
 0x14d   : > { %v1080_v61 = vadd.f32 %v1079_v18, %v849_v11  ;;  %v1171_v32 = vadd.f32 %v1548_v20, %v1170_v23 }
 0x14f   : > { %v1099_v63 = vpop.f32.mrf.mxu1  ;;  %v1175_v38 = vsel %vm1174_vm14, %v1548_v20, %v1171_v32 }
 0x150   : > { %v1100_v29 = vadd.f32 %v1099_v63, %v1080_v61  ;;  %v1180_v42 = vsel %vm1177_vm0, %v1179_v40, %v1175_v38 }
 0x151   : > { %v1189_v46 = vsub.f32 1.0, %v1180_v42  ;;  %v1198_v51 = vmul.f32 %v1194_v44, %v1180_v42 }
 0x152   : > { %v1183_v34 = vmul.f32 %v1140_v31, %v1100_v29  ;;  %v1550_v43 = vpop.eup %1549 }
 0x153   : > { %v1190_v49 = vmul.f32 %v1550_v43, %v1188_v45 }
 0x154   : > { %v1185_v36 = vadd.f32 %v1183_v34, %v648_v26 }
 0x155   : > { %v1199_v54 = vadd.f32 %v1197_v52, %v1190_v49 }
 0x156   : > { %1551 = vtanh.f32 %v1185_v36 }
 0x15c   : > { %v1552_v47 = vpop.eup %1551 }
 0x15d   : > { %v1191_v50 = vmul.f32 %v1552_v47, %v1189_v46 }
 0x15f   : > { %v1200_v53 = vadd.f32 %v1198_v51, %v1191_v50 }
 0x161   : > { %v1203_v55 = vrot.slane %v1200_v53, 6 }
 0x163   : > { %v1205_v56 = vsel %vm1204_vm1, %v1199_v54, %v1203_v55 }
 0x164   : > { %1207 = vst [vmem:[%s1999_s22] sm:$0xf] %v1205_v56 }
 0x165   : > { %1208 = vst [vmem:[%s1925_s12] sm:$0xf] %v1205_v56 }
 0x166 PF: > { %s24_s25 = sadd.s32 1, %s1747_s25   ;;  %s2305_s9 = sld [smem:[#allocation13_spill]] }
 0x167   : > { %p21_p3 = scmp.ge.s32.totalorder %s24_s25, 98   ;;  %s2306_s20 = sld [smem:[#allocation17_spill]] }
 0x168   : > { %s2307_s21 = sld [smem:[#allocation14_spill]]  ;;  %s2310_s18 = smov %s1723_s19 }
 0x169   : > { %s2308_s23 = sld [smem:[#allocation15_spill]]  ;;  %s2312_s22 = smov %s1743_s24 }
 0x16a   : > { %s2309_s29 = sld [smem:[#allocation16_spill]] }
 0x16c   : > { %s2311_s19 = smov %s2305_s9  ;;  %23 = sbr.rel (!%p21_p3) target bundleno = 12 (0xc), region = 126 }
 0x170   : > { %s2313_s24 = smov %s2309_s29 }
 0x171   :  { %1250 = vsyncpa [#allocation4], 1 }
 0x172   :  { %1252 = vsyncpa [#allocation4 + $0x1], 1 }
 0x173   :  { %1253 = vsyncpa [#allocation6], 1 }
 0x174   :  { %1255 = vsyncpa [#allocation6 + $0x1], 1 }
 0x175   :  { %1256 = vsyncpa [#allocation9], 1 }
 0x176   :  { %1258 = vsyncpa [#allocation9 + $0x1], 1 }

// kernel: gru_model_forward.4
= control target key start
LH: loop header
LB: loop body
LE: loop exit
PB: predicated region body
PF: predicated region fallthrough
CT: control target
= control target key end

     0   :  { %s3373_s0 = inlined_call_operand.vmem [shape: f32[48,2,512], index: 0, kind: input, shape index: {}]   ;;  %s3374_s1 = inlined_call_operand.hbm [shape: f32[2,512,768], index: 1, kind: input, shape index: {}]   ;;  %s3375_s2 = inlined_call_operand.hbm [shape: f32[2,256,768], index: 2, kind: input, shape index: {}]   ;;  %s3376_s3 = inlined_call_operand.hbm [shape: f32[2,1,768], index: 3, kind: input, shape index: {}]   ;;  %s3377_s4 = inlined_call_operand.hbm [shape: f32[2,1,768], index: 4, kind: input, shape index: {}]   ;;  %s3378_s5 = inlined_call_operand.vmem [shape: f32[2,48,2,256], index: 5, kind: output, shape index: {}]  }
   0x1   :  { %3383 = sst [smem:[#allocation18_spill]] %s3375_s2 }
   0x2   :  { %3384 = sst [smem:[#allocation19_spill]] %s3378_s5 }
   0x3   :  { %10 = vsyncpa [#allocation4], 0 }
   0x4   :  { %12 = vsyncpa [#allocation4 + $0x1], 0 }
   0x5   :  { %13 = vsyncpa [#allocation6], 0 }
   0x6   :  { %15 = vsyncpa [#allocation6 + $0x1], 0 }
   0x7   :  { %16 = vsyncpa [#allocation9], 0 }
   0x8   :  { %18 = vsyncpa [#allocation9 + $0x1], 0  ;;  %s2483_s18 = smov 0   ;;  %s2485_s19 = smov 0  }
   0x9   :  { %s2487_s20 = smov 0   ;;  %s2489_s21 = smov 0  }
   0xa   :  { %s2491_s22 = smov 0   ;;  %s2493_s23 = smov 0  }
   0xb   :  { %s2495_s24 = smov 0   ;;  %s2497_s25 = smov 0  }
   0xc LB: > { %3385 = sst [smem:[#allocation13_spill]] %s2428_s20  ;;  %s3379_s26 = sadd.s32 4294967295, %s2448_s25   ;;  %s2448_s25 = sphi %s2497_s25, %s24_s25   ;;  %s2444_s24 = sphi %s2495_s24, %s3404_s24   ;;  %s2440_s23 = sphi %s2493_s23, %s3399_s23   ;;  %s2436_s22 = sphi %s2491_s22, %s3403_s22   ;;  %s2432_s21 = sphi %s2489_s21, %s3398_s21   ;;  %s2428_s20 = sphi %s2487_s20, %s3397_s20   ;;  %s2424_s19 = sphi %s2485_s19, %s3402_s19   ;;  %s2420_s18 = sphi %s2483_s18, %s3401_s18  }
   0xd   : > { %3386 = sst [smem:[#allocation14_spill]] %s2440_s23  ;;  %s33_s27 = sadd.s32 1, %s2440_s23 }
   0xe   : > { %p34_p0 = scmp.ge.s32.totalorder %s33_s27, 48  ;;  %s36_s28 = sadd.s32 1, %s2444_s24 }
   0xf   : > { %s77_s29 = sadd.s32 1, %s2428_s20  ;;  %p84_p1 = scmp.ne.s32.totalorder %s2428_s20, %s2424_s19 }
  0x10   : > { %s3406_s27 = smov (%p34_p0, %s33_s27), 0  ;;  %s3408_s28 = smov (!%p34_p0, %s36_s28), %s2444_s24 }
  0x11   : > { %3387 = sst [smem:[#allocation15_spill]] %s3406_s27  ;;  %p85_p2 = scmp.eq.s32.totalorder %s2448_s25, 0 }
  0x12   : > { %p90_p3 = scmp.ne.s32.totalorder %s2424_s19, %s2420_s18  ;;  %p38_p4 = scmp.ge.s32.totalorder %s3408_s28, 2 }
  0x13   : > { %p91_p5 = scmp.eq.s32.totalorder %s3379_s26, 0  ;;  %p86_p6 = por %p85_p2, %p84_p1 }
  0x14   : > { %s3410_s28 = smov (%p38_p4, %s3408_s28), 0  ;;  %p2166_p8 = scmp.lt.s32.totalorder %s2448_s25, 96 }
  0x15   : > { %3388 = sst [smem:[#allocation16_spill]] %s3410_s28  ;;  %p2536_p7 = por %p91_p5, %p90_p3 }
  0x16   : > { %s74_s6 = ssub.s32 %s2444_s24, %s3410_s28  ;;  %s2544_s7 = sand.u32 1, %s2428_s20  }
  0x17   : > { %p75_p9 = scmp.eq.s32.totalorder %s74_s6, 0  ;;  %p2546_p10 = pnand %p2166_p8, %p86_p6 }
  0x18   : > { %s266_s10 = sand.u32 1, %s2448_s25   ;;  %s2135_s11 = smul.u32 1536, %s2544_s7 }
  0x19   : > { %s2551_s9 = scalar_select %p75_p9, %s2428_s20, %s77_s29  }
  0x1a   : > { %s2136_s12 = smul.u32 1536, %s2444_s24  ;;  %p2116_p11 = scmp.ge.s32.totalorder %s2448_s25, 1 }
  0x1b   : > { %3391 = sst [smem:[#allocation17_spill]] %s2551_s9  ;;  %p324_p12 = scmp.lt.s32.totalorder %s2448_s25, 97 }
  0x1c   : > { %s3392_s2 = sld [smem:[#allocation18_spill]]  ;;  %s270_s16 = scalar_lea.vmem [#allocation5], %s2135_s11 }
  0x1d   : > { %s278_s17 = sshll.u32 %s270_s16, 4  ;;  %p2561_p13 = pnand %p2116_p11, %p324_p12  ;;  %s279_s17 = int_to_ptr.vmem [resolvable:$true] %s278_s17 }
  0x1e   : > { %s267_s6 = scalar_lea.sflag [#allocation6], %s266_s10  ;;  %s2450_s26 = smov 768  }
  0x1f   : > { %s2451_s28 = smov 48   ;;  %s2133_s27 = smul.u32 3072, %s2544_s7 }
  0x20   : > { %s2134_s13 = smul.u32 3072, %s2444_s24  ;;  %s245_s9 = scalar_lea.sflag [#allocation4], %s2544_s7 }
  0x21   : > { %s248_s16 = scalar_lea.vmem [#allocation3], %s2133_s27  ;;  %s2138_s10 = smul.u32 6, %s2444_s24 }
  0x22   : > { %s275_s15 = scalar_lea.hbm %s3392_s2, %s2136_s12  ;;  %s2137_s12 = smul.u32 6, %s2544_s7 }
  0x23   : > { %s276_s18 = sshll.u32 %s275_s15, 4  ;;  %s253_s15 = scalar_lea.hbm %s3374_s1, %s2134_s13  ;;  %s277_s18 = int_to_ptr.hbm [resolvable:$true] %s276_s18 }
  0x24   : > { %2159 = dma.hbm_to_vmem [thread:$0]  (!%p2546_p10), %s277_s18, 24576, %s279_s17, %s267_s6, %s2450_s26, %s2450_s26, %s2451_s28  }
  0x25   : > { %s256_s2 = sshll.u32 %s248_s16, 4  ;;  %s254_s23 = sshll.u32 %s253_s15, 4  ;;  %s257_s2 = int_to_ptr.vmem [resolvable:$true] %s256_s2  ;;  %s255_s23 = int_to_ptr.hbm [resolvable:$true] %s254_s23 }
  0x26   : > { %2156 = dma.hbm_to_vmem [thread:$0]  (!%p2546_p10), %s255_s23, 49152, %s257_s2, %s245_s9, %s2450_s26, %s2450_s26, %s2451_s28  }
  0x27   : > { %s292_s17 = scalar_lea.vmem [#allocation7], %s2137_s12  ;;  %s296_s11 = scalar_lea.hbm %s3376_s3, %s2138_s10 }
  0x28   : > { %s300_s18 = sshll.u32 %s292_s17, 4  ;;  %s315_s14 = scalar_lea.hbm %s3377_s4, %s2138_s10  ;;  %s301_s18 = int_to_ptr.vmem [resolvable:$true] %s300_s18 }
  0x29   : > { %s298_s15 = sshll.u32 %s296_s11, 4  ;;  %s317_s16 = sshll.u32 %s315_s14, 4  ;;  %s299_s15 = int_to_ptr.hbm [resolvable:$true] %s298_s15  ;;  %s318_s16 = int_to_ptr.hbm [resolvable:$true] %s317_s16 }
  0x2a   : > { %2162 = dma.hbm_to_vmem [thread:$0]  (!%p2546_p10), %s299_s15, 96, %s301_s18, %s267_s6  }
  0x2b   : > { %s311_s2 = scalar_lea.vmem [#allocation8], %s2137_s12  ;;  %s308_s26 = scalar_lea.sflag [#allocation9], %s2544_s7 }
  0x2c   : > { %s319_s23 = sshll.u32 %s311_s2, 4  ;;  %328 = sbr.rel (%p2561_p13) target bundleno = 534 (0x216), region = 40  ;;  %s320_s23 = int_to_ptr.vmem [resolvable:$true] %s319_s23 }
  0x2d   : > { %2165 = dma.hbm_to_vmem [thread:$0]  (!%p2546_p10), %s318_s16, 96, %s320_s23, %s308_s26  }
  0x2e   : > { %s330_s5 = sand.u32 (!%p2561_p13), 1, %s2424_s19  }
  0x2f   : > { %s2141_s20 = smul.u32 (!%p2561_p13), 3072, %s330_s5  ;;  %s331_s28 = scalar_lea.sflag (!%p2561_p13), [#allocation4], %s330_s5 }
  0x31   : > { %s2591_s9 = scalar_lea.vmem [#allocation3], %s2141_s20 }
  0x32   : > { %2407 = dma.done.wait (%p2536_p7), %s331_s28, 49152  }
  0x33   : > { %2409 = vsyncadd (%p2536_p7), %s331_s28, 4294918144  ;;  %s3394_s6 = sadd.s32 4294967295, %s2448_s25   ;;  %s2142_s8 = smul.u32 1536, %s330_s5 }
  0x34   : > { %s340_s7 = sand.u32 1, %s3394_s6  }
  0x35   : > { %s341_s12 = scalar_lea.sflag [#allocation6], %s340_s7  ;;  %s2599_s29 = scalar_lea.vmem [#allocation5], %s2142_s8 }
  0x36   : > { %2411 = dma.done.wait (%p2536_p7), %s341_s12, 24672  }
  0x37   : > { %2413 = vsyncadd (%p2536_p7), %s341_s12, 4294942624  ;;  %s2143_s10 = smul.u32 6, %s330_s5  ;;  %s361_s18 = scalar_lea.sflag [#allocation9], %s330_s5 }
  0x39   : > { %s2605_s17 = scalar_lea.vmem [#allocation7], %s2143_s10  ;;  %s2607_s11 = scalar_lea.vmem [#allocation8], %s2143_s10 }
  0x3a   : > { %2415 = dma.done.wait (%p2536_p7), %s361_s18, 96  }
  0x3b   : > { %2417 = vsyncadd (%p2536_p7), %s361_s18, 4294967200  ;;  %s2117_s13 = sshll.u32 %s2432_s21, 1  ;;  %p441_p0 = scmp.lt.s32.totalorder %s2436_s22, 1 }
  0x3c   : > { %s425_s27 = ssub.s32 47, %s2117_s13  ;;  %s3395_s12 = sld [smem:[#allocation19_spill]] }
  0x3d   : > { %s426_s14 = smul.u32 %s2436_s22, %s425_s27  ;;  %p2123_p2 = scmp.ne.s32.totalorder %s2432_s21, 0 }
  0x3e   : > { %s442_s15 = scalar_select %p441_p0, %s2436_s22, 1 }
  0x3f   : > { %s427_s16 = sadd.s32 %s2432_s21, %s426_s14  ;;  %s2131_s18 = sshll.u32 (!%p2123_p2), %s2436_s22, 2 }
  0x40   : > { %p428_p1 = scmp.lt.s32.totalorder %s427_s16, 47  ;;  %s2144_s2 = smul.u32 96, %s442_s15 }
  0x41   : > { %s460_s13 = scalar_lea.vmem (!%p2123_p2), [#allocation2], %s2131_s18 }
  0x42   : > { %s3412_s16 = smov (!%p428_p1, %s427_s16), 47  ;;  %457 = sbr.rel (%p2123_p2) target bundleno = 73 (0x49), region = 60 }
  0x43   : > { %s2130_s23 = sshll.u32 %s3412_s16, 3  ;;  %s2121_s26 = sshll.u32 %s3412_s16, 1 }
  0x44   : > { %s2621_s30 = scalar_lea.vmem %s3373_s0, %s2130_s23  ;;  %s447_s28 = sadd.s32 %s2144_s2, %s2121_s26 }
  0x45   : > { %s2122_s6 = sshll.u32 %s447_s28, 1 }
  0x46   : > { %s2626_s10 = scalar_lea.vmem %s3395_s12, %s2122_s6 }
  0x47   : > { %v2452_v0 = vmov 0.0  }
  0x48   : > { %461 = vst [vmem:[%s460_s13] sm:$0xf] %v2452_v0 }
  0x49 PF: > { %v557_v1 = vld [vmem:[%s2591_s9 + $0x2d0] sm:$0xff]  ;;  %v551_v3 = vld [vmem:[%s2591_s9 + $0x2a0] sm:$0xff]  ;;  %v558_v63 = vld [vmem:[%s2591_s9 + $0x2d8] sm:$0xff]  ;;  %s2132_s21 = sshll.u32 %s2436_s22, 2 }
  0x4a   : > { %v749_v2 = vld [vmem:[%s2591_s9 + $0x8d0] sm:$0xff]  ;;  %875 = vmatpush.msra.mxu0 %v557_v1  ;;  %v743_v5 = vld [vmem:[%s2591_s9 + $0x8a0] sm:$0xff]  ;;  %v750_v0 = vld [vmem:[%s2591_s9 + $0x8d8] sm:$0xff]  ;;  %s2740_s22 = scalar_lea.vmem [#allocation2], %s2132_s21 }
  0x4b   : > { %915 = vmatpush.msra.mxu2 %v749_v2  ;;  %v653_v4 = vld [vmem:[%s2591_s9 + $0x5d0] sm:$0xff]  ;;  %v647_v8 = vld [vmem:[%s2591_s9 + $0x5a0] sm:$0xff] }
  0x4c   : > { %v845_v6 = vld [vmem:[%s2591_s9 + $0xbd0] sm:$0xff]  ;;  %895 = vmatpush.msra.mxu1 %v653_v4  ;;  %876 = vmatpush.msra.mxu0 %v551_v3  ;;  %v839_v10 = vld [vmem:[%s2591_s9 + $0xba0] sm:$0xff]  ;;  %v552_v3 = vld [vmem:[%s2591_s9 + $0x2a8] sm:$0xff] }
  0x4d   : > { %935 = vmatpush.msra.mxu3 %v845_v6  ;;  %v545_v7 = vld [vmem:[%s2591_s9 + $0x270] sm:$0xff]  ;;  %916 = vmatpush.msra.mxu2 %v743_v5  ;;  %v539_v12 = vld [vmem:[%s2591_s9 + $0x240] sm:$0xff]  ;;  %v654_v4 = vld [vmem:[%s2591_s9 + $0x5d8] sm:$0xff] }
  0x4e   : > { %v737_v9 = vld [vmem:[%s2591_s9 + $0x870] sm:$0xff]  ;;  %896 = vmatpush.msra.mxu1 %v647_v8  ;;  %v731_v13 = vld [vmem:[%s2591_s9 + $0x840] sm:$0xff]  ;;  %877 = vmatpush.msra.mxu0 %v545_v7  ;;  %v744_v5 = vld [vmem:[%s2591_s9 + $0x8a8] sm:$0xff] }
  0x4f   : > { %v641_v11 = vld [vmem:[%s2591_s9 + $0x570] sm:$0xff]  ;;  %936 = vmatpush.msra.mxu3 %v839_v10  ;;  %917 = vmatpush.msra.mxu2 %v737_v9  ;;  %v635_v15 = vld [vmem:[%s2591_s9 + $0x540] sm:$0xff]  ;;  %v846_v6 = vld [vmem:[%s2591_s9 + $0xbd8] sm:$0xff] }
  0x50   : > { %v833_v14 = vld [vmem:[%s2591_s9 + $0xb70] sm:$0xff]  ;;  %v827_v16 = vld [vmem:[%s2591_s9 + $0xb40] sm:$0xff]  ;;  %897 = vmatpush.msra.mxu1 %v641_v11  ;;  %878 = vmatpush.msra.mxu0 %v539_v12  ;;  %v546_v7 = vld [vmem:[%s2591_s9 + $0x278] sm:$0xff] }
  0x51   : > { %937 = vmatpush.msra.mxu3 %v833_v14  ;;  %v533_v17 = vld [vmem:[%s2591_s9 + $0x210] sm:$0xff]  ;;  %918 = vmatpush.msra.mxu2 %v731_v13  ;;  %v527_v21 = vld [vmem:[%s2591_s9 + $0x1e0] sm:$0xff]  ;;  %v648_v8 = vld [vmem:[%s2591_s9 + $0x5a8] sm:$0xff] }
  0x52   : > { %v725_v18 = vld [vmem:[%s2591_s9 + $0x810] sm:$0xff]  ;;  %898 = vmatpush.msra.mxu1 %v635_v15  ;;  %v719_v22 = vld [vmem:[%s2591_s9 + $0x7e0] sm:$0xff]  ;;  %879 = vmatpush.msra.mxu0 %v533_v17  ;;  %v738_v9 = vld [vmem:[%s2591_s9 + $0x878] sm:$0xff] }
  0x53   : > { %v629_v19 = vld [vmem:[%s2591_s9 + $0x510] sm:$0xff]  ;;  %938 = vmatpush.msra.mxu3 %v827_v16  ;;  %919 = vmatpush.msra.mxu2 %v725_v18  ;;  %v623_v23 = vld [vmem:[%s2591_s9 + $0x4e0] sm:$0xff]  ;;  %v840_v10 = vld [vmem:[%s2591_s9 + $0xba8] sm:$0xff] }
  0x54   : > { %v821_v20 = vld [vmem:[%s2591_s9 + $0xb10] sm:$0xff]  ;;  %v815_v24 = vld [vmem:[%s2591_s9 + $0xae0] sm:$0xff]  ;;  %899 = vmatpush.msra.mxu1 %v629_v19  ;;  %880 = vmatpush.msra.mxu0 %v527_v21  ;;  %v540_v11 = vld [vmem:[%s2591_s9 + $0x248] sm:$0xff] }
  0x55   : > { %939 = vmatpush.msra.mxu3 %v821_v20  ;;  %v521_v25 = vld [vmem:[%s2591_s9 + $0x1b0] sm:$0xff]  ;;  %920 = vmatpush.msra.mxu2 %v719_v22  ;;  %v515_v29 = vld [vmem:[%s2591_s9 + $0x180] sm:$0xff]  ;;  %v642_v12 = vld [vmem:[%s2591_s9 + $0x578] sm:$0xff] }
  0x56   : > { %v713_v26 = vld [vmem:[%s2591_s9 + $0x7b0] sm:$0xff]  ;;  %900 = vmatpush.msra.mxu1 %v623_v23  ;;  %v707_v30 = vld [vmem:[%s2591_s9 + $0x780] sm:$0xff]  ;;  %881 = vmatpush.msra.mxu0 %v521_v25  ;;  %v732_v13 = vld [vmem:[%s2591_s9 + $0x848] sm:$0xff] }
  0x57   : > { %v617_v27 = vld [vmem:[%s2591_s9 + $0x4b0] sm:$0xff]  ;;  %940 = vmatpush.msra.mxu3 %v815_v24  ;;  %921 = vmatpush.msra.mxu2 %v713_v26  ;;  %v611_v31 = vld [vmem:[%s2591_s9 + $0x480] sm:$0xff]  ;;  %v834_v14 = vld [vmem:[%s2591_s9 + $0xb78] sm:$0xff] }
  0x58   : > { %v809_v28 = vld [vmem:[%s2591_s9 + $0xab0] sm:$0xff]  ;;  %v803_v32 = vld [vmem:[%s2591_s9 + $0xa80] sm:$0xff]  ;;  %901 = vmatpush.msra.mxu1 %v617_v27  ;;  %882 = vmatpush.msra.mxu0 %v515_v29  ;;  %v534_v15 = vld [vmem:[%s2591_s9 + $0x218] sm:$0xff] }
  0x59   : > { %941 = vmatpush.msra.mxu3 %v809_v28  ;;  %v509_v33 = vld [vmem:[%s2591_s9 + $0x150] sm:$0xff]  ;;  %922 = vmatpush.msra.mxu2 %v707_v30  ;;  %v503_v37 = vld [vmem:[%s2591_s9 + $0x120] sm:$0xff]  ;;  %v636_v16 = vld [vmem:[%s2591_s9 + $0x548] sm:$0xff] }
  0x5a   : > { %v701_v34 = vld [vmem:[%s2591_s9 + $0x750] sm:$0xff]  ;;  %902 = vmatpush.msra.mxu1 %v611_v31  ;;  %v695_v38 = vld [vmem:[%s2591_s9 + $0x720] sm:$0xff]  ;;  %883 = vmatpush.msra.mxu0 %v509_v33  ;;  %v726_v17 = vld [vmem:[%s2591_s9 + $0x818] sm:$0xff] }
  0x5b   : > { %v605_v35 = vld [vmem:[%s2591_s9 + $0x450] sm:$0xff]  ;;  %942 = vmatpush.msra.mxu3 %v803_v32  ;;  %923 = vmatpush.msra.mxu2 %v701_v34  ;;  %v599_v39 = vld [vmem:[%s2591_s9 + $0x420] sm:$0xff]  ;;  %v828_v18 = vld [vmem:[%s2591_s9 + $0xb48] sm:$0xff] }
  0x5c   : > { %v797_v36 = vld [vmem:[%s2591_s9 + $0xa50] sm:$0xff]  ;;  %v791_v40 = vld [vmem:[%s2591_s9 + $0xa20] sm:$0xff]  ;;  %903 = vmatpush.msra.mxu1 %v605_v35  ;;  %884 = vmatpush.msra.mxu0 %v503_v37  ;;  %v528_v19 = vld [vmem:[%s2591_s9 + $0x1e8] sm:$0xff] }
  0x5d   : > { %943 = vmatpush.msra.mxu3 %v797_v36  ;;  %v497_v41 = vld [vmem:[%s2591_s9 + $0xf0] sm:$0xff]  ;;  %924 = vmatpush.msra.mxu2 %v695_v38  ;;  %v491_v45 = vld [vmem:[%s2591_s9 + $0xc0] sm:$0xff]  ;;  %v630_v20 = vld [vmem:[%s2591_s9 + $0x518] sm:$0xff] }
  0x5e   : > { %v689_v42 = vld [vmem:[%s2591_s9 + $0x6f0] sm:$0xff]  ;;  %904 = vmatpush.msra.mxu1 %v599_v39  ;;  %v683_v46 = vld [vmem:[%s2591_s9 + $0x6c0] sm:$0xff]  ;;  %885 = vmatpush.msra.mxu0 %v497_v41  ;;  %v720_v21 = vld [vmem:[%s2591_s9 + $0x7e8] sm:$0xff] }
  0x5f   : > { %v593_v43 = vld [vmem:[%s2591_s9 + $0x3f0] sm:$0xff]  ;;  %944 = vmatpush.msra.mxu3 %v791_v40  ;;  %925 = vmatpush.msra.mxu2 %v689_v42  ;;  %v587_v47 = vld [vmem:[%s2591_s9 + $0x3c0] sm:$0xff]  ;;  %v822_v22 = vld [vmem:[%s2591_s9 + $0xb18] sm:$0xff] }
  0x60   : > { %v785_v44 = vld [vmem:[%s2591_s9 + $0x9f0] sm:$0xff]  ;;  %v779_v48 = vld [vmem:[%s2591_s9 + $0x9c0] sm:$0xff]  ;;  %905 = vmatpush.msra.mxu1 %v593_v43  ;;  %886 = vmatpush.msra.mxu0 %v491_v45  ;;  %v522_v23 = vld [vmem:[%s2591_s9 + $0x1b8] sm:$0xff] }
  0x61   : > { %945 = vmatpush.msra.mxu3 %v785_v44  ;;  %v485_v49 = vld [vmem:[%s2591_s9 + $0x90] sm:$0xff]  ;;  %926 = vmatpush.msra.mxu2 %v683_v46  ;;  %v479_v53 = vld [vmem:[%s2591_s9 + $0x60] sm:$0xff]  ;;  %v624_v24 = vld [vmem:[%s2591_s9 + $0x4e8] sm:$0xff] }
  0x62   : > { %v677_v50 = vld [vmem:[%s2591_s9 + $0x690] sm:$0xff]  ;;  %906 = vmatpush.msra.mxu1 %v587_v47  ;;  %v671_v54 = vld [vmem:[%s2591_s9 + $0x660] sm:$0xff]  ;;  %887 = vmatpush.msra.mxu0 %v485_v49  ;;  %v714_v25 = vld [vmem:[%s2591_s9 + $0x7b8] sm:$0xff] }
  0x63   : > { %v581_v51 = vld [vmem:[%s2591_s9 + $0x390] sm:$0xff]  ;;  %946 = vmatpush.msra.mxu3 %v779_v48  ;;  %927 = vmatpush.msra.mxu2 %v677_v50  ;;  %v575_v55 = vld [vmem:[%s2591_s9 + $0x360] sm:$0xff]  ;;  %v816_v26 = vld [vmem:[%s2591_s9 + $0xae8] sm:$0xff] }
  0x64   : > { %v773_v52 = vld [vmem:[%s2591_s9 + $0x990] sm:$0xff]  ;;  %v767_v56 = vld [vmem:[%s2591_s9 + $0x960] sm:$0xff]  ;;  %907 = vmatpush.msra.mxu1 %v581_v51  ;;  %888 = vmatpush.msra.mxu0 %v479_v53  ;;  %v516_v28 = vld [vmem:[%s2591_s9 + $0x188] sm:$0xff] }
  0x65   : > { %947 = vmatpush.msra.mxu3 %v773_v52  ;;  %v473_v57 = vld [vmem:[%s2591_s9 + $0x30] sm:$0xff]  ;;  %928 = vmatpush.msra.mxu2 %v671_v54  ;;  %v467_v61 = vld [vmem:[%s2591_s9] sm:$0xff]  ;;  %v618_v29 = vld [vmem:[%s2591_s9 + $0x4b8] sm:$0xff] }
  0x66   : > { %v665_v58 = vld [vmem:[%s2591_s9 + $0x630] sm:$0xff]  ;;  %908 = vmatpush.msra.mxu1 %v575_v55  ;;  %v659_v62 = vld [vmem:[%s2591_s9 + $0x600] sm:$0xff]  ;;  %889 = vmatpush.msra.mxu0 %v473_v57  ;;  %v708_v30 = vld [vmem:[%s2591_s9 + $0x788] sm:$0xff] }
  0x67   : > { %v569_v59 = vld [vmem:[%s2591_s9 + $0x330] sm:$0xff]  ;;  %948 = vmatpush.msra.mxu3 %v767_v56  ;;  %929 = vmatpush.msra.mxu2 %v665_v58  ;;  %v563_v1 = vld [vmem:[%s2591_s9 + $0x300] sm:$0xff]  ;;  %v810_v31 = vld [vmem:[%s2591_s9 + $0xab8] sm:$0xff] }
  0x68   : > { %v761_v60 = vld [vmem:[%s2591_s9 + $0x930] sm:$0xff]  ;;  %909 = vmatpush.msra.mxu1 %v569_v59  ;;  %v755_v2 = vld [vmem:[%s2591_s9 + $0x900] sm:$0xff]  ;;  %890 = vmatpush.msra.mxu0 %v467_v61  ;;  %v510_v32 = vld [vmem:[%s2591_s9 + $0x158] sm:$0xff] }
  0x69   : > { %949 = vmatpush.msra.mxu3 %v761_v60  ;;  %930 = vmatpush.msra.mxu2 %v659_v62  ;;  %v462_v27 = vld [vmem:[%s2621_s30] sm:$0xff]  ;;  %v612_v33 = vld [vmem:[%s2591_s9 + $0x488] sm:$0xff]  ;;  %v702_v34 = vld [vmem:[%s2591_s9 + $0x758] sm:$0xff] }
  0x6a   : > { %955 = vmatpush.msrb.mxu0 %v558_v63  ;;  %910 = vmatpush.msra.mxu1 %v563_v1  ;;  %866 = vst [vmem:[#allocation1] ss:$4 sm:$0xff] %v462_v27  ;;  %v804_v35 = vld [vmem:[%s2591_s9 + $0xa88] sm:$0xff]  ;;  %v606_v37 = vld [vmem:[%s2591_s9 + $0x458] sm:$0xff]  ;;  %v2743_v46 = vld [vmem:[%s2740_s22] sm:$0xf] }
  0x6b   : > { %995 = vmatpush.msrb.mxu2 %v750_v0  ;;  %950 = vmatpush.msra.mxu3 %v755_v2  ;;  %v504_v36 = vld [vmem:[%s2591_s9 + $0x128] sm:$0xff]  ;;  %v798_v39 = vld [vmem:[%s2591_s9 + $0xa58] sm:$0xff]  ;;  %v721_v27 = vld [vmem:[%s2591_s9 + $0x7f0] sm:$0xff] }
  0x6c   : > { %956 = vmatpush.msrb.mxu0 %v552_v3  ;;  %975 = vmatpush.msrb.mxu1 %v654_v4  ;;  %v696_v38 = vld [vmem:[%s2591_s9 + $0x728] sm:$0xff]  ;;  %v498_v40 = vld [vmem:[%s2591_s9 + $0xf8] sm:$0xff] }
  0x6d   : > { %996 = vmatpush.msrb.mxu2 %v744_v5  ;;  %1015 = vmatpush.msrb.mxu3 %v846_v6  ;;  %v600_v41 = vld [vmem:[%s2591_s9 + $0x428] sm:$0xff]  ;;  %v690_v42 = vld [vmem:[%s2591_s9 + $0x6f8] sm:$0xff]  ;;  %v559_v5 = vld [vmem:[%s2591_s9 + $0x2e0] sm:$0xff] }
  0x6e   : > { %957 = vmatpush.msrb.mxu0 %v546_v7  ;;  %976 = vmatpush.msrb.mxu1 %v648_v8  ;;  %v792_v43 = vld [vmem:[%s2591_s9 + $0xa28] sm:$0xff]  ;;  %v594_v45 = vld [vmem:[%s2591_s9 + $0x3f8] sm:$0xff]  ;;  %v751_v6 = vld [vmem:[%s2591_s9 + $0x8e0] sm:$0xff] }
  0x6f   : > { %997 = vmatpush.msrb.mxu2 %v738_v9  ;;  %1016 = vmatpush.msrb.mxu3 %v840_v10  ;;  %v492_v44 = vld [vmem:[%s2591_s9 + $0xc8] sm:$0xff]  ;;  %v786_v52 = vld [vmem:[%s2591_s9 + $0x9f8] sm:$0xff]  ;;  %v553_v9 = vld [vmem:[%s2591_s9 + $0x2b0] sm:$0xff] }
  0x70   : > { %958 = vmatpush.msrb.mxu0 %v540_v11  ;;  %977 = vmatpush.msrb.mxu1 %v642_v12  ;;  %v684_v51 = vld [vmem:[%s2591_s9 + $0x6c8] sm:$0xff]  ;;  %v486_v53 = vld [vmem:[%s2591_s9 + $0x98] sm:$0xff]  ;;  %v655_v10 = vld [vmem:[%s2591_s9 + $0x5e0] sm:$0xff] }
  0x71   : > { %998 = vmatpush.msrb.mxu2 %v732_v13  ;;  %1017 = vmatpush.msrb.mxu3 %v834_v14  ;;  %v2745_v47 = vld.sshfl [vmem:[#allocation1] sm:$0xff pattern:$0x73625140]  ;;  %v2747_v48 = vld.sshfl [vmem:[#allocation1 + $0x10] sm:$0xff pattern:$0x73625140] }
  0x72   : > { %959 = vmatpush.msrb.mxu0 %v534_v15  ;;  %978 = vmatpush.msrb.mxu1 %v636_v16  ;;  %v2749_v49 = vld.sshfl [vmem:[#allocation1 + $0x8] sm:$0xff pattern:$0x73625140]  ;;  %v2751_v50 = vld.sshfl [vmem:[#allocation1 + $0x18] sm:$0xff pattern:$0x73625140] }
  0x73   : > { %999 = vmatpush.msrb.mxu2 %v726_v17  ;;  %1018 = vmatpush.msrb.mxu3 %v828_v18  ;;  %1562 = vst [vmem:[#allocation1] ss:$4 sm:$0xff] %v2743_v46  ;;  %v588_v54 = vld [vmem:[%s2591_s9 + $0x3c8] sm:$0xff]  ;;  %v678_v55 = vld [vmem:[%s2591_s9 + $0x698] sm:$0xff]  ;;  %v745_v11 = vld [vmem:[%s2591_s9 + $0x8b0] sm:$0xff] }
  0x74   : > { %960 = vmatpush.msrb.mxu0 %v528_v19  ;;  %979 = vmatpush.msrb.mxu1 %v630_v20  ;;  %v780_v56 = vld [vmem:[%s2591_s9 + $0x9c8] sm:$0xff]  ;;  %v582_v58 = vld [vmem:[%s2591_s9 + $0x398] sm:$0xff]  ;;  %v847_v12 = vld [vmem:[%s2591_s9 + $0xbe0] sm:$0xff] }
  0x75   : > { %1000 = vmatpush.msrb.mxu2 %v720_v21  ;;  %1019 = vmatpush.msrb.mxu3 %v822_v22  ;;  %v480_v57 = vld [vmem:[%s2591_s9 + $0x68] sm:$0xff]  ;;  %v774_v60 = vld [vmem:[%s2591_s9 + $0x998] sm:$0xff]  ;;  %v547_v13 = vld [vmem:[%s2591_s9 + $0x280] sm:$0xff] }
  0x76   : > { %961 = vmatpush.msrb.mxu0 %v522_v23  ;;  %980 = vmatpush.msrb.mxu1 %v624_v24  ;;  %v672_v59 = vld [vmem:[%s2591_s9 + $0x668] sm:$0xff]  ;;  %v474_v61 = vld [vmem:[%s2591_s9 + $0x38] sm:$0xff]  ;;  %v649_v14 = vld [vmem:[%s2591_s9 + $0x5b0] sm:$0xff] }
  0x77   : > { %1001 = vmatpush.msrb.mxu2 %v714_v25  ;;  %1020 = vmatpush.msrb.mxu3 %v816_v26  ;;  %v576_v62 = vld [vmem:[%s2591_s9 + $0x368] sm:$0xff]  ;;  %v666_v63 = vld [vmem:[%s2591_s9 + $0x638] sm:$0xff]  ;;  %v739_v15 = vld [vmem:[%s2591_s9 + $0x880] sm:$0xff] }
  0x78   : > { %962 = vmatpush.msrb.mxu0 %v516_v28  ;;  %981 = vmatpush.msrb.mxu1 %v618_v29  ;;  %v768_v0 = vld [vmem:[%s2591_s9 + $0x968] sm:$0xff]  ;;  %v570_v2 = vld [vmem:[%s2591_s9 + $0x338] sm:$0xff]  ;;  %v841_v16 = vld [vmem:[%s2591_s9 + $0xbb0] sm:$0xff] }
  0x79   : > { %1002 = vmatpush.msrb.mxu2 %v708_v30  ;;  %1021 = vmatpush.msrb.mxu3 %v810_v31  ;;  %v468_v1 = vld [vmem:[%s2591_s9 + $0x8] sm:$0xff]  ;;  %v762_v4 = vld [vmem:[%s2591_s9 + $0x938] sm:$0xff]  ;;  %v541_v17 = vld [vmem:[%s2591_s9 + $0x250] sm:$0xff] }
  0x7a   : > { %963 = vmatpush.msrb.mxu0 %v510_v32  ;;  %982 = vmatpush.msrb.mxu1 %v612_v33  ;;  %v660_v3 = vld [vmem:[%s2591_s9 + $0x608] sm:$0xff]  ;;  %v643_v18 = vld [vmem:[%s2591_s9 + $0x580] sm:$0xff]  ;;  %v733_v19 = vld [vmem:[%s2591_s9 + $0x850] sm:$0xff] }
  0x7b   : > { %1003 = vmatpush.msrb.mxu2 %v702_v34  ;;  %1022 = vmatpush.msrb.mxu3 %v804_v35  ;;  %v564_v7 = vld [vmem:[%s2591_s9 + $0x308] sm:$0xff]  ;;  %v835_v20 = vld [vmem:[%s2591_s9 + $0xb80] sm:$0xff]  ;;  %v637_v22 = vld [vmem:[%s2591_s9 + $0x550] sm:$0xff] }
  0x7c   : > { %964 = vmatpush.msrb.mxu0 %v504_v36  ;;  %983 = vmatpush.msrb.mxu1 %v606_v37  ;;  %v756_v8 = vld [vmem:[%s2591_s9 + $0x908] sm:$0xff]  ;;  %v535_v21 = vld [vmem:[%s2591_s9 + $0x220] sm:$0xff]  ;;  %v829_v24 = vld [vmem:[%s2591_s9 + $0xb50] sm:$0xff] }
  0x7d   : > { %1004 = vmatpush.msrb.mxu2 %v696_v38  ;;  %1023 = vmatpush.msrb.mxu3 %v798_v39  ;;  %v727_v23 = vld [vmem:[%s2591_s9 + $0x820] sm:$0xff]  ;;  %v529_v25 = vld [vmem:[%s2591_s9 + $0x1f0] sm:$0xff] }
  0x7e   : > { %965 = vmatpush.msrb.mxu0 %v498_v40  ;;  %984 = vmatpush.msrb.mxu1 %v600_v41  ;;  %v631_v26 = vld [vmem:[%s2591_s9 + $0x520] sm:$0xff]  ;;  %v625_v30 = vld [vmem:[%s2591_s9 + $0x4f0] sm:$0xff] }
  0x7f   : > { %1005 = vmatpush.msrb.mxu2 %v690_v42  ;;  %1024 = vmatpush.msrb.mxu3 %v792_v43  ;;  %v823_v28 = vld [vmem:[%s2591_s9 + $0xb20] sm:$0xff]  ;;  %v817_v32 = vld [vmem:[%s2591_s9 + $0xaf0] sm:$0xff] }
  0x80   : > { %966 = vmatpush.msrb.mxu0 %v492_v44  ;;  %985 = vmatpush.msrb.mxu1 %v594_v45  ;;  %v523_v29 = vld [vmem:[%s2591_s9 + $0x1c0] sm:$0xff]  ;;  %v517_v33 = vld [vmem:[%s2591_s9 + $0x190] sm:$0xff] }
  0x81   : > { %1006 = vmatpush.msrb.mxu2 %v684_v51  ;;  %1025 = vmatpush.msrb.mxu3 %v786_v52  ;;  %v715_v31 = vld [vmem:[%s2591_s9 + $0x7c0] sm:$0xff]  ;;  %v709_v35 = vld [vmem:[%s2591_s9 + $0x790] sm:$0xff] }
  0x82   : > { %967 = vmatpush.msrb.mxu0 %v486_v53  ;;  %986 = vmatpush.msrb.mxu1 %v588_v54  ;;  %v619_v34 = vld [vmem:[%s2591_s9 + $0x4c0] sm:$0xff]  ;;  %v613_v38 = vld [vmem:[%s2591_s9 + $0x490] sm:$0xff] }
  0x83   : > { %1007 = vmatpush.msrb.mxu2 %v678_v55  ;;  %1026 = vmatpush.msrb.mxu3 %v780_v56  ;;  %v811_v36 = vld [vmem:[%s2591_s9 + $0xac0] sm:$0xff]  ;;  %v805_v40 = vld [vmem:[%s2591_s9 + $0xa90] sm:$0xff] }
  0x84   : > { %968 = vmatpush.msrb.mxu0 %v480_v57  ;;  %987 = vmatpush.msrb.mxu1 %v582_v58  ;;  %v511_v37 = vld [vmem:[%s2591_s9 + $0x160] sm:$0xff]  ;;  %v505_v41 = vld [vmem:[%s2591_s9 + $0x130] sm:$0xff] }
  0x85   : > { %1008 = vmatpush.msrb.mxu2 %v672_v59  ;;  %1027 = vmatpush.msrb.mxu3 %v774_v60  ;;  %v703_v39 = vld [vmem:[%s2591_s9 + $0x760] sm:$0xff]  ;;  %v697_v43 = vld [vmem:[%s2591_s9 + $0x730] sm:$0xff] }
  0x86   : > { %969 = vmatpush.msrb.mxu0 %v474_v61  ;;  %988 = vmatpush.msrb.mxu1 %v576_v62  ;;  %v607_v42 = vld [vmem:[%s2591_s9 + $0x460] sm:$0xff]  ;;  %v601_v51 = vld [vmem:[%s2591_s9 + $0x430] sm:$0xff] }
  0x87   : > { %1009 = vmatpush.msrb.mxu2 %v666_v63  ;;  %1028 = vmatpush.msrb.mxu3 %v768_v0  ;;  %v799_v44 = vld [vmem:[%s2591_s9 + $0xa60] sm:$0xff]  ;;  %v793_v53 = vld [vmem:[%s2591_s9 + $0xa30] sm:$0xff] }
  0x88   : > { %970 = vmatpush.msrb.mxu0 %v468_v1  ;;  %989 = vmatpush.msrb.mxu1 %v570_v2  ;;  %v499_v45 = vld [vmem:[%s2591_s9 + $0x100] sm:$0xff]  ;;  %v493_v54 = vld [vmem:[%s2591_s9 + $0xd0] sm:$0xff] }
  0x89   : > { %1010 = vmatpush.msrb.mxu2 %v660_v3  ;;  %1029 = vmatpush.msrb.mxu3 %v762_v4  ;;  %v691_v52 = vld [vmem:[%s2591_s9 + $0x700] sm:$0xff]  ;;  %v685_v56 = vld [vmem:[%s2591_s9 + $0x6d0] sm:$0xff] }
  0x8a   : > { %891 = vmatmul.f32.vlgmr.msra.gmra.mxu0 %v2745_v47  ;;  %931 = vmatmul.f32.vlgmr.msra.gmra.mxu2 %v2747_v48  ;;  %v595_v55 = vld [vmem:[%s2591_s9 + $0x400] sm:$0xff]  ;;  %v589_v59 = vld [vmem:[%s2591_s9 + $0x3d0] sm:$0xff] }
  0x8b   : > { %1035 = vmatpush.msra.mxu0 %v559_v5  ;;  %1075 = vmatpush.msra.mxu2 %v751_v6  ;;  %v787_v57 = vld [vmem:[%s2591_s9 + $0xa00] sm:$0xff]  ;;  %v781_v61 = vld [vmem:[%s2591_s9 + $0x9d0] sm:$0xff] }
  0x8c   : > { %990 = vmatpush.msrb.mxu1 %v564_v7  ;;  %1030 = vmatpush.msrb.mxu3 %v756_v8  ;;  %v487_v58 = vld [vmem:[%s2591_s9 + $0xa0] sm:$0xff]  ;;  %v481_v62 = vld [vmem:[%s2591_s9 + $0x70] sm:$0xff] }
  0x8d   : > { %911 = vmatmul.f32.vlgmr.msra.gmra.mxu1 %v2749_v49  ;;  %951 = vmatmul.f32.vlgmr.msra.gmra.mxu3 %v2751_v50  ;;  %v679_v60 = vld [vmem:[%s2591_s9 + $0x6a0] sm:$0xff]  ;;  %v673_v0 = vld [vmem:[%s2591_s9 + $0x670] sm:$0xff] }
  0x8e   : > { %1036 = vmatpush.msra.mxu0 %v553_v9  ;;  %1055 = vmatpush.msra.mxu1 %v655_v10  ;;  %v583_v63 = vld [vmem:[%s2591_s9 + $0x3a0] sm:$0xff]  ;;  %v577_v3 = vld [vmem:[%s2591_s9 + $0x370] sm:$0xff]  ;;  %v560_v10 = vld [vmem:[%s2591_s9 + $0x2e8] sm:$0xff] }
  0x8f   : > { %1076 = vmatpush.msra.mxu2 %v745_v11  ;;  %1095 = vmatpush.msra.mxu3 %v847_v12  ;;  %v775_v1 = vld [vmem:[%s2591_s9 + $0x9a0] sm:$0xff]  ;;  %v769_v5 = vld [vmem:[%s2591_s9 + $0x970] sm:$0xff]  ;;  %v752_v11 = vld [vmem:[%s2591_s9 + $0x8e8] sm:$0xff] }
  0x90   : > { %1037 = vmatpush.msra.mxu0 %v547_v13  ;;  %1056 = vmatpush.msra.mxu1 %v649_v14  ;;  %v475_v2 = vld [vmem:[%s2591_s9 + $0x40] sm:$0xff]  ;;  %v469_v6 = vld [vmem:[%s2591_s9 + $0x10] sm:$0xff]  ;;  %v554_v14 = vld [vmem:[%s2591_s9 + $0x2b8] sm:$0xff] }
  0x91   : > { %1077 = vmatpush.msra.mxu2 %v739_v15  ;;  %1096 = vmatpush.msra.mxu3 %v841_v16  ;;  %v667_v4 = vld [vmem:[%s2591_s9 + $0x640] sm:$0xff]  ;;  %v661_v8 = vld [vmem:[%s2591_s9 + $0x610] sm:$0xff]  ;;  %v656_v15 = vld [vmem:[%s2591_s9 + $0x5e8] sm:$0xff] }
  0x92   : > { %1038 = vmatpush.msra.mxu0 %v541_v17  ;;  %1057 = vmatpush.msra.mxu1 %v643_v18  ;;  %v571_v7 = vld [vmem:[%s2591_s9 + $0x340] sm:$0xff]  ;;  %v565_v12 = vld [vmem:[%s2591_s9 + $0x310] sm:$0xff]  ;;  %v746_v16 = vld [vmem:[%s2591_s9 + $0x8b8] sm:$0xff] }
  0x93   : > { %1078 = vmatpush.msra.mxu2 %v733_v19  ;;  %1097 = vmatpush.msra.mxu3 %v835_v20  ;;  %v763_v9 = vld [vmem:[%s2591_s9 + $0x940] sm:$0xff]  ;;  %v757_v13 = vld [vmem:[%s2591_s9 + $0x910] sm:$0xff]  ;;  %v848_v17 = vld [vmem:[%s2591_s9 + $0xbe8] sm:$0xff] }
  0x94   : > { %1039 = vmatpush.msra.mxu0 %v535_v21  ;;  %1058 = vmatpush.msra.mxu1 %v637_v22  ;;  %v548_v18 = vld [vmem:[%s2591_s9 + $0x288] sm:$0xff]  ;;  %v650_v19 = vld [vmem:[%s2591_s9 + $0x5b8] sm:$0xff] }
  0x95   : > { %1079 = vmatpush.msra.mxu2 %v727_v23  ;;  %1098 = vmatpush.msra.mxu3 %v829_v24  ;;  %v740_v20 = vld [vmem:[%s2591_s9 + $0x888] sm:$0xff]  ;;  %v842_v21 = vld [vmem:[%s2591_s9 + $0xbb8] sm:$0xff] }
  0x96   : > { %1040 = vmatpush.msra.mxu0 %v529_v25  ;;  %1059 = vmatpush.msra.mxu1 %v631_v26  ;;  %v542_v22 = vld [vmem:[%s2591_s9 + $0x258] sm:$0xff]  ;;  %v644_v23 = vld [vmem:[%s2591_s9 + $0x588] sm:$0xff] }
  0x97   : > { %1080 = vmatpush.msra.mxu2 %v721_v27  ;;  %1099 = vmatpush.msra.mxu3 %v823_v28  ;;  %v734_v24 = vld [vmem:[%s2591_s9 + $0x858] sm:$0xff]  ;;  %v836_v25 = vld [vmem:[%s2591_s9 + $0xb88] sm:$0xff] }
  0x98   : > { %1041 = vmatpush.msra.mxu0 %v523_v29  ;;  %1060 = vmatpush.msra.mxu1 %v625_v30  ;;  %v536_v26 = vld [vmem:[%s2591_s9 + $0x228] sm:$0xff]  ;;  %v638_v27 = vld [vmem:[%s2591_s9 + $0x558] sm:$0xff] }
  0x99   : > { %1081 = vmatpush.msra.mxu2 %v715_v31  ;;  %1100 = vmatpush.msra.mxu3 %v817_v32  ;;  %v728_v28 = vld [vmem:[%s2591_s9 + $0x828] sm:$0xff]  ;;  %v830_v29 = vld [vmem:[%s2591_s9 + $0xb58] sm:$0xff] }
  0x9a   : > { %1042 = vmatpush.msra.mxu0 %v517_v33  ;;  %1061 = vmatpush.msra.mxu1 %v619_v34  ;;  %v530_v30 = vld [vmem:[%s2591_s9 + $0x1f8] sm:$0xff]  ;;  %v632_v31 = vld [vmem:[%s2591_s9 + $0x528] sm:$0xff] }
  0x9b   : > { %1082 = vmatpush.msra.mxu2 %v709_v35  ;;  %1101 = vmatpush.msra.mxu3 %v811_v36  ;;  %v722_v32 = vld [vmem:[%s2591_s9 + $0x7f8] sm:$0xff]  ;;  %v824_v33 = vld [vmem:[%s2591_s9 + $0xb28] sm:$0xff] }
  0x9c   : > { %1043 = vmatpush.msra.mxu0 %v511_v37  ;;  %1062 = vmatpush.msra.mxu1 %v613_v38  ;;  %v524_v34 = vld [vmem:[%s2591_s9 + $0x1c8] sm:$0xff]  ;;  %v626_v35 = vld [vmem:[%s2591_s9 + $0x4f8] sm:$0xff] }
  0x9d   : > { %1083 = vmatpush.msra.mxu2 %v703_v39  ;;  %1102 = vmatpush.msra.mxu3 %v805_v40  ;;  %v716_v36 = vld [vmem:[%s2591_s9 + $0x7c8] sm:$0xff]  ;;  %v818_v37 = vld [vmem:[%s2591_s9 + $0xaf8] sm:$0xff] }
  0x9e   : > { %1044 = vmatpush.msra.mxu0 %v505_v41  ;;  %1063 = vmatpush.msra.mxu1 %v607_v42  ;;  %v518_v38 = vld [vmem:[%s2591_s9 + $0x198] sm:$0xff]  ;;  %v620_v39 = vld [vmem:[%s2591_s9 + $0x4c8] sm:$0xff] }
  0x9f   : > { %1084 = vmatpush.msra.mxu2 %v697_v43  ;;  %1103 = vmatpush.msra.mxu3 %v799_v44  ;;  %v710_v40 = vld [vmem:[%s2591_s9 + $0x798] sm:$0xff]  ;;  %v812_v41 = vld [vmem:[%s2591_s9 + $0xac8] sm:$0xff] }
  0xa0   : > { %1045 = vmatpush.msra.mxu0 %v499_v45  ;;  %1064 = vmatpush.msra.mxu1 %v601_v51  ;;  %v512_v42 = vld [vmem:[%s2591_s9 + $0x168] sm:$0xff]  ;;  %v614_v43 = vld [vmem:[%s2591_s9 + $0x498] sm:$0xff] }
  0xa1   : > { %1085 = vmatpush.msra.mxu2 %v691_v52  ;;  %1104 = vmatpush.msra.mxu3 %v793_v53  ;;  %v704_v44 = vld [vmem:[%s2591_s9 + $0x768] sm:$0xff]  ;;  %v806_v45 = vld [vmem:[%s2591_s9 + $0xa98] sm:$0xff] }
  0xa2   : > { %1046 = vmatpush.msra.mxu0 %v493_v54  ;;  %1065 = vmatpush.msra.mxu1 %v595_v55  ;;  %v506_v51 = vld [vmem:[%s2591_s9 + $0x138] sm:$0xff]  ;;  %v608_v52 = vld [vmem:[%s2591_s9 + $0x468] sm:$0xff] }
  0xa3   : > { %1086 = vmatpush.msra.mxu2 %v685_v56  ;;  %1105 = vmatpush.msra.mxu3 %v787_v57  ;;  %v698_v53 = vld [vmem:[%s2591_s9 + $0x738] sm:$0xff]  ;;  %v800_v54 = vld [vmem:[%s2591_s9 + $0xa68] sm:$0xff] }
  0xa4   : > { %1047 = vmatpush.msra.mxu0 %v487_v58  ;;  %1066 = vmatpush.msra.mxu1 %v589_v59  ;;  %v500_v55 = vld [vmem:[%s2591_s9 + $0x108] sm:$0xff]  ;;  %v602_v56 = vld [vmem:[%s2591_s9 + $0x438] sm:$0xff] }
  0xa5   : > { %1087 = vmatpush.msra.mxu2 %v679_v60  ;;  %1106 = vmatpush.msra.mxu3 %v781_v61  ;;  %v692_v57 = vld [vmem:[%s2591_s9 + $0x708] sm:$0xff]  ;;  %v794_v58 = vld [vmem:[%s2591_s9 + $0xa38] sm:$0xff] }
  0xa6   : > { %1048 = vmatpush.msra.mxu0 %v481_v62  ;;  %1067 = vmatpush.msra.mxu1 %v583_v63  ;;  %v494_v59 = vld [vmem:[%s2591_s9 + $0xd8] sm:$0xff]  ;;  %v596_v60 = vld [vmem:[%s2591_s9 + $0x408] sm:$0xff] }
  0xa7   : > { %1088 = vmatpush.msra.mxu2 %v673_v0  ;;  %1107 = vmatpush.msra.mxu3 %v775_v1  ;;  %v686_v61 = vld [vmem:[%s2591_s9 + $0x6d8] sm:$0xff]  ;;  %v788_v62 = vld [vmem:[%s2591_s9 + $0xa08] sm:$0xff] }
  0xa8   : > { %1049 = vmatpush.msra.mxu0 %v475_v2  ;;  %1068 = vmatpush.msra.mxu1 %v577_v3  ;;  %v488_v63 = vld [vmem:[%s2591_s9 + $0xa8] sm:$0xff]  ;;  %v590_v0 = vld [vmem:[%s2591_s9 + $0x3d8] sm:$0xff] }
  0xa9   : > { %1089 = vmatpush.msra.mxu2 %v667_v4  ;;  %1108 = vmatpush.msra.mxu3 %v769_v5  ;;  %v680_v1 = vld [vmem:[%s2591_s9 + $0x6a8] sm:$0xff]  ;;  %v782_v2 = vld [vmem:[%s2591_s9 + $0x9d8] sm:$0xff] }
  0xaa   : > { %1050 = vmatpush.msra.mxu0 %v469_v6  ;;  %1069 = vmatpush.msra.mxu1 %v571_v7  ;;  %v482_v3 = vld [vmem:[%s2591_s9 + $0x78] sm:$0xff]  ;;  %v584_v4 = vld [vmem:[%s2591_s9 + $0x3a8] sm:$0xff] }
  0xab   : > { %1090 = vmatpush.msra.mxu2 %v661_v8  ;;  %1109 = vmatpush.msra.mxu3 %v763_v9  ;;  %v674_v5 = vld [vmem:[%s2591_s9 + $0x678] sm:$0xff]  ;;  %v776_v6 = vld [vmem:[%s2591_s9 + $0x9a8] sm:$0xff] }
  0xac   : > { %971 = vmatmul.f32.vlgmr.msrb.gmra.mxu0 %v2745_v47  ;;  %1011 = vmatmul.f32.vlgmr.msrb.gmra.mxu2 %v2747_v48  ;;  %v476_v7 = vld [vmem:[%s2591_s9 + $0x48] sm:$0xff]  ;;  %v578_v8 = vld [vmem:[%s2591_s9 + $0x378] sm:$0xff] }
  0xad   : > { %1115 = vmatpush.msrb.mxu0 %v560_v10  ;;  %1155 = vmatpush.msrb.mxu2 %v752_v11  ;;  %v668_v9 = vld [vmem:[%s2591_s9 + $0x648] sm:$0xff]  ;;  %v770_v10 = vld [vmem:[%s2591_s9 + $0x978] sm:$0xff] }
  0xae   : > { %1070 = vmatpush.msra.mxu1 %v565_v12  ;;  %1110 = vmatpush.msra.mxu3 %v757_v13  ;;  %v470_v11 = vld [vmem:[%s2591_s9 + $0x18] sm:$0xff]  ;;  %v572_v12 = vld [vmem:[%s2591_s9 + $0x348] sm:$0xff] }
  0xaf   : > { %991 = vmatmul.f32.vlgmr.msrb.gmra.mxu1 %v2749_v49  ;;  %1031 = vmatmul.f32.vlgmr.msrb.gmra.mxu3 %v2751_v50  ;;  %v662_v13 = vld [vmem:[%s2591_s9 + $0x618] sm:$0xff] }
  0xb0   : > { %1116 = vmatpush.msrb.mxu0 %v554_v14  ;;  %1135 = vmatpush.msrb.mxu1 %v656_v15  ;;  %v764_v14 = vld [vmem:[%s2591_s9 + $0x948] sm:$0xff]  ;;  %v561_v15 = vld [vmem:[%s2591_s9 + $0x2f0] sm:$0xff] }
  0xb1   : > { %1156 = vmatpush.msrb.mxu2 %v746_v16  ;;  %1175 = vmatpush.msrb.mxu3 %v848_v17  ;;  %v753_v16 = vld [vmem:[%s2591_s9 + $0x8f0] sm:$0xff]  ;;  %v566_v17 = vld [vmem:[%s2591_s9 + $0x318] sm:$0xff] }
  0xb2   : > { %1117 = vmatpush.msrb.mxu0 %v548_v18  ;;  %1136 = vmatpush.msrb.mxu1 %v650_v19  ;;  %v758_v18 = vld [vmem:[%s2591_s9 + $0x918] sm:$0xff]  ;;  %v555_v19 = vld [vmem:[%s2591_s9 + $0x2c0] sm:$0xff] }
  0xb3   : > { %1157 = vmatpush.msrb.mxu2 %v740_v20  ;;  %1176 = vmatpush.msrb.mxu3 %v842_v21  ;;  %v657_v20 = vld [vmem:[%s2591_s9 + $0x5f0] sm:$0xff]  ;;  %v747_v21 = vld [vmem:[%s2591_s9 + $0x8c0] sm:$0xff] }
  0xb4   : > { %1118 = vmatpush.msrb.mxu0 %v542_v22  ;;  %1137 = vmatpush.msrb.mxu1 %v644_v23  ;;  %v849_v22 = vld [vmem:[%s2591_s9 + $0xbf0] sm:$0xff] }
  0xb5   : > { %1158 = vmatpush.msrb.mxu2 %v734_v24  ;;  %1177 = vmatpush.msrb.mxu3 %v836_v25  ;;  %v549_v23 = vld [vmem:[%s2591_s9 + $0x290] sm:$0xff]  ;;  %v651_v24 = vld [vmem:[%s2591_s9 + $0x5c0] sm:$0xff] }
  0xb6   : > { %1119 = vmatpush.msrb.mxu0 %v536_v26  ;;  %1138 = vmatpush.msrb.mxu1 %v638_v27  ;;  %v741_v25 = vld [vmem:[%s2591_s9 + $0x890] sm:$0xff]  ;;  %v843_v26 = vld [vmem:[%s2591_s9 + $0xbc0] sm:$0xff] }
  0xb7   : > { %1159 = vmatpush.msrb.mxu2 %v728_v28  ;;  %1178 = vmatpush.msrb.mxu3 %v830_v29  ;;  %v543_v27 = vld [vmem:[%s2591_s9 + $0x260] sm:$0xff]  ;;  %v645_v28 = vld [vmem:[%s2591_s9 + $0x590] sm:$0xff] }
  0xb8   : > { %1120 = vmatpush.msrb.mxu0 %v530_v30  ;;  %1139 = vmatpush.msrb.mxu1 %v632_v31  ;;  %v735_v29 = vld [vmem:[%s2591_s9 + $0x860] sm:$0xff]  ;;  %v837_v30 = vld [vmem:[%s2591_s9 + $0xb90] sm:$0xff] }
  0xb9   : > { %1160 = vmatpush.msrb.mxu2 %v722_v32  ;;  %1179 = vmatpush.msrb.mxu3 %v824_v33  ;;  %v537_v31 = vld [vmem:[%s2591_s9 + $0x230] sm:$0xff]  ;;  %v639_v32 = vld [vmem:[%s2591_s9 + $0x560] sm:$0xff] }
  0xba   : > { %1121 = vmatpush.msrb.mxu0 %v524_v34  ;;  %1140 = vmatpush.msrb.mxu1 %v626_v35  ;;  %v729_v33 = vld [vmem:[%s2591_s9 + $0x830] sm:$0xff]  ;;  %v831_v34 = vld [vmem:[%s2591_s9 + $0xb60] sm:$0xff] }
  0xbb   : > { %1161 = vmatpush.msrb.mxu2 %v716_v36  ;;  %1180 = vmatpush.msrb.mxu3 %v818_v37  ;;  %v531_v35 = vld [vmem:[%s2591_s9 + $0x200] sm:$0xff]  ;;  %v633_v36 = vld [vmem:[%s2591_s9 + $0x530] sm:$0xff] }
  0xbc   : > { %1122 = vmatpush.msrb.mxu0 %v518_v38  ;;  %1141 = vmatpush.msrb.mxu1 %v620_v39  ;;  %v723_v37 = vld [vmem:[%s2591_s9 + $0x800] sm:$0xff]  ;;  %v825_v38 = vld [vmem:[%s2591_s9 + $0xb30] sm:$0xff] }
  0xbd   : > { %1162 = vmatpush.msrb.mxu2 %v710_v40  ;;  %1181 = vmatpush.msrb.mxu3 %v812_v41  ;;  %v525_v39 = vld [vmem:[%s2591_s9 + $0x1d0] sm:$0xff]  ;;  %v627_v40 = vld [vmem:[%s2591_s9 + $0x500] sm:$0xff] }
  0xbe   : > { %1123 = vmatpush.msrb.mxu0 %v512_v42  ;;  %1142 = vmatpush.msrb.mxu1 %v614_v43  ;;  %v717_v41 = vld [vmem:[%s2591_s9 + $0x7d0] sm:$0xff]  ;;  %v819_v42 = vld [vmem:[%s2591_s9 + $0xb00] sm:$0xff] }
  0xbf   : > { %1163 = vmatpush.msrb.mxu2 %v704_v44  ;;  %1182 = vmatpush.msrb.mxu3 %v806_v45  ;;  %v519_v43 = vld [vmem:[%s2591_s9 + $0x1a0] sm:$0xff]  ;;  %v621_v44 = vld [vmem:[%s2591_s9 + $0x4d0] sm:$0xff] }
  0xc0   : > { %1124 = vmatpush.msrb.mxu0 %v506_v51  ;;  %1143 = vmatpush.msrb.mxu1 %v608_v52  ;;  %v711_v45 = vld [vmem:[%s2591_s9 + $0x7a0] sm:$0xff]  ;;  %v813_v51 = vld [vmem:[%s2591_s9 + $0xad0] sm:$0xff] }
  0xc1   : > { %1164 = vmatpush.msrb.mxu2 %v698_v53  ;;  %1183 = vmatpush.msrb.mxu3 %v800_v54  ;;  %v513_v52 = vld [vmem:[%s2591_s9 + $0x170] sm:$0xff]  ;;  %v615_v53 = vld [vmem:[%s2591_s9 + $0x4a0] sm:$0xff] }
  0xc2   : > { %1125 = vmatpush.msrb.mxu0 %v500_v55  ;;  %1144 = vmatpush.msrb.mxu1 %v602_v56  ;;  %v705_v54 = vld [vmem:[%s2591_s9 + $0x770] sm:$0xff]  ;;  %v807_v55 = vld [vmem:[%s2591_s9 + $0xaa0] sm:$0xff] }
  0xc3   : > { %1165 = vmatpush.msrb.mxu2 %v692_v57  ;;  %1184 = vmatpush.msrb.mxu3 %v794_v58  ;;  %v507_v56 = vld [vmem:[%s2591_s9 + $0x140] sm:$0xff]  ;;  %v609_v57 = vld [vmem:[%s2591_s9 + $0x470] sm:$0xff] }
  0xc4   : > { %1126 = vmatpush.msrb.mxu0 %v494_v59  ;;  %1145 = vmatpush.msrb.mxu1 %v596_v60  ;;  %v699_v58 = vld [vmem:[%s2591_s9 + $0x740] sm:$0xff]  ;;  %v801_v59 = vld [vmem:[%s2591_s9 + $0xa70] sm:$0xff] }
  0xc5   : > { %1166 = vmatpush.msrb.mxu2 %v686_v61  ;;  %1185 = vmatpush.msrb.mxu3 %v788_v62  ;;  %v501_v60 = vld [vmem:[%s2591_s9 + $0x110] sm:$0xff]  ;;  %v603_v61 = vld [vmem:[%s2591_s9 + $0x440] sm:$0xff] }
  0xc6   : > { %1127 = vmatpush.msrb.mxu0 %v488_v63  ;;  %1146 = vmatpush.msrb.mxu1 %v590_v0  ;;  %v693_v62 = vld [vmem:[%s2591_s9 + $0x710] sm:$0xff]  ;;  %v795_v63 = vld [vmem:[%s2591_s9 + $0xa40] sm:$0xff] }
  0xc7   : > { %1167 = vmatpush.msrb.mxu2 %v680_v1  ;;  %1186 = vmatpush.msrb.mxu3 %v782_v2  ;;  %v495_v0 = vld [vmem:[%s2591_s9 + $0xe0] sm:$0xff]  ;;  %v597_v1 = vld [vmem:[%s2591_s9 + $0x410] sm:$0xff] }
  0xc8   : > { %1128 = vmatpush.msrb.mxu0 %v482_v3  ;;  %1147 = vmatpush.msrb.mxu1 %v584_v4  ;;  %v687_v2 = vld [vmem:[%s2591_s9 + $0x6e0] sm:$0xff]  ;;  %v789_v3 = vld [vmem:[%s2591_s9 + $0xa10] sm:$0xff] }
  0xc9   : > { %1168 = vmatpush.msrb.mxu2 %v674_v5  ;;  %1187 = vmatpush.msrb.mxu3 %v776_v6  ;;  %v489_v4 = vld [vmem:[%s2591_s9 + $0xb0] sm:$0xff]  ;;  %v591_v5 = vld [vmem:[%s2591_s9 + $0x3e0] sm:$0xff] }
  0xca   : > { %1129 = vmatpush.msrb.mxu0 %v476_v7  ;;  %1148 = vmatpush.msrb.mxu1 %v578_v8  ;;  %v681_v6 = vld [vmem:[%s2591_s9 + $0x6b0] sm:$0xff]  ;;  %v783_v7 = vld [vmem:[%s2591_s9 + $0x9e0] sm:$0xff] }
  0xcb   : > { %1169 = vmatpush.msrb.mxu2 %v668_v9  ;;  %1188 = vmatpush.msrb.mxu3 %v770_v10  ;;  %v483_v8 = vld [vmem:[%s2591_s9 + $0x80] sm:$0xff]  ;;  %v585_v9 = vld [vmem:[%s2591_s9 + $0x3b0] sm:$0xff] }
  0xcc   : > { %1130 = vmatpush.msrb.mxu0 %v470_v11  ;;  %1149 = vmatpush.msrb.mxu1 %v572_v12  ;;  %v675_v10 = vld [vmem:[%s2591_s9 + $0x680] sm:$0xff]  ;;  %v777_v11 = vld [vmem:[%s2591_s9 + $0x9b0] sm:$0xff] }
  0xcd   : > { %1170 = vmatpush.msrb.mxu2 %v662_v13  ;;  %1189 = vmatpush.msrb.mxu3 %v764_v14  ;;  %v477_v12 = vld [vmem:[%s2591_s9 + $0x50] sm:$0xff]  ;;  %v579_v13 = vld [vmem:[%s2591_s9 + $0x380] sm:$0xff] }
  0xce   : > { %1051 = vmatmul.f32.vlgmr.msra.gmra.mxu0 %v2745_v47  ;;  %1091 = vmatmul.f32.vlgmr.msra.gmra.mxu2 %v2747_v48  ;;  %v669_v14 = vld [vmem:[%s2591_s9 + $0x650] sm:$0xff] }
  0xcf   : > { %1195 = vmatpush.msra.mxu0 %v561_v15  ;;  %1235 = vmatpush.msra.mxu2 %v753_v16  ;;  %v771_v15 = vld [vmem:[%s2591_s9 + $0x980] sm:$0xff] }
  0xd0   : > { %1150 = vmatpush.msrb.mxu1 %v566_v17  ;;  %1190 = vmatpush.msrb.mxu3 %v758_v18  ;;  %v471_v16 = vld [vmem:[%s2591_s9 + $0x20] sm:$0xff]  ;;  %v573_v17 = vld [vmem:[%s2591_s9 + $0x350] sm:$0xff] }
  0xd1   : > { %1071 = vmatmul.f32.vlgmr.msra.gmra.mxu1 %v2749_v49  ;;  %1111 = vmatmul.f32.vlgmr.msra.gmra.mxu3 %v2751_v50  ;;  %v663_v18 = vld [vmem:[%s2591_s9 + $0x620] sm:$0xff] }
  0xd2   : > { %1196 = vmatpush.msra.mxu0 %v555_v19  ;;  %1215 = vmatpush.msra.mxu1 %v657_v20  ;;  %v765_v19 = vld [vmem:[%s2591_s9 + $0x950] sm:$0xff]  ;;  %v562_v20 = vld [vmem:[%s2591_s9 + $0x2f8] sm:$0xff] }
  0xd3   : > { %1236 = vmatpush.msra.mxu2 %v747_v21  ;;  %1255 = vmatpush.msra.mxu3 %v849_v22  ;;  %v754_v21 = vld [vmem:[%s2591_s9 + $0x8f8] sm:$0xff]  ;;  %v567_v22 = vld [vmem:[%s2591_s9 + $0x320] sm:$0xff] }
  0xd4   : > { %1197 = vmatpush.msra.mxu0 %v549_v23  ;;  %1216 = vmatpush.msra.mxu1 %v651_v24  ;;  %v759_v23 = vld [vmem:[%s2591_s9 + $0x920] sm:$0xff]  ;;  %v556_v24 = vld [vmem:[%s2591_s9 + $0x2c8] sm:$0xff] }
  0xd5   : > { %1237 = vmatpush.msra.mxu2 %v741_v25  ;;  %1256 = vmatpush.msra.mxu3 %v843_v26  ;;  %v658_v25 = vld [vmem:[%s2591_s9 + $0x5f8] sm:$0xff]  ;;  %v748_v26 = vld [vmem:[%s2591_s9 + $0x8c8] sm:$0xff] }
  0xd6   : > { %1198 = vmatpush.msra.mxu0 %v543_v27  ;;  %1217 = vmatpush.msra.mxu1 %v645_v28  ;;  %v850_v27 = vld [vmem:[%s2591_s9 + $0xbf8] sm:$0xff] }
  0xd7   : > { %1238 = vmatpush.msra.mxu2 %v735_v29  ;;  %1257 = vmatpush.msra.mxu3 %v837_v30  ;;  %v550_v28 = vld [vmem:[%s2591_s9 + $0x298] sm:$0xff]  ;;  %v652_v29 = vld [vmem:[%s2591_s9 + $0x5c8] sm:$0xff] }
  0xd8   : > { %1199 = vmatpush.msra.mxu0 %v537_v31  ;;  %1218 = vmatpush.msra.mxu1 %v639_v32  ;;  %v742_v30 = vld [vmem:[%s2591_s9 + $0x898] sm:$0xff]  ;;  %v844_v31 = vld [vmem:[%s2591_s9 + $0xbc8] sm:$0xff] }
  0xd9   : > { %1239 = vmatpush.msra.mxu2 %v729_v33  ;;  %1258 = vmatpush.msra.mxu3 %v831_v34  ;;  %v544_v32 = vld [vmem:[%s2591_s9 + $0x268] sm:$0xff]  ;;  %v646_v33 = vld [vmem:[%s2591_s9 + $0x598] sm:$0xff] }
  0xda   : > { %1200 = vmatpush.msra.mxu0 %v531_v35  ;;  %1219 = vmatpush.msra.mxu1 %v633_v36  ;;  %v736_v34 = vld [vmem:[%s2591_s9 + $0x868] sm:$0xff]  ;;  %v838_v35 = vld [vmem:[%s2591_s9 + $0xb98] sm:$0xff] }
  0xdb   : > { %1240 = vmatpush.msra.mxu2 %v723_v37  ;;  %1259 = vmatpush.msra.mxu3 %v825_v38  ;;  %v538_v36 = vld [vmem:[%s2591_s9 + $0x238] sm:$0xff]  ;;  %v640_v37 = vld [vmem:[%s2591_s9 + $0x568] sm:$0xff] }
  0xdc   : > { %1201 = vmatpush.msra.mxu0 %v525_v39  ;;  %1220 = vmatpush.msra.mxu1 %v627_v40  ;;  %v730_v38 = vld [vmem:[%s2591_s9 + $0x838] sm:$0xff]  ;;  %v832_v39 = vld [vmem:[%s2591_s9 + $0xb68] sm:$0xff] }
  0xdd   : > { %1241 = vmatpush.msra.mxu2 %v717_v41  ;;  %1260 = vmatpush.msra.mxu3 %v819_v42  ;;  %v532_v40 = vld [vmem:[%s2591_s9 + $0x208] sm:$0xff]  ;;  %v634_v41 = vld [vmem:[%s2591_s9 + $0x538] sm:$0xff] }
  0xde   : > { %1202 = vmatpush.msra.mxu0 %v519_v43  ;;  %1221 = vmatpush.msra.mxu1 %v621_v44  ;;  %v724_v42 = vld [vmem:[%s2591_s9 + $0x808] sm:$0xff]  ;;  %v826_v43 = vld [vmem:[%s2591_s9 + $0xb38] sm:$0xff] }
  0xdf   : > { %1242 = vmatpush.msra.mxu2 %v711_v45  ;;  %1261 = vmatpush.msra.mxu3 %v813_v51  ;;  %v526_v44 = vld [vmem:[%s2591_s9 + $0x1d8] sm:$0xff]  ;;  %v628_v45 = vld [vmem:[%s2591_s9 + $0x508] sm:$0xff] }
  0xe0   : > { %1203 = vmatpush.msra.mxu0 %v513_v52  ;;  %1222 = vmatpush.msra.mxu1 %v615_v53  ;;  %v718_v51 = vld [vmem:[%s2591_s9 + $0x7d8] sm:$0xff]  ;;  %v820_v52 = vld [vmem:[%s2591_s9 + $0xb08] sm:$0xff] }
  0xe1   : > { %1243 = vmatpush.msra.mxu2 %v705_v54  ;;  %1262 = vmatpush.msra.mxu3 %v807_v55  ;;  %v520_v53 = vld [vmem:[%s2591_s9 + $0x1a8] sm:$0xff]  ;;  %v622_v54 = vld [vmem:[%s2591_s9 + $0x4d8] sm:$0xff] }
  0xe2   : > { %1204 = vmatpush.msra.mxu0 %v507_v56  ;;  %1223 = vmatpush.msra.mxu1 %v609_v57  ;;  %v712_v55 = vld [vmem:[%s2591_s9 + $0x7a8] sm:$0xff]  ;;  %v814_v56 = vld [vmem:[%s2591_s9 + $0xad8] sm:$0xff] }
  0xe3   : > { %1244 = vmatpush.msra.mxu2 %v699_v58  ;;  %1263 = vmatpush.msra.mxu3 %v801_v59  ;;  %v514_v57 = vld [vmem:[%s2591_s9 + $0x178] sm:$0xff]  ;;  %v616_v58 = vld [vmem:[%s2591_s9 + $0x4a8] sm:$0xff] }
  0xe4   : > { %1205 = vmatpush.msra.mxu0 %v501_v60  ;;  %1224 = vmatpush.msra.mxu1 %v603_v61  ;;  %v706_v59 = vld [vmem:[%s2591_s9 + $0x778] sm:$0xff]  ;;  %v808_v60 = vld [vmem:[%s2591_s9 + $0xaa8] sm:$0xff] }
  0xe5   : > { %1245 = vmatpush.msra.mxu2 %v693_v62  ;;  %1264 = vmatpush.msra.mxu3 %v795_v63  ;;  %v508_v61 = vld [vmem:[%s2591_s9 + $0x148] sm:$0xff]  ;;  %v610_v62 = vld [vmem:[%s2591_s9 + $0x478] sm:$0xff] }
  0xe6   : > { %1206 = vmatpush.msra.mxu0 %v495_v0  ;;  %1225 = vmatpush.msra.mxu1 %v597_v1  ;;  %v700_v63 = vld [vmem:[%s2591_s9 + $0x748] sm:$0xff]  ;;  %v802_v0 = vld [vmem:[%s2591_s9 + $0xa78] sm:$0xff] }
  0xe7   : > { %1246 = vmatpush.msra.mxu2 %v687_v2  ;;  %1265 = vmatpush.msra.mxu3 %v789_v3  ;;  %v502_v1 = vld [vmem:[%s2591_s9 + $0x118] sm:$0xff]  ;;  %v604_v2 = vld [vmem:[%s2591_s9 + $0x448] sm:$0xff] }
  0xe8   : > { %1207 = vmatpush.msra.mxu0 %v489_v4  ;;  %1226 = vmatpush.msra.mxu1 %v591_v5  ;;  %v694_v3 = vld [vmem:[%s2591_s9 + $0x718] sm:$0xff]  ;;  %v796_v4 = vld [vmem:[%s2591_s9 + $0xa48] sm:$0xff] }
  0xe9   : > { %1247 = vmatpush.msra.mxu2 %v681_v6  ;;  %1266 = vmatpush.msra.mxu3 %v783_v7  ;;  %v496_v5 = vld [vmem:[%s2591_s9 + $0xe8] sm:$0xff]  ;;  %v598_v6 = vld [vmem:[%s2591_s9 + $0x418] sm:$0xff] }
  0xea   : > { %1208 = vmatpush.msra.mxu0 %v483_v8  ;;  %1227 = vmatpush.msra.mxu1 %v585_v9  ;;  %v688_v7 = vld [vmem:[%s2591_s9 + $0x6e8] sm:$0xff]  ;;  %v790_v8 = vld [vmem:[%s2591_s9 + $0xa18] sm:$0xff] }
  0xeb   : > { %1248 = vmatpush.msra.mxu2 %v675_v10  ;;  %1267 = vmatpush.msra.mxu3 %v777_v11  ;;  %v490_v9 = vld [vmem:[%s2591_s9 + $0xb8] sm:$0xff]  ;;  %v592_v10 = vld [vmem:[%s2591_s9 + $0x3e8] sm:$0xff] }
  0xec   : > { %1209 = vmatpush.msra.mxu0 %v477_v12  ;;  %1228 = vmatpush.msra.mxu1 %v579_v13  ;;  %v682_v11 = vld [vmem:[%s2591_s9 + $0x6b8] sm:$0xff]  ;;  %v784_v12 = vld [vmem:[%s2591_s9 + $0x9e8] sm:$0xff] }
  0xed   : > { %1249 = vmatpush.msra.mxu2 %v669_v14  ;;  %1268 = vmatpush.msra.mxu3 %v771_v15  ;;  %v484_v13 = vld [vmem:[%s2591_s9 + $0x88] sm:$0xff]  ;;  %v586_v14 = vld [vmem:[%s2591_s9 + $0x3b8] sm:$0xff] }
  0xee   : > { %1210 = vmatpush.msra.mxu0 %v471_v16  ;;  %1229 = vmatpush.msra.mxu1 %v573_v17  ;;  %v676_v15 = vld [vmem:[%s2591_s9 + $0x688] sm:$0xff]  ;;  %v778_v16 = vld [vmem:[%s2591_s9 + $0x9b8] sm:$0xff] }
  0xef   : > { %1250 = vmatpush.msra.mxu2 %v663_v18  ;;  %1269 = vmatpush.msra.mxu3 %v765_v19  ;;  %v478_v17 = vld [vmem:[%s2591_s9 + $0x58] sm:$0xff]  ;;  %v580_v18 = vld [vmem:[%s2591_s9 + $0x388] sm:$0xff] }
  0xf0   : > { %1131 = vmatmul.f32.vlgmr.msrb.gmra.mxu0 %v2745_v47  ;;  %1171 = vmatmul.f32.vlgmr.msrb.gmra.mxu2 %v2747_v48  ;;  %v670_v19 = vld [vmem:[%s2591_s9 + $0x658] sm:$0xff] }
  0xf1   : > { %1275 = vmatpush.msrb.mxu0 %v562_v20  ;;  %1315 = vmatpush.msrb.mxu2 %v754_v21  ;;  %v772_v20 = vld [vmem:[%s2591_s9 + $0x988] sm:$0xff] }
  0xf2   : > { %1230 = vmatpush.msra.mxu1 %v567_v22  ;;  %1270 = vmatpush.msra.mxu3 %v759_v23  ;;  %v472_v21 = vld [vmem:[%s2591_s9 + $0x28] sm:$0xff]  ;;  %v574_v22 = vld [vmem:[%s2591_s9 + $0x358] sm:$0xff] }
  0xf3   : > { %1151 = vmatmul.f32.vlgmr.msrb.gmra.mxu1 %v2749_v49  ;;  %1191 = vmatmul.f32.vlgmr.msrb.gmra.mxu3 %v2751_v50  ;;  %v664_v23 = vld [vmem:[%s2591_s9 + $0x628] sm:$0xff] }
  0xf4   : > { %1276 = vmatpush.msrb.mxu0 %v556_v24  ;;  %1295 = vmatpush.msrb.mxu1 %v658_v25  ;;  %v766_v24 = vld [vmem:[%s2591_s9 + $0x958] sm:$0xff]  ;;  %v1445_v25 = vld [vmem:[%s2599_s29 + $0x2d0] sm:$0xff] }
  0xf5   : > { %1316 = vmatpush.msrb.mxu2 %v748_v26  ;;  %1335 = vmatpush.msrb.mxu3 %v850_v27  ;;  %v1446_v26 = vld [vmem:[%s2599_s29 + $0x2d8] sm:$0xff]  ;;  %v568_v27 = vld [vmem:[%s2591_s9 + $0x328] sm:$0xff] }
  0xf6   : > { %1277 = vmatpush.msrb.mxu0 %v550_v28  ;;  %1296 = vmatpush.msrb.mxu1 %v652_v29  ;;  %v760_v28 = vld [vmem:[%s2591_s9 + $0x928] sm:$0xff]  ;;  %v1439_v29 = vld [vmem:[%s2599_s29 + $0x2a0] sm:$0xff] }
  0xf7   : > { %1317 = vmatpush.msrb.mxu2 %v742_v30  ;;  %1336 = vmatpush.msrb.mxu3 %v844_v31  ;;  %v1541_v30 = vld [vmem:[%s2599_s29 + $0x5d0] sm:$0xff]  ;;  %v1440_v31 = vld [vmem:[%s2599_s29 + $0x2a8] sm:$0xff] }
  0xf8   : > { %1278 = vmatpush.msrb.mxu0 %v544_v32  ;;  %1297 = vmatpush.msrb.mxu1 %v646_v33  ;;  %v1542_v32 = vld [vmem:[%s2599_s29 + $0x5d8] sm:$0xff]  ;;  %v1433_v33 = vld [vmem:[%s2599_s29 + $0x270] sm:$0xff] }
  0xf9   : > { %1318 = vmatpush.msrb.mxu2 %v736_v34  ;;  %1337 = vmatpush.msrb.mxu3 %v838_v35  ;;  %v1535_v34 = vld [vmem:[%s2599_s29 + $0x5a0] sm:$0xff]  ;;  %v1434_v35 = vld [vmem:[%s2599_s29 + $0x278] sm:$0xff] }
  0xfa   : > { %1279 = vmatpush.msrb.mxu0 %v538_v36  ;;  %1298 = vmatpush.msrb.mxu1 %v640_v37  ;;  %v1536_v36 = vld [vmem:[%s2599_s29 + $0x5a8] sm:$0xff]  ;;  %v1427_v37 = vld [vmem:[%s2599_s29 + $0x240] sm:$0xff] }
  0xfb   : > { %1319 = vmatpush.msrb.mxu2 %v730_v38  ;;  %1338 = vmatpush.msrb.mxu3 %v832_v39  ;;  %v1529_v38 = vld [vmem:[%s2599_s29 + $0x570] sm:$0xff]  ;;  %v1428_v39 = vld [vmem:[%s2599_s29 + $0x248] sm:$0xff] }
  0xfc   : > { %1280 = vmatpush.msrb.mxu0 %v532_v40  ;;  %1299 = vmatpush.msrb.mxu1 %v634_v41  ;;  %v1530_v40 = vld [vmem:[%s2599_s29 + $0x578] sm:$0xff]  ;;  %v3064_v41 = vld.sshfl [vmem:[#allocation1] sm:$0xff pattern:$0x73625140] }
  0xfd   : > { %1320 = vmatpush.msrb.mxu2 %v724_v42  ;;  %1339 = vmatpush.msrb.mxu3 %v826_v43  ;;  %v3066_v42 = vld.sshfl [vmem:[#allocation1 + $0x8] sm:$0xff pattern:$0x73625140]  ;;  %v1421_v43 = vld [vmem:[%s2599_s29 + $0x210] sm:$0xff] }
  0xfe   : > { %1281 = vmatpush.msrb.mxu0 %v526_v44  ;;  %1300 = vmatpush.msrb.mxu1 %v628_v45  ;;  %v1523_v44 = vld [vmem:[%s2599_s29 + $0x540] sm:$0xff]  ;;  %1897 = vst [vmem:[#allocation1] ss:$4 sm:$0xff] %v2743_v46  ;;  %v1422_v45 = vld [vmem:[%s2599_s29 + $0x218] sm:$0xff]  ;;  %v1409_v46 = vld [vmem:[%s2599_s29 + $0x1b0] sm:$0xff] }
  0xff   : > { %1321 = vmatpush.msrb.mxu2 %v718_v51  ;;  %1340 = vmatpush.msrb.mxu3 %v820_v52  ;;  %v1524_v51 = vld [vmem:[%s2599_s29 + $0x548] sm:$0xff]  ;;  %v1415_v52 = vld [vmem:[%s2599_s29 + $0x1e0] sm:$0xff] }
 0x100   : > { %1282 = vmatpush.msrb.mxu0 %v520_v53  ;;  %1301 = vmatpush.msrb.mxu1 %v622_v54  ;;  %v1517_v53 = vld [vmem:[%s2599_s29 + $0x510] sm:$0xff]  ;;  %v1416_v54 = vld [vmem:[%s2599_s29 + $0x1e8] sm:$0xff] }
 0x101   : > { %1322 = vmatpush.msrb.mxu2 %v712_v55  ;;  %1341 = vmatpush.msrb.mxu3 %v814_v56  ;;  %v1518_v55 = vld [vmem:[%s2599_s29 + $0x518] sm:$0xff]  ;;  %v1511_v56 = vld [vmem:[%s2599_s29 + $0x4e0] sm:$0xff] }
 0x102   : > { %1283 = vmatpush.msrb.mxu0 %v514_v57  ;;  %1302 = vmatpush.msrb.mxu1 %v616_v58  ;;  %v1410_v57 = vld [vmem:[%s2599_s29 + $0x1b8] sm:$0xff]  ;;  %v1512_v58 = vld [vmem:[%s2599_s29 + $0x4e8] sm:$0xff] }
 0x103   : > { %1323 = vmatpush.msrb.mxu2 %v706_v59  ;;  %1342 = vmatpush.msrb.mxu3 %v808_v60  ;;  %v1403_v59 = vld [vmem:[%s2599_s29 + $0x180] sm:$0xff]  ;;  %v1505_v60 = vld [vmem:[%s2599_s29 + $0x4b0] sm:$0xff] }
 0x104   : > { %1284 = vmatpush.msrb.mxu0 %v508_v61  ;;  %1303 = vmatpush.msrb.mxu1 %v610_v62  ;;  %v1404_v61 = vld [vmem:[%s2599_s29 + $0x188] sm:$0xff]  ;;  %v1506_v62 = vld [vmem:[%s2599_s29 + $0x4b8] sm:$0xff] }
 0x105   : > { %1324 = vmatpush.msrb.mxu2 %v700_v63  ;;  %1343 = vmatpush.msrb.mxu3 %v802_v0  ;;  %v1397_v63 = vld [vmem:[%s2599_s29 + $0x150] sm:$0xff]  ;;  %v1499_v0 = vld [vmem:[%s2599_s29 + $0x480] sm:$0xff] }
 0x106   : > { %1285 = vmatpush.msrb.mxu0 %v502_v1  ;;  %1304 = vmatpush.msrb.mxu1 %v604_v2  ;;  %v1398_v1 = vld [vmem:[%s2599_s29 + $0x158] sm:$0xff]  ;;  %v1500_v2 = vld [vmem:[%s2599_s29 + $0x488] sm:$0xff] }
 0x107   : > { %1325 = vmatpush.msrb.mxu2 %v694_v3  ;;  %1344 = vmatpush.msrb.mxu3 %v796_v4  ;;  %v1391_v3 = vld [vmem:[%s2599_s29 + $0x120] sm:$0xff]  ;;  %v1493_v4 = vld [vmem:[%s2599_s29 + $0x450] sm:$0xff] }
 0x108   : > { %1286 = vmatpush.msrb.mxu0 %v496_v5  ;;  %1305 = vmatpush.msrb.mxu1 %v598_v6  ;;  %v1392_v5 = vld [vmem:[%s2599_s29 + $0x128] sm:$0xff]  ;;  %v1494_v6 = vld [vmem:[%s2599_s29 + $0x458] sm:$0xff] }
 0x109   : > { %1326 = vmatpush.msrb.mxu2 %v688_v7  ;;  %1345 = vmatpush.msrb.mxu3 %v790_v8  ;;  %v1385_v7 = vld [vmem:[%s2599_s29 + $0xf0] sm:$0xff]  ;;  %v1487_v8 = vld [vmem:[%s2599_s29 + $0x420] sm:$0xff] }
 0x10a   : > { %1287 = vmatpush.msrb.mxu0 %v490_v9  ;;  %1306 = vmatpush.msrb.mxu1 %v592_v10  ;;  %v1386_v9 = vld [vmem:[%s2599_s29 + $0xf8] sm:$0xff]  ;;  %v1488_v10 = vld [vmem:[%s2599_s29 + $0x428] sm:$0xff] }
 0x10b   : > { %1327 = vmatpush.msrb.mxu2 %v682_v11  ;;  %1346 = vmatpush.msrb.mxu3 %v784_v12  ;;  %v1379_v11 = vld [vmem:[%s2599_s29 + $0xc0] sm:$0xff]  ;;  %v1481_v12 = vld [vmem:[%s2599_s29 + $0x3f0] sm:$0xff] }
 0x10c   : > { %1288 = vmatpush.msrb.mxu0 %v484_v13  ;;  %1307 = vmatpush.msrb.mxu1 %v586_v14  ;;  %v1380_v13 = vld [vmem:[%s2599_s29 + $0xc8] sm:$0xff]  ;;  %v1482_v14 = vld [vmem:[%s2599_s29 + $0x3f8] sm:$0xff] }
 0x10d   : > { %1328 = vmatpush.msrb.mxu2 %v676_v15  ;;  %1347 = vmatpush.msrb.mxu3 %v778_v16  ;;  %v1373_v15 = vld [vmem:[%s2599_s29 + $0x90] sm:$0xff]  ;;  %v1475_v16 = vld [vmem:[%s2599_s29 + $0x3c0] sm:$0xff] }
 0x10e   : > { %1289 = vmatpush.msrb.mxu0 %v478_v17  ;;  %1308 = vmatpush.msrb.mxu1 %v580_v18  ;;  %v1374_v17 = vld [vmem:[%s2599_s29 + $0x98] sm:$0xff]  ;;  %v1476_v18 = vld [vmem:[%s2599_s29 + $0x3c8] sm:$0xff] }
 0x10f   : > { %1329 = vmatpush.msrb.mxu2 %v670_v19  ;;  %1348 = vmatpush.msrb.mxu3 %v772_v20  ;;  %v1367_v19 = vld [vmem:[%s2599_s29 + $0x60] sm:$0xff]  ;;  %v1469_v20 = vld [vmem:[%s2599_s29 + $0x390] sm:$0xff] }
 0x110   : > { %1290 = vmatpush.msrb.mxu0 %v472_v21  ;;  %1309 = vmatpush.msrb.mxu1 %v574_v22  ;;  %v1368_v21 = vld [vmem:[%s2599_s29 + $0x68] sm:$0xff]  ;;  %v1470_v22 = vld [vmem:[%s2599_s29 + $0x398] sm:$0xff] }
 0x111   : > { %1330 = vmatpush.msrb.mxu2 %v664_v23  ;;  %1349 = vmatpush.msrb.mxu3 %v766_v24  ;;  %v1463_v23 = vld [vmem:[%s2599_s29 + $0x360] sm:$0xff]  ;;  %v1464_v24 = vld [vmem:[%s2599_s29 + $0x368] sm:$0xff] }
 0x112   : > { %1211 = vmatmul.f32.vlgmr.msra.gmra.mxu0 %v2745_v47  ;;  %1251 = vmatmul.f32.vlgmr.msra.gmra.mxu2 %v2747_v48 }
 0x113   : > { %1567 = vmatpush.msra.mxu0 %v1445_v25  ;;  %1607 = vmatpush.msra.mxu2 %v1446_v26  ;;  %v1355_v25 = vld [vmem:[%s2599_s29] sm:$0xff]  ;;  %v1457_v26 = vld [vmem:[%s2599_s29 + $0x330] sm:$0xff] }
 0x114   : > { %1310 = vmatpush.msrb.mxu1 %v568_v27  ;;  %1350 = vmatpush.msrb.mxu3 %v760_v28  ;;  %v1356_v27 = vld [vmem:[%s2599_s29 + $0x8] sm:$0xff] }
 0x115   : > { %1231 = vmatmul.f32.vlgmr.msra.gmra.mxu1 %v2749_v49  ;;  %1271 = vmatmul.f32.vlgmr.msra.gmra.mxu3 %v2751_v50  ;;  %v1448_v28 = vld [vmem:[%s2599_s29 + $0x2e8] sm:$0xff] }
 0x116   : > { %1568 = vmatpush.msra.mxu0 %v1439_v29  ;;  %1587 = vmatpush.msra.mxu1 %v1541_v30  ;;  %v1451_v29 = vld [vmem:[%s2599_s29 + $0x300] sm:$0xff]  ;;  %v1452_v30 = vld [vmem:[%s2599_s29 + $0x308] sm:$0xff] }
 0x117   : > { %1608 = vmatpush.msra.mxu2 %v1440_v31  ;;  %1627 = vmatpush.msra.mxu3 %v1542_v32  ;;  %v1441_v31 = vld [vmem:[%s2599_s29 + $0x2b0] sm:$0xff]  ;;  %v1543_v32 = vld [vmem:[%s2599_s29 + $0x5e0] sm:$0xff] }
 0x118   : > { %1569 = vmatpush.msra.mxu0 %v1433_v33  ;;  %1588 = vmatpush.msra.mxu1 %v1535_v34  ;;  %v1442_v33 = vld [vmem:[%s2599_s29 + $0x2b8] sm:$0xff]  ;;  %v1544_v34 = vld [vmem:[%s2599_s29 + $0x5e8] sm:$0xff] }
 0x119   : > { %1609 = vmatpush.msra.mxu2 %v1434_v35  ;;  %1628 = vmatpush.msra.mxu3 %v1536_v36  ;;  %v1435_v35 = vld [vmem:[%s2599_s29 + $0x280] sm:$0xff]  ;;  %v1537_v36 = vld [vmem:[%s2599_s29 + $0x5b0] sm:$0xff] }
 0x11a   : > { %1570 = vmatpush.msra.mxu0 %v1427_v37  ;;  %1589 = vmatpush.msra.mxu1 %v1529_v38  ;;  %v1436_v37 = vld [vmem:[%s2599_s29 + $0x288] sm:$0xff]  ;;  %v1538_v38 = vld [vmem:[%s2599_s29 + $0x5b8] sm:$0xff] }
 0x11b   : > { %1610 = vmatpush.msra.mxu2 %v1428_v39  ;;  %1629 = vmatpush.msra.mxu3 %v1530_v40  ;;  %v1429_v39 = vld [vmem:[%s2599_s29 + $0x250] sm:$0xff]  ;;  %v1531_v40 = vld [vmem:[%s2599_s29 + $0x580] sm:$0xff] }
 0x11c   : > { %1571 = vmatpush.msra.mxu0 %v1421_v43  ;;  %1590 = vmatpush.msra.mxu1 %v1523_v44  ;;  %v1430_v43 = vld [vmem:[%s2599_s29 + $0x258] sm:$0xff]  ;;  %v1532_v44 = vld [vmem:[%s2599_s29 + $0x588] sm:$0xff] }
 0x11d   : > { %1611 = vmatpush.msra.mxu2 %v1422_v45  ;;  %1630 = vmatpush.msra.mxu3 %v1524_v51  ;;  %v1423_v45 = vld [vmem:[%s2599_s29 + $0x220] sm:$0xff]  ;;  %v1525_v51 = vld [vmem:[%s2599_s29 + $0x550] sm:$0xff] }
 0x11e   : > { %1572 = vmatpush.msra.mxu0 %v1415_v52  ;;  %1591 = vmatpush.msra.mxu1 %v1517_v53  ;;  %v1424_v52 = vld [vmem:[%s2599_s29 + $0x228] sm:$0xff]  ;;  %v1526_v53 = vld [vmem:[%s2599_s29 + $0x558] sm:$0xff] }
 0x11f   : > { %1612 = vmatpush.msra.mxu2 %v1416_v54  ;;  %1631 = vmatpush.msra.mxu3 %v1518_v55  ;;  %v1417_v54 = vld [vmem:[%s2599_s29 + $0x1f0] sm:$0xff]  ;;  %v1519_v55 = vld [vmem:[%s2599_s29 + $0x520] sm:$0xff] }
 0x120   : > { %1573 = vmatpush.msra.mxu0 %v1409_v46  ;;  %1592 = vmatpush.msra.mxu1 %v1511_v56  ;;  %v1418_v46 = vld [vmem:[%s2599_s29 + $0x1f8] sm:$0xff]  ;;  %v1520_v56 = vld [vmem:[%s2599_s29 + $0x528] sm:$0xff] }
 0x121   : > { %1613 = vmatpush.msra.mxu2 %v1410_v57  ;;  %1632 = vmatpush.msra.mxu3 %v1512_v58  ;;  %v1411_v57 = vld [vmem:[%s2599_s29 + $0x1c0] sm:$0xff]  ;;  %v1513_v58 = vld [vmem:[%s2599_s29 + $0x4f0] sm:$0xff] }
 0x122   : > { %1574 = vmatpush.msra.mxu0 %v1403_v59  ;;  %1593 = vmatpush.msra.mxu1 %v1505_v60  ;;  %v1412_v59 = vld [vmem:[%s2599_s29 + $0x1c8] sm:$0xff]  ;;  %v1514_v60 = vld [vmem:[%s2599_s29 + $0x4f8] sm:$0xff] }
 0x123   : > { %1614 = vmatpush.msra.mxu2 %v1404_v61  ;;  %1633 = vmatpush.msra.mxu3 %v1506_v62  ;;  %v1405_v61 = vld [vmem:[%s2599_s29 + $0x190] sm:$0xff]  ;;  %v1507_v62 = vld [vmem:[%s2599_s29 + $0x4c0] sm:$0xff] }
 0x124   : > { %1575 = vmatpush.msra.mxu0 %v1397_v63  ;;  %1594 = vmatpush.msra.mxu1 %v1499_v0  ;;  %v1406_v63 = vld [vmem:[%s2599_s29 + $0x198] sm:$0xff]  ;;  %v1508_v0 = vld [vmem:[%s2599_s29 + $0x4c8] sm:$0xff] }
 0x125   : > { %1615 = vmatpush.msra.mxu2 %v1398_v1  ;;  %1634 = vmatpush.msra.mxu3 %v1500_v2  ;;  %v1399_v1 = vld [vmem:[%s2599_s29 + $0x160] sm:$0xff]  ;;  %v1501_v2 = vld [vmem:[%s2599_s29 + $0x490] sm:$0xff] }
 0x126   : > { %1576 = vmatpush.msra.mxu0 %v1391_v3  ;;  %1595 = vmatpush.msra.mxu1 %v1493_v4  ;;  %v1400_v3 = vld [vmem:[%s2599_s29 + $0x168] sm:$0xff]  ;;  %v1502_v4 = vld [vmem:[%s2599_s29 + $0x498] sm:$0xff] }
 0x127   : > { %1616 = vmatpush.msra.mxu2 %v1392_v5  ;;  %1635 = vmatpush.msra.mxu3 %v1494_v6  ;;  %v1393_v5 = vld [vmem:[%s2599_s29 + $0x130] sm:$0xff]  ;;  %v1495_v6 = vld [vmem:[%s2599_s29 + $0x460] sm:$0xff] }
 0x128   : > { %1577 = vmatpush.msra.mxu0 %v1385_v7  ;;  %1596 = vmatpush.msra.mxu1 %v1487_v8  ;;  %v1394_v7 = vld [vmem:[%s2599_s29 + $0x138] sm:$0xff]  ;;  %v1496_v8 = vld [vmem:[%s2599_s29 + $0x468] sm:$0xff] }
 0x129   : > { %1617 = vmatpush.msra.mxu2 %v1386_v9  ;;  %1636 = vmatpush.msra.mxu3 %v1488_v10  ;;  %v1387_v9 = vld [vmem:[%s2599_s29 + $0x100] sm:$0xff]  ;;  %v1489_v10 = vld [vmem:[%s2599_s29 + $0x430] sm:$0xff] }
 0x12a   : > { %1578 = vmatpush.msra.mxu0 %v1379_v11  ;;  %1597 = vmatpush.msra.mxu1 %v1481_v12  ;;  %v1388_v11 = vld [vmem:[%s2599_s29 + $0x108] sm:$0xff]  ;;  %v1490_v12 = vld [vmem:[%s2599_s29 + $0x438] sm:$0xff] }
 0x12b   : > { %1618 = vmatpush.msra.mxu2 %v1380_v13  ;;  %1637 = vmatpush.msra.mxu3 %v1482_v14  ;;  %v1381_v13 = vld [vmem:[%s2599_s29 + $0xd0] sm:$0xff]  ;;  %v1483_v14 = vld [vmem:[%s2599_s29 + $0x400] sm:$0xff] }
 0x12c   : > { %1291 = vmatmul.f32.vlgmr.msrb.gmra.mxu0 %v2745_v47  ;;  %1331 = vmatmul.f32.vlgmr.msrb.gmra.mxu2 %v2747_v48  ;;  %v1361_v47 = vld [vmem:[%s2599_s29 + $0x30] sm:$0xff]  ;;  %v1362_v48 = vld [vmem:[%s2599_s29 + $0x38] sm:$0xff] }
 0x12d   : > { %1579 = vmatpush.msra.mxu0 %v1373_v15  ;;  %1598 = vmatpush.msra.mxu1 %v1475_v16  ;;  %v1382_v15 = vld [vmem:[%s2599_s29 + $0xd8] sm:$0xff]  ;;  %v1484_v16 = vld [vmem:[%s2599_s29 + $0x408] sm:$0xff] }
 0x12e   : > { %1619 = vmatpush.msra.mxu2 %v1374_v17  ;;  %1638 = vmatpush.msra.mxu3 %v1476_v18  ;;  %v1375_v17 = vld [vmem:[%s2599_s29 + $0xa0] sm:$0xff]  ;;  %v1477_v18 = vld [vmem:[%s2599_s29 + $0x3d0] sm:$0xff] }
 0x12f   : > { %1311 = vmatmul.f32.vlgmr.msrb.gmra.mxu1 %v2749_v49  ;;  %1351 = vmatmul.f32.vlgmr.msrb.gmra.mxu3 %v2751_v50  ;;  %v1458_v49 = vld [vmem:[%s2599_s29 + $0x338] sm:$0xff]  ;;  %v1447_v50 = vld [vmem:[%s2599_s29 + $0x2e0] sm:$0xff] }
 0x130   : > { %1580 = vmatpush.msra.mxu0 %v1367_v19  ;;  %1599 = vmatpush.msra.mxu1 %v1469_v20  ;;  %v1376_v19 = vld [vmem:[%s2599_s29 + $0xa8] sm:$0xff]  ;;  %v1478_v20 = vld [vmem:[%s2599_s29 + $0x3d8] sm:$0xff] }
 0x131   : > { %1620 = vmatpush.msra.mxu2 %v1368_v21  ;;  %1639 = vmatpush.msra.mxu3 %v1470_v22  ;;  %v1369_v21 = vld [vmem:[%s2599_s29 + $0x70] sm:$0xff]  ;;  %v1471_v22 = vld [vmem:[%s2599_s29 + $0x3a0] sm:$0xff] }
 0x132   : > { %1581 = vmatpush.msra.mxu0 %v1361_v47  ;;  %1600 = vmatpush.msra.mxu1 %v1463_v23  ;;  %v1370_v47 = vld [vmem:[%s2599_s29 + $0x78] sm:$0xff]  ;;  %v1472_v23 = vld [vmem:[%s2599_s29 + $0x3a8] sm:$0xff] }
 0x133   : > { %1621 = vmatpush.msra.mxu2 %v1362_v48  ;;  %1640 = vmatpush.msra.mxu3 %v1464_v24  ;;  %v1363_v48 = vld [vmem:[%s2599_s29 + $0x40] sm:$0xff]  ;;  %v1465_v24 = vld [vmem:[%s2599_s29 + $0x370] sm:$0xff] }
 0x134   : > { %1582 = vmatpush.msra.mxu0 %v1355_v25  ;;  %1601 = vmatpush.msra.mxu1 %v1457_v26  ;;  %v1364_v25 = vld [vmem:[%s2599_s29 + $0x48] sm:$0xff]  ;;  %v1466_v26 = vld [vmem:[%s2599_s29 + $0x378] sm:$0xff] }
 0x135   : > { %1622 = vmatpush.msra.mxu2 %v1356_v27  ;;  %1641 = vmatpush.msra.mxu3 %v1458_v49  ;;  %v1357_v27 = vld [vmem:[%s2599_s29 + $0x10] sm:$0xff]  ;;  %v1459_v49 = vld [vmem:[%s2599_s29 + $0x340] sm:$0xff] }
 0x136   : > { %1583 = vmatmul.f32.vlgmr.msra.gmra.mxu0 %v3064_v41  ;;  %1623 = vmatmul.f32.vlgmr.msra.gmra.mxu2 %v3064_v41 }
 0x137   : > { %1647 = vmatpush.msrb.mxu0 %v1447_v50  ;;  %1687 = vmatpush.msrb.mxu2 %v1448_v28  ;;  %v1358_v50 = vld [vmem:[%s2599_s29 + $0x18] sm:$0xff]  ;;  %v1460_v28 = vld [vmem:[%s2599_s29 + $0x348] sm:$0xff] }
 0x138   : > { %1602 = vmatpush.msra.mxu1 %v1451_v29  ;;  %1642 = vmatpush.msra.mxu3 %v1452_v30  ;;  %v1449_v29 = vld [vmem:[%s2599_s29 + $0x2f0] sm:$0xff]  ;;  %v1450_v30 = vld [vmem:[%s2599_s29 + $0x2f8] sm:$0xff] }
 0x139   : > { %1603 = vmatmul.f32.vlgmr.msra.gmra.mxu1 %v3066_v42  ;;  %1643 = vmatmul.f32.vlgmr.msra.gmra.mxu3 %v3066_v42 }
 0x13a   : > { %1648 = vmatpush.msrb.mxu0 %v1441_v31  ;;  %1667 = vmatpush.msrb.mxu1 %v1543_v32  ;;  %v1453_v31 = vld [vmem:[%s2599_s29 + $0x310] sm:$0xff]  ;;  %v1454_v32 = vld [vmem:[%s2599_s29 + $0x318] sm:$0xff] }
 0x13b   : > { %1688 = vmatpush.msrb.mxu2 %v1442_v33  ;;  %1707 = vmatpush.msrb.mxu3 %v1544_v34  ;;  %v1443_v33 = vld [vmem:[%s2599_s29 + $0x2c0] sm:$0xff]  ;;  %v1545_v34 = vld [vmem:[%s2599_s29 + $0x5f0] sm:$0xff] }
 0x13c   : > { %1649 = vmatpush.msrb.mxu0 %v1435_v35  ;;  %1668 = vmatpush.msrb.mxu1 %v1537_v36  ;;  %v1444_v35 = vld [vmem:[%s2599_s29 + $0x2c8] sm:$0xff]  ;;  %v1546_v36 = vld [vmem:[%s2599_s29 + $0x5f8] sm:$0xff] }
 0x13d   : > { %1689 = vmatpush.msrb.mxu2 %v1436_v37  ;;  %1708 = vmatpush.msrb.mxu3 %v1538_v38  ;;  %v1437_v37 = vld [vmem:[%s2599_s29 + $0x290] sm:$0xff]  ;;  %v1539_v38 = vld [vmem:[%s2599_s29 + $0x5c0] sm:$0xff] }
 0x13e   : > { %1650 = vmatpush.msrb.mxu0 %v1429_v39  ;;  %1669 = vmatpush.msrb.mxu1 %v1531_v40  ;;  %v1438_v39 = vld [vmem:[%s2599_s29 + $0x298] sm:$0xff]  ;;  %v1540_v40 = vld [vmem:[%s2599_s29 + $0x5c8] sm:$0xff] }
 0x13f   : > { %1690 = vmatpush.msrb.mxu2 %v1430_v43  ;;  %1709 = vmatpush.msrb.mxu3 %v1532_v44  ;;  %v1431_v43 = vld [vmem:[%s2599_s29 + $0x260] sm:$0xff]  ;;  %v1533_v44 = vld [vmem:[%s2599_s29 + $0x590] sm:$0xff] }
 0x140   : > { %1651 = vmatpush.msrb.mxu0 %v1423_v45  ;;  %1670 = vmatpush.msrb.mxu1 %v1525_v51  ;;  %v1432_v45 = vld [vmem:[%s2599_s29 + $0x268] sm:$0xff]  ;;  %v1534_v51 = vld [vmem:[%s2599_s29 + $0x598] sm:$0xff] }
 0x141   : > { %1691 = vmatpush.msrb.mxu2 %v1424_v52  ;;  %1710 = vmatpush.msrb.mxu3 %v1526_v53  ;;  %v1425_v52 = vld [vmem:[%s2599_s29 + $0x230] sm:$0xff]  ;;  %v1527_v53 = vld [vmem:[%s2599_s29 + $0x560] sm:$0xff] }
 0x142   : > { %1652 = vmatpush.msrb.mxu0 %v1417_v54  ;;  %1671 = vmatpush.msrb.mxu1 %v1519_v55  ;;  %v1426_v54 = vld [vmem:[%s2599_s29 + $0x238] sm:$0xff]  ;;  %v1528_v55 = vld [vmem:[%s2599_s29 + $0x568] sm:$0xff] }
 0x143   : > { %1692 = vmatpush.msrb.mxu2 %v1418_v46  ;;  %1711 = vmatpush.msrb.mxu3 %v1520_v56  ;;  %v1419_v46 = vld [vmem:[%s2599_s29 + $0x200] sm:$0xff]  ;;  %v1521_v56 = vld [vmem:[%s2599_s29 + $0x530] sm:$0xff] }
 0x144   : > { %1653 = vmatpush.msrb.mxu0 %v1411_v57  ;;  %1672 = vmatpush.msrb.mxu1 %v1513_v58  ;;  %v1420_v57 = vld [vmem:[%s2599_s29 + $0x208] sm:$0xff]  ;;  %v1522_v58 = vld [vmem:[%s2599_s29 + $0x538] sm:$0xff] }
 0x145   : > { %1693 = vmatpush.msrb.mxu2 %v1412_v59  ;;  %1712 = vmatpush.msrb.mxu3 %v1514_v60  ;;  %v1413_v59 = vld [vmem:[%s2599_s29 + $0x1d0] sm:$0xff]  ;;  %v1515_v60 = vld [vmem:[%s2599_s29 + $0x500] sm:$0xff] }
 0x146   : > { %1654 = vmatpush.msrb.mxu0 %v1405_v61  ;;  %1673 = vmatpush.msrb.mxu1 %v1507_v62  ;;  %v1414_v61 = vld [vmem:[%s2599_s29 + $0x1d8] sm:$0xff]  ;;  %v1516_v62 = vld [vmem:[%s2599_s29 + $0x508] sm:$0xff] }
 0x147   : > { %1694 = vmatpush.msrb.mxu2 %v1406_v63  ;;  %1713 = vmatpush.msrb.mxu3 %v1508_v0  ;;  %v1407_v63 = vld [vmem:[%s2599_s29 + $0x1a0] sm:$0xff]  ;;  %v1509_v0 = vld [vmem:[%s2599_s29 + $0x4d0] sm:$0xff] }
 0x148   : > { %1655 = vmatpush.msrb.mxu0 %v1399_v1  ;;  %1674 = vmatpush.msrb.mxu1 %v1501_v2  ;;  %v1408_v1 = vld [vmem:[%s2599_s29 + $0x1a8] sm:$0xff]  ;;  %v1510_v2 = vld [vmem:[%s2599_s29 + $0x4d8] sm:$0xff] }
 0x149   : > { %1695 = vmatpush.msrb.mxu2 %v1400_v3  ;;  %1714 = vmatpush.msrb.mxu3 %v1502_v4  ;;  %v1401_v3 = vld [vmem:[%s2599_s29 + $0x170] sm:$0xff]  ;;  %v1503_v4 = vld [vmem:[%s2599_s29 + $0x4a0] sm:$0xff] }
 0x14a   : > { %1656 = vmatpush.msrb.mxu0 %v1393_v5  ;;  %1675 = vmatpush.msrb.mxu1 %v1495_v6  ;;  %v1402_v5 = vld [vmem:[%s2599_s29 + $0x178] sm:$0xff]  ;;  %v1504_v6 = vld [vmem:[%s2599_s29 + $0x4a8] sm:$0xff] }
 0x14b   : > { %1696 = vmatpush.msrb.mxu2 %v1394_v7  ;;  %1715 = vmatpush.msrb.mxu3 %v1496_v8  ;;  %v1395_v7 = vld [vmem:[%s2599_s29 + $0x140] sm:$0xff]  ;;  %v1497_v8 = vld [vmem:[%s2599_s29 + $0x470] sm:$0xff] }
 0x14c   : > { %1657 = vmatpush.msrb.mxu0 %v1387_v9  ;;  %1676 = vmatpush.msrb.mxu1 %v1489_v10  ;;  %v1396_v9 = vld [vmem:[%s2599_s29 + $0x148] sm:$0xff]  ;;  %v1498_v10 = vld [vmem:[%s2599_s29 + $0x478] sm:$0xff] }
 0x14d   : > { %1697 = vmatpush.msrb.mxu2 %v1388_v11  ;;  %1716 = vmatpush.msrb.mxu3 %v1490_v12  ;;  %v1389_v11 = vld [vmem:[%s2599_s29 + $0x110] sm:$0xff]  ;;  %v1491_v12 = vld [vmem:[%s2599_s29 + $0x440] sm:$0xff] }
 0x14e   : > { %1658 = vmatpush.msrb.mxu0 %v1381_v13  ;;  %1677 = vmatpush.msrb.mxu1 %v1483_v14  ;;  %v1390_v13 = vld [vmem:[%s2599_s29 + $0x118] sm:$0xff]  ;;  %v1492_v14 = vld [vmem:[%s2599_s29 + $0x448] sm:$0xff] }
 0x14f   : > { %1698 = vmatpush.msrb.mxu2 %v1382_v15  ;;  %1717 = vmatpush.msrb.mxu3 %v1484_v16  ;;  %v1383_v15 = vld [vmem:[%s2599_s29 + $0xe0] sm:$0xff]  ;;  %v1485_v16 = vld [vmem:[%s2599_s29 + $0x410] sm:$0xff] }
 0x150   : > { %1659 = vmatpush.msrb.mxu0 %v1375_v17  ;;  %1678 = vmatpush.msrb.mxu1 %v1477_v18  ;;  %v1384_v17 = vld [vmem:[%s2599_s29 + $0xe8] sm:$0xff]  ;;  %v1486_v18 = vld [vmem:[%s2599_s29 + $0x418] sm:$0xff] }
 0x151   : > { %1699 = vmatpush.msrb.mxu2 %v1376_v19  ;;  %1718 = vmatpush.msrb.mxu3 %v1478_v20  ;;  %v1377_v19 = vld [vmem:[%s2599_s29 + $0xb0] sm:$0xff]  ;;  %v1479_v20 = vld [vmem:[%s2599_s29 + $0x3e0] sm:$0xff] }
 0x152   : > { %1660 = vmatpush.msrb.mxu0 %v1369_v21  ;;  %1679 = vmatpush.msrb.mxu1 %v1471_v22  ;;  %v1378_v21 = vld [vmem:[%s2599_s29 + $0xb8] sm:$0xff]  ;;  %v1480_v22 = vld [vmem:[%s2599_s29 + $0x3e8] sm:$0xff] }
 0x153   : > { %1700 = vmatpush.msrb.mxu2 %v1370_v47  ;;  %1719 = vmatpush.msrb.mxu3 %v1472_v23  ;;  %v1371_v47 = vld [vmem:[%s2599_s29 + $0x80] sm:$0xff]  ;;  %v1473_v23 = vld [vmem:[%s2599_s29 + $0x3b0] sm:$0xff] }
 0x154   : > { %1661 = vmatpush.msrb.mxu0 %v1363_v48  ;;  %1680 = vmatpush.msrb.mxu1 %v1465_v24  ;;  %v1372_v48 = vld [vmem:[%s2599_s29 + $0x88] sm:$0xff]  ;;  %v1474_v24 = vld [vmem:[%s2599_s29 + $0x3b8] sm:$0xff] }
 0x155   : > { %1701 = vmatpush.msrb.mxu2 %v1364_v25  ;;  %1720 = vmatpush.msrb.mxu3 %v1466_v26  ;;  %v1365_v25 = vld [vmem:[%s2599_s29 + $0x50] sm:$0xff]  ;;  %v1467_v26 = vld [vmem:[%s2599_s29 + $0x380] sm:$0xff] }
 0x156   : > { %1662 = vmatpush.msrb.mxu0 %v1357_v27  ;;  %1681 = vmatpush.msrb.mxu1 %v1459_v49  ;;  %v1366_v27 = vld [vmem:[%s2599_s29 + $0x58] sm:$0xff]  ;;  %v1468_v49 = vld [vmem:[%s2599_s29 + $0x388] sm:$0xff] }
 0x157   : > { %1702 = vmatpush.msrb.mxu2 %v1358_v50  ;;  %1721 = vmatpush.msrb.mxu3 %v1460_v28  ;;  %v1359_v50 = vld [vmem:[%s2599_s29 + $0x20] sm:$0xff]  ;;  %v1461_v28 = vld [vmem:[%s2599_s29 + $0x350] sm:$0xff] }
 0x158   : > { %1663 = vmatmul.f32.vlgmr.msrb.gmra.mxu0 %v3064_v41  ;;  %1703 = vmatmul.f32.vlgmr.msrb.gmra.mxu2 %v3064_v41 }
 0x159   : > { %1727 = vmatpush.msra.mxu0 %v1449_v29  ;;  %1767 = vmatpush.msra.mxu2 %v1450_v30  ;;  %v1360_v29 = vld [vmem:[%s2599_s29 + $0x28] sm:$0xff]  ;;  %v1462_v30 = vld [vmem:[%s2599_s29 + $0x358] sm:$0xff] }
 0x15a   : > { %1682 = vmatpush.msrb.mxu1 %v1453_v31  ;;  %1722 = vmatpush.msrb.mxu3 %v1454_v32  ;;  %v1455_v31 = vld [vmem:[%s2599_s29 + $0x320] sm:$0xff]  ;;  %v1456_v32 = vld [vmem:[%s2599_s29 + $0x328] sm:$0xff] }
 0x15b   : > { %1683 = vmatmul.f32.vlgmr.msrb.gmra.mxu1 %v3066_v42  ;;  %1723 = vmatmul.f32.vlgmr.msrb.gmra.mxu3 %v3066_v42 }
 0x15c   : > { %1728 = vmatpush.msra.mxu0 %v1443_v33  ;;  %1747 = vmatpush.msra.mxu1 %v1545_v34  ;;  %v892_v33 = vpop.f32.mrf.mxu0  ;;  %v912_v34 = vpop.f32.mrf.mxu1 }
 0x15d   : > { %1768 = vmatpush.msra.mxu2 %v1444_v35  ;;  %1787 = vmatpush.msra.mxu3 %v1546_v36  ;;  %v932_v35 = vpop.f32.mrf.mxu2 }
 0x15e   : > { %1729 = vmatpush.msra.mxu0 %v1437_v37  ;;  %1748 = vmatpush.msra.mxu1 %v1539_v38  ;;  %v952_v37 = vpop.f32.mrf.mxu3 }
 0x15f   : > { %1769 = vmatpush.msra.mxu2 %v1438_v39  ;;  %1788 = vmatpush.msra.mxu3 %v1540_v40 }
 0x160   : > { %1730 = vmatpush.msra.mxu0 %v1431_v43  ;;  %1749 = vmatpush.msra.mxu1 %v1533_v44 }
 0x161   : > { %1770 = vmatpush.msra.mxu2 %v1432_v45  ;;  %1789 = vmatpush.msra.mxu3 %v1534_v51 }
 0x162   : > { %1731 = vmatpush.msra.mxu0 %v1425_v52  ;;  %1750 = vmatpush.msra.mxu1 %v1527_v53 }
 0x163   : > { %1771 = vmatpush.msra.mxu2 %v1426_v54  ;;  %1790 = vmatpush.msra.mxu3 %v1528_v55 }
 0x164   : > { %1732 = vmatpush.msra.mxu0 %v1419_v46  ;;  %1751 = vmatpush.msra.mxu1 %v1521_v56  ;;  %v972_v36 = vpop.f32.mrf.mxu0  ;;  %v992_v38 = vpop.f32.mrf.mxu1  ;;  %v3270_v56 = vld [vmem:[%s2605_s17] sm:$0x3f] }
 0x165   : > { %1772 = vmatpush.msra.mxu2 %v1420_v57  ;;  %1791 = vmatpush.msra.mxu3 %v1522_v58  ;;  %v1012_v39 = vpop.f32.mrf.mxu2 }
 0x166   : > { %1733 = vmatpush.msra.mxu0 %v1413_v59  ;;  %1752 = vmatpush.msra.mxu1 %v1515_v60  ;;  %v1032_v43 = vpop.f32.mrf.mxu3  ;;  %v853_v59 = vperm.slane %v3270_v56, 0 }
 0x167   : > { %1773 = vmatpush.msra.mxu2 %v1414_v61  ;;  %1792 = vmatpush.msra.mxu3 %v1516_v62  ;;  %v3282_v62 = vld [vmem:[%s2607_s11] sm:$0x3f] }
 0x168   : > { %1734 = vmatpush.msra.mxu0 %v1407_v63  ;;  %1753 = vmatpush.msra.mxu1 %v1509_v0  ;;  %v893_v63 = vadd.f32 %v892_v33, %v853_v59  ;;  %v854_v0 = vperm.slane %v3270_v56, 1  ;;  %v1552_v33 = vperm.slane %v3282_v62, 3 }
 0x169   : > { %1774 = vmatpush.msra.mxu2 %v1408_v1  ;;  %1793 = vmatpush.msra.mxu3 %v1510_v2  ;;  %v1549_v1 = vperm.slane %v3282_v62, 0 }
 0x16a   : > { %1735 = vmatpush.msra.mxu0 %v1401_v3  ;;  %1754 = vmatpush.msra.mxu1 %v1503_v4  ;;  %v913_v4 = vadd.f32 %v912_v34, %v893_v63 }
 0x16b   : > { %1775 = vmatpush.msra.mxu2 %v1402_v5  ;;  %1794 = vmatpush.msra.mxu3 %v1504_v6  ;;  %v973_v5 = vadd.f32 %v972_v36, %v854_v0 }
 0x16c   : > { %1736 = vmatpush.msra.mxu0 %v1395_v7  ;;  %1755 = vmatpush.msra.mxu1 %v1497_v8  ;;  %v1052_v40 = vpop.f32.mrf.mxu0  ;;  %v1072_v44 = vpop.f32.mrf.mxu1  ;;  %v933_v8 = vadd.f32 %v932_v35, %v913_v4 }
 0x16d   : > { %1776 = vmatpush.msra.mxu2 %v1396_v9  ;;  %1795 = vmatpush.msra.mxu3 %v1498_v10  ;;  %v1092_v45 = vpop.f32.mrf.mxu2  ;;  %v1550_v9 = vperm.slane %v3282_v62, 1 }
 0x16e   : > { %1737 = vmatpush.msra.mxu0 %v1389_v11  ;;  %1756 = vmatpush.msra.mxu1 %v1491_v12  ;;  %v1112_v51 = vpop.f32.mrf.mxu3  ;;  %v993_v11 = vadd.f32 %v992_v38, %v973_v5 }
 0x16f   : > { %1777 = vmatpush.msra.mxu2 %v1390_v13  ;;  %1796 = vmatpush.msra.mxu3 %v1492_v14  ;;  %v953_v13 = vadd.f32 %v952_v37, %v933_v8 }
 0x170   : > { %1738 = vmatpush.msra.mxu0 %v1383_v15  ;;  %1757 = vmatpush.msra.mxu1 %v1485_v16  ;;  %v1013_v16 = vadd.f32 %v1012_v39, %v993_v11  ;;  %v858_v11 = vperm.slane %v3270_v56, 5 }
 0x171   : > { %1778 = vmatpush.msra.mxu2 %v1384_v17  ;;  %1797 = vmatpush.msra.mxu3 %v1486_v18 }
 0x172   : > { %1739 = vmatpush.msra.mxu0 %v1377_v19  ;;  %1758 = vmatpush.msra.mxu1 %v1479_v20  ;;  %v855_v19 = vperm.slane %v3270_v56, 2  ;;  %v1033_v20 = vadd.f32 %v1032_v43, %v1013_v16 }
 0x173   : > { %1779 = vmatpush.msra.mxu2 %v1378_v21  ;;  %1798 = vmatpush.msra.mxu3 %v1480_v22 }
 0x174   : > { %1740 = vmatpush.msra.mxu0 %v1371_v47  ;;  %1759 = vmatpush.msra.mxu1 %v1473_v23  ;;  %v1152_v52 = vpop.f32.mrf.mxu1  ;;  %v1053_v47 = vadd.f32 %v1052_v40, %v855_v19 }
 0x175   : > { %1780 = vmatpush.msra.mxu2 %v1372_v48  ;;  %1799 = vmatpush.msra.mxu3 %v1474_v24  ;;  %v1172_v53 = vpop.f32.mrf.mxu2  ;;  %v856_v48 = vperm.slane %v3270_v56, 3 }
 0x176   : > { %1741 = vmatpush.msra.mxu0 %v1365_v25  ;;  %1760 = vmatpush.msra.mxu1 %v1467_v26  ;;  %v1073_v25 = vadd.f32 %v1072_v44, %v1053_v47  ;;  %v1551_v26 = vperm.slane %v3282_v62, 2 }
 0x177   : > { %1781 = vmatpush.msra.mxu2 %v1366_v27  ;;  %1800 = vmatpush.msra.mxu3 %v1468_v49 }
 0x178   : > { %1742 = vmatpush.msra.mxu0 %v1359_v50  ;;  %1761 = vmatpush.msra.mxu1 %v1461_v28  ;;  %v1093_v50 = vadd.f32 %v1092_v45, %v1073_v25 }
 0x179   : > { %1782 = vmatpush.msra.mxu2 %v1360_v29  ;;  %1801 = vmatpush.msra.mxu3 %v1462_v30 }
 0x17a   : > { %1743 = vmatmul.f32.vlgmr.msra.gmra.mxu0 %v3064_v41  ;;  %1783 = vmatmul.f32.vlgmr.msra.gmra.mxu2 %v3064_v41  ;;  %v1132_v41 = vpop.f32.mrf.mxu0  ;;  %v1113_v34 = vadd.f32 %v1112_v51, %v1093_v50 }
 0x17b   : > { %1762 = vmatpush.msra.mxu1 %v1455_v31  ;;  %1802 = vmatpush.msra.mxu3 %v1456_v32  ;;  %v1133_v27 = vadd.f32 %v1132_v41, %v856_v48 }
 0x17c   : > { %1763 = vmatmul.f32.vlgmr.msra.gmra.mxu1 %v3066_v42  ;;  %1803 = vmatmul.f32.vlgmr.msra.gmra.mxu3 %v3066_v42  ;;  %v1192_v42 = vpop.f32.mrf.mxu3 }
 0x17d   : > { %v1153_v30 = vadd.f32 %v1152_v52, %v1133_v27 }
 0x17f   : > { %v1173_v36 = vadd.f32 %v1172_v53, %v1153_v30 }
 0x181   : > { %v1193_v59 = vadd.f32 %v1192_v42, %v1173_v36  ;;  %v857_v42 = vperm.slane %v3270_v56, 4 }
 0x18f   : > { %v3263_v54 = vpop.f32.mrf.mxu0 }
 0x192   : > { %v3265_v55 = vpop.f32.mrf.mxu1 }
 0x195   : > { %v3267_v46 = vpop.f32.mrf.mxu2 }
 0x198   : > { %v3274_v58 = vpop.f32.mrf.mxu3 }
 0x1a9   : > { %v3272_v57 = vpop.f32.mrf.mxu0 }
 0x1aa   : > { %v1293_v16 = vadd.f32 %v3272_v57, %v858_v11 }
 0x1ac   : > { %v3277_v60 = vpop.f32.mrf.mxu1 }
 0x1ad   : > { %v1313_v47 = vadd.f32 %v3277_v60, %v1293_v16 }
 0x1af   : > { %v3279_v61 = vpop.f32.mrf.mxu2 }
 0x1b0   : > { %v1333_v60 = vadd.f32 %v3279_v61, %v1313_v47 }
 0x1b2   : > { %v3286_v2 = vpop.f32.mrf.mxu3 }
 0x1b3   : > { %v1584_v3 = vpop.f32.mrf.mxu0  ;;  %v1353_v61 = vadd.f32 %v3286_v2, %v1333_v60 }
 0x1b4   : > { %v1585_v6 = vadd.f32 %v1584_v3, %v1549_v1 }
 0x1b6   : > { %v1604_v7 = vpop.f32.mrf.mxu1 }
 0x1b7   : > { %v1605_v12 = vadd.f32 %v1604_v7, %v1585_v6 }
 0x1b9   : > { %v1624_v10 = vpop.f32.mrf.mxu2  ;;  %v1807_v17 = vadd.f32 %v1605_v12, %v953_v13  ;;  %v1213_v12 = vadd.f32 %v3263_v54, %v857_v42 }
 0x1ba   : > { %v1625_v14 = vadd.f32 %v1624_v10, %v1550_v9 }
 0x1bb   : > { %v1809_v21 = vsub.f32 0.0, %v1807_v17  ;;  %v1233_v17 = vadd.f32 %v3265_v55, %v1213_v12 }
 0x1bc   : > { %v1644_v15 = vpop.f32.mrf.mxu3 }
 0x1bd   : > { %v1645_v18 = vadd.f32 %v1644_v15, %v1625_v14  ;;  %v1811_v23 = vmul.f32 1.442695, %v1809_v21 }
 0x1bf   : > { %v1808_v22 = vadd.f32 %v1645_v18, %v1033_v20  ;;  %2234 = vpow2.f32 %v1811_v23  ;;  %v1553_v18 = vperm.slane %v3282_v62, 4  ;;  %v1253_v23 = vadd.f32 %v3267_v46, %v1233_v17 }
 0x1c1   : > { %v1810_v24 = vsub.f32 0.0, %v1808_v22 }
 0x1c3   : > { %v1813_v49 = vmul.f32 1.442695, %v1810_v24 }
 0x1c5   : > { %v2235_v31 = vpop.eup %2234  ;;  %2236 = vpow2.f32 %v1813_v49 }
 0x1c6   : > { %v1815_v37 = vadd.f32 1.0, %v2235_v31 }
 0x1c8   : > { %2238 = vrcp.f32 %v1815_v37  ;;  %v1826_v56 = vand.u32 2147483647, %v1815_v37  ;;  %v1828_v21 = vand.u32 2147483648, %v1815_v37  ;;  %vm1822_vm1 = vweird.f32 %v1815_v37 }
 0x1ca   : > { %vm1827_vm3 = vcmp.eq.f32.partialorder %v1826_v56, 8.507059e+37  ;;  %v1829_v49 = vor.u32 1.1754944e-38, %v1828_v21 }
 0x1cb   : > { %v2237_v44 = vpop.eup %2236 }
 0x1cc   : > { %v3293_v52 = vadd.f32 1.0, %v2237_v44 }
 0x1ce   : > { %v2239_v3 = vpop.eup %2238  ;;  %v1843_v31 = vand.u32 2147483648, %v3293_v52  ;;  %vm1837_vm5 = vweird.f32 %v3293_v52 }
 0x1cf   : > { %v1818_v5 = vmul.f32 %v2239_v3, %v1815_v37  ;;  %vm1823_vm0 = vweird.f32 %v2239_v3 }
 0x1d0   : > { %vm1824_vm2 = vmor %vm1822_vm1, %vm1823_vm0  ;;  %vm1909_vm0 = vcmask 1041408  }
 0x1d1   : > { %v1819_v7 = vsub.f32 1.0, %v1818_v5 }
 0x1d3   : > { %v1820_v13 = vmul.f32 %v2239_v3, %v1819_v7 }
 0x1d5   : > { %v1664_v28 = vpop.f32.mrf.mxu0  ;;  %v1821_v19 = vadd.f32 %v2239_v3, %v1820_v13 }
 0x1d6   : > { %v1665_v29 = vadd.f32 %v1664_v28, %v1551_v26  ;;  %v1554_v28 = vperm.slane %v3282_v62, 5  ;;  %v1273_v62 = vadd.f32 %v3274_v58, %v1253_v23 }
 0x1d7   : > { %v1825_v24 = vsel %vm1824_vm2, %v2239_v3, %v1821_v19 }
 0x1d8   : > { %v1684_v32 = vpop.f32.mrf.mxu1  ;;  %v1830_v30 = vsel %vm1827_vm3, %v1829_v49, %v1825_v24 }
 0x1d9   : > { %v1685_v35 = vadd.f32 %v1684_v32, %v1665_v29  ;;  %v1841_v32 = vand.u32 2147483647, %v3293_v52 }
 0x1db   : > { %v1847_v38 = vadd.f32 %v1685_v35, %v1113_v34  ;;  %v1704_v39 = vpop.f32.mrf.mxu2  ;;  %vm1842_vm8 = vcmp.eq.f32.partialorder %v1841_v32, 8.507059e+37 }
 0x1dc   : > { %v1705_v40 = vadd.f32 %v1704_v39, %v1552_v33  ;;  %v1844_v39 = vor.u32 1.1754944e-38, %v1843_v31 }
 0x1dd   : > { %v1849_v43 = vsub.f32 0.0, %v1847_v38 }
 0x1de   : > { %v1724_v41 = vpop.f32.mrf.mxu3 }
 0x1df   : > { %v1851_v45 = vmul.f32 1.442695, %v1849_v43  ;;  %v1725_v63 = vadd.f32 %v1724_v41, %v1705_v40 }
 0x1e1   : > { %2240 = vpow2.f32 %v1851_v45  ;;  %v1848_v0 = vadd.f32 %v1725_v63, %v1193_v59 }
 0x1e2   : > { %2242 = vrcp.f32 %v3293_v52 }
 0x1e3   : > { %v1850_v1 = vsub.f32 0.0, %v1848_v0 }
 0x1e5   : > { %v1853_v51 = vmul.f32 1.442695, %v1850_v1 }
 0x1e7   : > { %v2241_v53 = vpop.eup %2240  ;;  %2244 = vpow2.f32 %v1853_v51 }
 0x1e8   : > { %v3296_v4 = vadd.f32 1.0, %v2241_v53  ;;  %v3298_v6 = vpop.eup %2242 }
 0x1e9   : > { %v1833_v10 = vmul.f32 %v3298_v6, %v3293_v52  ;;  %vm1838_vm4 = vweird.f32 %v3298_v6 }
 0x1ea   : > { %2246 = vrcp.f32 %v3296_v4  ;;  %vm1839_vm6 = vmor %vm1837_vm5, %vm1838_vm4  ;;  %vm1862_vm10 = vweird.f32 %v3296_v4  ;;  %v1868_v58 = vand.u32 2147483648, %v3296_v4  ;;  %v1866_v63 = vand.u32 2147483647, %v3296_v4 }
 0x1eb   : > { %v1834_v15 = vsub.f32 1.0, %v1833_v10  ;;  %v1898_v10 = vld.sshfl [vmem:[#allocation1] sm:$0xff pattern:$0x73625140] }
 0x1ec   : > { %v1869_v51 = vor.u32 1.1754944e-38, %v1868_v58  ;;  %vm1867_vm14 = vcmp.eq.f32.partialorder %v1866_v63, 8.507059e+37 }
 0x1ed   : > { %v2245_v8 = vpop.eup %2244  ;;  %v1835_v22 = vmul.f32 %v3298_v6, %v1834_v15 }
 0x1ee   : > { %v3302_v9 = vadd.f32 1.0, %v2245_v8 }
 0x1ef   : > { %v1836_v29 = vadd.f32 %v3298_v6, %v1835_v22 }
 0x1f0   : > { %2248 = vrcp.f32 %v3302_v9  ;;  %v3309_v14 = vpop.eup %2246  ;;  %v1883_v2 = vand.u32 2147483648, %v3302_v9  ;;  %vm1877_vm12 = vweird.f32 %v3302_v9  ;;  %v1881_v52 = vand.u32 2147483647, %v3302_v9 }
 0x1f1   : > { %v1858_v20 = vmul.f32 %v3309_v14, %v3296_v4  ;;  %v1840_v37 = vsel %vm1839_vm6, %v3298_v6, %v1836_v29  ;;  %vm1863_vm7 = vweird.f32 %v3309_v14  ;;  %v1899_v4 = vld.sshfl [vmem:[#allocation1 + $0x8] sm:$0xff pattern:$0x73625140] }
 0x1f2   : > { %v1845_v41 = vsel %vm1842_vm8, %v1844_v39, %v1840_v37  ;;  %vm1864_vm11 = vmor %vm1862_vm10, %vm1863_vm7  ;;  %v1884_v53 = vor.u32 1.1754944e-38, %v1883_v2  ;;  %vm1882_vm15 = vcmp.eq.f32.partialorder %v1881_v52, 8.507059e+37 }
 0x1f3   : > { %v1859_v25 = vsub.f32 1.0, %v1858_v20 }
 0x1f5   : > { %v1860_v33 = vmul.f32 %v3309_v14, %v1859_v25 }
 0x1f6   : > { %v3316_v54 = vpop.eup %2248 }
 0x1f7   : > { %v1873_v57 = vmul.f32 %v3316_v54, %v3302_v9  ;;  %v1744_v55 = vpop.f32.mrf.mxu0  ;;  %vm1878_vm9 = vweird.f32 %v3316_v54  ;;  %v1861_v44 = vadd.f32 %v3309_v14, %v1860_v33 }
 0x1f8   : > { %v1745_v48 = vadd.f32 %v1744_v55, %v1553_v18  ;;  %vm1879_vm13 = vmor %vm1877_vm12, %vm1878_vm9 }
 0x1f9   : > { %v1874_v26 = vsub.f32 1.0, %v1873_v57  ;;  %v1764_v27 = vpop.f32.mrf.mxu1  ;;  %v1865_v1 = vsel %vm1864_vm11, %v3309_v14, %v1861_v44 }
 0x1fa   : > { %v1765_v50 = vadd.f32 %v1764_v27, %v1745_v48  ;;  %v1870_v5 = vsel %vm1867_vm14, %v1869_v51, %v1865_v1 }
 0x1fb   : > { %v1875_v34 = vmul.f32 %v3316_v54, %v1874_v26  ;;  %v1893_v7 = vsub.f32 1.0, %v1870_v5  ;;  %v1902_v14 = vmul.f32 %v1898_v10, %v1870_v5 }
 0x1fc   : > { %v1887_v46 = vmul.f32 %v1830_v30, %v1765_v50 }
 0x1fd   : > { %v1784_v35 = vpop.f32.mrf.mxu2  ;;  %v1876_v59 = vadd.f32 %v3316_v54, %v1875_v34 }
 0x1fe   : > { %v1785_v36 = vadd.f32 %v1784_v35, %v1554_v28  ;;  %v1889_v40 = vadd.f32 %v1887_v46, %v1273_v62 }
 0x1ff   : > { %v1804_v38 = vpop.f32.mrf.mxu3  ;;  %v1880_v3 = vsel %vm1879_vm13, %v3316_v54, %v1876_v59 }
 0x200   : > { %v1805_v43 = vadd.f32 %v1804_v38, %v1785_v36  ;;  %2250 = vtanh.f32 %v1889_v40  ;;  %v1885_v6 = vsel %vm1882_vm15, %v1884_v53, %v1880_v3 }
 0x201   : > { %v1894_v8 = vsub.f32 1.0, %v1885_v6  ;;  %v1903_v13 = vmul.f32 %v1899_v4, %v1885_v6 }
 0x202   : > { %v1888_v45 = vmul.f32 %v1845_v41, %v1805_v43 }
 0x204   : > { %v1890_v0 = vadd.f32 %v1888_v45, %v1353_v61 }
 0x206   : > { %2252 = vtanh.f32 %v1890_v0  ;;  %v2251_v42 = vpop.eup %2250 }
 0x207   : > { %v1895_v11 = vmul.f32 %v2251_v42, %v1893_v7 }
 0x209   : > { %v1904_v16 = vadd.f32 %v1902_v14, %v1895_v11 }
 0x20c   : > { %v2253_v9 = vpop.eup %2252 }
 0x20d   : > { %v1896_v12 = vmul.f32 %v2253_v9, %v1894_v8 }
 0x20f   : > { %v1905_v15 = vadd.f32 %v1903_v13, %v1896_v12 }
 0x211   : > { %v1908_v17 = vrot.slane %v1905_v15, 6 }
 0x213   : > { %v1910_v18 = vsel %vm1909_vm0, %v1904_v16, %v1908_v17 }
 0x214   : > { %1912 = vst [vmem:[%s2740_s22] sm:$0xf] %v1910_v18 }
 0x215   : > { %1913 = vst [vmem:[%s2626_s10] sm:$0xf] %v1910_v18 }
 0x216 PF: > { %s24_s25 = sadd.s32 1, %s2448_s25   ;;  %s3396_s9 = sld [smem:[#allocation13_spill]] }
 0x217   : > { %p21_p3 = scmp.ge.s32.totalorder %s24_s25, 98   ;;  %s3397_s20 = sld [smem:[#allocation17_spill]] }
 0x218   : > { %s3398_s21 = sld [smem:[#allocation14_spill]]  ;;  %s3401_s18 = smov %s2424_s19 }
 0x219   : > { %s3399_s23 = sld [smem:[#allocation15_spill]]  ;;  %s3403_s22 = smov %s2444_s24 }
 0x21a   : > { %s3400_s29 = sld [smem:[#allocation16_spill]] }
 0x21c   : > { %s3402_s19 = smov %s3396_s9  ;;  %23 = sbr.rel (!%p21_p3) target bundleno = 12 (0xc), region = 126 }
 0x220   : > { %s3404_s24 = smov %s3400_s29 }
 0x221   :  { %1955 = vsyncpa [#allocation4], 1 }
 0x222   :  { %1957 = vsyncpa [#allocation4 + $0x1], 1 }
 0x223   :  { %1958 = vsyncpa [#allocation6], 1 }
 0x224   :  { %1960 = vsyncpa [#allocation6 + $0x1], 1 }
 0x225   :  { %1961 = vsyncpa [#allocation9], 1 }
 0x226   :  { %1963 = vsyncpa [#allocation9 + $0x1], 1 }

// kernel: gru_model_forward.5
= control target key start
LH: loop header
LB: loop body
LE: loop exit
PB: predicated region body
PF: predicated region fallthrough
CT: control target
= control target key end

     0   :  { %10 = vsyncpa [#allocation4], 0  ;;  %s11906_s18 = smov 0   ;;  %s12762_s0 = inlined_call_operand.vmem [shape: bf16[2,24576], index: 0, kind: input, shape index: {}]   ;;  %s12763_s1 = inlined_call_operand.vmem [shape: bf16[24576,32], index: 1, kind: input, shape index: {}]   ;;  %s12764_s2 = inlined_call_operand.vmem [shape: f32[1,32], index: 2, kind: input, shape index: {}]   ;;  %s12765_s3 = inlined_call_operand.vmem [shape: f32[32,7], index: 3, kind: input, shape index: {}]   ;;  %s12766_s4 = inlined_call_operand.vmem [shape: f32[1,7], index: 4, kind: input, shape index: {}]   ;;  %s12767_s5 = inlined_call_operand.hbm [shape: f32[2,7], index: 5, kind: output, shape index: {}]  }
   0x1 LB: > { %s11912_s19 = sadd.s32 4294967295, %s11872_s18   ;;  %p7967_p0 = scmp.ge.s32.totalorder %s11872_s18, 1  ;;  %s11872_s18 = sphi %s11906_s18, %s16_s18  }
   0x2   : > { %p194_p1 = scmp.lt.s32.totalorder %s11872_s18, 3 }
   0x4   : > { %p195_p2 = pnand %p7967_p0, %p194_p1 }
   0x5   : > { %s221_s20 = smul.u32 (!%p195_p2), 96, %s11912_s19  ;;  %p7969_p5 = scmp.ne.s32.totalorder (!%p195_p2), %s11912_s19, 0 }
   0x6   : > { %198 = sbr.rel (%p195_p2) target bundleno = 1074 (0x432), region = 40 }
   0x7   : > { %s226_s21 = smul.u32 (!%p195_p2), 1536, %s11912_s19  ;;  %p222_p3 = scmp.lt.s32.totalorder (!%p195_p2), %s221_s20, 191 }
   0x9   : > { %p227_p4 = scmp.lt.s32.totalorder (!%p195_p2), %s226_s21, 3071 }
   0xb   : > { %s12769_s20 = smov (!%p222_p3, %s221_s20), 191  ;;  %s12771_s21 = smov (!%p227_p4, %s226_s21), 3071 }
   0xc   : > { %s11921_s24 = scalar_lea.vmem %s12762_s0, %s12769_s20  ;;  %s7968_s25 = sshll.u32 %s12771_s21, 2 }
   0xd   : > { %s11926_s28 = scalar_lea.vmem %s12763_s1, %s7968_s25  ;;  %235 = sbr.rel (%p7969_p5) target bundleno = 20 (0x14), region = 44 }
  0x12   : > { %vm236_vm0 = vcmask 254976   ;;  %v11874_v0 = vmov 0.0  }
  0x13   : > { %237 = vst.msk [vmem:[#allocation2] sm:$0x3] %vm236_vm0, %v11874_v0 }
  0x14 PF: > { %v11055_v1 = vld [vmem:[%s11926_s28 + $0x38] sm:$0xff]  ;;  %v11054_v5 = vld [vmem:[%s11926_s28 + $0x30] sm:$0xff]  ;;  %v11053_v9 = vld [vmem:[%s11926_s28 + $0x28] sm:$0xff]  ;;  %vm7860_vm1 = vcmask 254976   ;;  %p11042_p6 = scmp.ne.s32.totalorder %s11912_s19, 1 }
  0x15   : > { %v11063_v2 = vld [vmem:[%s11926_s28 + $0x78] sm:$0xff]  ;;  %6611 = vmatpush.bf16.msra.mxu0 %v11055_v1  ;;  %v11062_v6 = vld [vmem:[%s11926_s28 + $0x70] sm:$0xff]  ;;  %v11061_v10 = vld [vmem:[%s11926_s28 + $0x68] sm:$0xff] }
  0x16   : > { %v11071_v3 = vld [vmem:[%s11926_s28 + $0xb8] sm:$0xff]  ;;  %6624 = vmatpush.bf16.msra.mxu1 %v11063_v2  ;;  %v11070_v7 = vld [vmem:[%s11926_s28 + $0xb0] sm:$0xff]  ;;  %v11069_v11 = vld [vmem:[%s11926_s28 + $0xa8] sm:$0xff] }
  0x17   : > { %v11079_v4 = vld [vmem:[%s11926_s28 + $0xf8] sm:$0xff]  ;;  %6637 = vmatpush.bf16.msra.mxu2 %v11071_v3  ;;  %v11078_v8 = vld [vmem:[%s11926_s28 + $0xf0] sm:$0xff]  ;;  %v11077_v12 = vld [vmem:[%s11926_s28 + $0xe8] sm:$0xff] }
  0x18   : > { %6650 = vmatpush.bf16.msra.mxu3 %v11079_v4  ;;  %v11052_v13 = vld [vmem:[%s11926_s28 + $0x20] sm:$0xff]  ;;  %v11051_v17 = vld [vmem:[%s11926_s28 + $0x18] sm:$0xff]  ;;  %v11050_v22 = vld [vmem:[%s11926_s28 + $0x10] sm:$0xff] }
  0x19   : > { %6612 = vmatpush.bf16.msra.mxu0 %v11054_v5  ;;  %v11060_v14 = vld [vmem:[%s11926_s28 + $0x60] sm:$0xff]  ;;  %v11059_v18 = vld [vmem:[%s11926_s28 + $0x58] sm:$0xff]  ;;  %v11058_v23 = vld [vmem:[%s11926_s28 + $0x50] sm:$0xff] }
  0x1a   : > { %6625 = vmatpush.bf16.msra.mxu1 %v11062_v6  ;;  %v11068_v15 = vld [vmem:[%s11926_s28 + $0xa0] sm:$0xff]  ;;  %v11067_v19 = vld [vmem:[%s11926_s28 + $0x98] sm:$0xff]  ;;  %v11066_v24 = vld [vmem:[%s11926_s28 + $0x90] sm:$0xff] }
  0x1b   : > { %6638 = vmatpush.bf16.msra.mxu2 %v11070_v7  ;;  %v11076_v16 = vld [vmem:[%s11926_s28 + $0xe0] sm:$0xff]  ;;  %v11075_v20 = vld [vmem:[%s11926_s28 + $0xd8] sm:$0xff]  ;;  %v11074_v25 = vld [vmem:[%s11926_s28 + $0xd0] sm:$0xff] }
  0x1c   : > { %6651 = vmatpush.bf16.msra.mxu3 %v11078_v8  ;;  %v239_v21 = vld [vmem:[%s11921_s24] sm:$0xff]  ;;  %v11049_v26 = vld [vmem:[%s11926_s28 + $0x8] sm:$0xff]  ;;  %v11087_v34 = vld [vmem:[%s11926_s28 + $0x138] sm:$0xff] }
  0x1d   : > { %6613 = vmatpush.bf16.msra.mxu0 %v11053_v9  ;;  %1788 = vst [vmem:[#allocation1] ss:$9 sm:$0xff] %v239_v21  ;;  %v11057_v27 = vld [vmem:[%s11926_s28 + $0x48] sm:$0xff]  ;;  %v11048_v30 = vld [vmem:[%s11926_s28] sm:$0xff]  ;;  %v11095_v35 = vld [vmem:[%s11926_s28 + $0x178] sm:$0xff] }
  0x1e   : > { %6626 = vmatpush.bf16.msra.mxu1 %v11061_v10  ;;  %v11065_v28 = vld [vmem:[%s11926_s28 + $0x88] sm:$0xff]  ;;  %v11056_v31 = vld [vmem:[%s11926_s28 + $0x40] sm:$0xff]  ;;  %v11103_v36 = vld [vmem:[%s11926_s28 + $0x1b8] sm:$0xff] }
  0x1f   : > { %6639 = vmatpush.bf16.msra.mxu2 %v11069_v11  ;;  %v11073_v29 = vld [vmem:[%s11926_s28 + $0xc8] sm:$0xff]  ;;  %v11064_v32 = vld [vmem:[%s11926_s28 + $0x80] sm:$0xff]  ;;  %v11111_v37 = vld [vmem:[%s11926_s28 + $0x1f8] sm:$0xff] }
  0x20   : > { %6652 = vmatpush.bf16.msra.mxu3 %v11077_v12  ;;  %v11072_v33 = vld [vmem:[%s11926_s28 + $0xc0] sm:$0xff]  ;;  %v11086_v38 = vld [vmem:[%s11926_s28 + $0x130] sm:$0xff]  ;;  %v11085_v46 = vld [vmem:[%s11926_s28 + $0x128] sm:$0xff] }
  0x21   : > { %6614 = vmatpush.bf16.msra.mxu0 %v11052_v13  ;;  %v11094_v41 = vld [vmem:[%s11926_s28 + $0x170] sm:$0xff]  ;;  %v11093_v47 = vld [vmem:[%s11926_s28 + $0x168] sm:$0xff]  ;;  %v11084_v50 = vld [vmem:[%s11926_s28 + $0x120] sm:$0xff] }
  0x22   : > { %6627 = vmatpush.bf16.msra.mxu1 %v11060_v14  ;;  %v11102_v44 = vld [vmem:[%s11926_s28 + $0x1b0] sm:$0xff]  ;;  %v11101_v48 = vld [vmem:[%s11926_s28 + $0x1a8] sm:$0xff]  ;;  %v11092_v51 = vld [vmem:[%s11926_s28 + $0x160] sm:$0xff] }
  0x23   : > { %6640 = vmatpush.bf16.msra.mxu2 %v11068_v15  ;;  %v11110_v45 = vld [vmem:[%s11926_s28 + $0x1f0] sm:$0xff]  ;;  %v11109_v49 = vld [vmem:[%s11926_s28 + $0x1e8] sm:$0xff]  ;;  %v11100_v52 = vld [vmem:[%s11926_s28 + $0x1a0] sm:$0xff] }
  0x24   : > { %6653 = vmatpush.bf16.msra.mxu3 %v11076_v16  ;;  %v1791_v39 = vld [vmem:[#allocation1 + $0x12] sm:$0xff]  ;;  %v1789_v40 = vld [vmem:[#allocation1] sm:$0xff]  ;;  %v1790_v43 = vld [vmem:[#allocation1 + $0x9] sm:$0xff] }
  0x25   : > { %6615 = vmatpush.bf16.msra.mxu0 %v11051_v17  ;;  %v1792_v42 = vld [vmem:[#allocation1 + $0x1b] sm:$0xff]  ;;  %v11082_v58 = vld [vmem:[%s11926_s28 + $0x110] sm:$0xff]  ;;  %v11081_v62 = vld [vmem:[%s11926_s28 + $0x108] sm:$0xff] }
  0x26   : > { %6628 = vmatpush.bf16.msra.mxu1 %v11059_v18  ;;  %v11108_v53 = vld [vmem:[%s11926_s28 + $0x1e0] sm:$0xff]  ;;  %v11083_v54 = vld [vmem:[%s11926_s28 + $0x118] sm:$0xff]  ;;  %v11090_v59 = vld [vmem:[%s11926_s28 + $0x150] sm:$0xff] }
  0x27   : > { %6641 = vmatpush.bf16.msra.mxu2 %v11067_v19  ;;  %v11091_v55 = vld [vmem:[%s11926_s28 + $0x158] sm:$0xff]  ;;  %v11098_v60 = vld [vmem:[%s11926_s28 + $0x190] sm:$0xff]  ;;  %v11089_v63 = vld [vmem:[%s11926_s28 + $0x148] sm:$0xff] }
  0x28   : > { %6654 = vmatpush.bf16.msra.mxu3 %v11075_v20  ;;  %v11099_v56 = vld [vmem:[%s11926_s28 + $0x198] sm:$0xff]  ;;  %v11106_v61 = vld [vmem:[%s11926_s28 + $0x1d0] sm:$0xff]  ;;  %v11097_v0 = vld [vmem:[%s11926_s28 + $0x188] sm:$0xff] }
  0x29   : > { %6616 = vmatpush.bf16.msra.mxu0 %v11050_v22  ;;  %v11107_v57 = vld [vmem:[%s11926_s28 + $0x1d8] sm:$0xff]  ;;  %v11105_v1 = vld [vmem:[%s11926_s28 + $0x1c8] sm:$0xff]  ;;  %v11080_v7 = vld [vmem:[%s11926_s28 + $0x100] sm:$0xff] }
  0x2a   : > { %6629 = vmatpush.bf16.msra.mxu1 %v11058_v23  ;;  %v1795_v2 = vld [vmem:[#allocation1 + $0x36] sm:$0xff]  ;;  %v1793_v3 = vld [vmem:[#allocation1 + $0x24] sm:$0xff]  ;;  %v1794_v5 = vld [vmem:[#allocation1 + $0x2d] sm:$0xff] }
  0x2b   : > { %6642 = vmatpush.bf16.msra.mxu2 %v11066_v24  ;;  %v1796_v4 = vld [vmem:[#allocation1 + $0x3f] sm:$0xff]  ;;  %v240_v6 = vld [vmem:[%s11921_s24 + $0x8] sm:$0xff]  ;;  %v11118_v15 = vld [vmem:[%s11926_s28 + $0x230] sm:$0xff] }
  0x2c   : > { %6655 = vmatpush.bf16.msra.mxu3 %v11074_v25  ;;  %1798 = vst [vmem:[#allocation1] ss:$9 sm:$0xff] %v240_v6  ;;  %v11088_v8 = vld [vmem:[%s11926_s28 + $0x140] sm:$0xff]  ;;  %v11119_v11 = vld [vmem:[%s11926_s28 + $0x238] sm:$0xff]  ;;  %v11126_v16 = vld [vmem:[%s11926_s28 + $0x270] sm:$0xff] }
  0x2d   : > { %6617 = vmatpush.bf16.msra.mxu0 %v11049_v26  ;;  %v11096_v9 = vld [vmem:[%s11926_s28 + $0x180] sm:$0xff]  ;;  %v11127_v12 = vld [vmem:[%s11926_s28 + $0x278] sm:$0xff]  ;;  %v11134_v17 = vld [vmem:[%s11926_s28 + $0x2b0] sm:$0xff] }
  0x2e   : > { %6630 = vmatpush.bf16.msra.mxu1 %v11057_v27  ;;  %v11104_v10 = vld [vmem:[%s11926_s28 + $0x1c0] sm:$0xff]  ;;  %v11135_v13 = vld [vmem:[%s11926_s28 + $0x2b8] sm:$0xff]  ;;  %v11142_v18 = vld [vmem:[%s11926_s28 + $0x2f0] sm:$0xff] }
  0x2f   : > { %6643 = vmatpush.bf16.msra.mxu2 %v11065_v28  ;;  %v11143_v14 = vld [vmem:[%s11926_s28 + $0x2f8] sm:$0xff]  ;;  %v11117_v19 = vld [vmem:[%s11926_s28 + $0x228] sm:$0xff]  ;;  %v11116_v23 = vld [vmem:[%s11926_s28 + $0x220] sm:$0xff] }
  0x30   : > { %6656 = vmatpush.bf16.msra.mxu3 %v11073_v29  ;;  %v11125_v20 = vld [vmem:[%s11926_s28 + $0x268] sm:$0xff]  ;;  %v11124_v24 = vld [vmem:[%s11926_s28 + $0x260] sm:$0xff]  ;;  %v11115_v27 = vld [vmem:[%s11926_s28 + $0x218] sm:$0xff] }
  0x31   : > { %6618 = vmatpush.bf16.msra.mxu0 %v11048_v30  ;;  %v11133_v21 = vld [vmem:[%s11926_s28 + $0x2a8] sm:$0xff]  ;;  %v11132_v25 = vld [vmem:[%s11926_s28 + $0x2a0] sm:$0xff]  ;;  %v11123_v28 = vld [vmem:[%s11926_s28 + $0x258] sm:$0xff] }
  0x32   : > { %6631 = vmatpush.bf16.msra.mxu1 %v11056_v31  ;;  %v11141_v22 = vld [vmem:[%s11926_s28 + $0x2e8] sm:$0xff]  ;;  %v11140_v26 = vld [vmem:[%s11926_s28 + $0x2e0] sm:$0xff]  ;;  %v11131_v29 = vld [vmem:[%s11926_s28 + $0x298] sm:$0xff] }
  0x33   : > { %6644 = vmatpush.bf16.msra.mxu2 %v11064_v32  ;;  %v11139_v30 = vld [vmem:[%s11926_s28 + $0x2d8] sm:$0xff]  ;;  %v11114_v31 = vld [vmem:[%s11926_s28 + $0x210] sm:$0xff] }
  0x34   : > { %6657 = vmatpush.bf16.msra.mxu3 %v11072_v33  ;;  %6619 = vmatmul.bf16.vlgmr.msra.gmra.mxu0 %v1789_v40  ;;  %v11122_v32 = vld [vmem:[%s11926_s28 + $0x250] sm:$0xff]  ;;  %v11120_v40 = vld [vmem:[%s11926_s28 + $0x240] sm:$0xff] }
  0x35   : > { %6663 = vmatpush.bf16.msrb.mxu0 %v11087_v34  ;;  %6632 = vmatmul.bf16.vlgmr.msra.gmra.mxu1 %v1790_v43  ;;  %v11130_v33 = vld [vmem:[%s11926_s28 + $0x290] sm:$0xff]  ;;  %v11151_v43 = vld [vmem:[%s11926_s28 + $0x338] sm:$0xff] }
  0x36   : > { %6676 = vmatpush.bf16.msrb.mxu1 %v11095_v35  ;;  %6645 = vmatmul.bf16.vlgmr.msra.gmra.mxu2 %v1791_v39  ;;  %v11138_v34 = vld [vmem:[%s11926_s28 + $0x2d0] sm:$0xff]  ;;  %v11113_v35 = vld [vmem:[%s11926_s28 + $0x208] sm:$0xff]  ;;  %v11112_v39 = vld [vmem:[%s11926_s28 + $0x200] sm:$0xff] }
  0x37   : > { %6689 = vmatpush.bf16.msrb.mxu2 %v11103_v36  ;;  %6658 = vmatmul.bf16.vlgmr.msra.gmra.mxu3 %v1792_v42  ;;  %v11121_v36 = vld [vmem:[%s11926_s28 + $0x248] sm:$0xff]  ;;  %v11136_v42 = vld [vmem:[%s11926_s28 + $0x2c0] sm:$0xff]  ;;  %v11170_v6 = vld [vmem:[%s11926_s28 + $0x3d0] sm:$0xff] }
  0x38   : > { %6702 = vmatpush.bf16.msrb.mxu3 %v11111_v37  ;;  %v11129_v37 = vld [vmem:[%s11926_s28 + $0x288] sm:$0xff] }
  0x39   : > { %6664 = vmatpush.bf16.msrb.mxu0 %v11086_v38  ;;  %v11137_v38 = vld [vmem:[%s11926_s28 + $0x2c8] sm:$0xff] }
  0x3a   : > { %6677 = vmatpush.bf16.msrb.mxu1 %v11094_v41  ;;  %v11128_v41 = vld [vmem:[%s11926_s28 + $0x280] sm:$0xff] }
  0x3b   : > { %6690 = vmatpush.bf16.msrb.mxu2 %v11102_v44  ;;  %v11159_v44 = vld [vmem:[%s11926_s28 + $0x378] sm:$0xff] }
  0x3c   : > { %6703 = vmatpush.bf16.msrb.mxu3 %v11110_v45  ;;  %v11167_v45 = vld [vmem:[%s11926_s28 + $0x3b8] sm:$0xff] }
  0x3d   : > { %6665 = vmatpush.bf16.msrb.mxu0 %v11085_v46  ;;  %v11175_v46 = vld [vmem:[%s11926_s28 + $0x3f8] sm:$0xff] }
  0x3e   : > { %6678 = vmatpush.bf16.msrb.mxu1 %v11093_v47  ;;  %v1799_v47 = vld [vmem:[#allocation1] sm:$0xff] }
  0x3f   : > { %6691 = vmatpush.bf16.msrb.mxu2 %v11101_v48  ;;  %v1801_v48 = vld [vmem:[#allocation1 + $0x12] sm:$0xff] }
  0x40   : > { %6704 = vmatpush.bf16.msrb.mxu3 %v11109_v49  ;;  %v1800_v49 = vld [vmem:[#allocation1 + $0x9] sm:$0xff] }
  0x41   : > { %6666 = vmatpush.bf16.msrb.mxu0 %v11084_v50  ;;  %v1802_v50 = vld [vmem:[#allocation1 + $0x1b] sm:$0xff] }
  0x42   : > { %6679 = vmatpush.bf16.msrb.mxu1 %v11092_v51  ;;  %v11150_v51 = vld [vmem:[%s11926_s28 + $0x330] sm:$0xff] }
  0x43   : > { %6692 = vmatpush.bf16.msrb.mxu2 %v11100_v52  ;;  %v11158_v52 = vld [vmem:[%s11926_s28 + $0x370] sm:$0xff] }
  0x44   : > { %6705 = vmatpush.bf16.msrb.mxu3 %v11108_v53  ;;  %v11166_v53 = vld [vmem:[%s11926_s28 + $0x3b0] sm:$0xff] }
  0x45   : > { %6667 = vmatpush.bf16.msrb.mxu0 %v11083_v54  ;;  %v11174_v54 = vld [vmem:[%s11926_s28 + $0x3f0] sm:$0xff] }
  0x46   : > { %6680 = vmatpush.bf16.msrb.mxu1 %v11091_v55  ;;  %v11149_v55 = vld [vmem:[%s11926_s28 + $0x328] sm:$0xff] }
  0x47   : > { %6693 = vmatpush.bf16.msrb.mxu2 %v11099_v56  ;;  %v11157_v56 = vld [vmem:[%s11926_s28 + $0x368] sm:$0xff] }
  0x48   : > { %6706 = vmatpush.bf16.msrb.mxu3 %v11107_v57  ;;  %v11165_v57 = vld [vmem:[%s11926_s28 + $0x3a8] sm:$0xff] }
  0x49   : > { %6668 = vmatpush.bf16.msrb.mxu0 %v11082_v58  ;;  %v11173_v58 = vld [vmem:[%s11926_s28 + $0x3e8] sm:$0xff] }
  0x4a   : > { %6681 = vmatpush.bf16.msrb.mxu1 %v11090_v59  ;;  %v11148_v59 = vld [vmem:[%s11926_s28 + $0x320] sm:$0xff] }
  0x4b   : > { %6694 = vmatpush.bf16.msrb.mxu2 %v11098_v60  ;;  %v11156_v60 = vld [vmem:[%s11926_s28 + $0x360] sm:$0xff] }
  0x4c   : > { %6707 = vmatpush.bf16.msrb.mxu3 %v11106_v61  ;;  %v11164_v61 = vld [vmem:[%s11926_s28 + $0x3a0] sm:$0xff] }
  0x4d   : > { %6669 = vmatpush.bf16.msrb.mxu0 %v11081_v62  ;;  %v11172_v62 = vld [vmem:[%s11926_s28 + $0x3e0] sm:$0xff] }
  0x4e   : > { %6682 = vmatpush.bf16.msrb.mxu1 %v11089_v63  ;;  %v11147_v63 = vld [vmem:[%s11926_s28 + $0x318] sm:$0xff] }
  0x4f   : > { %6695 = vmatpush.bf16.msrb.mxu2 %v11097_v0  ;;  %v11155_v0 = vld [vmem:[%s11926_s28 + $0x358] sm:$0xff] }
  0x50   : > { %6708 = vmatpush.bf16.msrb.mxu3 %v11105_v1  ;;  %v11163_v1 = vld [vmem:[%s11926_s28 + $0x398] sm:$0xff] }
  0x51   : > { %6670 = vmatpush.bf16.msrb.mxu0 %v11080_v7  ;;  %v11145_v7 = vld [vmem:[%s11926_s28 + $0x308] sm:$0xff] }
  0x52   : > { %6683 = vmatpush.bf16.msrb.mxu1 %v11088_v8  ;;  %v11153_v8 = vld [vmem:[%s11926_s28 + $0x348] sm:$0xff] }
  0x53   : > { %6696 = vmatpush.bf16.msrb.mxu2 %v11096_v9  ;;  %v11161_v9 = vld [vmem:[%s11926_s28 + $0x388] sm:$0xff] }
  0x54   : > { %6709 = vmatpush.bf16.msrb.mxu3 %v11104_v10  ;;  %6671 = vmatmul.bf16.vlgmr.msrb.gmra.mxu0 %v1793_v3  ;;  %v11146_v3 = vld [vmem:[%s11926_s28 + $0x310] sm:$0xff]  ;;  %v11169_v10 = vld [vmem:[%s11926_s28 + $0x3c8] sm:$0xff] }
  0x55   : > { %6715 = vmatpush.bf16.msra.mxu0 %v11119_v11  ;;  %6684 = vmatmul.bf16.vlgmr.msrb.gmra.mxu1 %v1794_v5  ;;  %v11162_v5 = vld [vmem:[%s11926_s28 + $0x390] sm:$0xff]  ;;  %v1803_v11 = vld [vmem:[#allocation1 + $0x24] sm:$0xff] }
  0x56   : > { %6728 = vmatpush.bf16.msra.mxu1 %v11127_v12  ;;  %6697 = vmatmul.bf16.vlgmr.msrb.gmra.mxu2 %v1795_v2  ;;  %v11171_v2 = vld [vmem:[%s11926_s28 + $0x3d8] sm:$0xff] }
  0x57   : > { %6741 = vmatpush.bf16.msra.mxu2 %v11135_v13  ;;  %6710 = vmatmul.bf16.vlgmr.msrb.gmra.mxu3 %v1796_v4  ;;  %v11154_v4 = vld [vmem:[%s11926_s28 + $0x350] sm:$0xff] }
  0x58   : > { %6754 = vmatpush.bf16.msra.mxu3 %v11143_v14  ;;  %v1805_v12 = vld [vmem:[#allocation1 + $0x36] sm:$0xff]  ;;  %v1804_v13 = vld [vmem:[#allocation1 + $0x2d] sm:$0xff]  ;;  %v1806_v14 = vld [vmem:[#allocation1 + $0x3f] sm:$0xff] }
  0x59   : > { %6716 = vmatpush.bf16.msra.mxu0 %v11118_v15  ;;  %v241_v15 = vld [vmem:[%s11921_s24 + $0x10] sm:$0xff] }
  0x5a   : > { %6729 = vmatpush.bf16.msra.mxu1 %v11126_v16  ;;  %1808 = vst [vmem:[#allocation1] ss:$9 sm:$0xff] %v241_v15  ;;  %v11144_v16 = vld [vmem:[%s11926_s28 + $0x300] sm:$0xff] }
  0x5b   : > { %6742 = vmatpush.bf16.msra.mxu2 %v11134_v17  ;;  %v11152_v17 = vld [vmem:[%s11926_s28 + $0x340] sm:$0xff] }
  0x5c   : > { %6755 = vmatpush.bf16.msra.mxu3 %v11142_v18  ;;  %v11160_v18 = vld [vmem:[%s11926_s28 + $0x380] sm:$0xff] }
  0x5d   : > { %6717 = vmatpush.bf16.msra.mxu0 %v11117_v19  ;;  %v11168_v19 = vld [vmem:[%s11926_s28 + $0x3c0] sm:$0xff] }
  0x5e   : > { %6730 = vmatpush.bf16.msra.mxu1 %v11125_v20  ;;  %v11183_v20 = vld [vmem:[%s11926_s28 + $0x438] sm:$0xff] }
  0x5f   : > { %6743 = vmatpush.bf16.msra.mxu2 %v11133_v21  ;;  %v11191_v21 = vld [vmem:[%s11926_s28 + $0x478] sm:$0xff] }
  0x60   : > { %6756 = vmatpush.bf16.msra.mxu3 %v11141_v22  ;;  %v11199_v22 = vld [vmem:[%s11926_s28 + $0x4b8] sm:$0xff] }
  0x61   : > { %6718 = vmatpush.bf16.msra.mxu0 %v11116_v23  ;;  %v11207_v23 = vld [vmem:[%s11926_s28 + $0x4f8] sm:$0xff] }
  0x62   : > { %6731 = vmatpush.bf16.msra.mxu1 %v11124_v24  ;;  %v11182_v24 = vld [vmem:[%s11926_s28 + $0x430] sm:$0xff] }
  0x63   : > { %6744 = vmatpush.bf16.msra.mxu2 %v11132_v25  ;;  %v11190_v25 = vld [vmem:[%s11926_s28 + $0x470] sm:$0xff] }
  0x64   : > { %6757 = vmatpush.bf16.msra.mxu3 %v11140_v26  ;;  %v11198_v26 = vld [vmem:[%s11926_s28 + $0x4b0] sm:$0xff] }
  0x65   : > { %6719 = vmatpush.bf16.msra.mxu0 %v11115_v27  ;;  %v11206_v27 = vld [vmem:[%s11926_s28 + $0x4f0] sm:$0xff] }
  0x66   : > { %6732 = vmatpush.bf16.msra.mxu1 %v11123_v28  ;;  %v11181_v28 = vld [vmem:[%s11926_s28 + $0x428] sm:$0xff] }
  0x67   : > { %6745 = vmatpush.bf16.msra.mxu2 %v11131_v29  ;;  %v11189_v29 = vld [vmem:[%s11926_s28 + $0x468] sm:$0xff] }
  0x68   : > { %6758 = vmatpush.bf16.msra.mxu3 %v11139_v30  ;;  %v11197_v30 = vld [vmem:[%s11926_s28 + $0x4a8] sm:$0xff] }
  0x69   : > { %6720 = vmatpush.bf16.msra.mxu0 %v11114_v31  ;;  %v11205_v31 = vld [vmem:[%s11926_s28 + $0x4e8] sm:$0xff] }
  0x6a   : > { %6733 = vmatpush.bf16.msra.mxu1 %v11122_v32  ;;  %v11180_v32 = vld [vmem:[%s11926_s28 + $0x420] sm:$0xff] }
  0x6b   : > { %6746 = vmatpush.bf16.msra.mxu2 %v11130_v33  ;;  %v11188_v33 = vld [vmem:[%s11926_s28 + $0x460] sm:$0xff] }
  0x6c   : > { %6759 = vmatpush.bf16.msra.mxu3 %v11138_v34  ;;  %v11196_v34 = vld [vmem:[%s11926_s28 + $0x4a0] sm:$0xff] }
  0x6d   : > { %6721 = vmatpush.bf16.msra.mxu0 %v11113_v35  ;;  %v11204_v35 = vld [vmem:[%s11926_s28 + $0x4e0] sm:$0xff] }
  0x6e   : > { %6734 = vmatpush.bf16.msra.mxu1 %v11121_v36  ;;  %v11179_v36 = vld [vmem:[%s11926_s28 + $0x418] sm:$0xff] }
  0x6f   : > { %6747 = vmatpush.bf16.msra.mxu2 %v11129_v37  ;;  %v11187_v37 = vld [vmem:[%s11926_s28 + $0x458] sm:$0xff] }
  0x70   : > { %6760 = vmatpush.bf16.msra.mxu3 %v11137_v38  ;;  %v11195_v38 = vld [vmem:[%s11926_s28 + $0x498] sm:$0xff] }
  0x71   : > { %6722 = vmatpush.bf16.msra.mxu0 %v11112_v39  ;;  %v11203_v39 = vld [vmem:[%s11926_s28 + $0x4d8] sm:$0xff] }
  0x72   : > { %6735 = vmatpush.bf16.msra.mxu1 %v11120_v40  ;;  %v11178_v40 = vld [vmem:[%s11926_s28 + $0x410] sm:$0xff] }
  0x73   : > { %6748 = vmatpush.bf16.msra.mxu2 %v11128_v41  ;;  %v11186_v41 = vld [vmem:[%s11926_s28 + $0x450] sm:$0xff] }
  0x74   : > { %6761 = vmatpush.bf16.msra.mxu3 %v11136_v42  ;;  %6723 = vmatmul.bf16.vlgmr.msra.gmra.mxu0 %v1799_v47  ;;  %v11194_v42 = vld [vmem:[%s11926_s28 + $0x490] sm:$0xff]  ;;  %v11201_v47 = vld [vmem:[%s11926_s28 + $0x4c8] sm:$0xff] }
  0x75   : > { %6767 = vmatpush.bf16.msrb.mxu0 %v11151_v43  ;;  %6736 = vmatmul.bf16.vlgmr.msra.gmra.mxu1 %v1800_v49  ;;  %v11202_v43 = vld [vmem:[%s11926_s28 + $0x4d0] sm:$0xff]  ;;  %v11184_v49 = vld [vmem:[%s11926_s28 + $0x440] sm:$0xff] }
  0x76   : > { %6780 = vmatpush.bf16.msrb.mxu1 %v11159_v44  ;;  %6749 = vmatmul.bf16.vlgmr.msra.gmra.mxu2 %v1801_v48  ;;  %v11177_v44 = vld [vmem:[%s11926_s28 + $0x408] sm:$0xff]  ;;  %v11176_v48 = vld [vmem:[%s11926_s28 + $0x400] sm:$0xff] }
  0x77   : > { %6793 = vmatpush.bf16.msrb.mxu2 %v11167_v45  ;;  %6762 = vmatmul.bf16.vlgmr.msra.gmra.mxu3 %v1802_v50  ;;  %v11185_v45 = vld [vmem:[%s11926_s28 + $0x448] sm:$0xff]  ;;  %v11192_v50 = vld [vmem:[%s11926_s28 + $0x480] sm:$0xff] }
  0x78   : > { %6806 = vmatpush.bf16.msrb.mxu3 %v11175_v46  ;;  %v11193_v46 = vld [vmem:[%s11926_s28 + $0x488] sm:$0xff] }
  0x79   : > { %6768 = vmatpush.bf16.msrb.mxu0 %v11150_v51  ;;  %v11200_v51 = vld [vmem:[%s11926_s28 + $0x4c0] sm:$0xff] }
  0x7a   : > { %6781 = vmatpush.bf16.msrb.mxu1 %v11158_v52  ;;  %v11215_v52 = vld [vmem:[%s11926_s28 + $0x538] sm:$0xff] }
  0x7b   : > { %6794 = vmatpush.bf16.msrb.mxu2 %v11166_v53  ;;  %v11223_v53 = vld [vmem:[%s11926_s28 + $0x578] sm:$0xff] }
  0x7c   : > { %6807 = vmatpush.bf16.msrb.mxu3 %v11174_v54  ;;  %v11231_v54 = vld [vmem:[%s11926_s28 + $0x5b8] sm:$0xff] }
  0x7d   : > { %6769 = vmatpush.bf16.msrb.mxu0 %v11149_v55  ;;  %v11239_v55 = vld [vmem:[%s11926_s28 + $0x5f8] sm:$0xff] }
  0x7e   : > { %6782 = vmatpush.bf16.msrb.mxu1 %v11157_v56  ;;  %v1809_v56 = vld [vmem:[#allocation1] sm:$0xff] }
  0x7f   : > { %6795 = vmatpush.bf16.msrb.mxu2 %v11165_v57  ;;  %v1811_v57 = vld [vmem:[#allocation1 + $0x12] sm:$0xff] }
  0x80   : > { %6808 = vmatpush.bf16.msrb.mxu3 %v11173_v58  ;;  %v1810_v58 = vld [vmem:[#allocation1 + $0x9] sm:$0xff] }
  0x81   : > { %6770 = vmatpush.bf16.msrb.mxu0 %v11148_v59  ;;  %v1812_v59 = vld [vmem:[#allocation1 + $0x1b] sm:$0xff] }
  0x82   : > { %6783 = vmatpush.bf16.msrb.mxu1 %v11156_v60  ;;  %v11214_v60 = vld [vmem:[%s11926_s28 + $0x530] sm:$0xff] }
  0x83   : > { %6796 = vmatpush.bf16.msrb.mxu2 %v11164_v61  ;;  %v11222_v61 = vld [vmem:[%s11926_s28 + $0x570] sm:$0xff] }
  0x84   : > { %6809 = vmatpush.bf16.msrb.mxu3 %v11172_v62  ;;  %v11230_v62 = vld [vmem:[%s11926_s28 + $0x5b0] sm:$0xff] }
  0x85   : > { %6771 = vmatpush.bf16.msrb.mxu0 %v11147_v63  ;;  %v11238_v63 = vld [vmem:[%s11926_s28 + $0x5f0] sm:$0xff] }
  0x86   : > { %6784 = vmatpush.bf16.msrb.mxu1 %v11155_v0  ;;  %v11213_v0 = vld [vmem:[%s11926_s28 + $0x528] sm:$0xff] }
  0x87   : > { %6797 = vmatpush.bf16.msrb.mxu2 %v11163_v1  ;;  %v11221_v1 = vld [vmem:[%s11926_s28 + $0x568] sm:$0xff] }
  0x88   : > { %6810 = vmatpush.bf16.msrb.mxu3 %v11171_v2  ;;  %v11229_v2 = vld [vmem:[%s11926_s28 + $0x5a8] sm:$0xff] }
  0x89   : > { %6772 = vmatpush.bf16.msrb.mxu0 %v11146_v3  ;;  %v11237_v3 = vld [vmem:[%s11926_s28 + $0x5e8] sm:$0xff] }
  0x8a   : > { %6785 = vmatpush.bf16.msrb.mxu1 %v11154_v4 }
  0x8b   : > { %6798 = vmatpush.bf16.msrb.mxu2 %v11162_v5  ;;  %v11212_v5 = vld [vmem:[%s11926_s28 + $0x520] sm:$0xff] }
  0x8c   : > { %6811 = vmatpush.bf16.msrb.mxu3 %v11170_v6  ;;  %v11220_v6 = vld [vmem:[%s11926_s28 + $0x560] sm:$0xff] }
  0x8d   : > { %6773 = vmatpush.bf16.msrb.mxu0 %v11145_v7 }
  0x8e   : > { %6786 = vmatpush.bf16.msrb.mxu1 %v11153_v8  ;;  %v11228_v8 = vld [vmem:[%s11926_s28 + $0x5a0] sm:$0xff] }
  0x8f   : > { %6799 = vmatpush.bf16.msrb.mxu2 %v11161_v9  ;;  %v11236_v9 = vld [vmem:[%s11926_s28 + $0x5e0] sm:$0xff] }
  0x90   : > { %6812 = vmatpush.bf16.msrb.mxu3 %v11169_v10 }
  0x91   : > { %6774 = vmatpush.bf16.msrb.mxu0 %v11144_v16 }
  0x92   : > { %6787 = vmatpush.bf16.msrb.mxu1 %v11152_v17 }
  0x93   : > { %6800 = vmatpush.bf16.msrb.mxu2 %v11160_v18 }
  0x94   : > { %6813 = vmatpush.bf16.msrb.mxu3 %v11168_v19  ;;  %6775 = vmatmul.bf16.vlgmr.msrb.gmra.mxu0 %v1803_v11  ;;  %v11211_v11 = vld [vmem:[%s11926_s28 + $0x518] sm:$0xff]  ;;  %v11210_v19 = vld [vmem:[%s11926_s28 + $0x510] sm:$0xff] }
  0x95   : > { %6819 = vmatpush.bf16.msra.mxu0 %v11183_v20  ;;  %6788 = vmatmul.bf16.vlgmr.msrb.gmra.mxu1 %v1804_v13  ;;  %v11227_v13 = vld [vmem:[%s11926_s28 + $0x598] sm:$0xff]  ;;  %v11218_v20 = vld [vmem:[%s11926_s28 + $0x550] sm:$0xff] }
  0x96   : > { %6832 = vmatpush.bf16.msra.mxu1 %v11191_v21  ;;  %6801 = vmatmul.bf16.vlgmr.msrb.gmra.mxu2 %v1805_v12  ;;  %v11219_v12 = vld [vmem:[%s11926_s28 + $0x558] sm:$0xff] }
  0x97   : > { %6845 = vmatpush.bf16.msra.mxu2 %v11199_v22  ;;  %6814 = vmatmul.bf16.vlgmr.msrb.gmra.mxu3 %v1806_v14  ;;  %v11235_v14 = vld [vmem:[%s11926_s28 + $0x5d8] sm:$0xff] }
  0x98   : > { %6858 = vmatpush.bf16.msra.mxu3 %v11207_v23  ;;  %v11226_v23 = vld [vmem:[%s11926_s28 + $0x590] sm:$0xff] }
  0x99   : > { %6820 = vmatpush.bf16.msra.mxu0 %v11182_v24  ;;  %v11234_v24 = vld [vmem:[%s11926_s28 + $0x5d0] sm:$0xff] }
  0x9a   : > { %6833 = vmatpush.bf16.msra.mxu1 %v11190_v25  ;;  %v11209_v25 = vld [vmem:[%s11926_s28 + $0x508] sm:$0xff] }
  0x9b   : > { %6846 = vmatpush.bf16.msra.mxu2 %v11198_v26  ;;  %v11217_v26 = vld [vmem:[%s11926_s28 + $0x548] sm:$0xff] }
  0x9c   : > { %6859 = vmatpush.bf16.msra.mxu3 %v11206_v27  ;;  %v11225_v27 = vld [vmem:[%s11926_s28 + $0x588] sm:$0xff] }
  0x9d   : > { %6821 = vmatpush.bf16.msra.mxu0 %v11181_v28  ;;  %v11233_v28 = vld [vmem:[%s11926_s28 + $0x5c8] sm:$0xff] }
  0x9e   : > { %6834 = vmatpush.bf16.msra.mxu1 %v11189_v29  ;;  %v1813_v29 = vld [vmem:[#allocation1 + $0x24] sm:$0xff] }
  0x9f   : > { %6847 = vmatpush.bf16.msra.mxu2 %v11197_v30  ;;  %v1815_v30 = vld [vmem:[#allocation1 + $0x36] sm:$0xff] }
  0xa0   : > { %6860 = vmatpush.bf16.msra.mxu3 %v11205_v31 }
  0xa1   : > { %6822 = vmatpush.bf16.msra.mxu0 %v11180_v32  ;;  %v1814_v32 = vld [vmem:[#allocation1 + $0x2d] sm:$0xff] }
  0xa2   : > { %6835 = vmatpush.bf16.msra.mxu1 %v11188_v33  ;;  %v1816_v33 = vld [vmem:[#allocation1 + $0x3f] sm:$0xff] }
  0xa3   : > { %6848 = vmatpush.bf16.msra.mxu2 %v11196_v34 }
  0xa4   : > { %6861 = vmatpush.bf16.msra.mxu3 %v11204_v35  ;;  %v242_v35 = vld [vmem:[%s11921_s24 + $0x18] sm:$0xff] }
  0xa5   : > { %6823 = vmatpush.bf16.msra.mxu0 %v11179_v36  ;;  %1818 = vst [vmem:[#allocation1] ss:$9 sm:$0xff] %v242_v35  ;;  %v11208_v36 = vld [vmem:[%s11926_s28 + $0x500] sm:$0xff]  ;;  %v11301_v35 = vld [vmem:[%s11926_s28 + $0x7e8] sm:$0xff] }
  0xa6   : > { %6836 = vmatpush.bf16.msra.mxu1 %v11187_v37  ;;  %v11216_v37 = vld [vmem:[%s11926_s28 + $0x540] sm:$0xff] }
  0xa7   : > { %6849 = vmatpush.bf16.msra.mxu2 %v11195_v38  ;;  %v11224_v38 = vld [vmem:[%s11926_s28 + $0x580] sm:$0xff] }
  0xa8   : > { %6862 = vmatpush.bf16.msra.mxu3 %v11203_v39  ;;  %v11232_v39 = vld [vmem:[%s11926_s28 + $0x5c0] sm:$0xff] }
  0xa9   : > { %6824 = vmatpush.bf16.msra.mxu0 %v11178_v40  ;;  %v11247_v40 = vld [vmem:[%s11926_s28 + $0x638] sm:$0xff] }
  0xaa   : > { %6837 = vmatpush.bf16.msra.mxu1 %v11186_v41  ;;  %v11255_v41 = vld [vmem:[%s11926_s28 + $0x678] sm:$0xff] }
  0xab   : > { %6850 = vmatpush.bf16.msra.mxu2 %v11194_v42  ;;  %v11263_v42 = vld [vmem:[%s11926_s28 + $0x6b8] sm:$0xff] }
  0xac   : > { %6863 = vmatpush.bf16.msra.mxu3 %v11202_v43  ;;  %v11271_v43 = vld [vmem:[%s11926_s28 + $0x6f8] sm:$0xff] }
  0xad   : > { %6825 = vmatpush.bf16.msra.mxu0 %v11177_v44  ;;  %v11246_v44 = vld [vmem:[%s11926_s28 + $0x630] sm:$0xff] }
  0xae   : > { %6838 = vmatpush.bf16.msra.mxu1 %v11185_v45  ;;  %v11254_v45 = vld [vmem:[%s11926_s28 + $0x670] sm:$0xff] }
  0xaf   : > { %6851 = vmatpush.bf16.msra.mxu2 %v11193_v46  ;;  %v11262_v46 = vld [vmem:[%s11926_s28 + $0x6b0] sm:$0xff] }
  0xb0   : > { %6864 = vmatpush.bf16.msra.mxu3 %v11201_v47  ;;  %v11270_v47 = vld [vmem:[%s11926_s28 + $0x6f0] sm:$0xff] }
  0xb1   : > { %6826 = vmatpush.bf16.msra.mxu0 %v11176_v48  ;;  %v6620_v4 = vpop.f32.mrf.mxu0  ;;  %v11245_v48 = vld [vmem:[%s11926_s28 + $0x628] sm:$0xff] }
  0xb2   : > { %6839 = vmatpush.bf16.msra.mxu1 %v11184_v49  ;;  %v6633_v7 = vpop.f32.mrf.mxu1  ;;  %v11253_v49 = vld [vmem:[%s11926_s28 + $0x668] sm:$0xff] }
  0xb3   : > { %6852 = vmatpush.bf16.msra.mxu2 %v11192_v50  ;;  %v6634_v10 = vadd.f32 %v6633_v7, %v6620_v4  ;;  %v11261_v50 = vld [vmem:[%s11926_s28 + $0x6a8] sm:$0xff]  ;;  %v11242_v4 = vld [vmem:[%s11926_s28 + $0x610] sm:$0xff] }
  0xb4   : > { %6865 = vmatpush.bf16.msra.mxu3 %v11200_v51  ;;  %6827 = vmatmul.bf16.vlgmr.msra.gmra.mxu0 %v1809_v56  ;;  %v11269_v51 = vld [vmem:[%s11926_s28 + $0x6e8] sm:$0xff] }
  0xb5   : > { %6871 = vmatpush.bf16.msrb.mxu0 %v11215_v52  ;;  %6840 = vmatmul.bf16.vlgmr.msra.gmra.mxu1 %v1810_v58  ;;  %v11268_v58 = vld [vmem:[%s11926_s28 + $0x6e0] sm:$0xff] }
  0xb6   : > { %6884 = vmatpush.bf16.msrb.mxu1 %v11223_v53  ;;  %6853 = vmatmul.bf16.vlgmr.msra.gmra.mxu2 %v1811_v57  ;;  %v11244_v53 = vld [vmem:[%s11926_s28 + $0x620] sm:$0xff] }
  0xb7   : > { %6897 = vmatpush.bf16.msrb.mxu2 %v11231_v54  ;;  %6866 = vmatmul.bf16.vlgmr.msra.gmra.mxu3 %v1812_v59  ;;  %v11252_v54 = vld [vmem:[%s11926_s28 + $0x660] sm:$0xff] }
  0xb8   : > { %6910 = vmatpush.bf16.msrb.mxu3 %v11239_v55  ;;  %v11260_v57 = vld [vmem:[%s11926_s28 + $0x6a0] sm:$0xff] }
  0xb9   : > { %6872 = vmatpush.bf16.msrb.mxu0 %v11214_v60  ;;  %v6646_v15 = vpop.f32.mrf.mxu2  ;;  %v6622_v18 = vpop.f32.mrf.mxu0  ;;  %v11243_v60 = vld [vmem:[%s11926_s28 + $0x618] sm:$0xff] }
  0xba   : > { %6885 = vmatpush.bf16.msrb.mxu1 %v11222_v61  ;;  %v6647_v16 = vadd.f32 %v6646_v15, %v6634_v10  ;;  %v6659_v17 = vpop.f32.mrf.mxu3  ;;  %v6635_v22 = vpop.f32.mrf.mxu1  ;;  %v11251_v61 = vld [vmem:[%s11926_s28 + $0x658] sm:$0xff]  ;;  %v11241_v10 = vld [vmem:[%s11926_s28 + $0x608] sm:$0xff]  ;;  %v11256_v18 = vld [vmem:[%s11926_s28 + $0x680] sm:$0xff] }
  0xbb   : > { %6898 = vmatpush.bf16.msrb.mxu2 %v11230_v62  ;;  %v11259_v62 = vld [vmem:[%s11926_s28 + $0x698] sm:$0xff] }
  0xbc   : > { %6911 = vmatpush.bf16.msrb.mxu3 %v11238_v63  ;;  %v12114_v21 = vadd.f32 %v6659_v17, %v6647_v16  ;;  %v11267_v63 = vld [vmem:[%s11926_s28 + $0x6d8] sm:$0xff]  ;;  %v11240_v16 = vld [vmem:[%s11926_s28 + $0x600] sm:$0xff] }
  0xbd   : > { %6873 = vmatpush.bf16.msrb.mxu0 %v11213_v0  ;;  %v11248_v17 = vld [vmem:[%s11926_s28 + $0x640] sm:$0xff]  ;;  %v11295_v22 = vld [vmem:[%s11926_s28 + $0x7b8] sm:$0xff] }
  0xbe   : > { %6886 = vmatpush.bf16.msrb.mxu1 %v11221_v1 }
  0xbf   : > { %6899 = vmatpush.bf16.msrb.mxu2 %v11229_v2 }
  0xc0   : > { %6912 = vmatpush.bf16.msrb.mxu3 %v11237_v3 }
  0xc1   : > { %6874 = vmatpush.bf16.msrb.mxu0 %v11212_v5  ;;  %v6648_v31 = vpop.f32.mrf.mxu2  ;;  %v11250_v5 = vld [vmem:[%s11926_s28 + $0x650] sm:$0xff] }
  0xc2   : > { %6887 = vmatpush.bf16.msrb.mxu1 %v11220_v6  ;;  %v6661_v34 = vpop.f32.mrf.mxu3  ;;  %v11302_v31 = vld [vmem:[%s11926_s28 + $0x7f0] sm:$0xff] }
  0xc3   : > { %6900 = vmatpush.bf16.msrb.mxu2 %v11228_v8  ;;  %v11258_v8 = vld [vmem:[%s11926_s28 + $0x690] sm:$0xff]  ;;  %v11293_v34 = vld [vmem:[%s11926_s28 + $0x7a8] sm:$0xff] }
  0xc4   : > { %6913 = vmatpush.bf16.msrb.mxu3 %v11236_v9  ;;  %v11266_v9 = vld [vmem:[%s11926_s28 + $0x6d0] sm:$0xff] }
  0xc5   : > { %6875 = vmatpush.bf16.msrb.mxu0 %v11211_v11  ;;  %v11249_v11 = vld [vmem:[%s11926_s28 + $0x648] sm:$0xff] }
  0xc6   : > { %6888 = vmatpush.bf16.msrb.mxu1 %v11219_v12  ;;  %v11257_v12 = vld [vmem:[%s11926_s28 + $0x688] sm:$0xff] }
  0xc7   : > { %6901 = vmatpush.bf16.msrb.mxu2 %v11227_v13  ;;  %v11265_v13 = vld [vmem:[%s11926_s28 + $0x6c8] sm:$0xff] }
  0xc8   : > { %6914 = vmatpush.bf16.msrb.mxu3 %v11235_v14 }
  0xc9   : > { %6876 = vmatpush.bf16.msrb.mxu0 %v11210_v19  ;;  %v11264_v19 = vld [vmem:[%s11926_s28 + $0x6c0] sm:$0xff] }
  0xca   : > { %6889 = vmatpush.bf16.msrb.mxu1 %v11218_v20  ;;  %v11279_v20 = vld [vmem:[%s11926_s28 + $0x738] sm:$0xff] }
  0xcb   : > { %6902 = vmatpush.bf16.msrb.mxu2 %v11226_v23  ;;  %v11303_v23 = vld [vmem:[%s11926_s28 + $0x7f8] sm:$0xff] }
  0xcc   : > { %6915 = vmatpush.bf16.msrb.mxu3 %v11234_v24  ;;  %v1819_v24 = vld [vmem:[#allocation1] sm:$0xff] }
  0xcd   : > { %6877 = vmatpush.bf16.msrb.mxu0 %v11209_v25  ;;  %v1821_v25 = vld [vmem:[#allocation1 + $0x12] sm:$0xff] }
  0xce   : > { %6890 = vmatpush.bf16.msrb.mxu1 %v11217_v26  ;;  %v1820_v26 = vld [vmem:[#allocation1 + $0x9] sm:$0xff] }
  0xcf   : > { %6903 = vmatpush.bf16.msrb.mxu2 %v11225_v27  ;;  %v1822_v27 = vld [vmem:[#allocation1 + $0x1b] sm:$0xff] }
  0xd0   : > { %6916 = vmatpush.bf16.msrb.mxu3 %v11233_v28  ;;  %v11278_v28 = vld [vmem:[%s11926_s28 + $0x730] sm:$0xff] }
  0xd1   : > { %6878 = vmatpush.bf16.msrb.mxu0 %v11208_v36  ;;  %v6672_v52 = vpop.f32.mrf.mxu0 }
  0xd2   : > { %6891 = vmatpush.bf16.msrb.mxu1 %v11216_v37  ;;  %v6673_v55 = vadd.f32 %v6672_v52, %v12114_v21  ;;  %v6685_v56 = vpop.f32.mrf.mxu1  ;;  %v11287_v21 = vld [vmem:[%s11926_s28 + $0x778] sm:$0xff] }
  0xd3   : > { %6904 = vmatpush.bf16.msrb.mxu2 %v11224_v38  ;;  %v11276_v38 = vld [vmem:[%s11926_s28 + $0x720] sm:$0xff] }
  0xd4   : > { %6917 = vmatpush.bf16.msrb.mxu3 %v11232_v39  ;;  %6879 = vmatmul.bf16.vlgmr.msrb.gmra.mxu0 %v1813_v29  ;;  %v6686_v59 = vadd.f32 %v6685_v56, %v6673_v55  ;;  %v11286_v29 = vld [vmem:[%s11926_s28 + $0x770] sm:$0xff]  ;;  %v11284_v39 = vld [vmem:[%s11926_s28 + $0x760] sm:$0xff] }
  0xd5   : > { %6923 = vmatpush.bf16.msra.mxu0 %v11247_v40  ;;  %6892 = vmatmul.bf16.vlgmr.msrb.gmra.mxu1 %v1814_v32  ;;  %v11277_v32 = vld [vmem:[%s11926_s28 + $0x728] sm:$0xff]  ;;  %v11290_v56 = vld [vmem:[%s11926_s28 + $0x790] sm:$0xff] }
  0xd6   : > { %6936 = vmatpush.bf16.msra.mxu1 %v11255_v41  ;;  %6905 = vmatmul.bf16.vlgmr.msrb.gmra.mxu2 %v1815_v30  ;;  %v11294_v30 = vld [vmem:[%s11926_s28 + $0x7b0] sm:$0xff]  ;;  %v11292_v41 = vld [vmem:[%s11926_s28 + $0x7a0] sm:$0xff] }
  0xd7   : > { %6949 = vmatpush.bf16.msra.mxu2 %v11263_v42  ;;  %6918 = vmatmul.bf16.vlgmr.msrb.gmra.mxu3 %v1816_v33  ;;  %v11285_v33 = vld [vmem:[%s11926_s28 + $0x768] sm:$0xff]  ;;  %v11300_v42 = vld [vmem:[%s11926_s28 + $0x7e0] sm:$0xff] }
  0xd8   : > { %6962 = vmatpush.bf16.msra.mxu3 %v11271_v43 }
  0xd9   : > { %6924 = vmatpush.bf16.msra.mxu0 %v11246_v44  ;;  %v6698_v0 = vpop.f32.mrf.mxu2  ;;  %v6674_v3 = vpop.f32.mrf.mxu0  ;;  %v11275_v44 = vld [vmem:[%s11926_s28 + $0x718] sm:$0xff] }
  0xda   : > { %6937 = vmatpush.bf16.msra.mxu1 %v11254_v45  ;;  %v6699_v1 = vadd.f32 %v6698_v0, %v6686_v59  ;;  %v6711_v2 = vpop.f32.mrf.mxu3  ;;  %v6687_v7 = vpop.f32.mrf.mxu1  ;;  %v11283_v45 = vld [vmem:[%s11926_s28 + $0x758] sm:$0xff]  ;;  %v11281_v59 = vld [vmem:[%s11926_s28 + $0x748] sm:$0xff] }
  0xdb   : > { %6950 = vmatpush.bf16.msra.mxu2 %v11262_v46  ;;  %v11291_v46 = vld [vmem:[%s11926_s28 + $0x798] sm:$0xff]  ;;  %v11288_v7 = vld [vmem:[%s11926_s28 + $0x780] sm:$0xff] }
  0xdc   : > { %6963 = vmatpush.bf16.msra.mxu3 %v11270_v47  ;;  %v6712_v6 = vadd.f32 %v6711_v2, %v6699_v1  ;;  %v11299_v47 = vld [vmem:[%s11926_s28 + $0x7d8] sm:$0xff]  ;;  %v1824_v1 = vld [vmem:[#allocation1 + $0x2d] sm:$0xff] }
  0xdd   : > { %6925 = vmatpush.bf16.msra.mxu0 %v11245_v48  ;;  %v1826_v2 = vld [vmem:[#allocation1 + $0x3f] sm:$0xff] }
  0xde   : > { %6938 = vmatpush.bf16.msra.mxu1 %v11253_v49 }
  0xdf   : > { %6951 = vmatpush.bf16.msra.mxu2 %v11261_v50 }
  0xe0   : > { %6964 = vmatpush.bf16.msra.mxu3 %v11269_v51 }
  0xe1   : > { %6926 = vmatpush.bf16.msra.mxu0 %v11244_v53  ;;  %v6700_v14 = vpop.f32.mrf.mxu2  ;;  %v11274_v53 = vld [vmem:[%s11926_s28 + $0x710] sm:$0xff] }
  0xe2   : > { %6939 = vmatpush.bf16.msra.mxu1 %v11252_v54  ;;  %v6713_v15 = vpop.f32.mrf.mxu3  ;;  %v11282_v54 = vld [vmem:[%s11926_s28 + $0x750] sm:$0xff] }
  0xe3   : > { %6952 = vmatpush.bf16.msra.mxu2 %v11260_v57  ;;  %v11298_v57 = vld [vmem:[%s11926_s28 + $0x7d0] sm:$0xff] }
  0xe4   : > { %6965 = vmatpush.bf16.msra.mxu3 %v11268_v58  ;;  %v11273_v58 = vld [vmem:[%s11926_s28 + $0x708] sm:$0xff]  ;;  %v11318_v14 = vld [vmem:[%s11926_s28 + $0x870] sm:$0xff] }
  0xe5   : > { %6927 = vmatpush.bf16.msra.mxu0 %v11243_v60  ;;  %v11289_v60 = vld [vmem:[%s11926_s28 + $0x788] sm:$0xff]  ;;  %v11326_v15 = vld [vmem:[%s11926_s28 + $0x8b0] sm:$0xff] }
  0xe6   : > { %6940 = vmatpush.bf16.msra.mxu1 %v11251_v61  ;;  %v11297_v61 = vld [vmem:[%s11926_s28 + $0x7c8] sm:$0xff] }
  0xe7   : > { %6953 = vmatpush.bf16.msra.mxu2 %v11259_v62  ;;  %v1823_v62 = vld [vmem:[#allocation1 + $0x24] sm:$0xff] }
  0xe8   : > { %6966 = vmatpush.bf16.msra.mxu3 %v11267_v63  ;;  %v1825_v63 = vld [vmem:[#allocation1 + $0x36] sm:$0xff] }
  0xe9   : > { %6928 = vmatpush.bf16.msra.mxu0 %v11242_v4  ;;  %v243_v4 = vld [vmem:[%s11921_s24 + $0x20] sm:$0xff] }
  0xea   : > { %6941 = vmatpush.bf16.msra.mxu1 %v11250_v5  ;;  %1828 = vst [vmem:[#allocation1] ss:$9 sm:$0xff] %v243_v4  ;;  %v11272_v5 = vld [vmem:[%s11926_s28 + $0x700] sm:$0xff]  ;;  %v11365_v4 = vld [vmem:[%s11926_s28 + $0x9e8] sm:$0xff] }
  0xeb   : > { %6954 = vmatpush.bf16.msra.mxu2 %v11258_v8  ;;  %v11296_v8 = vld [vmem:[%s11926_s28 + $0x7c0] sm:$0xff] }
  0xec   : > { %6967 = vmatpush.bf16.msra.mxu3 %v11266_v9  ;;  %v11311_v9 = vld [vmem:[%s11926_s28 + $0x838] sm:$0xff] }
  0xed   : > { %6929 = vmatpush.bf16.msra.mxu0 %v11241_v10  ;;  %v11319_v10 = vld [vmem:[%s11926_s28 + $0x878] sm:$0xff] }
  0xee   : > { %6942 = vmatpush.bf16.msra.mxu1 %v11249_v11  ;;  %v11327_v11 = vld [vmem:[%s11926_s28 + $0x8b8] sm:$0xff] }
  0xef   : > { %6955 = vmatpush.bf16.msra.mxu2 %v11257_v12  ;;  %v11335_v12 = vld [vmem:[%s11926_s28 + $0x8f8] sm:$0xff] }
  0xf0   : > { %6968 = vmatpush.bf16.msra.mxu3 %v11265_v13  ;;  %v11310_v13 = vld [vmem:[%s11926_s28 + $0x830] sm:$0xff] }
  0xf1   : > { %6930 = vmatpush.bf16.msra.mxu0 %v11240_v16  ;;  %v6724_v36 = vpop.f32.mrf.mxu0  ;;  %v11334_v16 = vld [vmem:[%s11926_s28 + $0x8f0] sm:$0xff] }
  0xf2   : > { %6943 = vmatpush.bf16.msra.mxu1 %v11248_v17  ;;  %v6725_v37 = vadd.f32 %v6724_v36, %v6712_v6  ;;  %v6737_v40 = vpop.f32.mrf.mxu1  ;;  %v11280_v6 = vld [vmem:[%s11926_s28 + $0x740] sm:$0xff]  ;;  %v11309_v17 = vld [vmem:[%s11926_s28 + $0x828] sm:$0xff] }
  0xf3   : > { %6956 = vmatpush.bf16.msra.mxu2 %v11256_v18  ;;  %v11317_v18 = vld [vmem:[%s11926_s28 + $0x868] sm:$0xff] }
  0xf4   : > { %6969 = vmatpush.bf16.msra.mxu3 %v11264_v19  ;;  %6931 = vmatmul.bf16.vlgmr.msra.gmra.mxu0 %v1819_v24  ;;  %v6738_v43 = vadd.f32 %v6737_v40, %v6725_v37  ;;  %v11325_v19 = vld [vmem:[%s11926_s28 + $0x8a8] sm:$0xff]  ;;  %v11316_v24 = vld [vmem:[%s11926_s28 + $0x860] sm:$0xff] }
  0xf5   : > { %6975 = vmatpush.bf16.msrb.mxu0 %v11279_v20  ;;  %6944 = vmatmul.bf16.vlgmr.msra.gmra.mxu1 %v1820_v26  ;;  %v11333_v20 = vld [vmem:[%s11926_s28 + $0x8e8] sm:$0xff]  ;;  %v11324_v26 = vld [vmem:[%s11926_s28 + $0x8a0] sm:$0xff] }
  0xf6   : > { %6988 = vmatpush.bf16.msrb.mxu1 %v11287_v21  ;;  %6957 = vmatmul.bf16.vlgmr.msra.gmra.mxu2 %v1821_v25 }
  0xf7   : > { %7001 = vmatpush.bf16.msrb.mxu2 %v11295_v22  ;;  %6970 = vmatmul.bf16.vlgmr.msra.gmra.mxu3 %v1822_v27  ;;  %v11332_v27 = vld [vmem:[%s11926_s28 + $0x8e0] sm:$0xff] }
  0xf8   : > { %7014 = vmatpush.bf16.msrb.mxu3 %v11303_v23  ;;  %v11308_v23 = vld [vmem:[%s11926_s28 + $0x820] sm:$0xff] }
  0xf9   : > { %6976 = vmatpush.bf16.msrb.mxu0 %v11278_v28  ;;  %v6750_v48 = vpop.f32.mrf.mxu2  ;;  %v6726_v51 = vpop.f32.mrf.mxu0 }
  0xfa   : > { %6989 = vmatpush.bf16.msrb.mxu1 %v11286_v29  ;;  %v6751_v49 = vadd.f32 %v6750_v48, %v6738_v43  ;;  %v6763_v50 = vpop.f32.mrf.mxu3  ;;  %v6739_v55 = vpop.f32.mrf.mxu1  ;;  %v11307_v29 = vld [vmem:[%s11926_s28 + $0x818] sm:$0xff]  ;;  %v11305_v43 = vld [vmem:[%s11926_s28 + $0x808] sm:$0xff]  ;;  %v11320_v51 = vld [vmem:[%s11926_s28 + $0x880] sm:$0xff] }
  0xfb   : > { %7002 = vmatpush.bf16.msrb.mxu2 %v11294_v30  ;;  %v11315_v30 = vld [vmem:[%s11926_s28 + $0x858] sm:$0xff] }
  0xfc   : > { %7015 = vmatpush.bf16.msrb.mxu3 %v11302_v31  ;;  %v12180_v52 = vadd.f32 %v6763_v50, %v6751_v49  ;;  %v11323_v31 = vld [vmem:[%s11926_s28 + $0x898] sm:$0xff]  ;;  %v11304_v49 = vld [vmem:[%s11926_s28 + $0x800] sm:$0xff] }
  0xfd   : > { %6977 = vmatpush.bf16.msrb.mxu0 %v11277_v32  ;;  %v11331_v32 = vld [vmem:[%s11926_s28 + $0x8d8] sm:$0xff]  ;;  %v11312_v50 = vld [vmem:[%s11926_s28 + $0x840] sm:$0xff] }
  0xfe   : > { %6990 = vmatpush.bf16.msrb.mxu1 %v11285_v33  ;;  %v11359_v55 = vld [vmem:[%s11926_s28 + $0x9b8] sm:$0xff] }
  0xff   : > { %7003 = vmatpush.bf16.msrb.mxu2 %v11293_v34 }
 0x100   : > { %7016 = vmatpush.bf16.msrb.mxu3 %v11301_v35 }
 0x101   : > { %6978 = vmatpush.bf16.msrb.mxu0 %v11276_v38  ;;  %v6752_v0 = vpop.f32.mrf.mxu2  ;;  %v11306_v38 = vld [vmem:[%s11926_s28 + $0x810] sm:$0xff] }
 0x102   : > { %6991 = vmatpush.bf16.msrb.mxu1 %v11284_v39  ;;  %v6765_v3 = vpop.f32.mrf.mxu3  ;;  %v11314_v39 = vld [vmem:[%s11926_s28 + $0x850] sm:$0xff] }
 0x103   : > { %7004 = vmatpush.bf16.msrb.mxu2 %v11292_v41  ;;  %v11322_v41 = vld [vmem:[%s11926_s28 + $0x890] sm:$0xff]  ;;  %v11357_v3 = vld [vmem:[%s11926_s28 + $0x9a8] sm:$0xff] }
 0x104   : > { %7017 = vmatpush.bf16.msrb.mxu3 %v11300_v42  ;;  %v11330_v42 = vld [vmem:[%s11926_s28 + $0x8d0] sm:$0xff] }
 0x105   : > { %6979 = vmatpush.bf16.msrb.mxu0 %v11275_v44  ;;  %v11313_v44 = vld [vmem:[%s11926_s28 + $0x848] sm:$0xff]  ;;  %v11366_v0 = vld [vmem:[%s11926_s28 + $0x9f0] sm:$0xff] }
 0x106   : > { %6992 = vmatpush.bf16.msrb.mxu1 %v11283_v45  ;;  %v11321_v45 = vld [vmem:[%s11926_s28 + $0x888] sm:$0xff] }
 0x107   : > { %7005 = vmatpush.bf16.msrb.mxu2 %v11291_v46  ;;  %v11329_v46 = vld [vmem:[%s11926_s28 + $0x8c8] sm:$0xff] }
 0x108   : > { %7018 = vmatpush.bf16.msrb.mxu3 %v11299_v47 }
 0x109   : > { %6980 = vmatpush.bf16.msrb.mxu0 %v11274_v53  ;;  %v11343_v53 = vld [vmem:[%s11926_s28 + $0x938] sm:$0xff] }
 0x10a   : > { %6993 = vmatpush.bf16.msrb.mxu1 %v11282_v54  ;;  %v11351_v54 = vld [vmem:[%s11926_s28 + $0x978] sm:$0xff] }
 0x10b   : > { %7006 = vmatpush.bf16.msrb.mxu2 %v11290_v56  ;;  %v11367_v56 = vld [vmem:[%s11926_s28 + $0x9f8] sm:$0xff] }
 0x10c   : > { %7019 = vmatpush.bf16.msrb.mxu3 %v11298_v57  ;;  %v1829_v57 = vld [vmem:[#allocation1] sm:$0xff] }
 0x10d   : > { %6981 = vmatpush.bf16.msrb.mxu0 %v11273_v58  ;;  %v1831_v58 = vld [vmem:[#allocation1 + $0x12] sm:$0xff] }
 0x10e   : > { %6994 = vmatpush.bf16.msrb.mxu1 %v11281_v59  ;;  %v1830_v59 = vld [vmem:[#allocation1 + $0x9] sm:$0xff] }
 0x10f   : > { %7007 = vmatpush.bf16.msrb.mxu2 %v11289_v60  ;;  %v1832_v60 = vld [vmem:[#allocation1 + $0x1b] sm:$0xff] }
 0x110   : > { %7020 = vmatpush.bf16.msrb.mxu3 %v11297_v61  ;;  %v11342_v61 = vld [vmem:[%s11926_s28 + $0x930] sm:$0xff] }
 0x111   : > { %6982 = vmatpush.bf16.msrb.mxu0 %v11272_v5  ;;  %v6776_v21 = vpop.f32.mrf.mxu0 }
 0x112   : > { %6995 = vmatpush.bf16.msrb.mxu1 %v11280_v6  ;;  %v6777_v22 = vadd.f32 %v6776_v21, %v12180_v52  ;;  %v6789_v25 = vpop.f32.mrf.mxu1  ;;  %v11328_v52 = vld [vmem:[%s11926_s28 + $0x8c0] sm:$0xff] }
 0x113   : > { %7008 = vmatpush.bf16.msrb.mxu2 %v11288_v7  ;;  %v11340_v7 = vld [vmem:[%s11926_s28 + $0x920] sm:$0xff] }
 0x114   : > { %7021 = vmatpush.bf16.msrb.mxu3 %v11296_v8  ;;  %6983 = vmatmul.bf16.vlgmr.msrb.gmra.mxu0 %v1823_v62  ;;  %v6790_v28 = vadd.f32 %v6789_v25, %v6777_v22  ;;  %v11350_v62 = vld [vmem:[%s11926_s28 + $0x970] sm:$0xff]  ;;  %v11348_v8 = vld [vmem:[%s11926_s28 + $0x960] sm:$0xff] }
 0x115   : > { %7027 = vmatpush.bf16.msra.mxu0 %v11311_v9  ;;  %6996 = vmatmul.bf16.vlgmr.msrb.gmra.mxu1 %v1824_v1  ;;  %v11341_v1 = vld [vmem:[%s11926_s28 + $0x928] sm:$0xff]  ;;  %v11338_v22 = vld [vmem:[%s11926_s28 + $0x910] sm:$0xff] }
 0x116   : > { %7040 = vmatpush.bf16.msra.mxu1 %v11319_v10  ;;  %7009 = vmatmul.bf16.vlgmr.msrb.gmra.mxu2 %v1825_v63  ;;  %v11358_v63 = vld [vmem:[%s11926_s28 + $0x9b0] sm:$0xff]  ;;  %v11356_v10 = vld [vmem:[%s11926_s28 + $0x9a0] sm:$0xff] }
 0x117   : > { %7053 = vmatpush.bf16.msra.mxu2 %v11327_v11  ;;  %7022 = vmatmul.bf16.vlgmr.msrb.gmra.mxu3 %v1826_v2  ;;  %v11349_v2 = vld [vmem:[%s11926_s28 + $0x968] sm:$0xff]  ;;  %v11364_v11 = vld [vmem:[%s11926_s28 + $0x9e0] sm:$0xff]  ;;  %v11354_v25 = vld [vmem:[%s11926_s28 + $0x990] sm:$0xff] }
 0x118   : > { %7066 = vmatpush.bf16.msra.mxu3 %v11335_v12 }
 0x119   : > { %7028 = vmatpush.bf16.msra.mxu0 %v11310_v13  ;;  %v6802_v33 = vpop.f32.mrf.mxu2  ;;  %v6778_v36 = vpop.f32.mrf.mxu0  ;;  %v11339_v13 = vld [vmem:[%s11926_s28 + $0x918] sm:$0xff] }
 0x11a   : > { %7041 = vmatpush.bf16.msra.mxu1 %v11318_v14  ;;  %v6803_v34 = vadd.f32 %v6802_v33, %v6790_v28  ;;  %v6815_v35 = vpop.f32.mrf.mxu3  ;;  %v6791_v40 = vpop.f32.mrf.mxu1  ;;  %v11347_v14 = vld [vmem:[%s11926_s28 + $0x958] sm:$0xff]  ;;  %v11345_v28 = vld [vmem:[%s11926_s28 + $0x948] sm:$0xff] }
 0x11b   : > { %7054 = vmatpush.bf16.msra.mxu2 %v11326_v15  ;;  %v11355_v15 = vld [vmem:[%s11926_s28 + $0x998] sm:$0xff]  ;;  %v11352_v40 = vld [vmem:[%s11926_s28 + $0x980] sm:$0xff] }
 0x11c   : > { %7067 = vmatpush.bf16.msra.mxu3 %v11334_v16  ;;  %v6816_v37 = vadd.f32 %v6815_v35, %v6803_v34  ;;  %v11363_v16 = vld [vmem:[%s11926_s28 + $0x9d8] sm:$0xff]  ;;  %v1834_v34 = vld [vmem:[#allocation1 + $0x2d] sm:$0xff] }
 0x11d   : > { %7029 = vmatpush.bf16.msra.mxu0 %v11309_v17  ;;  %v1836_v35 = vld [vmem:[#allocation1 + $0x3f] sm:$0xff] }
 0x11e   : > { %7042 = vmatpush.bf16.msra.mxu1 %v11317_v18 }
 0x11f   : > { %7055 = vmatpush.bf16.msra.mxu2 %v11325_v19 }
 0x120   : > { %7068 = vmatpush.bf16.msra.mxu3 %v11333_v20 }
 0x121   : > { %7030 = vmatpush.bf16.msra.mxu0 %v11308_v23  ;;  %v6804_v47 = vpop.f32.mrf.mxu2  ;;  %v11346_v23 = vld [vmem:[%s11926_s28 + $0x950] sm:$0xff] }
 0x122   : > { %7043 = vmatpush.bf16.msra.mxu1 %v11316_v24  ;;  %v6817_v48 = vpop.f32.mrf.mxu3  ;;  %v11382_v47 = vld [vmem:[%s11926_s28 + $0xa70] sm:$0xff] }
 0x123   : > { %7056 = vmatpush.bf16.msra.mxu2 %v11324_v26  ;;  %v11362_v26 = vld [vmem:[%s11926_s28 + $0x9d0] sm:$0xff] }
 0x124   : > { %7069 = vmatpush.bf16.msra.mxu3 %v11332_v27  ;;  %v11337_v27 = vld [vmem:[%s11926_s28 + $0x908] sm:$0xff]  ;;  %v11390_v48 = vld [vmem:[%s11926_s28 + $0xab0] sm:$0xff] }
 0x125   : > { %7031 = vmatpush.bf16.msra.mxu0 %v11307_v29  ;;  %v11353_v29 = vld [vmem:[%s11926_s28 + $0x988] sm:$0xff] }
 0x126   : > { %7044 = vmatpush.bf16.msra.mxu1 %v11315_v30  ;;  %v11361_v30 = vld [vmem:[%s11926_s28 + $0x9c8] sm:$0xff] }
 0x127   : > { %7057 = vmatpush.bf16.msra.mxu2 %v11323_v31  ;;  %v1833_v31 = vld [vmem:[#allocation1 + $0x24] sm:$0xff] }
 0x128   : > { %7070 = vmatpush.bf16.msra.mxu3 %v11331_v32  ;;  %v1835_v32 = vld [vmem:[#allocation1 + $0x36] sm:$0xff] }
 0x129   : > { %7032 = vmatpush.bf16.msra.mxu0 %v11306_v38  ;;  %v11336_v38 = vld [vmem:[%s11926_s28 + $0x900] sm:$0xff] }
 0x12a   : > { %7045 = vmatpush.bf16.msra.mxu1 %v11314_v39  ;;  %v11344_v39 = vld [vmem:[%s11926_s28 + $0x940] sm:$0xff] }
 0x12b   : > { %7058 = vmatpush.bf16.msra.mxu2 %v11322_v41  ;;  %v11360_v41 = vld [vmem:[%s11926_s28 + $0x9c0] sm:$0xff] }
 0x12c   : > { %7071 = vmatpush.bf16.msra.mxu3 %v11330_v42  ;;  %v11375_v42 = vld [vmem:[%s11926_s28 + $0xa38] sm:$0xff] }
 0x12d   : > { %7033 = vmatpush.bf16.msra.mxu0 %v11305_v43  ;;  %v11383_v43 = vld [vmem:[%s11926_s28 + $0xa78] sm:$0xff] }
 0x12e   : > { %7046 = vmatpush.bf16.msra.mxu1 %v11313_v44  ;;  %v11391_v44 = vld [vmem:[%s11926_s28 + $0xab8] sm:$0xff] }
 0x12f   : > { %7059 = vmatpush.bf16.msra.mxu2 %v11321_v45  ;;  %v11399_v45 = vld [vmem:[%s11926_s28 + $0xaf8] sm:$0xff] }
 0x130   : > { %7072 = vmatpush.bf16.msra.mxu3 %v11329_v46  ;;  %v11374_v46 = vld [vmem:[%s11926_s28 + $0xa30] sm:$0xff] }
 0x131   : > { %7034 = vmatpush.bf16.msra.mxu0 %v11304_v49  ;;  %v6828_v5 = vpop.f32.mrf.mxu0  ;;  %v11398_v49 = vld [vmem:[%s11926_s28 + $0xaf0] sm:$0xff] }
 0x132   : > { %7047 = vmatpush.bf16.msra.mxu1 %v11312_v50  ;;  %v6829_v6 = vadd.f32 %v6828_v5, %v6816_v37  ;;  %v6841_v9 = vpop.f32.mrf.mxu1  ;;  %v244_v37 = vld [vmem:[%s11921_s24 + $0x28] sm:$0xff] }
 0x133   : > { %7060 = vmatpush.bf16.msra.mxu2 %v11320_v51  ;;  %1838 = vst [vmem:[#allocation1] ss:$9 sm:$0xff] %v244_v37  ;;  %v11373_v50 = vld [vmem:[%s11926_s28 + $0xa28] sm:$0xff] }
 0x134   : > { %7073 = vmatpush.bf16.msra.mxu3 %v11328_v52  ;;  %7035 = vmatmul.bf16.vlgmr.msra.gmra.mxu0 %v1829_v57  ;;  %v6842_v12 = vadd.f32 %v6841_v9, %v6829_v6  ;;  %v11381_v51 = vld [vmem:[%s11926_s28 + $0xa68] sm:$0xff]  ;;  %v11380_v57 = vld [vmem:[%s11926_s28 + $0xa60] sm:$0xff] }
 0x135   : > { %7079 = vmatpush.bf16.msrb.mxu0 %v11343_v53  ;;  %7048 = vmatmul.bf16.vlgmr.msra.gmra.mxu1 %v1830_v59  ;;  %v11389_v52 = vld [vmem:[%s11926_s28 + $0xaa8] sm:$0xff]  ;;  %v11388_v59 = vld [vmem:[%s11926_s28 + $0xaa0] sm:$0xff] }
 0x136   : > { %7092 = vmatpush.bf16.msrb.mxu1 %v11351_v54  ;;  %7061 = vmatmul.bf16.vlgmr.msra.gmra.mxu2 %v1831_v58  ;;  %v11397_v53 = vld [vmem:[%s11926_s28 + $0xae8] sm:$0xff] }
 0x137   : > { %7105 = vmatpush.bf16.msrb.mxu2 %v11359_v55  ;;  %7074 = vmatmul.bf16.vlgmr.msra.gmra.mxu3 %v1832_v60  ;;  %v11396_v60 = vld [vmem:[%s11926_s28 + $0xae0] sm:$0xff]  ;;  %v11429_v37 = vld [vmem:[%s11926_s28 + $0xbe8] sm:$0xff] }
 0x138   : > { %7118 = vmatpush.bf16.msrb.mxu3 %v11367_v56  ;;  %v11372_v56 = vld [vmem:[%s11926_s28 + $0xa20] sm:$0xff] }
 0x139   : > { %7080 = vmatpush.bf16.msrb.mxu0 %v11342_v61  ;;  %v6854_v17 = vpop.f32.mrf.mxu2  ;;  %v6830_v20 = vpop.f32.mrf.mxu0 }
 0x13a   : > { %7093 = vmatpush.bf16.msrb.mxu1 %v11350_v62  ;;  %v6855_v18 = vadd.f32 %v6854_v17, %v6842_v12  ;;  %v6867_v19 = vpop.f32.mrf.mxu3  ;;  %v6843_v24 = vpop.f32.mrf.mxu1  ;;  %v11371_v62 = vld [vmem:[%s11926_s28 + $0xa18] sm:$0xff]  ;;  %v11369_v12 = vld [vmem:[%s11926_s28 + $0xa08] sm:$0xff]  ;;  %v11384_v20 = vld [vmem:[%s11926_s28 + $0xa80] sm:$0xff] }
 0x13b   : > { %7106 = vmatpush.bf16.msrb.mxu2 %v11358_v63  ;;  %v11379_v63 = vld [vmem:[%s11926_s28 + $0xa58] sm:$0xff] }
 0x13c   : > { %7119 = vmatpush.bf16.msrb.mxu3 %v11366_v0  ;;  %v12248_v21 = vadd.f32 %v6867_v19, %v6855_v18  ;;  %v11387_v0 = vld [vmem:[%s11926_s28 + $0xa98] sm:$0xff]  ;;  %v11368_v18 = vld [vmem:[%s11926_s28 + $0xa00] sm:$0xff] }
 0x13d   : > { %7081 = vmatpush.bf16.msrb.mxu0 %v11341_v1  ;;  %v11395_v1 = vld [vmem:[%s11926_s28 + $0xad8] sm:$0xff]  ;;  %v11376_v19 = vld [vmem:[%s11926_s28 + $0xa40] sm:$0xff] }
 0x13e   : > { %7094 = vmatpush.bf16.msrb.mxu1 %v11349_v2  ;;  %v11423_v24 = vld [vmem:[%s11926_s28 + $0xbb8] sm:$0xff] }
 0x13f   : > { %7107 = vmatpush.bf16.msrb.mxu2 %v11357_v3 }
 0x140   : > { %7120 = vmatpush.bf16.msrb.mxu3 %v11365_v4 }
 0x141   : > { %7082 = vmatpush.bf16.msrb.mxu0 %v11340_v7  ;;  %v6856_v33 = vpop.f32.mrf.mxu2  ;;  %v11370_v7 = vld [vmem:[%s11926_s28 + $0xa10] sm:$0xff] }
 0x142   : > { %7095 = vmatpush.bf16.msrb.mxu1 %v11348_v8  ;;  %v6869_v36 = vpop.f32.mrf.mxu3  ;;  %v11378_v8 = vld [vmem:[%s11926_s28 + $0xa50] sm:$0xff] }
 0x143   : > { %7108 = vmatpush.bf16.msrb.mxu2 %v11356_v10  ;;  %v11386_v10 = vld [vmem:[%s11926_s28 + $0xa90] sm:$0xff]  ;;  %v11421_v36 = vld [vmem:[%s11926_s28 + $0xba8] sm:$0xff] }
 0x144   : > { %7121 = vmatpush.bf16.msrb.mxu3 %v11364_v11  ;;  %v11394_v11 = vld [vmem:[%s11926_s28 + $0xad0] sm:$0xff] }
 0x145   : > { %7083 = vmatpush.bf16.msrb.mxu0 %v11339_v13  ;;  %v11377_v13 = vld [vmem:[%s11926_s28 + $0xa48] sm:$0xff]  ;;  %v11430_v33 = vld [vmem:[%s11926_s28 + $0xbf0] sm:$0xff] }
 0x146   : > { %7096 = vmatpush.bf16.msrb.mxu1 %v11347_v14  ;;  %v11385_v14 = vld [vmem:[%s11926_s28 + $0xa88] sm:$0xff] }
 0x147   : > { %7109 = vmatpush.bf16.msrb.mxu2 %v11355_v15  ;;  %v11393_v15 = vld [vmem:[%s11926_s28 + $0xac8] sm:$0xff] }
 0x148   : > { %7122 = vmatpush.bf16.msrb.mxu3 %v11363_v16 }
 0x149   : > { %7084 = vmatpush.bf16.msrb.mxu0 %v11338_v22  ;;  %v11407_v22 = vld [vmem:[%s11926_s28 + $0xb38] sm:$0xff] }
 0x14a   : > { %7097 = vmatpush.bf16.msrb.mxu1 %v11346_v23  ;;  %v11415_v23 = vld [vmem:[%s11926_s28 + $0xb78] sm:$0xff] }
 0x14b   : > { %7110 = vmatpush.bf16.msrb.mxu2 %v11354_v25  ;;  %v11431_v25 = vld [vmem:[%s11926_s28 + $0xbf8] sm:$0xff] }
 0x14c   : > { %7123 = vmatpush.bf16.msrb.mxu3 %v11362_v26  ;;  %v1839_v26 = vld [vmem:[#allocation1] sm:$0xff] }
 0x14d   : > { %7085 = vmatpush.bf16.msrb.mxu0 %v11337_v27  ;;  %v1841_v27 = vld [vmem:[#allocation1 + $0x12] sm:$0xff] }
 0x14e   : > { %7098 = vmatpush.bf16.msrb.mxu1 %v11345_v28  ;;  %v1840_v28 = vld [vmem:[#allocation1 + $0x9] sm:$0xff] }
 0x14f   : > { %7111 = vmatpush.bf16.msrb.mxu2 %v11353_v29  ;;  %v1842_v29 = vld [vmem:[#allocation1 + $0x1b] sm:$0xff] }
 0x150   : > { %7124 = vmatpush.bf16.msrb.mxu3 %v11361_v30  ;;  %v11406_v30 = vld [vmem:[%s11926_s28 + $0xb30] sm:$0xff] }
 0x151   : > { %7086 = vmatpush.bf16.msrb.mxu0 %v11336_v38  ;;  %v6880_v54 = vpop.f32.mrf.mxu0 }
 0x152   : > { %7099 = vmatpush.bf16.msrb.mxu1 %v11344_v39  ;;  %v6881_v55 = vadd.f32 %v6880_v54, %v12248_v21  ;;  %v6893_v58 = vpop.f32.mrf.mxu1  ;;  %v11392_v21 = vld [vmem:[%s11926_s28 + $0xac0] sm:$0xff] }
 0x153   : > { %7112 = vmatpush.bf16.msrb.mxu2 %v11352_v40  ;;  %v11404_v40 = vld [vmem:[%s11926_s28 + $0xb20] sm:$0xff] }
 0x154   : > { %7125 = vmatpush.bf16.msrb.mxu3 %v11360_v41  ;;  %7087 = vmatmul.bf16.vlgmr.msrb.gmra.mxu0 %v1833_v31  ;;  %v6894_v61 = vadd.f32 %v6893_v58, %v6881_v55  ;;  %v11414_v31 = vld [vmem:[%s11926_s28 + $0xb70] sm:$0xff]  ;;  %v11412_v41 = vld [vmem:[%s11926_s28 + $0xb60] sm:$0xff] }
 0x155   : > { %7131 = vmatpush.bf16.msra.mxu0 %v11375_v42  ;;  %7100 = vmatmul.bf16.vlgmr.msrb.gmra.mxu1 %v1834_v34  ;;  %v11405_v34 = vld [vmem:[%s11926_s28 + $0xb28] sm:$0xff]  ;;  %v11402_v55 = vld [vmem:[%s11926_s28 + $0xb10] sm:$0xff] }
 0x156   : > { %7144 = vmatpush.bf16.msra.mxu1 %v11383_v43  ;;  %7113 = vmatmul.bf16.vlgmr.msrb.gmra.mxu2 %v1835_v32  ;;  %v11422_v32 = vld [vmem:[%s11926_s28 + $0xbb0] sm:$0xff]  ;;  %v11420_v43 = vld [vmem:[%s11926_s28 + $0xba0] sm:$0xff] }
 0x157   : > { %7157 = vmatpush.bf16.msra.mxu2 %v11391_v44  ;;  %7126 = vmatmul.bf16.vlgmr.msrb.gmra.mxu3 %v1836_v35  ;;  %v11413_v35 = vld [vmem:[%s11926_s28 + $0xb68] sm:$0xff]  ;;  %v11428_v44 = vld [vmem:[%s11926_s28 + $0xbe0] sm:$0xff]  ;;  %v11418_v58 = vld [vmem:[%s11926_s28 + $0xb90] sm:$0xff] }
 0x158   : > { %7170 = vmatpush.bf16.msra.mxu3 %v11399_v45 }
 0x159   : > { %7132 = vmatpush.bf16.msra.mxu0 %v11374_v46  ;;  %v6906_v2 = vpop.f32.mrf.mxu2  ;;  %v6882_v5 = vpop.f32.mrf.mxu0  ;;  %v11403_v46 = vld [vmem:[%s11926_s28 + $0xb18] sm:$0xff] }
 0x15a   : > { %7145 = vmatpush.bf16.msra.mxu1 %v11382_v47  ;;  %v6907_v3 = vadd.f32 %v6906_v2, %v6894_v61  ;;  %v6919_v4 = vpop.f32.mrf.mxu3  ;;  %v6895_v9 = vpop.f32.mrf.mxu1  ;;  %v11411_v47 = vld [vmem:[%s11926_s28 + $0xb58] sm:$0xff]  ;;  %v11409_v61 = vld [vmem:[%s11926_s28 + $0xb48] sm:$0xff] }
 0x15b   : > { %7158 = vmatpush.bf16.msra.mxu2 %v11390_v48  ;;  %v11419_v48 = vld [vmem:[%s11926_s28 + $0xb98] sm:$0xff]  ;;  %v11416_v9 = vld [vmem:[%s11926_s28 + $0xb80] sm:$0xff] }
 0x15c   : > { %7171 = vmatpush.bf16.msra.mxu3 %v11398_v49  ;;  %v6920_v6 = vadd.f32 %v6919_v4, %v6907_v3  ;;  %v11427_v49 = vld [vmem:[%s11926_s28 + $0xbd8] sm:$0xff]  ;;  %v1844_v3 = vld [vmem:[#allocation1 + $0x2d] sm:$0xff] }
 0x15d   : > { %7133 = vmatpush.bf16.msra.mxu0 %v11373_v50  ;;  %v1846_v4 = vld [vmem:[#allocation1 + $0x3f] sm:$0xff] }
 0x15e   : > { %7146 = vmatpush.bf16.msra.mxu1 %v11381_v51 }
 0x15f   : > { %7159 = vmatpush.bf16.msra.mxu2 %v11389_v52 }
 0x160   : > { %7172 = vmatpush.bf16.msra.mxu3 %v11397_v53 }
 0x161   : > { %7134 = vmatpush.bf16.msra.mxu0 %v11372_v56  ;;  %v6908_v16 = vpop.f32.mrf.mxu2  ;;  %v11410_v56 = vld [vmem:[%s11926_s28 + $0xb50] sm:$0xff] }
 0x162   : > { %7147 = vmatpush.bf16.msra.mxu1 %v11380_v57  ;;  %v6921_v17 = vpop.f32.mrf.mxu3  ;;  %v11446_v16 = vld [vmem:[%s11926_s28 + $0xc70] sm:$0xff] }
 0x163   : > { %7160 = vmatpush.bf16.msra.mxu2 %v11388_v59  ;;  %v11426_v59 = vld [vmem:[%s11926_s28 + $0xbd0] sm:$0xff] }
 0x164   : > { %7173 = vmatpush.bf16.msra.mxu3 %v11396_v60  ;;  %v11401_v60 = vld [vmem:[%s11926_s28 + $0xb08] sm:$0xff]  ;;  %v11454_v17 = vld [vmem:[%s11926_s28 + $0xcb0] sm:$0xff] }
 0x165   : > { %7135 = vmatpush.bf16.msra.mxu0 %v11371_v62  ;;  %v11417_v62 = vld [vmem:[%s11926_s28 + $0xb88] sm:$0xff] }
 0x166   : > { %7148 = vmatpush.bf16.msra.mxu1 %v11379_v63  ;;  %v11425_v63 = vld [vmem:[%s11926_s28 + $0xbc8] sm:$0xff] }
 0x167   : > { %7161 = vmatpush.bf16.msra.mxu2 %v11387_v0  ;;  %v1843_v0 = vld [vmem:[#allocation1 + $0x24] sm:$0xff] }
 0x168   : > { %7174 = vmatpush.bf16.msra.mxu3 %v11395_v1  ;;  %v1845_v1 = vld [vmem:[#allocation1 + $0x36] sm:$0xff] }
 0x169   : > { %7136 = vmatpush.bf16.msra.mxu0 %v11370_v7  ;;  %v11400_v7 = vld [vmem:[%s11926_s28 + $0xb00] sm:$0xff] }
 0x16a   : > { %7149 = vmatpush.bf16.msra.mxu1 %v11378_v8  ;;  %v11408_v8 = vld [vmem:[%s11926_s28 + $0xb40] sm:$0xff] }
 0x16b   : > { %7162 = vmatpush.bf16.msra.mxu2 %v11386_v10  ;;  %v11424_v10 = vld [vmem:[%s11926_s28 + $0xbc0] sm:$0xff] }
 0x16c   : > { %7175 = vmatpush.bf16.msra.mxu3 %v11394_v11  ;;  %v11439_v11 = vld [vmem:[%s11926_s28 + $0xc38] sm:$0xff] }
 0x16d   : > { %7137 = vmatpush.bf16.msra.mxu0 %v11369_v12  ;;  %v11447_v12 = vld [vmem:[%s11926_s28 + $0xc78] sm:$0xff] }
 0x16e   : > { %7150 = vmatpush.bf16.msra.mxu1 %v11377_v13  ;;  %v11455_v13 = vld [vmem:[%s11926_s28 + $0xcb8] sm:$0xff] }
 0x16f   : > { %7163 = vmatpush.bf16.msra.mxu2 %v11385_v14  ;;  %v11463_v14 = vld [vmem:[%s11926_s28 + $0xcf8] sm:$0xff] }
 0x170   : > { %7176 = vmatpush.bf16.msra.mxu3 %v11393_v15  ;;  %v11438_v15 = vld [vmem:[%s11926_s28 + $0xc30] sm:$0xff] }
 0x171   : > { %7138 = vmatpush.bf16.msra.mxu0 %v11368_v18  ;;  %v6932_v38 = vpop.f32.mrf.mxu0  ;;  %v11462_v18 = vld [vmem:[%s11926_s28 + $0xcf0] sm:$0xff] }
 0x172   : > { %7151 = vmatpush.bf16.msra.mxu1 %v11376_v19  ;;  %v6933_v39 = vadd.f32 %v6932_v38, %v6920_v6  ;;  %v6945_v42 = vpop.f32.mrf.mxu1  ;;  %v245_v6 = vld [vmem:[%s11921_s24 + $0x30] sm:$0xff]  ;;  %v11437_v19 = vld [vmem:[%s11926_s28 + $0xc28] sm:$0xff] }
 0x173   : > { %7164 = vmatpush.bf16.msra.mxu2 %v11384_v20  ;;  %1848 = vst [vmem:[#allocation1] ss:$9 sm:$0xff] %v245_v6  ;;  %v11445_v20 = vld [vmem:[%s11926_s28 + $0xc68] sm:$0xff] }
 0x174   : > { %7177 = vmatpush.bf16.msra.mxu3 %v11392_v21  ;;  %7139 = vmatmul.bf16.vlgmr.msra.gmra.mxu0 %v1839_v26  ;;  %v6946_v45 = vadd.f32 %v6945_v42, %v6933_v39  ;;  %v11453_v21 = vld [vmem:[%s11926_s28 + $0xca8] sm:$0xff]  ;;  %v11444_v26 = vld [vmem:[%s11926_s28 + $0xc60] sm:$0xff] }
 0x175   : > { %7183 = vmatpush.bf16.msrb.mxu0 %v11407_v22  ;;  %7152 = vmatmul.bf16.vlgmr.msra.gmra.mxu1 %v1840_v28  ;;  %v11461_v22 = vld [vmem:[%s11926_s28 + $0xce8] sm:$0xff]  ;;  %v11452_v28 = vld [vmem:[%s11926_s28 + $0xca0] sm:$0xff] }
 0x176   : > { %7196 = vmatpush.bf16.msrb.mxu1 %v11415_v23  ;;  %7165 = vmatmul.bf16.vlgmr.msra.gmra.mxu2 %v1841_v27  ;;  %v11493_v6 = vld [vmem:[%s11926_s28 + $0xde8] sm:$0xff] }
 0x177   : > { %7209 = vmatpush.bf16.msrb.mxu2 %v11423_v24  ;;  %7178 = vmatmul.bf16.vlgmr.msra.gmra.mxu3 %v1842_v29  ;;  %v11460_v29 = vld [vmem:[%s11926_s28 + $0xce0] sm:$0xff] }
 0x178   : > { %7222 = vmatpush.bf16.msrb.mxu3 %v11431_v25  ;;  %v11436_v25 = vld [vmem:[%s11926_s28 + $0xc20] sm:$0xff] }
 0x179   : > { %7184 = vmatpush.bf16.msrb.mxu0 %v11406_v30  ;;  %v6958_v50 = vpop.f32.mrf.mxu2  ;;  %v6934_v53 = vpop.f32.mrf.mxu0 }
 0x17a   : > { %7197 = vmatpush.bf16.msrb.mxu1 %v11414_v31  ;;  %v6959_v51 = vadd.f32 %v6958_v50, %v6946_v45  ;;  %v6971_v52 = vpop.f32.mrf.mxu3  ;;  %v6947_v57 = vpop.f32.mrf.mxu1  ;;  %v11435_v31 = vld [vmem:[%s11926_s28 + $0xc18] sm:$0xff]  ;;  %v11433_v45 = vld [vmem:[%s11926_s28 + $0xc08] sm:$0xff]  ;;  %v11448_v53 = vld [vmem:[%s11926_s28 + $0xc80] sm:$0xff] }
 0x17b   : > { %7210 = vmatpush.bf16.msrb.mxu2 %v11422_v32  ;;  %v11443_v32 = vld [vmem:[%s11926_s28 + $0xc58] sm:$0xff] }
 0x17c   : > { %7223 = vmatpush.bf16.msrb.mxu3 %v11430_v33  ;;  %v12316_v54 = vadd.f32 %v6971_v52, %v6959_v51  ;;  %v11451_v33 = vld [vmem:[%s11926_s28 + $0xc98] sm:$0xff]  ;;  %v11432_v51 = vld [vmem:[%s11926_s28 + $0xc00] sm:$0xff] }
 0x17d   : > { %7185 = vmatpush.bf16.msrb.mxu0 %v11405_v34  ;;  %v11459_v34 = vld [vmem:[%s11926_s28 + $0xcd8] sm:$0xff]  ;;  %v11440_v52 = vld [vmem:[%s11926_s28 + $0xc40] sm:$0xff] }
 0x17e   : > { %7198 = vmatpush.bf16.msrb.mxu1 %v11413_v35  ;;  %v11487_v57 = vld [vmem:[%s11926_s28 + $0xdb8] sm:$0xff] }
 0x17f   : > { %7211 = vmatpush.bf16.msrb.mxu2 %v11421_v36 }
 0x180   : > { %7224 = vmatpush.bf16.msrb.mxu3 %v11429_v37 }
 0x181   : > { %7186 = vmatpush.bf16.msrb.mxu0 %v11404_v40  ;;  %v6960_v2 = vpop.f32.mrf.mxu2  ;;  %v11434_v40 = vld [vmem:[%s11926_s28 + $0xc10] sm:$0xff] }
 0x182   : > { %7199 = vmatpush.bf16.msrb.mxu1 %v11412_v41  ;;  %v6973_v5 = vpop.f32.mrf.mxu3  ;;  %v11442_v41 = vld [vmem:[%s11926_s28 + $0xc50] sm:$0xff] }
 0x183   : > { %7212 = vmatpush.bf16.msrb.mxu2 %v11420_v43  ;;  %v11450_v43 = vld [vmem:[%s11926_s28 + $0xc90] sm:$0xff]  ;;  %v11485_v5 = vld [vmem:[%s11926_s28 + $0xda8] sm:$0xff] }
 0x184   : > { %7225 = vmatpush.bf16.msrb.mxu3 %v11428_v44  ;;  %v11458_v44 = vld [vmem:[%s11926_s28 + $0xcd0] sm:$0xff] }
 0x185   : > { %7187 = vmatpush.bf16.msrb.mxu0 %v11403_v46  ;;  %v11441_v46 = vld [vmem:[%s11926_s28 + $0xc48] sm:$0xff]  ;;  %v11494_v2 = vld [vmem:[%s11926_s28 + $0xdf0] sm:$0xff] }
 0x186   : > { %7200 = vmatpush.bf16.msrb.mxu1 %v11411_v47  ;;  %v11449_v47 = vld [vmem:[%s11926_s28 + $0xc88] sm:$0xff] }
 0x187   : > { %7213 = vmatpush.bf16.msrb.mxu2 %v11419_v48  ;;  %v11457_v48 = vld [vmem:[%s11926_s28 + $0xcc8] sm:$0xff] }
 0x188   : > { %7226 = vmatpush.bf16.msrb.mxu3 %v11427_v49 }
 0x189   : > { %7188 = vmatpush.bf16.msrb.mxu0 %v11402_v55  ;;  %v11471_v55 = vld [vmem:[%s11926_s28 + $0xd38] sm:$0xff] }
 0x18a   : > { %7201 = vmatpush.bf16.msrb.mxu1 %v11410_v56  ;;  %v11479_v56 = vld [vmem:[%s11926_s28 + $0xd78] sm:$0xff] }
 0x18b   : > { %7214 = vmatpush.bf16.msrb.mxu2 %v11418_v58  ;;  %v11495_v58 = vld [vmem:[%s11926_s28 + $0xdf8] sm:$0xff] }
 0x18c   : > { %7227 = vmatpush.bf16.msrb.mxu3 %v11426_v59  ;;  %v1849_v59 = vld [vmem:[#allocation1] sm:$0xff] }
 0x18d   : > { %7189 = vmatpush.bf16.msrb.mxu0 %v11401_v60  ;;  %v1851_v60 = vld [vmem:[#allocation1 + $0x12] sm:$0xff] }
 0x18e   : > { %7202 = vmatpush.bf16.msrb.mxu1 %v11409_v61  ;;  %v1850_v61 = vld [vmem:[#allocation1 + $0x9] sm:$0xff] }
 0x18f   : > { %7215 = vmatpush.bf16.msrb.mxu2 %v11417_v62  ;;  %v1852_v62 = vld [vmem:[#allocation1 + $0x1b] sm:$0xff] }
 0x190   : > { %7228 = vmatpush.bf16.msrb.mxu3 %v11425_v63  ;;  %v11470_v63 = vld [vmem:[%s11926_s28 + $0xd30] sm:$0xff] }
 0x191   : > { %7190 = vmatpush.bf16.msrb.mxu0 %v11400_v7  ;;  %v6984_v23 = vpop.f32.mrf.mxu0 }
 0x192   : > { %7203 = vmatpush.bf16.msrb.mxu1 %v11408_v8  ;;  %v6985_v24 = vadd.f32 %v6984_v23, %v12316_v54  ;;  %v6997_v27 = vpop.f32.mrf.mxu1  ;;  %v11456_v54 = vld [vmem:[%s11926_s28 + $0xcc0] sm:$0xff] }
 0x193   : > { %7216 = vmatpush.bf16.msrb.mxu2 %v11416_v9  ;;  %v11468_v9 = vld [vmem:[%s11926_s28 + $0xd20] sm:$0xff] }
 0x194   : > { %7229 = vmatpush.bf16.msrb.mxu3 %v11424_v10  ;;  %7191 = vmatmul.bf16.vlgmr.msrb.gmra.mxu0 %v1843_v0  ;;  %v6998_v30 = vadd.f32 %v6997_v27, %v6985_v24  ;;  %v11478_v0 = vld [vmem:[%s11926_s28 + $0xd70] sm:$0xff]  ;;  %v11476_v10 = vld [vmem:[%s11926_s28 + $0xd60] sm:$0xff] }
 0x195   : > { %7235 = vmatpush.bf16.msra.mxu0 %v11439_v11  ;;  %7204 = vmatmul.bf16.vlgmr.msrb.gmra.mxu1 %v1844_v3  ;;  %v11469_v3 = vld [vmem:[%s11926_s28 + $0xd28] sm:$0xff]  ;;  %v11466_v24 = vld [vmem:[%s11926_s28 + $0xd10] sm:$0xff] }
 0x196   : > { %7248 = vmatpush.bf16.msra.mxu1 %v11447_v12  ;;  %7217 = vmatmul.bf16.vlgmr.msrb.gmra.mxu2 %v1845_v1  ;;  %v11486_v1 = vld [vmem:[%s11926_s28 + $0xdb0] sm:$0xff]  ;;  %v11484_v12 = vld [vmem:[%s11926_s28 + $0xda0] sm:$0xff] }
 0x197   : > { %7261 = vmatpush.bf16.msra.mxu2 %v11455_v13  ;;  %7230 = vmatmul.bf16.vlgmr.msrb.gmra.mxu3 %v1846_v4  ;;  %v11477_v4 = vld [vmem:[%s11926_s28 + $0xd68] sm:$0xff]  ;;  %v11492_v13 = vld [vmem:[%s11926_s28 + $0xde0] sm:$0xff]  ;;  %v11482_v27 = vld [vmem:[%s11926_s28 + $0xd90] sm:$0xff] }
 0x198   : > { %7274 = vmatpush.bf16.msra.mxu3 %v11463_v14 }
 0x199   : > { %7236 = vmatpush.bf16.msra.mxu0 %v11438_v15  ;;  %v7010_v35 = vpop.f32.mrf.mxu2  ;;  %v6986_v38 = vpop.f32.mrf.mxu0  ;;  %v11467_v15 = vld [vmem:[%s11926_s28 + $0xd18] sm:$0xff] }
 0x19a   : > { %7249 = vmatpush.bf16.msra.mxu1 %v11446_v16  ;;  %v7011_v36 = vadd.f32 %v7010_v35, %v6998_v30  ;;  %v7023_v37 = vpop.f32.mrf.mxu3  ;;  %v6999_v42 = vpop.f32.mrf.mxu1  ;;  %v11475_v16 = vld [vmem:[%s11926_s28 + $0xd58] sm:$0xff]  ;;  %v11473_v30 = vld [vmem:[%s11926_s28 + $0xd48] sm:$0xff] }
 0x19b   : > { %7262 = vmatpush.bf16.msra.mxu2 %v11454_v17  ;;  %v11483_v17 = vld [vmem:[%s11926_s28 + $0xd98] sm:$0xff]  ;;  %v11480_v42 = vld [vmem:[%s11926_s28 + $0xd80] sm:$0xff] }
 0x19c   : > { %7275 = vmatpush.bf16.msra.mxu3 %v11462_v18  ;;  %v7024_v39 = vadd.f32 %v7023_v37, %v7011_v36  ;;  %v11491_v18 = vld [vmem:[%s11926_s28 + $0xdd8] sm:$0xff]  ;;  %v1854_v36 = vld [vmem:[#allocation1 + $0x2d] sm:$0xff] }
 0x19d   : > { %7237 = vmatpush.bf16.msra.mxu0 %v11437_v19  ;;  %v1856_v37 = vld [vmem:[#allocation1 + $0x3f] sm:$0xff] }
 0x19e   : > { %7250 = vmatpush.bf16.msra.mxu1 %v11445_v20 }
 0x19f   : > { %7263 = vmatpush.bf16.msra.mxu2 %v11453_v21 }
 0x1a0   : > { %7276 = vmatpush.bf16.msra.mxu3 %v11461_v22 }
 0x1a1   : > { %7238 = vmatpush.bf16.msra.mxu0 %v11436_v25  ;;  %v7012_v49 = vpop.f32.mrf.mxu2  ;;  %v11474_v25 = vld [vmem:[%s11926_s28 + $0xd50] sm:$0xff] }
 0x1a2   : > { %7251 = vmatpush.bf16.msra.mxu1 %v11444_v26  ;;  %v7025_v50 = vpop.f32.mrf.mxu3  ;;  %v11510_v49 = vld [vmem:[%s11926_s28 + $0xe70] sm:$0xff] }
 0x1a3   : > { %7264 = vmatpush.bf16.msra.mxu2 %v11452_v28  ;;  %v11490_v28 = vld [vmem:[%s11926_s28 + $0xdd0] sm:$0xff] }
 0x1a4   : > { %7277 = vmatpush.bf16.msra.mxu3 %v11460_v29  ;;  %v11465_v29 = vld [vmem:[%s11926_s28 + $0xd08] sm:$0xff]  ;;  %v11518_v50 = vld [vmem:[%s11926_s28 + $0xeb0] sm:$0xff] }
 0x1a5   : > { %7239 = vmatpush.bf16.msra.mxu0 %v11435_v31  ;;  %v11481_v31 = vld [vmem:[%s11926_s28 + $0xd88] sm:$0xff] }
 0x1a6   : > { %7252 = vmatpush.bf16.msra.mxu1 %v11443_v32  ;;  %v11489_v32 = vld [vmem:[%s11926_s28 + $0xdc8] sm:$0xff] }
 0x1a7   : > { %7265 = vmatpush.bf16.msra.mxu2 %v11451_v33  ;;  %v1853_v33 = vld [vmem:[#allocation1 + $0x24] sm:$0xff] }
 0x1a8   : > { %7278 = vmatpush.bf16.msra.mxu3 %v11459_v34  ;;  %v1855_v34 = vld [vmem:[#allocation1 + $0x36] sm:$0xff] }
 0x1a9   : > { %7240 = vmatpush.bf16.msra.mxu0 %v11434_v40  ;;  %v11464_v40 = vld [vmem:[%s11926_s28 + $0xd00] sm:$0xff] }
 0x1aa   : > { %7253 = vmatpush.bf16.msra.mxu1 %v11442_v41  ;;  %v11472_v41 = vld [vmem:[%s11926_s28 + $0xd40] sm:$0xff] }
 0x1ab   : > { %7266 = vmatpush.bf16.msra.mxu2 %v11450_v43  ;;  %v11488_v43 = vld [vmem:[%s11926_s28 + $0xdc0] sm:$0xff] }
 0x1ac   : > { %7279 = vmatpush.bf16.msra.mxu3 %v11458_v44  ;;  %v11503_v44 = vld [vmem:[%s11926_s28 + $0xe38] sm:$0xff] }
 0x1ad   : > { %7241 = vmatpush.bf16.msra.mxu0 %v11433_v45  ;;  %v11511_v45 = vld [vmem:[%s11926_s28 + $0xe78] sm:$0xff] }
 0x1ae   : > { %7254 = vmatpush.bf16.msra.mxu1 %v11441_v46  ;;  %v11519_v46 = vld [vmem:[%s11926_s28 + $0xeb8] sm:$0xff] }
 0x1af   : > { %7267 = vmatpush.bf16.msra.mxu2 %v11449_v47  ;;  %v11527_v47 = vld [vmem:[%s11926_s28 + $0xef8] sm:$0xff] }
 0x1b0   : > { %7280 = vmatpush.bf16.msra.mxu3 %v11457_v48  ;;  %v11502_v48 = vld [vmem:[%s11926_s28 + $0xe30] sm:$0xff] }
 0x1b1   : > { %7242 = vmatpush.bf16.msra.mxu0 %v11432_v51  ;;  %v7036_v7 = vpop.f32.mrf.mxu0  ;;  %v11526_v51 = vld [vmem:[%s11926_s28 + $0xef0] sm:$0xff] }
 0x1b2   : > { %7255 = vmatpush.bf16.msra.mxu1 %v11440_v52  ;;  %v7037_v8 = vadd.f32 %v7036_v7, %v7024_v39  ;;  %v7049_v11 = vpop.f32.mrf.mxu1  ;;  %v246_v39 = vld [vmem:[%s11921_s24 + $0x38] sm:$0xff]  ;;  %v11501_v52 = vld [vmem:[%s11926_s28 + $0xe28] sm:$0xff] }
 0x1b3   : > { %7268 = vmatpush.bf16.msra.mxu2 %v11448_v53  ;;  %1858 = vst [vmem:[#allocation1] ss:$9 sm:$0xff] %v246_v39  ;;  %v11509_v53 = vld [vmem:[%s11926_s28 + $0xe68] sm:$0xff] }
 0x1b4   : > { %7281 = vmatpush.bf16.msra.mxu3 %v11456_v54  ;;  %7243 = vmatmul.bf16.vlgmr.msra.gmra.mxu0 %v1849_v59  ;;  %v7050_v14 = vadd.f32 %v7049_v11, %v7037_v8  ;;  %v11517_v54 = vld [vmem:[%s11926_s28 + $0xea8] sm:$0xff]  ;;  %v11508_v59 = vld [vmem:[%s11926_s28 + $0xe60] sm:$0xff] }
 0x1b5   : > { %7287 = vmatpush.bf16.msrb.mxu0 %v11471_v55  ;;  %7256 = vmatmul.bf16.vlgmr.msra.gmra.mxu1 %v1850_v61  ;;  %v11525_v55 = vld [vmem:[%s11926_s28 + $0xee8] sm:$0xff]  ;;  %v11516_v61 = vld [vmem:[%s11926_s28 + $0xea0] sm:$0xff] }
 0x1b6   : > { %7300 = vmatpush.bf16.msrb.mxu1 %v11479_v56  ;;  %7269 = vmatmul.bf16.vlgmr.msra.gmra.mxu2 %v1851_v60  ;;  %v11557_v39 = vld [vmem:[%s11926_s28 + $0xfe8] sm:$0xff] }
 0x1b7   : > { %7313 = vmatpush.bf16.msrb.mxu2 %v11487_v57  ;;  %7282 = vmatmul.bf16.vlgmr.msra.gmra.mxu3 %v1852_v62  ;;  %v11524_v62 = vld [vmem:[%s11926_s28 + $0xee0] sm:$0xff] }
 0x1b8   : > { %7326 = vmatpush.bf16.msrb.mxu3 %v11495_v58  ;;  %v11500_v58 = vld [vmem:[%s11926_s28 + $0xe20] sm:$0xff] }
 0x1b9   : > { %7288 = vmatpush.bf16.msrb.mxu0 %v11470_v63  ;;  %v7062_v19 = vpop.f32.mrf.mxu2  ;;  %v7038_v22 = vpop.f32.mrf.mxu0 }
 0x1ba   : > { %7301 = vmatpush.bf16.msrb.mxu1 %v11478_v0  ;;  %v7063_v20 = vadd.f32 %v7062_v19, %v7050_v14  ;;  %v7075_v21 = vpop.f32.mrf.mxu3  ;;  %v7051_v26 = vpop.f32.mrf.mxu1  ;;  %v11499_v0 = vld [vmem:[%s11926_s28 + $0xe18] sm:$0xff]  ;;  %v11497_v14 = vld [vmem:[%s11926_s28 + $0xe08] sm:$0xff]  ;;  %v11512_v22 = vld [vmem:[%s11926_s28 + $0xe80] sm:$0xff] }
 0x1bb   : > { %7314 = vmatpush.bf16.msrb.mxu2 %v11486_v1  ;;  %v11507_v1 = vld [vmem:[%s11926_s28 + $0xe58] sm:$0xff] }
 0x1bc   : > { %7327 = vmatpush.bf16.msrb.mxu3 %v11494_v2  ;;  %v12384_v23 = vadd.f32 %v7075_v21, %v7063_v20  ;;  %v11515_v2 = vld [vmem:[%s11926_s28 + $0xe98] sm:$0xff]  ;;  %v11496_v20 = vld [vmem:[%s11926_s28 + $0xe00] sm:$0xff] }
 0x1bd   : > { %7289 = vmatpush.bf16.msrb.mxu0 %v11469_v3  ;;  %v11523_v3 = vld [vmem:[%s11926_s28 + $0xed8] sm:$0xff]  ;;  %v11504_v21 = vld [vmem:[%s11926_s28 + $0xe40] sm:$0xff] }
 0x1be   : > { %7302 = vmatpush.bf16.msrb.mxu1 %v11477_v4  ;;  %v11551_v26 = vld [vmem:[%s11926_s28 + $0xfb8] sm:$0xff] }
 0x1bf   : > { %7315 = vmatpush.bf16.msrb.mxu2 %v11485_v5 }
 0x1c0   : > { %7328 = vmatpush.bf16.msrb.mxu3 %v11493_v6 }
 0x1c1   : > { %7290 = vmatpush.bf16.msrb.mxu0 %v11468_v9  ;;  %v7064_v35 = vpop.f32.mrf.mxu2  ;;  %v11498_v9 = vld [vmem:[%s11926_s28 + $0xe10] sm:$0xff] }
 0x1c2   : > { %7303 = vmatpush.bf16.msrb.mxu1 %v11476_v10  ;;  %v7077_v38 = vpop.f32.mrf.mxu3  ;;  %v11506_v10 = vld [vmem:[%s11926_s28 + $0xe50] sm:$0xff] }
 0x1c3   : > { %7316 = vmatpush.bf16.msrb.mxu2 %v11484_v12  ;;  %v11514_v12 = vld [vmem:[%s11926_s28 + $0xe90] sm:$0xff]  ;;  %v11549_v38 = vld [vmem:[%s11926_s28 + $0xfa8] sm:$0xff] }
 0x1c4   : > { %7329 = vmatpush.bf16.msrb.mxu3 %v11492_v13  ;;  %v11522_v13 = vld [vmem:[%s11926_s28 + $0xed0] sm:$0xff] }
 0x1c5   : > { %7291 = vmatpush.bf16.msrb.mxu0 %v11467_v15  ;;  %v11505_v15 = vld [vmem:[%s11926_s28 + $0xe48] sm:$0xff]  ;;  %v11558_v35 = vld [vmem:[%s11926_s28 + $0xff0] sm:$0xff] }
 0x1c6   : > { %7304 = vmatpush.bf16.msrb.mxu1 %v11475_v16  ;;  %v11513_v16 = vld [vmem:[%s11926_s28 + $0xe88] sm:$0xff] }
 0x1c7   : > { %7317 = vmatpush.bf16.msrb.mxu2 %v11483_v17  ;;  %v11521_v17 = vld [vmem:[%s11926_s28 + $0xec8] sm:$0xff] }
 0x1c8   : > { %7330 = vmatpush.bf16.msrb.mxu3 %v11491_v18 }
 0x1c9   : > { %7292 = vmatpush.bf16.msrb.mxu0 %v11466_v24  ;;  %v11535_v24 = vld [vmem:[%s11926_s28 + $0xf38] sm:$0xff] }
 0x1ca   : > { %7305 = vmatpush.bf16.msrb.mxu1 %v11474_v25  ;;  %v11543_v25 = vld [vmem:[%s11926_s28 + $0xf78] sm:$0xff] }
 0x1cb   : > { %7318 = vmatpush.bf16.msrb.mxu2 %v11482_v27  ;;  %v11559_v27 = vld [vmem:[%s11926_s28 + $0xff8] sm:$0xff] }
 0x1cc   : > { %7331 = vmatpush.bf16.msrb.mxu3 %v11490_v28  ;;  %v1859_v28 = vld [vmem:[#allocation1] sm:$0xff] }
 0x1cd   : > { %7293 = vmatpush.bf16.msrb.mxu0 %v11465_v29  ;;  %v1861_v29 = vld [vmem:[#allocation1 + $0x12] sm:$0xff] }
 0x1ce   : > { %7306 = vmatpush.bf16.msrb.mxu1 %v11473_v30  ;;  %v1860_v30 = vld [vmem:[#allocation1 + $0x9] sm:$0xff] }
 0x1cf   : > { %7319 = vmatpush.bf16.msrb.mxu2 %v11481_v31  ;;  %v1862_v31 = vld [vmem:[#allocation1 + $0x1b] sm:$0xff] }
 0x1d0   : > { %7332 = vmatpush.bf16.msrb.mxu3 %v11489_v32  ;;  %v11534_v32 = vld [vmem:[%s11926_s28 + $0xf30] sm:$0xff] }
 0x1d1   : > { %7294 = vmatpush.bf16.msrb.mxu0 %v11464_v40  ;;  %v7088_v56 = vpop.f32.mrf.mxu0 }
 0x1d2   : > { %7307 = vmatpush.bf16.msrb.mxu1 %v11472_v41  ;;  %v7089_v57 = vadd.f32 %v7088_v56, %v12384_v23  ;;  %v7101_v60 = vpop.f32.mrf.mxu1  ;;  %v11520_v23 = vld [vmem:[%s11926_s28 + $0xec0] sm:$0xff] }
 0x1d3   : > { %7320 = vmatpush.bf16.msrb.mxu2 %v11480_v42  ;;  %v11532_v42 = vld [vmem:[%s11926_s28 + $0xf20] sm:$0xff] }
 0x1d4   : > { %7333 = vmatpush.bf16.msrb.mxu3 %v11488_v43  ;;  %7295 = vmatmul.bf16.vlgmr.msrb.gmra.mxu0 %v1853_v33  ;;  %v7102_v63 = vadd.f32 %v7101_v60, %v7089_v57  ;;  %v11542_v33 = vld [vmem:[%s11926_s28 + $0xf70] sm:$0xff]  ;;  %v11540_v43 = vld [vmem:[%s11926_s28 + $0xf60] sm:$0xff] }
 0x1d5   : > { %7339 = vmatpush.bf16.msra.mxu0 %v11503_v44  ;;  %7308 = vmatmul.bf16.vlgmr.msrb.gmra.mxu1 %v1854_v36  ;;  %v11533_v36 = vld [vmem:[%s11926_s28 + $0xf28] sm:$0xff]  ;;  %v11530_v57 = vld [vmem:[%s11926_s28 + $0xf10] sm:$0xff] }
 0x1d6   : > { %7352 = vmatpush.bf16.msra.mxu1 %v11511_v45  ;;  %7321 = vmatmul.bf16.vlgmr.msrb.gmra.mxu2 %v1855_v34  ;;  %v11550_v34 = vld [vmem:[%s11926_s28 + $0xfb0] sm:$0xff]  ;;  %v11548_v45 = vld [vmem:[%s11926_s28 + $0xfa0] sm:$0xff] }
 0x1d7   : > { %7365 = vmatpush.bf16.msra.mxu2 %v11519_v46  ;;  %7334 = vmatmul.bf16.vlgmr.msrb.gmra.mxu3 %v1856_v37  ;;  %v11541_v37 = vld [vmem:[%s11926_s28 + $0xf68] sm:$0xff]  ;;  %v11556_v46 = vld [vmem:[%s11926_s28 + $0xfe0] sm:$0xff]  ;;  %v11546_v60 = vld [vmem:[%s11926_s28 + $0xf90] sm:$0xff] }
 0x1d8   : > { %7378 = vmatpush.bf16.msra.mxu3 %v11527_v47 }
 0x1d9   : > { %7340 = vmatpush.bf16.msra.mxu0 %v11502_v48  ;;  %v7114_v4 = vpop.f32.mrf.mxu2  ;;  %v7090_v7 = vpop.f32.mrf.mxu0  ;;  %v11531_v48 = vld [vmem:[%s11926_s28 + $0xf18] sm:$0xff] }
 0x1da   : > { %7353 = vmatpush.bf16.msra.mxu1 %v11510_v49  ;;  %v7115_v5 = vadd.f32 %v7114_v4, %v7102_v63  ;;  %v7127_v6 = vpop.f32.mrf.mxu3  ;;  %v7103_v11 = vpop.f32.mrf.mxu1  ;;  %v11539_v49 = vld [vmem:[%s11926_s28 + $0xf58] sm:$0xff]  ;;  %v11537_v63 = vld [vmem:[%s11926_s28 + $0xf48] sm:$0xff] }
 0x1db   : > { %7366 = vmatpush.bf16.msra.mxu2 %v11518_v50  ;;  %v11547_v50 = vld [vmem:[%s11926_s28 + $0xf98] sm:$0xff]  ;;  %v11544_v11 = vld [vmem:[%s11926_s28 + $0xf80] sm:$0xff] }
 0x1dc   : > { %7379 = vmatpush.bf16.msra.mxu3 %v11526_v51  ;;  %v7128_v8 = vadd.f32 %v7127_v6, %v7115_v5  ;;  %v11555_v51 = vld [vmem:[%s11926_s28 + $0xfd8] sm:$0xff]  ;;  %v1864_v5 = vld [vmem:[#allocation1 + $0x2d] sm:$0xff] }
 0x1dd   : > { %7341 = vmatpush.bf16.msra.mxu0 %v11501_v52  ;;  %v1866_v6 = vld [vmem:[#allocation1 + $0x3f] sm:$0xff] }
 0x1de   : > { %7354 = vmatpush.bf16.msra.mxu1 %v11509_v53 }
 0x1df   : > { %7367 = vmatpush.bf16.msra.mxu2 %v11517_v54 }
 0x1e0   : > { %7380 = vmatpush.bf16.msra.mxu3 %v11525_v55 }
 0x1e1   : > { %7342 = vmatpush.bf16.msra.mxu0 %v11500_v58  ;;  %v7116_v18 = vpop.f32.mrf.mxu2  ;;  %v11538_v58 = vld [vmem:[%s11926_s28 + $0xf50] sm:$0xff] }
 0x1e2   : > { %7355 = vmatpush.bf16.msra.mxu1 %v11508_v59  ;;  %v7129_v19 = vpop.f32.mrf.mxu3  ;;  %v11574_v18 = vld [vmem:[%s11926_s28 + $0x1070] sm:$0xff] }
 0x1e3   : > { %7368 = vmatpush.bf16.msra.mxu2 %v11516_v61  ;;  %v11554_v61 = vld [vmem:[%s11926_s28 + $0xfd0] sm:$0xff] }
 0x1e4   : > { %7381 = vmatpush.bf16.msra.mxu3 %v11524_v62  ;;  %v11529_v62 = vld [vmem:[%s11926_s28 + $0xf08] sm:$0xff]  ;;  %v11582_v19 = vld [vmem:[%s11926_s28 + $0x10b0] sm:$0xff] }
 0x1e5   : > { %7343 = vmatpush.bf16.msra.mxu0 %v11499_v0  ;;  %v11545_v0 = vld [vmem:[%s11926_s28 + $0xf88] sm:$0xff] }
 0x1e6   : > { %7356 = vmatpush.bf16.msra.mxu1 %v11507_v1  ;;  %v11553_v1 = vld [vmem:[%s11926_s28 + $0xfc8] sm:$0xff] }
 0x1e7   : > { %7369 = vmatpush.bf16.msra.mxu2 %v11515_v2  ;;  %v1863_v2 = vld [vmem:[#allocation1 + $0x24] sm:$0xff] }
 0x1e8   : > { %7382 = vmatpush.bf16.msra.mxu3 %v11523_v3  ;;  %v1865_v3 = vld [vmem:[#allocation1 + $0x36] sm:$0xff] }
 0x1e9   : > { %7344 = vmatpush.bf16.msra.mxu0 %v11498_v9  ;;  %v11528_v9 = vld [vmem:[%s11926_s28 + $0xf00] sm:$0xff] }
 0x1ea   : > { %7357 = vmatpush.bf16.msra.mxu1 %v11506_v10  ;;  %v11536_v10 = vld [vmem:[%s11926_s28 + $0xf40] sm:$0xff] }
 0x1eb   : > { %7370 = vmatpush.bf16.msra.mxu2 %v11514_v12  ;;  %v11552_v12 = vld [vmem:[%s11926_s28 + $0xfc0] sm:$0xff] }
 0x1ec   : > { %7383 = vmatpush.bf16.msra.mxu3 %v11522_v13  ;;  %v11567_v13 = vld [vmem:[%s11926_s28 + $0x1038] sm:$0xff] }
 0x1ed   : > { %7345 = vmatpush.bf16.msra.mxu0 %v11497_v14  ;;  %v11575_v14 = vld [vmem:[%s11926_s28 + $0x1078] sm:$0xff] }
 0x1ee   : > { %7358 = vmatpush.bf16.msra.mxu1 %v11505_v15  ;;  %v11583_v15 = vld [vmem:[%s11926_s28 + $0x10b8] sm:$0xff] }
 0x1ef   : > { %7371 = vmatpush.bf16.msra.mxu2 %v11513_v16  ;;  %v11591_v16 = vld [vmem:[%s11926_s28 + $0x10f8] sm:$0xff] }
 0x1f0   : > { %7384 = vmatpush.bf16.msra.mxu3 %v11521_v17  ;;  %v11566_v17 = vld [vmem:[%s11926_s28 + $0x1030] sm:$0xff] }
 0x1f1   : > { %7346 = vmatpush.bf16.msra.mxu0 %v11496_v20  ;;  %v7140_v40 = vpop.f32.mrf.mxu0  ;;  %v11590_v20 = vld [vmem:[%s11926_s28 + $0x10f0] sm:$0xff] }
 0x1f2   : > { %7359 = vmatpush.bf16.msra.mxu1 %v11504_v21  ;;  %v7141_v41 = vadd.f32 %v7140_v40, %v7128_v8  ;;  %v7153_v44 = vpop.f32.mrf.mxu1  ;;  %v247_v8 = vld [vmem:[%s11921_s24 + $0x40] sm:$0xff]  ;;  %v11565_v21 = vld [vmem:[%s11926_s28 + $0x1028] sm:$0xff] }
 0x1f3   : > { %7372 = vmatpush.bf16.msra.mxu2 %v11512_v22  ;;  %1868 = vst [vmem:[#allocation1] ss:$9 sm:$0xff] %v247_v8  ;;  %v11573_v22 = vld [vmem:[%s11926_s28 + $0x1068] sm:$0xff] }
 0x1f4   : > { %7385 = vmatpush.bf16.msra.mxu3 %v11520_v23  ;;  %7347 = vmatmul.bf16.vlgmr.msra.gmra.mxu0 %v1859_v28  ;;  %v7154_v47 = vadd.f32 %v7153_v44, %v7141_v41  ;;  %v11581_v23 = vld [vmem:[%s11926_s28 + $0x10a8] sm:$0xff]  ;;  %v11572_v28 = vld [vmem:[%s11926_s28 + $0x1060] sm:$0xff] }
 0x1f5   : > { %7391 = vmatpush.bf16.msrb.mxu0 %v11535_v24  ;;  %7360 = vmatmul.bf16.vlgmr.msra.gmra.mxu1 %v1860_v30  ;;  %v11589_v24 = vld [vmem:[%s11926_s28 + $0x10e8] sm:$0xff]  ;;  %v11580_v30 = vld [vmem:[%s11926_s28 + $0x10a0] sm:$0xff] }
 0x1f6   : > { %7404 = vmatpush.bf16.msrb.mxu1 %v11543_v25  ;;  %7373 = vmatmul.bf16.vlgmr.msra.gmra.mxu2 %v1861_v29  ;;  %v11621_v8 = vld [vmem:[%s11926_s28 + $0x11e8] sm:$0xff] }
 0x1f7   : > { %7417 = vmatpush.bf16.msrb.mxu2 %v11551_v26  ;;  %7386 = vmatmul.bf16.vlgmr.msra.gmra.mxu3 %v1862_v31  ;;  %v11588_v31 = vld [vmem:[%s11926_s28 + $0x10e0] sm:$0xff] }
 0x1f8   : > { %7430 = vmatpush.bf16.msrb.mxu3 %v11559_v27  ;;  %v11564_v27 = vld [vmem:[%s11926_s28 + $0x1020] sm:$0xff] }
 0x1f9   : > { %7392 = vmatpush.bf16.msrb.mxu0 %v11534_v32  ;;  %v7166_v52 = vpop.f32.mrf.mxu2  ;;  %v7142_v55 = vpop.f32.mrf.mxu0 }
 0x1fa   : > { %7405 = vmatpush.bf16.msrb.mxu1 %v11542_v33  ;;  %v7167_v53 = vadd.f32 %v7166_v52, %v7154_v47  ;;  %v7179_v54 = vpop.f32.mrf.mxu3  ;;  %v7155_v59 = vpop.f32.mrf.mxu1  ;;  %v11563_v33 = vld [vmem:[%s11926_s28 + $0x1018] sm:$0xff]  ;;  %v11561_v47 = vld [vmem:[%s11926_s28 + $0x1008] sm:$0xff]  ;;  %v11576_v55 = vld [vmem:[%s11926_s28 + $0x1080] sm:$0xff] }
 0x1fb   : > { %7418 = vmatpush.bf16.msrb.mxu2 %v11550_v34  ;;  %v11571_v34 = vld [vmem:[%s11926_s28 + $0x1058] sm:$0xff] }
 0x1fc   : > { %7431 = vmatpush.bf16.msrb.mxu3 %v11558_v35  ;;  %v12452_v56 = vadd.f32 %v7179_v54, %v7167_v53  ;;  %v11579_v35 = vld [vmem:[%s11926_s28 + $0x1098] sm:$0xff]  ;;  %v11560_v53 = vld [vmem:[%s11926_s28 + $0x1000] sm:$0xff] }
 0x1fd   : > { %7393 = vmatpush.bf16.msrb.mxu0 %v11533_v36  ;;  %v11587_v36 = vld [vmem:[%s11926_s28 + $0x10d8] sm:$0xff]  ;;  %v11568_v54 = vld [vmem:[%s11926_s28 + $0x1040] sm:$0xff] }
 0x1fe   : > { %7406 = vmatpush.bf16.msrb.mxu1 %v11541_v37  ;;  %v11615_v59 = vld [vmem:[%s11926_s28 + $0x11b8] sm:$0xff] }
 0x1ff   : > { %7419 = vmatpush.bf16.msrb.mxu2 %v11549_v38 }
 0x200   : > { %7432 = vmatpush.bf16.msrb.mxu3 %v11557_v39 }
 0x201   : > { %7394 = vmatpush.bf16.msrb.mxu0 %v11532_v42  ;;  %v7168_v4 = vpop.f32.mrf.mxu2  ;;  %v11562_v42 = vld [vmem:[%s11926_s28 + $0x1010] sm:$0xff] }
 0x202   : > { %7407 = vmatpush.bf16.msrb.mxu1 %v11540_v43  ;;  %v7181_v7 = vpop.f32.mrf.mxu3  ;;  %v11570_v43 = vld [vmem:[%s11926_s28 + $0x1050] sm:$0xff] }
 0x203   : > { %7420 = vmatpush.bf16.msrb.mxu2 %v11548_v45  ;;  %v11578_v45 = vld [vmem:[%s11926_s28 + $0x1090] sm:$0xff]  ;;  %v11613_v7 = vld [vmem:[%s11926_s28 + $0x11a8] sm:$0xff] }
 0x204   : > { %7433 = vmatpush.bf16.msrb.mxu3 %v11556_v46  ;;  %v11586_v46 = vld [vmem:[%s11926_s28 + $0x10d0] sm:$0xff] }
 0x205   : > { %7395 = vmatpush.bf16.msrb.mxu0 %v11531_v48  ;;  %v11569_v48 = vld [vmem:[%s11926_s28 + $0x1048] sm:$0xff]  ;;  %v11622_v4 = vld [vmem:[%s11926_s28 + $0x11f0] sm:$0xff] }
 0x206   : > { %7408 = vmatpush.bf16.msrb.mxu1 %v11539_v49  ;;  %v11577_v49 = vld [vmem:[%s11926_s28 + $0x1088] sm:$0xff] }
 0x207   : > { %7421 = vmatpush.bf16.msrb.mxu2 %v11547_v50  ;;  %v11585_v50 = vld [vmem:[%s11926_s28 + $0x10c8] sm:$0xff] }
 0x208   : > { %7434 = vmatpush.bf16.msrb.mxu3 %v11555_v51 }
 0x209   : > { %7396 = vmatpush.bf16.msrb.mxu0 %v11530_v57  ;;  %v11599_v57 = vld [vmem:[%s11926_s28 + $0x1138] sm:$0xff] }
 0x20a   : > { %7409 = vmatpush.bf16.msrb.mxu1 %v11538_v58  ;;  %v11607_v58 = vld [vmem:[%s11926_s28 + $0x1178] sm:$0xff] }
 0x20b   : > { %7422 = vmatpush.bf16.msrb.mxu2 %v11546_v60  ;;  %v11623_v60 = vld [vmem:[%s11926_s28 + $0x11f8] sm:$0xff] }
 0x20c   : > { %7435 = vmatpush.bf16.msrb.mxu3 %v11554_v61  ;;  %v1869_v61 = vld [vmem:[#allocation1] sm:$0xff] }
 0x20d   : > { %7397 = vmatpush.bf16.msrb.mxu0 %v11529_v62  ;;  %v1871_v62 = vld [vmem:[#allocation1 + $0x12] sm:$0xff] }
 0x20e   : > { %7410 = vmatpush.bf16.msrb.mxu1 %v11537_v63  ;;  %v1870_v63 = vld [vmem:[#allocation1 + $0x9] sm:$0xff] }
 0x20f   : > { %7423 = vmatpush.bf16.msrb.mxu2 %v11545_v0  ;;  %v1872_v0 = vld [vmem:[#allocation1 + $0x1b] sm:$0xff] }
 0x210   : > { %7436 = vmatpush.bf16.msrb.mxu3 %v11553_v1  ;;  %v11598_v1 = vld [vmem:[%s11926_s28 + $0x1130] sm:$0xff] }
 0x211   : > { %7398 = vmatpush.bf16.msrb.mxu0 %v11528_v9  ;;  %v7192_v25 = vpop.f32.mrf.mxu0 }
 0x212   : > { %7411 = vmatpush.bf16.msrb.mxu1 %v11536_v10  ;;  %v7193_v26 = vadd.f32 %v7192_v25, %v12452_v56  ;;  %v7205_v29 = vpop.f32.mrf.mxu1  ;;  %v11584_v56 = vld [vmem:[%s11926_s28 + $0x10c0] sm:$0xff] }
 0x213   : > { %7424 = vmatpush.bf16.msrb.mxu2 %v11544_v11  ;;  %v11596_v11 = vld [vmem:[%s11926_s28 + $0x1120] sm:$0xff] }
 0x214   : > { %7437 = vmatpush.bf16.msrb.mxu3 %v11552_v12  ;;  %7399 = vmatmul.bf16.vlgmr.msrb.gmra.mxu0 %v1863_v2  ;;  %v7206_v32 = vadd.f32 %v7205_v29, %v7193_v26  ;;  %v11606_v2 = vld [vmem:[%s11926_s28 + $0x1170] sm:$0xff]  ;;  %v11604_v12 = vld [vmem:[%s11926_s28 + $0x1160] sm:$0xff] }
 0x215   : > { %7443 = vmatpush.bf16.msra.mxu0 %v11567_v13  ;;  %7412 = vmatmul.bf16.vlgmr.msrb.gmra.mxu1 %v1864_v5  ;;  %v11597_v5 = vld [vmem:[%s11926_s28 + $0x1128] sm:$0xff]  ;;  %v11594_v26 = vld [vmem:[%s11926_s28 + $0x1110] sm:$0xff] }
 0x216   : > { %7456 = vmatpush.bf16.msra.mxu1 %v11575_v14  ;;  %7425 = vmatmul.bf16.vlgmr.msrb.gmra.mxu2 %v1865_v3  ;;  %v11614_v3 = vld [vmem:[%s11926_s28 + $0x11b0] sm:$0xff]  ;;  %v11612_v14 = vld [vmem:[%s11926_s28 + $0x11a0] sm:$0xff] }
 0x217   : > { %7469 = vmatpush.bf16.msra.mxu2 %v11583_v15  ;;  %7438 = vmatmul.bf16.vlgmr.msrb.gmra.mxu3 %v1866_v6  ;;  %v11605_v6 = vld [vmem:[%s11926_s28 + $0x1168] sm:$0xff]  ;;  %v11620_v15 = vld [vmem:[%s11926_s28 + $0x11e0] sm:$0xff]  ;;  %v11610_v29 = vld [vmem:[%s11926_s28 + $0x1190] sm:$0xff] }
 0x218   : > { %7482 = vmatpush.bf16.msra.mxu3 %v11591_v16 }
 0x219   : > { %7444 = vmatpush.bf16.msra.mxu0 %v11566_v17  ;;  %v7218_v37 = vpop.f32.mrf.mxu2  ;;  %v7194_v40 = vpop.f32.mrf.mxu0  ;;  %v11595_v17 = vld [vmem:[%s11926_s28 + $0x1118] sm:$0xff] }
 0x21a   : > { %7457 = vmatpush.bf16.msra.mxu1 %v11574_v18  ;;  %v7219_v38 = vadd.f32 %v7218_v37, %v7206_v32  ;;  %v7231_v39 = vpop.f32.mrf.mxu3  ;;  %v7207_v44 = vpop.f32.mrf.mxu1  ;;  %v11603_v18 = vld [vmem:[%s11926_s28 + $0x1158] sm:$0xff]  ;;  %v11601_v32 = vld [vmem:[%s11926_s28 + $0x1148] sm:$0xff] }
 0x21b   : > { %7470 = vmatpush.bf16.msra.mxu2 %v11582_v19  ;;  %v11611_v19 = vld [vmem:[%s11926_s28 + $0x1198] sm:$0xff]  ;;  %v11608_v44 = vld [vmem:[%s11926_s28 + $0x1180] sm:$0xff] }
 0x21c   : > { %7483 = vmatpush.bf16.msra.mxu3 %v11590_v20  ;;  %v7232_v41 = vadd.f32 %v7231_v39, %v7219_v38  ;;  %v11619_v20 = vld [vmem:[%s11926_s28 + $0x11d8] sm:$0xff]  ;;  %v1874_v38 = vld [vmem:[#allocation1 + $0x2d] sm:$0xff] }
 0x21d   : > { %7445 = vmatpush.bf16.msra.mxu0 %v11565_v21  ;;  %v1876_v39 = vld [vmem:[#allocation1 + $0x3f] sm:$0xff] }
 0x21e   : > { %7458 = vmatpush.bf16.msra.mxu1 %v11573_v22 }
 0x21f   : > { %7471 = vmatpush.bf16.msra.mxu2 %v11581_v23 }
 0x220   : > { %7484 = vmatpush.bf16.msra.mxu3 %v11589_v24 }
 0x221   : > { %7446 = vmatpush.bf16.msra.mxu0 %v11564_v27  ;;  %v7220_v51 = vpop.f32.mrf.mxu2  ;;  %v11602_v27 = vld [vmem:[%s11926_s28 + $0x1150] sm:$0xff] }
 0x222   : > { %7459 = vmatpush.bf16.msra.mxu1 %v11572_v28  ;;  %v7233_v52 = vpop.f32.mrf.mxu3  ;;  %v11638_v51 = vld [vmem:[%s11926_s28 + $0x1270] sm:$0xff] }
 0x223   : > { %7472 = vmatpush.bf16.msra.mxu2 %v11580_v30  ;;  %v11618_v30 = vld [vmem:[%s11926_s28 + $0x11d0] sm:$0xff] }
 0x224   : > { %7485 = vmatpush.bf16.msra.mxu3 %v11588_v31  ;;  %v11593_v31 = vld [vmem:[%s11926_s28 + $0x1108] sm:$0xff]  ;;  %v11646_v52 = vld [vmem:[%s11926_s28 + $0x12b0] sm:$0xff] }
 0x225   : > { %7447 = vmatpush.bf16.msra.mxu0 %v11563_v33  ;;  %v11609_v33 = vld [vmem:[%s11926_s28 + $0x1188] sm:$0xff] }
 0x226   : > { %7460 = vmatpush.bf16.msra.mxu1 %v11571_v34  ;;  %v11617_v34 = vld [vmem:[%s11926_s28 + $0x11c8] sm:$0xff] }
 0x227   : > { %7473 = vmatpush.bf16.msra.mxu2 %v11579_v35  ;;  %v1873_v35 = vld [vmem:[#allocation1 + $0x24] sm:$0xff] }
 0x228   : > { %7486 = vmatpush.bf16.msra.mxu3 %v11587_v36  ;;  %v1875_v36 = vld [vmem:[#allocation1 + $0x36] sm:$0xff] }
 0x229   : > { %7448 = vmatpush.bf16.msra.mxu0 %v11562_v42  ;;  %v11592_v42 = vld [vmem:[%s11926_s28 + $0x1100] sm:$0xff] }
 0x22a   : > { %7461 = vmatpush.bf16.msra.mxu1 %v11570_v43  ;;  %v11600_v43 = vld [vmem:[%s11926_s28 + $0x1140] sm:$0xff] }
 0x22b   : > { %7474 = vmatpush.bf16.msra.mxu2 %v11578_v45  ;;  %v11616_v45 = vld [vmem:[%s11926_s28 + $0x11c0] sm:$0xff] }
 0x22c   : > { %7487 = vmatpush.bf16.msra.mxu3 %v11586_v46  ;;  %v11631_v46 = vld [vmem:[%s11926_s28 + $0x1238] sm:$0xff] }
 0x22d   : > { %7449 = vmatpush.bf16.msra.mxu0 %v11561_v47  ;;  %v11639_v47 = vld [vmem:[%s11926_s28 + $0x1278] sm:$0xff] }
 0x22e   : > { %7462 = vmatpush.bf16.msra.mxu1 %v11569_v48  ;;  %v11647_v48 = vld [vmem:[%s11926_s28 + $0x12b8] sm:$0xff] }
 0x22f   : > { %7475 = vmatpush.bf16.msra.mxu2 %v11577_v49  ;;  %v11655_v49 = vld [vmem:[%s11926_s28 + $0x12f8] sm:$0xff] }
 0x230   : > { %7488 = vmatpush.bf16.msra.mxu3 %v11585_v50  ;;  %v11630_v50 = vld [vmem:[%s11926_s28 + $0x1230] sm:$0xff] }
 0x231   : > { %7450 = vmatpush.bf16.msra.mxu0 %v11560_v53  ;;  %v7244_v9 = vpop.f32.mrf.mxu0  ;;  %v11654_v53 = vld [vmem:[%s11926_s28 + $0x12f0] sm:$0xff] }
 0x232   : > { %7463 = vmatpush.bf16.msra.mxu1 %v11568_v54  ;;  %v7245_v10 = vadd.f32 %v7244_v9, %v7232_v41  ;;  %v7257_v13 = vpop.f32.mrf.mxu1  ;;  %v248_v41 = vld [vmem:[%s11921_s24 + $0x48] sm:$0xff] }
 0x233   : > { %7476 = vmatpush.bf16.msra.mxu2 %v11576_v55  ;;  %1878 = vst [vmem:[#allocation1] ss:$9 sm:$0xff] %v248_v41  ;;  %v11629_v54 = vld [vmem:[%s11926_s28 + $0x1228] sm:$0xff] }
 0x234   : > { %7489 = vmatpush.bf16.msra.mxu3 %v11584_v56  ;;  %7451 = vmatmul.bf16.vlgmr.msra.gmra.mxu0 %v1869_v61  ;;  %v7258_v16 = vadd.f32 %v7257_v13, %v7245_v10  ;;  %v11637_v55 = vld [vmem:[%s11926_s28 + $0x1268] sm:$0xff]  ;;  %v11636_v61 = vld [vmem:[%s11926_s28 + $0x1260] sm:$0xff] }
 0x235   : > { %7495 = vmatpush.bf16.msrb.mxu0 %v11599_v57  ;;  %7464 = vmatmul.bf16.vlgmr.msra.gmra.mxu1 %v1870_v63  ;;  %v11645_v56 = vld [vmem:[%s11926_s28 + $0x12a8] sm:$0xff]  ;;  %v11644_v63 = vld [vmem:[%s11926_s28 + $0x12a0] sm:$0xff] }
 0x236   : > { %7508 = vmatpush.bf16.msrb.mxu1 %v11607_v58  ;;  %7477 = vmatmul.bf16.vlgmr.msra.gmra.mxu2 %v1871_v62  ;;  %v11653_v57 = vld [vmem:[%s11926_s28 + $0x12e8] sm:$0xff] }
 0x237   : > { %7521 = vmatpush.bf16.msrb.mxu2 %v11615_v59  ;;  %7490 = vmatmul.bf16.vlgmr.msra.gmra.mxu3 %v1872_v0  ;;  %v11652_v0 = vld [vmem:[%s11926_s28 + $0x12e0] sm:$0xff]  ;;  %v11685_v41 = vld [vmem:[%s11926_s28 + $0x13e8] sm:$0xff] }
 0x238   : > { %7534 = vmatpush.bf16.msrb.mxu3 %v11623_v60  ;;  %v11628_v60 = vld [vmem:[%s11926_s28 + $0x1220] sm:$0xff] }
 0x239   : > { %7496 = vmatpush.bf16.msrb.mxu0 %v11598_v1  ;;  %v7270_v21 = vpop.f32.mrf.mxu2  ;;  %v7246_v24 = vpop.f32.mrf.mxu0 }
 0x23a   : > { %7509 = vmatpush.bf16.msrb.mxu1 %v11606_v2  ;;  %v7271_v22 = vadd.f32 %v7270_v21, %v7258_v16  ;;  %v7283_v23 = vpop.f32.mrf.mxu3  ;;  %v7259_v28 = vpop.f32.mrf.mxu1  ;;  %v11627_v2 = vld [vmem:[%s11926_s28 + $0x1218] sm:$0xff]  ;;  %v11625_v16 = vld [vmem:[%s11926_s28 + $0x1208] sm:$0xff]  ;;  %v11640_v24 = vld [vmem:[%s11926_s28 + $0x1280] sm:$0xff] }
 0x23b   : > { %7522 = vmatpush.bf16.msrb.mxu2 %v11614_v3  ;;  %v11635_v3 = vld [vmem:[%s11926_s28 + $0x1258] sm:$0xff] }
 0x23c   : > { %7535 = vmatpush.bf16.msrb.mxu3 %v11622_v4  ;;  %v12520_v25 = vadd.f32 %v7283_v23, %v7271_v22  ;;  %v11643_v4 = vld [vmem:[%s11926_s28 + $0x1298] sm:$0xff]  ;;  %v11624_v22 = vld [vmem:[%s11926_s28 + $0x1200] sm:$0xff] }
 0x23d   : > { %7497 = vmatpush.bf16.msrb.mxu0 %v11597_v5  ;;  %v11651_v5 = vld [vmem:[%s11926_s28 + $0x12d8] sm:$0xff]  ;;  %v11632_v23 = vld [vmem:[%s11926_s28 + $0x1240] sm:$0xff] }
 0x23e   : > { %7510 = vmatpush.bf16.msrb.mxu1 %v11605_v6  ;;  %v11679_v28 = vld [vmem:[%s11926_s28 + $0x13b8] sm:$0xff] }
 0x23f   : > { %7523 = vmatpush.bf16.msrb.mxu2 %v11613_v7 }
 0x240   : > { %7536 = vmatpush.bf16.msrb.mxu3 %v11621_v8 }
 0x241   : > { %7498 = vmatpush.bf16.msrb.mxu0 %v11596_v11  ;;  %v7272_v37 = vpop.f32.mrf.mxu2  ;;  %v11626_v11 = vld [vmem:[%s11926_s28 + $0x1210] sm:$0xff] }
 0x242   : > { %7511 = vmatpush.bf16.msrb.mxu1 %v11604_v12  ;;  %v7285_v40 = vpop.f32.mrf.mxu3  ;;  %v11634_v12 = vld [vmem:[%s11926_s28 + $0x1250] sm:$0xff] }
 0x243   : > { %7524 = vmatpush.bf16.msrb.mxu2 %v11612_v14  ;;  %v11642_v14 = vld [vmem:[%s11926_s28 + $0x1290] sm:$0xff]  ;;  %v11677_v40 = vld [vmem:[%s11926_s28 + $0x13a8] sm:$0xff] }
 0x244   : > { %7537 = vmatpush.bf16.msrb.mxu3 %v11620_v15  ;;  %v11650_v15 = vld [vmem:[%s11926_s28 + $0x12d0] sm:$0xff] }
 0x245   : > { %7499 = vmatpush.bf16.msrb.mxu0 %v11595_v17  ;;  %v11633_v17 = vld [vmem:[%s11926_s28 + $0x1248] sm:$0xff]  ;;  %v11686_v37 = vld [vmem:[%s11926_s28 + $0x13f0] sm:$0xff] }
 0x246   : > { %7512 = vmatpush.bf16.msrb.mxu1 %v11603_v18  ;;  %v11641_v18 = vld [vmem:[%s11926_s28 + $0x1288] sm:$0xff] }
 0x247   : > { %7525 = vmatpush.bf16.msrb.mxu2 %v11611_v19  ;;  %v11649_v19 = vld [vmem:[%s11926_s28 + $0x12c8] sm:$0xff] }
 0x248   : > { %7538 = vmatpush.bf16.msrb.mxu3 %v11619_v20 }
 0x249   : > { %7500 = vmatpush.bf16.msrb.mxu0 %v11594_v26  ;;  %v11663_v26 = vld [vmem:[%s11926_s28 + $0x1338] sm:$0xff] }
 0x24a   : > { %7513 = vmatpush.bf16.msrb.mxu1 %v11602_v27  ;;  %v11671_v27 = vld [vmem:[%s11926_s28 + $0x1378] sm:$0xff] }
 0x24b   : > { %7526 = vmatpush.bf16.msrb.mxu2 %v11610_v29  ;;  %v11687_v29 = vld [vmem:[%s11926_s28 + $0x13f8] sm:$0xff] }
 0x24c   : > { %7539 = vmatpush.bf16.msrb.mxu3 %v11618_v30  ;;  %v1879_v30 = vld [vmem:[#allocation1] sm:$0xff] }
 0x24d   : > { %7501 = vmatpush.bf16.msrb.mxu0 %v11593_v31  ;;  %v1881_v31 = vld [vmem:[#allocation1 + $0x12] sm:$0xff] }
 0x24e   : > { %7514 = vmatpush.bf16.msrb.mxu1 %v11601_v32  ;;  %v1880_v32 = vld [vmem:[#allocation1 + $0x9] sm:$0xff] }
 0x24f   : > { %7527 = vmatpush.bf16.msrb.mxu2 %v11609_v33  ;;  %v1882_v33 = vld [vmem:[#allocation1 + $0x1b] sm:$0xff] }
 0x250   : > { %7540 = vmatpush.bf16.msrb.mxu3 %v11617_v34  ;;  %v11662_v34 = vld [vmem:[%s11926_s28 + $0x1330] sm:$0xff] }
 0x251   : > { %7502 = vmatpush.bf16.msrb.mxu0 %v11592_v42  ;;  %v7296_v58 = vpop.f32.mrf.mxu0 }
 0x252   : > { %7515 = vmatpush.bf16.msrb.mxu1 %v11600_v43  ;;  %v7297_v59 = vadd.f32 %v7296_v58, %v12520_v25  ;;  %v7309_v62 = vpop.f32.mrf.mxu1  ;;  %v11648_v25 = vld [vmem:[%s11926_s28 + $0x12c0] sm:$0xff] }
 0x253   : > { %7528 = vmatpush.bf16.msrb.mxu2 %v11608_v44  ;;  %v11660_v44 = vld [vmem:[%s11926_s28 + $0x1320] sm:$0xff] }
 0x254   : > { %7541 = vmatpush.bf16.msrb.mxu3 %v11616_v45  ;;  %7503 = vmatmul.bf16.vlgmr.msrb.gmra.mxu0 %v1873_v35  ;;  %v7310_v1 = vadd.f32 %v7309_v62, %v7297_v59  ;;  %v11670_v35 = vld [vmem:[%s11926_s28 + $0x1370] sm:$0xff]  ;;  %v11668_v45 = vld [vmem:[%s11926_s28 + $0x1360] sm:$0xff] }
 0x255   : > { %7547 = vmatpush.bf16.msra.mxu0 %v11631_v46  ;;  %7516 = vmatmul.bf16.vlgmr.msrb.gmra.mxu1 %v1874_v38  ;;  %v11661_v38 = vld [vmem:[%s11926_s28 + $0x1328] sm:$0xff]  ;;  %v11658_v59 = vld [vmem:[%s11926_s28 + $0x1310] sm:$0xff] }
 0x256   : > { %7560 = vmatpush.bf16.msra.mxu1 %v11639_v47  ;;  %7529 = vmatmul.bf16.vlgmr.msrb.gmra.mxu2 %v1875_v36  ;;  %v11678_v36 = vld [vmem:[%s11926_s28 + $0x13b0] sm:$0xff]  ;;  %v11676_v47 = vld [vmem:[%s11926_s28 + $0x13a0] sm:$0xff] }
 0x257   : > { %7573 = vmatpush.bf16.msra.mxu2 %v11647_v48  ;;  %7542 = vmatmul.bf16.vlgmr.msrb.gmra.mxu3 %v1876_v39  ;;  %v11669_v39 = vld [vmem:[%s11926_s28 + $0x1368] sm:$0xff]  ;;  %v11684_v48 = vld [vmem:[%s11926_s28 + $0x13e0] sm:$0xff]  ;;  %v11674_v62 = vld [vmem:[%s11926_s28 + $0x1390] sm:$0xff] }
 0x258   : > { %7586 = vmatpush.bf16.msra.mxu3 %v11655_v49 }
 0x259   : > { %7548 = vmatpush.bf16.msra.mxu0 %v11630_v50  ;;  %v7322_v6 = vpop.f32.mrf.mxu2  ;;  %v7298_v9 = vpop.f32.mrf.mxu0  ;;  %v11659_v50 = vld [vmem:[%s11926_s28 + $0x1318] sm:$0xff] }
 0x25a   : > { %7561 = vmatpush.bf16.msra.mxu1 %v11638_v51  ;;  %v7323_v7 = vadd.f32 %v7322_v6, %v7310_v1  ;;  %v7335_v8 = vpop.f32.mrf.mxu3  ;;  %v7311_v13 = vpop.f32.mrf.mxu1  ;;  %v11667_v51 = vld [vmem:[%s11926_s28 + $0x1358] sm:$0xff]  ;;  %v11665_v1 = vld [vmem:[%s11926_s28 + $0x1348] sm:$0xff] }
 0x25b   : > { %7574 = vmatpush.bf16.msra.mxu2 %v11646_v52  ;;  %v11675_v52 = vld [vmem:[%s11926_s28 + $0x1398] sm:$0xff]  ;;  %v11672_v13 = vld [vmem:[%s11926_s28 + $0x1380] sm:$0xff] }
 0x25c   : > { %7587 = vmatpush.bf16.msra.mxu3 %v11654_v53  ;;  %v7336_v10 = vadd.f32 %v7335_v8, %v7323_v7  ;;  %v11683_v53 = vld [vmem:[%s11926_s28 + $0x13d8] sm:$0xff]  ;;  %v1884_v7 = vld [vmem:[#allocation1 + $0x2d] sm:$0xff] }
 0x25d   : > { %7549 = vmatpush.bf16.msra.mxu0 %v11629_v54  ;;  %v1886_v8 = vld [vmem:[#allocation1 + $0x3f] sm:$0xff] }
 0x25e   : > { %7562 = vmatpush.bf16.msra.mxu1 %v11637_v55 }
 0x25f   : > { %7575 = vmatpush.bf16.msra.mxu2 %v11645_v56 }
 0x260   : > { %7588 = vmatpush.bf16.msra.mxu3 %v11653_v57 }
 0x261   : > { %7550 = vmatpush.bf16.msra.mxu0 %v11628_v60  ;;  %v7324_v20 = vpop.f32.mrf.mxu2  ;;  %v11666_v60 = vld [vmem:[%s11926_s28 + $0x1350] sm:$0xff] }
 0x262   : > { %7563 = vmatpush.bf16.msra.mxu1 %v11636_v61  ;;  %v7337_v21 = vpop.f32.mrf.mxu3  ;;  %v11702_v20 = vld [vmem:[%s11926_s28 + $0x1470] sm:$0xff] }
 0x263   : > { %7576 = vmatpush.bf16.msra.mxu2 %v11644_v63  ;;  %v11682_v63 = vld [vmem:[%s11926_s28 + $0x13d0] sm:$0xff] }
 0x264   : > { %7589 = vmatpush.bf16.msra.mxu3 %v11652_v0  ;;  %v11657_v0 = vld [vmem:[%s11926_s28 + $0x1308] sm:$0xff]  ;;  %v11710_v21 = vld [vmem:[%s11926_s28 + $0x14b0] sm:$0xff] }
 0x265   : > { %7551 = vmatpush.bf16.msra.mxu0 %v11627_v2  ;;  %v11673_v2 = vld [vmem:[%s11926_s28 + $0x1388] sm:$0xff] }
 0x266   : > { %7564 = vmatpush.bf16.msra.mxu1 %v11635_v3  ;;  %v11681_v3 = vld [vmem:[%s11926_s28 + $0x13c8] sm:$0xff] }
 0x267   : > { %7577 = vmatpush.bf16.msra.mxu2 %v11643_v4  ;;  %v1883_v4 = vld [vmem:[#allocation1 + $0x24] sm:$0xff] }
 0x268   : > { %7590 = vmatpush.bf16.msra.mxu3 %v11651_v5  ;;  %v1885_v5 = vld [vmem:[#allocation1 + $0x36] sm:$0xff] }
 0x269   : > { %7552 = vmatpush.bf16.msra.mxu0 %v11626_v11  ;;  %v11656_v11 = vld [vmem:[%s11926_s28 + $0x1300] sm:$0xff] }
 0x26a   : > { %7565 = vmatpush.bf16.msra.mxu1 %v11634_v12  ;;  %v11664_v12 = vld [vmem:[%s11926_s28 + $0x1340] sm:$0xff] }
 0x26b   : > { %7578 = vmatpush.bf16.msra.mxu2 %v11642_v14  ;;  %v11680_v14 = vld [vmem:[%s11926_s28 + $0x13c0] sm:$0xff] }
 0x26c   : > { %7591 = vmatpush.bf16.msra.mxu3 %v11650_v15  ;;  %v11695_v15 = vld [vmem:[%s11926_s28 + $0x1438] sm:$0xff] }
 0x26d   : > { %7553 = vmatpush.bf16.msra.mxu0 %v11625_v16  ;;  %v11703_v16 = vld [vmem:[%s11926_s28 + $0x1478] sm:$0xff] }
 0x26e   : > { %7566 = vmatpush.bf16.msra.mxu1 %v11633_v17  ;;  %v11711_v17 = vld [vmem:[%s11926_s28 + $0x14b8] sm:$0xff] }
 0x26f   : > { %7579 = vmatpush.bf16.msra.mxu2 %v11641_v18  ;;  %v11719_v18 = vld [vmem:[%s11926_s28 + $0x14f8] sm:$0xff] }
 0x270   : > { %7592 = vmatpush.bf16.msra.mxu3 %v11649_v19  ;;  %v11694_v19 = vld [vmem:[%s11926_s28 + $0x1430] sm:$0xff] }
 0x271   : > { %7554 = vmatpush.bf16.msra.mxu0 %v11624_v22  ;;  %v7348_v42 = vpop.f32.mrf.mxu0  ;;  %v11718_v22 = vld [vmem:[%s11926_s28 + $0x14f0] sm:$0xff] }
 0x272   : > { %7567 = vmatpush.bf16.msra.mxu1 %v11632_v23  ;;  %v7349_v43 = vadd.f32 %v7348_v42, %v7336_v10  ;;  %v7361_v46 = vpop.f32.mrf.mxu1  ;;  %v249_v10 = vld [vmem:[%s11921_s24 + $0x50] sm:$0xff]  ;;  %v11693_v23 = vld [vmem:[%s11926_s28 + $0x1428] sm:$0xff] }
 0x273   : > { %7580 = vmatpush.bf16.msra.mxu2 %v11640_v24  ;;  %1888 = vst [vmem:[#allocation1] ss:$9 sm:$0xff] %v249_v10  ;;  %v11701_v24 = vld [vmem:[%s11926_s28 + $0x1468] sm:$0xff] }
 0x274   : > { %7593 = vmatpush.bf16.msra.mxu3 %v11648_v25  ;;  %7555 = vmatmul.bf16.vlgmr.msra.gmra.mxu0 %v1879_v30  ;;  %v7362_v49 = vadd.f32 %v7361_v46, %v7349_v43  ;;  %v11709_v25 = vld [vmem:[%s11926_s28 + $0x14a8] sm:$0xff]  ;;  %v11700_v30 = vld [vmem:[%s11926_s28 + $0x1460] sm:$0xff] }
 0x275   : > { %7599 = vmatpush.bf16.msrb.mxu0 %v11663_v26  ;;  %7568 = vmatmul.bf16.vlgmr.msra.gmra.mxu1 %v1880_v32  ;;  %v11717_v26 = vld [vmem:[%s11926_s28 + $0x14e8] sm:$0xff]  ;;  %v11708_v32 = vld [vmem:[%s11926_s28 + $0x14a0] sm:$0xff] }
 0x276   : > { %7612 = vmatpush.bf16.msrb.mxu1 %v11671_v27  ;;  %7581 = vmatmul.bf16.vlgmr.msra.gmra.mxu2 %v1881_v31  ;;  %v11749_v10 = vld [vmem:[%s11926_s28 + $0x15e8] sm:$0xff] }
 0x277   : > { %7625 = vmatpush.bf16.msrb.mxu2 %v11679_v28  ;;  %7594 = vmatmul.bf16.vlgmr.msra.gmra.mxu3 %v1882_v33  ;;  %v11716_v33 = vld [vmem:[%s11926_s28 + $0x14e0] sm:$0xff] }
 0x278   : > { %7638 = vmatpush.bf16.msrb.mxu3 %v11687_v29  ;;  %v11692_v29 = vld [vmem:[%s11926_s28 + $0x1420] sm:$0xff] }
 0x279   : > { %7600 = vmatpush.bf16.msrb.mxu0 %v11662_v34  ;;  %v7374_v54 = vpop.f32.mrf.mxu2  ;;  %v7350_v57 = vpop.f32.mrf.mxu0 }
 0x27a   : > { %7613 = vmatpush.bf16.msrb.mxu1 %v11670_v35  ;;  %v7375_v55 = vadd.f32 %v7374_v54, %v7362_v49  ;;  %v7387_v56 = vpop.f32.mrf.mxu3  ;;  %v7363_v61 = vpop.f32.mrf.mxu1  ;;  %v11691_v35 = vld [vmem:[%s11926_s28 + $0x1418] sm:$0xff]  ;;  %v11689_v49 = vld [vmem:[%s11926_s28 + $0x1408] sm:$0xff]  ;;  %v11704_v57 = vld [vmem:[%s11926_s28 + $0x1480] sm:$0xff] }
 0x27b   : > { %7626 = vmatpush.bf16.msrb.mxu2 %v11678_v36  ;;  %v11699_v36 = vld [vmem:[%s11926_s28 + $0x1458] sm:$0xff] }
 0x27c   : > { %7639 = vmatpush.bf16.msrb.mxu3 %v11686_v37  ;;  %v12588_v58 = vadd.f32 %v7387_v56, %v7375_v55  ;;  %v11707_v37 = vld [vmem:[%s11926_s28 + $0x1498] sm:$0xff]  ;;  %v11688_v55 = vld [vmem:[%s11926_s28 + $0x1400] sm:$0xff] }
 0x27d   : > { %7601 = vmatpush.bf16.msrb.mxu0 %v11661_v38  ;;  %v11715_v38 = vld [vmem:[%s11926_s28 + $0x14d8] sm:$0xff]  ;;  %v11696_v56 = vld [vmem:[%s11926_s28 + $0x1440] sm:$0xff] }
 0x27e   : > { %7614 = vmatpush.bf16.msrb.mxu1 %v11669_v39  ;;  %v11743_v61 = vld [vmem:[%s11926_s28 + $0x15b8] sm:$0xff] }
 0x27f   : > { %7627 = vmatpush.bf16.msrb.mxu2 %v11677_v40 }
 0x280   : > { %7640 = vmatpush.bf16.msrb.mxu3 %v11685_v41 }
 0x281   : > { %7602 = vmatpush.bf16.msrb.mxu0 %v11660_v44  ;;  %v7376_v6 = vpop.f32.mrf.mxu2  ;;  %v11690_v44 = vld [vmem:[%s11926_s28 + $0x1410] sm:$0xff] }
 0x282   : > { %7615 = vmatpush.bf16.msrb.mxu1 %v11668_v45  ;;  %v7389_v9 = vpop.f32.mrf.mxu3  ;;  %v11698_v45 = vld [vmem:[%s11926_s28 + $0x1450] sm:$0xff] }
 0x283   : > { %7628 = vmatpush.bf16.msrb.mxu2 %v11676_v47  ;;  %v11706_v47 = vld [vmem:[%s11926_s28 + $0x1490] sm:$0xff]  ;;  %v11741_v9 = vld [vmem:[%s11926_s28 + $0x15a8] sm:$0xff] }
 0x284   : > { %7641 = vmatpush.bf16.msrb.mxu3 %v11684_v48  ;;  %v11714_v48 = vld [vmem:[%s11926_s28 + $0x14d0] sm:$0xff] }
 0x285   : > { %7603 = vmatpush.bf16.msrb.mxu0 %v11659_v50  ;;  %v11697_v50 = vld [vmem:[%s11926_s28 + $0x1448] sm:$0xff]  ;;  %v11750_v6 = vld [vmem:[%s11926_s28 + $0x15f0] sm:$0xff] }
 0x286   : > { %7616 = vmatpush.bf16.msrb.mxu1 %v11667_v51  ;;  %v11705_v51 = vld [vmem:[%s11926_s28 + $0x1488] sm:$0xff] }
 0x287   : > { %7629 = vmatpush.bf16.msrb.mxu2 %v11675_v52  ;;  %v11713_v52 = vld [vmem:[%s11926_s28 + $0x14c8] sm:$0xff] }
 0x288   : > { %7642 = vmatpush.bf16.msrb.mxu3 %v11683_v53 }
 0x289   : > { %7604 = vmatpush.bf16.msrb.mxu0 %v11658_v59  ;;  %v11727_v59 = vld [vmem:[%s11926_s28 + $0x1538] sm:$0xff] }
 0x28a   : > { %7617 = vmatpush.bf16.msrb.mxu1 %v11666_v60  ;;  %v11735_v60 = vld [vmem:[%s11926_s28 + $0x1578] sm:$0xff] }
 0x28b   : > { %7630 = vmatpush.bf16.msrb.mxu2 %v11674_v62  ;;  %v11751_v62 = vld [vmem:[%s11926_s28 + $0x15f8] sm:$0xff] }
 0x28c   : > { %7643 = vmatpush.bf16.msrb.mxu3 %v11682_v63  ;;  %v1889_v63 = vld [vmem:[#allocation1] sm:$0xff] }
 0x28d   : > { %7605 = vmatpush.bf16.msrb.mxu0 %v11657_v0  ;;  %v1891_v0 = vld [vmem:[#allocation1 + $0x12] sm:$0xff] }
 0x28e   : > { %7618 = vmatpush.bf16.msrb.mxu1 %v11665_v1  ;;  %v1890_v1 = vld [vmem:[#allocation1 + $0x9] sm:$0xff] }
 0x28f   : > { %7631 = vmatpush.bf16.msrb.mxu2 %v11673_v2  ;;  %v1892_v2 = vld [vmem:[#allocation1 + $0x1b] sm:$0xff] }
 0x290   : > { %7644 = vmatpush.bf16.msrb.mxu3 %v11681_v3  ;;  %v11726_v3 = vld [vmem:[%s11926_s28 + $0x1530] sm:$0xff] }
 0x291   : > { %7606 = vmatpush.bf16.msrb.mxu0 %v11656_v11  ;;  %v7400_v27 = vpop.f32.mrf.mxu0 }
 0x292   : > { %7619 = vmatpush.bf16.msrb.mxu1 %v11664_v12  ;;  %v7401_v28 = vadd.f32 %v7400_v27, %v12588_v58  ;;  %v7413_v31 = vpop.f32.mrf.mxu1  ;;  %v11712_v58 = vld [vmem:[%s11926_s28 + $0x14c0] sm:$0xff] }
 0x293   : > { %7632 = vmatpush.bf16.msrb.mxu2 %v11672_v13  ;;  %v11724_v13 = vld [vmem:[%s11926_s28 + $0x1520] sm:$0xff] }
 0x294   : > { %7645 = vmatpush.bf16.msrb.mxu3 %v11680_v14  ;;  %7607 = vmatmul.bf16.vlgmr.msrb.gmra.mxu0 %v1883_v4  ;;  %v7414_v34 = vadd.f32 %v7413_v31, %v7401_v28  ;;  %v11734_v4 = vld [vmem:[%s11926_s28 + $0x1570] sm:$0xff]  ;;  %v11732_v14 = vld [vmem:[%s11926_s28 + $0x1560] sm:$0xff] }
 0x295   : > { %7651 = vmatpush.bf16.msra.mxu0 %v11695_v15  ;;  %7620 = vmatmul.bf16.vlgmr.msrb.gmra.mxu1 %v1884_v7  ;;  %v11725_v7 = vld [vmem:[%s11926_s28 + $0x1528] sm:$0xff]  ;;  %v11722_v28 = vld [vmem:[%s11926_s28 + $0x1510] sm:$0xff] }
 0x296   : > { %7664 = vmatpush.bf16.msra.mxu1 %v11703_v16  ;;  %7633 = vmatmul.bf16.vlgmr.msrb.gmra.mxu2 %v1885_v5  ;;  %v11742_v5 = vld [vmem:[%s11926_s28 + $0x15b0] sm:$0xff]  ;;  %v11740_v16 = vld [vmem:[%s11926_s28 + $0x15a0] sm:$0xff] }
 0x297   : > { %7677 = vmatpush.bf16.msra.mxu2 %v11711_v17  ;;  %7646 = vmatmul.bf16.vlgmr.msrb.gmra.mxu3 %v1886_v8  ;;  %v11733_v8 = vld [vmem:[%s11926_s28 + $0x1568] sm:$0xff]  ;;  %v11748_v17 = vld [vmem:[%s11926_s28 + $0x15e0] sm:$0xff]  ;;  %v11738_v31 = vld [vmem:[%s11926_s28 + $0x1590] sm:$0xff] }
 0x298   : > { %7690 = vmatpush.bf16.msra.mxu3 %v11719_v18 }
 0x299   : > { %7652 = vmatpush.bf16.msra.mxu0 %v11694_v19  ;;  %v7426_v39 = vpop.f32.mrf.mxu2  ;;  %v7402_v42 = vpop.f32.mrf.mxu0  ;;  %v11723_v19 = vld [vmem:[%s11926_s28 + $0x1518] sm:$0xff] }
 0x29a   : > { %7665 = vmatpush.bf16.msra.mxu1 %v11702_v20  ;;  %v7427_v40 = vadd.f32 %v7426_v39, %v7414_v34  ;;  %v7439_v41 = vpop.f32.mrf.mxu3  ;;  %v7415_v46 = vpop.f32.mrf.mxu1  ;;  %v11731_v20 = vld [vmem:[%s11926_s28 + $0x1558] sm:$0xff]  ;;  %v11729_v34 = vld [vmem:[%s11926_s28 + $0x1548] sm:$0xff] }
 0x29b   : > { %7678 = vmatpush.bf16.msra.mxu2 %v11710_v21  ;;  %v11739_v21 = vld [vmem:[%s11926_s28 + $0x1598] sm:$0xff]  ;;  %v11736_v46 = vld [vmem:[%s11926_s28 + $0x1580] sm:$0xff] }
 0x29c   : > { %7691 = vmatpush.bf16.msra.mxu3 %v11718_v22  ;;  %v7440_v43 = vadd.f32 %v7439_v41, %v7427_v40  ;;  %v11747_v22 = vld [vmem:[%s11926_s28 + $0x15d8] sm:$0xff]  ;;  %v1894_v40 = vld [vmem:[#allocation1 + $0x2d] sm:$0xff] }
 0x29d   : > { %7653 = vmatpush.bf16.msra.mxu0 %v11693_v23  ;;  %v1896_v41 = vld [vmem:[#allocation1 + $0x3f] sm:$0xff] }
 0x29e   : > { %7666 = vmatpush.bf16.msra.mxu1 %v11701_v24 }
 0x29f   : > { %7679 = vmatpush.bf16.msra.mxu2 %v11709_v25 }
 0x2a0   : > { %7692 = vmatpush.bf16.msra.mxu3 %v11717_v26 }
 0x2a1   : > { %7654 = vmatpush.bf16.msra.mxu0 %v11692_v29  ;;  %v7428_v53 = vpop.f32.mrf.mxu2  ;;  %v11730_v29 = vld [vmem:[%s11926_s28 + $0x1550] sm:$0xff] }
 0x2a2   : > { %7667 = vmatpush.bf16.msra.mxu1 %v11700_v30  ;;  %v7441_v54 = vpop.f32.mrf.mxu3  ;;  %v11766_v53 = vld [vmem:[%s11926_s28 + $0x1670] sm:$0xff] }
 0x2a3   : > { %7680 = vmatpush.bf16.msra.mxu2 %v11708_v32  ;;  %v11746_v32 = vld [vmem:[%s11926_s28 + $0x15d0] sm:$0xff] }
 0x2a4   : > { %7693 = vmatpush.bf16.msra.mxu3 %v11716_v33  ;;  %v11721_v33 = vld [vmem:[%s11926_s28 + $0x1508] sm:$0xff]  ;;  %v11774_v54 = vld [vmem:[%s11926_s28 + $0x16b0] sm:$0xff] }
 0x2a5   : > { %7655 = vmatpush.bf16.msra.mxu0 %v11691_v35  ;;  %v11737_v35 = vld [vmem:[%s11926_s28 + $0x1588] sm:$0xff] }
 0x2a6   : > { %7668 = vmatpush.bf16.msra.mxu1 %v11699_v36  ;;  %v11745_v36 = vld [vmem:[%s11926_s28 + $0x15c8] sm:$0xff] }
 0x2a7   : > { %7681 = vmatpush.bf16.msra.mxu2 %v11707_v37  ;;  %v1893_v37 = vld [vmem:[#allocation1 + $0x24] sm:$0xff] }
 0x2a8   : > { %7694 = vmatpush.bf16.msra.mxu3 %v11715_v38  ;;  %v1895_v38 = vld [vmem:[#allocation1 + $0x36] sm:$0xff] }
 0x2a9   : > { %7656 = vmatpush.bf16.msra.mxu0 %v11690_v44  ;;  %v11720_v44 = vld [vmem:[%s11926_s28 + $0x1500] sm:$0xff] }
 0x2aa   : > { %7669 = vmatpush.bf16.msra.mxu1 %v11698_v45  ;;  %v11728_v45 = vld [vmem:[%s11926_s28 + $0x1540] sm:$0xff] }
 0x2ab   : > { %7682 = vmatpush.bf16.msra.mxu2 %v11706_v47  ;;  %v11744_v47 = vld [vmem:[%s11926_s28 + $0x15c0] sm:$0xff] }
 0x2ac   : > { %7695 = vmatpush.bf16.msra.mxu3 %v11714_v48  ;;  %v11759_v48 = vld [vmem:[%s11926_s28 + $0x1638] sm:$0xff] }
 0x2ad   : > { %7657 = vmatpush.bf16.msra.mxu0 %v11689_v49  ;;  %v11767_v49 = vld [vmem:[%s11926_s28 + $0x1678] sm:$0xff] }
 0x2ae   : > { %7670 = vmatpush.bf16.msra.mxu1 %v11697_v50  ;;  %v11775_v50 = vld [vmem:[%s11926_s28 + $0x16b8] sm:$0xff] }
 0x2af   : > { %7683 = vmatpush.bf16.msra.mxu2 %v11705_v51  ;;  %v11783_v51 = vld [vmem:[%s11926_s28 + $0x16f8] sm:$0xff] }
 0x2b0   : > { %7696 = vmatpush.bf16.msra.mxu3 %v11713_v52  ;;  %v11758_v52 = vld [vmem:[%s11926_s28 + $0x1630] sm:$0xff] }
 0x2b1   : > { %7658 = vmatpush.bf16.msra.mxu0 %v11688_v55  ;;  %v7452_v11 = vpop.f32.mrf.mxu0  ;;  %v11782_v55 = vld [vmem:[%s11926_s28 + $0x16f0] sm:$0xff] }
 0x2b2   : > { %7671 = vmatpush.bf16.msra.mxu1 %v11696_v56  ;;  %v7453_v12 = vadd.f32 %v7452_v11, %v7440_v43  ;;  %v7465_v15 = vpop.f32.mrf.mxu1  ;;  %v250_v43 = vld [vmem:[%s11921_s24 + $0x58] sm:$0xff]  ;;  %v11757_v56 = vld [vmem:[%s11926_s28 + $0x1628] sm:$0xff] }
 0x2b3   : > { %7684 = vmatpush.bf16.msra.mxu2 %v11704_v57  ;;  %1898 = vst [vmem:[#allocation1] ss:$9 sm:$0xff] %v250_v43  ;;  %v11765_v57 = vld [vmem:[%s11926_s28 + $0x1668] sm:$0xff] }
 0x2b4   : > { %7697 = vmatpush.bf16.msra.mxu3 %v11712_v58  ;;  %7659 = vmatmul.bf16.vlgmr.msra.gmra.mxu0 %v1889_v63  ;;  %v7466_v18 = vadd.f32 %v7465_v15, %v7453_v12  ;;  %v11773_v58 = vld [vmem:[%s11926_s28 + $0x16a8] sm:$0xff]  ;;  %v11764_v63 = vld [vmem:[%s11926_s28 + $0x1660] sm:$0xff] }
 0x2b5   : > { %7703 = vmatpush.bf16.msrb.mxu0 %v11727_v59  ;;  %7672 = vmatmul.bf16.vlgmr.msra.gmra.mxu1 %v1890_v1  ;;  %v11781_v59 = vld [vmem:[%s11926_s28 + $0x16e8] sm:$0xff]  ;;  %v11772_v1 = vld [vmem:[%s11926_s28 + $0x16a0] sm:$0xff] }
 0x2b6   : > { %7716 = vmatpush.bf16.msrb.mxu1 %v11735_v60  ;;  %7685 = vmatmul.bf16.vlgmr.msra.gmra.mxu2 %v1891_v0  ;;  %v11813_v43 = vld [vmem:[%s11926_s28 + $0x17e8] sm:$0xff] }
 0x2b7   : > { %7729 = vmatpush.bf16.msrb.mxu2 %v11743_v61  ;;  %7698 = vmatmul.bf16.vlgmr.msra.gmra.mxu3 %v1892_v2  ;;  %v11780_v2 = vld [vmem:[%s11926_s28 + $0x16e0] sm:$0xff] }
 0x2b8   : > { %7742 = vmatpush.bf16.msrb.mxu3 %v11751_v62  ;;  %v11756_v62 = vld [vmem:[%s11926_s28 + $0x1620] sm:$0xff] }
 0x2b9   : > { %7704 = vmatpush.bf16.msrb.mxu0 %v11726_v3  ;;  %v7478_v23 = vpop.f32.mrf.mxu2  ;;  %v7454_v26 = vpop.f32.mrf.mxu0 }
 0x2ba   : > { %7717 = vmatpush.bf16.msrb.mxu1 %v11734_v4  ;;  %v7479_v24 = vadd.f32 %v7478_v23, %v7466_v18  ;;  %v7491_v25 = vpop.f32.mrf.mxu3  ;;  %v7467_v30 = vpop.f32.mrf.mxu1  ;;  %v11755_v4 = vld [vmem:[%s11926_s28 + $0x1618] sm:$0xff]  ;;  %v11753_v18 = vld [vmem:[%s11926_s28 + $0x1608] sm:$0xff]  ;;  %v11768_v26 = vld [vmem:[%s11926_s28 + $0x1680] sm:$0xff] }
 0x2bb   : > { %7730 = vmatpush.bf16.msrb.mxu2 %v11742_v5  ;;  %v11763_v5 = vld [vmem:[%s11926_s28 + $0x1658] sm:$0xff] }
 0x2bc   : > { %7743 = vmatpush.bf16.msrb.mxu3 %v11750_v6  ;;  %v12656_v27 = vadd.f32 %v7491_v25, %v7479_v24  ;;  %v11771_v6 = vld [vmem:[%s11926_s28 + $0x1698] sm:$0xff]  ;;  %v11752_v24 = vld [vmem:[%s11926_s28 + $0x1600] sm:$0xff] }
 0x2bd   : > { %7705 = vmatpush.bf16.msrb.mxu0 %v11725_v7  ;;  %v11779_v7 = vld [vmem:[%s11926_s28 + $0x16d8] sm:$0xff]  ;;  %v11760_v25 = vld [vmem:[%s11926_s28 + $0x1640] sm:$0xff] }
 0x2be   : > { %7718 = vmatpush.bf16.msrb.mxu1 %v11733_v8  ;;  %v11807_v30 = vld [vmem:[%s11926_s28 + $0x17b8] sm:$0xff] }
 0x2bf   : > { %7731 = vmatpush.bf16.msrb.mxu2 %v11741_v9 }
 0x2c0   : > { %7744 = vmatpush.bf16.msrb.mxu3 %v11749_v10 }
 0x2c1   : > { %7706 = vmatpush.bf16.msrb.mxu0 %v11724_v13  ;;  %v7480_v39 = vpop.f32.mrf.mxu2  ;;  %v11754_v13 = vld [vmem:[%s11926_s28 + $0x1610] sm:$0xff] }
 0x2c2   : > { %7719 = vmatpush.bf16.msrb.mxu1 %v11732_v14  ;;  %v7493_v42 = vpop.f32.mrf.mxu3  ;;  %v11762_v14 = vld [vmem:[%s11926_s28 + $0x1650] sm:$0xff] }
 0x2c3   : > { %7732 = vmatpush.bf16.msrb.mxu2 %v11740_v16  ;;  %v11770_v16 = vld [vmem:[%s11926_s28 + $0x1690] sm:$0xff]  ;;  %v11805_v42 = vld [vmem:[%s11926_s28 + $0x17a8] sm:$0xff] }
 0x2c4   : > { %7745 = vmatpush.bf16.msrb.mxu3 %v11748_v17  ;;  %v11778_v17 = vld [vmem:[%s11926_s28 + $0x16d0] sm:$0xff] }
 0x2c5   : > { %7707 = vmatpush.bf16.msrb.mxu0 %v11723_v19  ;;  %v11761_v19 = vld [vmem:[%s11926_s28 + $0x1648] sm:$0xff]  ;;  %v11814_v39 = vld [vmem:[%s11926_s28 + $0x17f0] sm:$0xff] }
 0x2c6   : > { %7720 = vmatpush.bf16.msrb.mxu1 %v11731_v20  ;;  %v11769_v20 = vld [vmem:[%s11926_s28 + $0x1688] sm:$0xff] }
 0x2c7   : > { %7733 = vmatpush.bf16.msrb.mxu2 %v11739_v21  ;;  %v11777_v21 = vld [vmem:[%s11926_s28 + $0x16c8] sm:$0xff] }
 0x2c8   : > { %7746 = vmatpush.bf16.msrb.mxu3 %v11747_v22 }
 0x2c9   : > { %7708 = vmatpush.bf16.msrb.mxu0 %v11722_v28  ;;  %v11791_v28 = vld [vmem:[%s11926_s28 + $0x1738] sm:$0xff] }
 0x2ca   : > { %7721 = vmatpush.bf16.msrb.mxu1 %v11730_v29  ;;  %v11799_v29 = vld [vmem:[%s11926_s28 + $0x1778] sm:$0xff] }
 0x2cb   : > { %7734 = vmatpush.bf16.msrb.mxu2 %v11738_v31  ;;  %v11815_v31 = vld [vmem:[%s11926_s28 + $0x17f8] sm:$0xff] }
 0x2cc   : > { %7747 = vmatpush.bf16.msrb.mxu3 %v11746_v32  ;;  %v1899_v32 = vld [vmem:[#allocation1] sm:$0xff] }
 0x2cd   : > { %7709 = vmatpush.bf16.msrb.mxu0 %v11721_v33  ;;  %v1901_v33 = vld [vmem:[#allocation1 + $0x12] sm:$0xff] }
 0x2ce   : > { %7722 = vmatpush.bf16.msrb.mxu1 %v11729_v34  ;;  %v1900_v34 = vld [vmem:[#allocation1 + $0x9] sm:$0xff] }
 0x2cf   : > { %7735 = vmatpush.bf16.msrb.mxu2 %v11737_v35  ;;  %v1902_v35 = vld [vmem:[#allocation1 + $0x1b] sm:$0xff] }
 0x2d0   : > { %7748 = vmatpush.bf16.msrb.mxu3 %v11745_v36  ;;  %v11790_v36 = vld [vmem:[%s11926_s28 + $0x1730] sm:$0xff] }
 0x2d1   : > { %7710 = vmatpush.bf16.msrb.mxu0 %v11720_v44  ;;  %v7504_v60 = vpop.f32.mrf.mxu0 }
 0x2d2   : > { %7723 = vmatpush.bf16.msrb.mxu1 %v11728_v45  ;;  %v7505_v61 = vadd.f32 %v7504_v60, %v12656_v27  ;;  %v7517_v0 = vpop.f32.mrf.mxu1  ;;  %v11776_v27 = vld [vmem:[%s11926_s28 + $0x16c0] sm:$0xff] }
 0x2d3   : > { %7736 = vmatpush.bf16.msrb.mxu2 %v11736_v46  ;;  %v11788_v46 = vld [vmem:[%s11926_s28 + $0x1720] sm:$0xff] }
 0x2d4   : > { %7749 = vmatpush.bf16.msrb.mxu3 %v11744_v47  ;;  %7711 = vmatmul.bf16.vlgmr.msrb.gmra.mxu0 %v1893_v37  ;;  %v7518_v3 = vadd.f32 %v7517_v0, %v7505_v61  ;;  %v11798_v37 = vld [vmem:[%s11926_s28 + $0x1770] sm:$0xff]  ;;  %v11796_v47 = vld [vmem:[%s11926_s28 + $0x1760] sm:$0xff] }
 0x2d5   : > { %7755 = vmatpush.bf16.msra.mxu0 %v11759_v48  ;;  %7724 = vmatmul.bf16.vlgmr.msrb.gmra.mxu1 %v1894_v40  ;;  %v11789_v40 = vld [vmem:[%s11926_s28 + $0x1728] sm:$0xff]  ;;  %v11786_v61 = vld [vmem:[%s11926_s28 + $0x1710] sm:$0xff] }
 0x2d6   : > { %7768 = vmatpush.bf16.msra.mxu1 %v11767_v49  ;;  %7737 = vmatmul.bf16.vlgmr.msrb.gmra.mxu2 %v1895_v38  ;;  %v11806_v38 = vld [vmem:[%s11926_s28 + $0x17b0] sm:$0xff]  ;;  %v11804_v49 = vld [vmem:[%s11926_s28 + $0x17a0] sm:$0xff] }
 0x2d7   : > { %7781 = vmatpush.bf16.msra.mxu2 %v11775_v50  ;;  %7750 = vmatmul.bf16.vlgmr.msrb.gmra.mxu3 %v1896_v41  ;;  %v11797_v41 = vld [vmem:[%s11926_s28 + $0x1768] sm:$0xff]  ;;  %v11812_v50 = vld [vmem:[%s11926_s28 + $0x17e0] sm:$0xff]  ;;  %v11802_v0 = vld [vmem:[%s11926_s28 + $0x1790] sm:$0xff] }
 0x2d8   : > { %7794 = vmatpush.bf16.msra.mxu3 %v11783_v51 }
 0x2d9   : > { %7756 = vmatpush.bf16.msra.mxu0 %v11758_v52  ;;  %v7530_v8 = vpop.f32.mrf.mxu2  ;;  %v7506_v11 = vpop.f32.mrf.mxu0  ;;  %v11787_v52 = vld [vmem:[%s11926_s28 + $0x1718] sm:$0xff] }
 0x2da   : > { %7769 = vmatpush.bf16.msra.mxu1 %v11766_v53  ;;  %v7531_v9 = vadd.f32 %v7530_v8, %v7518_v3  ;;  %v7543_v10 = vpop.f32.mrf.mxu3  ;;  %v7519_v15 = vpop.f32.mrf.mxu1  ;;  %v11795_v53 = vld [vmem:[%s11926_s28 + $0x1758] sm:$0xff]  ;;  %v11793_v3 = vld [vmem:[%s11926_s28 + $0x1748] sm:$0xff]  ;;  %v11784_v8 = vld [vmem:[%s11926_s28 + $0x1700] sm:$0xff] }
 0x2db   : > { %7782 = vmatpush.bf16.msra.mxu2 %v11774_v54  ;;  %v11803_v54 = vld [vmem:[%s11926_s28 + $0x1798] sm:$0xff]  ;;  %v11808_v11 = vld [vmem:[%s11926_s28 + $0x17c0] sm:$0xff] }
 0x2dc   : > { %7795 = vmatpush.bf16.msra.mxu3 %v11782_v55  ;;  %v7544_v12 = vadd.f32 %v7543_v10, %v7531_v9  ;;  %v11811_v55 = vld [vmem:[%s11926_s28 + $0x17d8] sm:$0xff]  ;;  %v11792_v9 = vld [vmem:[%s11926_s28 + $0x1740] sm:$0xff] }
 0x2dd   : > { %7757 = vmatpush.bf16.msra.mxu0 %v11757_v56  ;;  %v11800_v10 = vld [vmem:[%s11926_s28 + $0x1780] sm:$0xff] }
 0x2de   : > { %7770 = vmatpush.bf16.msra.mxu1 %v11765_v57  ;;  %v1906_v15 = vld [vmem:[#allocation1 + $0x3f] sm:$0xff] }
 0x2df   : > { %7783 = vmatpush.bf16.msra.mxu2 %v11773_v58 }
 0x2e0   : > { %7796 = vmatpush.bf16.msra.mxu3 %v11781_v59 }
 0x2e1   : > { %7758 = vmatpush.bf16.msra.mxu0 %v11756_v62  ;;  %v7532_v22 = vpop.f32.mrf.mxu2  ;;  %v11794_v62 = vld [vmem:[%s11926_s28 + $0x1750] sm:$0xff] }
 0x2e2   : > { %7771 = vmatpush.bf16.msra.mxu1 %v11764_v63  ;;  %v7545_v23 = vpop.f32.mrf.mxu3 }
 0x2e3   : > { %7784 = vmatpush.bf16.msra.mxu2 %v11772_v1  ;;  %v11810_v1 = vld [vmem:[%s11926_s28 + $0x17d0] sm:$0xff] }
 0x2e4   : > { %7797 = vmatpush.bf16.msra.mxu3 %v11780_v2  ;;  %v11785_v2 = vld [vmem:[%s11926_s28 + $0x1708] sm:$0xff] }
 0x2e5   : > { %7759 = vmatpush.bf16.msra.mxu0 %v11755_v4  ;;  %v11801_v4 = vld [vmem:[%s11926_s28 + $0x1788] sm:$0xff] }
 0x2e6   : > { %7772 = vmatpush.bf16.msra.mxu1 %v11763_v5  ;;  %v11809_v5 = vld [vmem:[%s11926_s28 + $0x17c8] sm:$0xff] }
 0x2e7   : > { %7785 = vmatpush.bf16.msra.mxu2 %v11771_v6 }
 0x2e8   : > { %7798 = vmatpush.bf16.msra.mxu3 %v11779_v7 }
 0x2e9   : > { %7760 = vmatpush.bf16.msra.mxu0 %v11754_v13  ;;  %v1904_v13 = vld [vmem:[#allocation1 + $0x2d] sm:$0xff] }
 0x2ea   : > { %7773 = vmatpush.bf16.msra.mxu1 %v11762_v14  ;;  %v1905_v14 = vld [vmem:[#allocation1 + $0x36] sm:$0xff] }
 0x2eb   : > { %7786 = vmatpush.bf16.msra.mxu2 %v11770_v16 }
 0x2ec   : > { %7799 = vmatpush.bf16.msra.mxu3 %v11778_v17 }
 0x2ed   : > { %7761 = vmatpush.bf16.msra.mxu0 %v11753_v18 }
 0x2ee   : > { %7774 = vmatpush.bf16.msra.mxu1 %v11761_v19 }
 0x2ef   : > { %7787 = vmatpush.bf16.msra.mxu2 %v11769_v20 }
 0x2f0   : > { %7800 = vmatpush.bf16.msra.mxu3 %v11777_v21 }
 0x2f1   : > { %7762 = vmatpush.bf16.msra.mxu0 %v11752_v24  ;;  %v7556_v44 = vpop.f32.mrf.mxu0 }
 0x2f2   : > { %7775 = vmatpush.bf16.msra.mxu1 %v11760_v25  ;;  %v7557_v45 = vadd.f32 %v7556_v44, %v7544_v12  ;;  %v7569_v48 = vpop.f32.mrf.mxu1  ;;  %v1903_v12 = vld [vmem:[#allocation1 + $0x24] sm:$0xff] }
 0x2f3   : > { %7788 = vmatpush.bf16.msra.mxu2 %v11768_v26 }
 0x2f4   : > { %7801 = vmatpush.bf16.msra.mxu3 %v11776_v27  ;;  %7763 = vmatmul.bf16.vlgmr.msra.gmra.mxu0 %v1899_v32  ;;  %v7570_v51 = vadd.f32 %v7569_v48, %v7557_v45 }
 0x2f5   : > { %7807 = vmatpush.bf16.msrb.mxu0 %v11791_v28  ;;  %7776 = vmatmul.bf16.vlgmr.msra.gmra.mxu1 %v1900_v34 }
 0x2f6   : > { %7820 = vmatpush.bf16.msrb.mxu1 %v11799_v29  ;;  %7789 = vmatmul.bf16.vlgmr.msra.gmra.mxu2 %v1901_v33 }
 0x2f7   : > { %7833 = vmatpush.bf16.msrb.mxu2 %v11807_v30  ;;  %7802 = vmatmul.bf16.vlgmr.msra.gmra.mxu3 %v1902_v35 }
 0x2f8   : > { %7846 = vmatpush.bf16.msrb.mxu3 %v11815_v31 }
 0x2f9   : > { %7808 = vmatpush.bf16.msrb.mxu0 %v11790_v36  ;;  %v7582_v56 = vpop.f32.mrf.mxu2  ;;  %v7558_v59 = vpop.f32.mrf.mxu0 }
 0x2fa   : > { %7821 = vmatpush.bf16.msrb.mxu1 %v11798_v37  ;;  %v7583_v57 = vadd.f32 %v7582_v56, %v7570_v51  ;;  %v7595_v58 = vpop.f32.mrf.mxu3  ;;  %v7571_v63 = vpop.f32.mrf.mxu1 }
 0x2fb   : > { %7834 = vmatpush.bf16.msrb.mxu2 %v11806_v38 }
 0x2fc   : > { %7847 = vmatpush.bf16.msrb.mxu3 %v11814_v39  ;;  %v7596_v60 = vadd.f32 %v7595_v58, %v7583_v57 }
 0x2fd   : > { %7809 = vmatpush.bf16.msrb.mxu0 %v11789_v40 }
 0x2fe   : > { %7822 = vmatpush.bf16.msrb.mxu1 %v11797_v41 }
 0x2ff   : > { %7835 = vmatpush.bf16.msrb.mxu2 %v11805_v42 }
 0x300   : > { %7848 = vmatpush.bf16.msrb.mxu3 %v11813_v43 }
 0x301   : > { %7810 = vmatpush.bf16.msrb.mxu0 %v11788_v46  ;;  %v7584_v6 = vpop.f32.mrf.mxu2 }
 0x302   : > { %7823 = vmatpush.bf16.msrb.mxu1 %v11796_v47  ;;  %v7597_v7 = vpop.f32.mrf.mxu3 }
 0x303   : > { %7836 = vmatpush.bf16.msrb.mxu2 %v11804_v49 }
 0x304   : > { %7849 = vmatpush.bf16.msrb.mxu3 %v11812_v50 }
 0x305   : > { %7811 = vmatpush.bf16.msrb.mxu0 %v11787_v52 }
 0x306   : > { %7824 = vmatpush.bf16.msrb.mxu1 %v11795_v53 }
 0x307   : > { %7837 = vmatpush.bf16.msrb.mxu2 %v11803_v54 }
 0x308   : > { %7850 = vmatpush.bf16.msrb.mxu3 %v11811_v55 }
 0x309   : > { %7812 = vmatpush.bf16.msrb.mxu0 %v11786_v61 }
 0x30a   : > { %7825 = vmatpush.bf16.msrb.mxu1 %v11794_v62 }
 0x30b   : > { %7838 = vmatpush.bf16.msrb.mxu2 %v11802_v0 }
 0x30c   : > { %7851 = vmatpush.bf16.msrb.mxu3 %v11810_v1 }
 0x30d   : > { %7813 = vmatpush.bf16.msrb.mxu0 %v11785_v2 }
 0x30e   : > { %7826 = vmatpush.bf16.msrb.mxu1 %v11793_v3 }
 0x30f   : > { %7839 = vmatpush.bf16.msrb.mxu2 %v11801_v4 }
 0x310   : > { %7852 = vmatpush.bf16.msrb.mxu3 %v11809_v5 }
 0x311   : > { %7814 = vmatpush.bf16.msrb.mxu0 %v11784_v8  ;;  %v7608_v16 = vpop.f32.mrf.mxu0 }
 0x312   : > { %7827 = vmatpush.bf16.msrb.mxu1 %v11792_v9  ;;  %v7609_v17 = vadd.f32 %v7608_v16, %v7596_v60  ;;  %v7621_v18 = vpop.f32.mrf.mxu1  ;;  %v238_v9 = vld [vmem:[#allocation2] sm:$0x3] }
 0x313   : > { %7840 = vmatpush.bf16.msrb.mxu2 %v11800_v10 }
 0x314   : > { %7853 = vmatpush.bf16.msrb.mxu3 %v11808_v11  ;;  %7815 = vmatmul.bf16.vlgmr.msrb.gmra.mxu0 %v1903_v12  ;;  %v7622_v19 = vadd.f32 %v7621_v18, %v7609_v17 }
 0x315   : > { %7828 = vmatmul.bf16.vlgmr.msrb.gmra.mxu1 %v1904_v13 }
 0x316   : > { %7841 = vmatmul.bf16.vlgmr.msrb.gmra.mxu2 %v1905_v14 }
 0x317   : > { %7854 = vmatmul.bf16.vlgmr.msrb.gmra.mxu3 %v1906_v15 }
 0x319   : > { %v7634_v20 = vpop.f32.mrf.mxu2  ;;  %v7610_v23 = vpop.f32.mrf.mxu0 }
 0x31a   : > { %v7635_v21 = vadd.f32 %v7634_v20, %v7622_v19  ;;  %v7647_v22 = vpop.f32.mrf.mxu3  ;;  %v7623_v25 = vpop.f32.mrf.mxu1 }
 0x31c   : > { %v7648_v24 = vadd.f32 %v7647_v22, %v7635_v21 }
 0x321   : > { %v7636_v26 = vpop.f32.mrf.mxu2 }
 0x322   : > { %v7649_v27 = vpop.f32.mrf.mxu3 }
 0x331   : > { %v7660_v28 = vpop.f32.mrf.mxu0 }
 0x332   : > { %v7661_v29 = vadd.f32 %v7660_v28, %v7648_v24  ;;  %v7673_v30 = vpop.f32.mrf.mxu1 }
 0x334   : > { %v7674_v31 = vadd.f32 %v7673_v30, %v7661_v29 }
 0x339   : > { %v7686_v32 = vpop.f32.mrf.mxu2  ;;  %v7662_v35 = vpop.f32.mrf.mxu0 }
 0x33a   : > { %v7687_v33 = vadd.f32 %v7686_v32, %v7674_v31  ;;  %v7699_v34 = vpop.f32.mrf.mxu3  ;;  %v7675_v37 = vpop.f32.mrf.mxu1 }
 0x33c   : > { %v7700_v36 = vadd.f32 %v7699_v34, %v7687_v33 }
 0x341   : > { %v7688_v38 = vpop.f32.mrf.mxu2 }
 0x342   : > { %v7701_v39 = vpop.f32.mrf.mxu3 }
 0x351   : > { %v7712_v40 = vpop.f32.mrf.mxu0 }
 0x352   : > { %v7725_v41 = vpop.f32.mrf.mxu1  ;;  %v7713_v51 = vadd.f32 %v7712_v40, %v7700_v36 }
 0x354   : > { %v7726_v55 = vadd.f32 %v7725_v41, %v7713_v51 }
 0x359   : > { %v7738_v42 = vpop.f32.mrf.mxu2  ;;  %v7714_v44 = vpop.f32.mrf.mxu0 }
 0x35a   : > { %v7751_v43 = vpop.f32.mrf.mxu3  ;;  %v7727_v45 = vpop.f32.mrf.mxu1  ;;  %v7739_v56 = vadd.f32 %v7738_v42, %v7726_v55 }
 0x35c   : > { %v7752_v59 = vadd.f32 %v7751_v43, %v7739_v56 }
 0x361   : > { %v7740_v46 = vpop.f32.mrf.mxu2 }
 0x362   : > { %v7753_v47 = vpop.f32.mrf.mxu3 }
 0x371   : > { %v7764_v48 = vpop.f32.mrf.mxu0 }
 0x372   : > { %v7777_v49 = vpop.f32.mrf.mxu1  ;;  %v7765_v60 = vadd.f32 %v7764_v48, %v7752_v59 }
 0x374   : > { %v7778_v61 = vadd.f32 %v7777_v49, %v7765_v60 }
 0x379   : > { %v7790_v50 = vpop.f32.mrf.mxu2  ;;  %v7766_v53 = vpop.f32.mrf.mxu0 }
 0x37a   : > { %v7803_v52 = vpop.f32.mrf.mxu3  ;;  %v7779_v54 = vpop.f32.mrf.mxu1  ;;  %v7791_v62 = vadd.f32 %v7790_v50, %v7778_v61 }
 0x37c   : > { %v7804_v63 = vadd.f32 %v7803_v52, %v7791_v62 }
 0x381   : > { %v7792_v57 = vpop.f32.mrf.mxu2 }
 0x382   : > { %v7805_v58 = vpop.f32.mrf.mxu3 }
 0x391   : > { %v7816_v0 = vpop.f32.mrf.mxu0 }
 0x392   : > { %v7829_v1 = vpop.f32.mrf.mxu1  ;;  %v7817_v2 = vadd.f32 %v7816_v0, %v7804_v63 }
 0x394   : > { %v7830_v3 = vadd.f32 %v7829_v1, %v7817_v2 }
 0x399   : > { %v7842_v4 = vpop.f32.mrf.mxu2  ;;  %v7818_v7 = vpop.f32.mrf.mxu0 }
 0x39a   : > { %v7855_v5 = vpop.f32.mrf.mxu3  ;;  %v7843_v6 = vadd.f32 %v7842_v4, %v7830_v3  ;;  %v7831_v8 = vpop.f32.mrf.mxu1 }
 0x39c   : > { %v7856_v10 = vadd.f32 %v7855_v5, %v7843_v6 }
 0x39e   : > { %v7859_v11 = vadd.f32 %v7856_v10, %v238_v9  ;;  %7865 = sbr.rel (%p11042_p6) target bundleno = 1069 (0x42d), region = 48 }
 0x3a0   : > { %7861 = vst.msk [vmem:[#allocation2] sm:$0x3] %vm7860_vm1, %v7859_v11 }
 0x3a1   : > { %v7844_v12 = vpop.f32.mrf.mxu2 }
 0x3a2   : > { %v7857_v13 = vpop.f32.mrf.mxu3 }
 0x3a3   : > { %v7876_v14 = vld [vmem:[%s12765_s3 + $0x18] sm:$0xff]  ;;  %v7875_v15 = vld [vmem:[%s12765_s3 + $0x10] sm:$0xff]  ;;  %v7874_v17 = vld [vmem:[%s12765_s3 + $0x8] sm:$0xff]  ;;  %vm7881_vm2 = vcmask 261120   ;;  %vm7905_vm3 = vcmask 50176  }
 0x3a4   : > { %7897 = vmatpush.msra.mxu0 %v7876_v14  ;;  %v11832_v18 = vld [vmem:[%s12764_s2] ss:$0 sm:$0xff] }
 0x3a5   : > { %v7873_v19 = vld [vmem:[%s12765_s3] sm:$0xff] }
 0x3a6   : > { %7898 = vmatpush.msra.mxu0 %v7875_v15  ;;  %v11833_v22 = vld [vmem:[%s12766_s4] ss:$0 sm:$0xff] }
 0x3a7   : > { %v7866_v16 = vld [vmem:[#allocation2] sm:$0x3] }
 0x3a8   : > { %v7871_v20 = vadd.f32 %v11832_v18, %v7866_v16  ;;  %7899 = vmatpush.msra.mxu0 %v7874_v17 }
 0x3aa   : > { %v7872_v21 = vmax.f32 %v7871_v20, 0.0  ;;  %7900 = vmatpush.msra.mxu0 %v7873_v19 }
 0x3ac   : > { %11043 = vmatmul.msk.f32.vlgmr.msra.gmra.mxu0 %vm7881_vm2, %v7872_v21 }
 0x429   : > { %v7902_v23 = vpop.f32.mrf.mxu0 }
 0x42a   : > { %v7903_v24 = vadd.f32 %v11833_v22, %v7902_v23 }
 0x42c   : > { %7906 = vst.msk [vmem:[#allocation3] sm:$0x3] %vm7905_vm3, %v7903_v24 }
 0x42d PF: > { %p11820_p7 = scmp.eq.s32.totalorder %s11912_s19, 1  ;;  %s11875_s16 = smov [#allocation3]  }
 0x42e   : > { %s7913_s17 = sshll.u32 %s11875_s16, 4  ;;  %s7915_s22 = sshll.u32 %s12767_s5, 4  ;;  %s7914_s17 = int_to_ptr.vmem [resolvable:$true] %s7913_s17  ;;  %s7916_s22 = int_to_ptr.hbm [resolvable:$true] %s7915_s22 }
 0x42f   : > { %11817 = dma.vmem_to_hbm [thread:$0]  (%p11820_p7), %s7914_s17, 32, %s7916_s22, [#allocation4]  }
 0x430   : > { %11867 = dma.done.wait (%p11820_p7), [#allocation4], 32  }
 0x431   : > { %11869 = vsyncadd (%p11820_p7), [#allocation4], 4294967264 }
 0x432 PF: > { %s16_s18 = sadd.s32 1, %s11872_s18  }
 0x433   : > { %p13_p8 = scmp.ge.s32.totalorder %s16_s18, 4  }
 0x435   :  { %15 = sbr.rel (!%p13_p8) target bundleno = 1 (0x1), region = 78 }
 0x43a   :  { %7929 = vsyncpa [#allocation4], 1 }
 0x43b   :  { %7931 = vsyncpa [#allocation4 + $0x1], 1 }

</bundles_post_ra>
